<compile_context>
chip_gen: v5e
topology: v5e:2x2
jax: 0.10.0
libtpu: 0.0.40
codegen_flags: <defaults>
</compile_context>

<pallas_src>
import functools

import jax
import jax.numpy as jnp
from jax.experimental import pallas as pl
from jax.experimental.pallas import tpu as pltpu


_COMPUTE_DTYPE = jnp.bfloat16          # MXU operand dtype (f32 accumulation)


def _round_up(x, m):
    return ((x + m - 1) // m) * m


def _vmem_budget_bytes():
    # Generation-aware VMEM budget: ~75% of physical per-core VMEM
    # (v5e/v6e: 128 MiB -> 96 MiB, v7x: 64 MiB -> 48 MiB).
    try:
        cap = int(pltpu.get_tpu_info().vmem_capacity_bytes)
    except Exception:
        cap = 64 << 20                 # conservative fallback (v7x-sized)
    return (cap * 3) // 4


_VMEM_BUDGET = _vmem_budget_bytes()


# ----------------------------------------------------------------------------
# Tiled matmul kernel:  y = act(x @ w + b), optional fused per-K prescale+ReLU
# ----------------------------------------------------------------------------
def _matmul_kernel(*refs, relu, prescale):
    if prescale:
        x_ref, w_ref, b_ref, s_ref, t_ref, o_ref, acc_ref = refs
    else:
        x_ref, w_ref, b_ref, o_ref, acc_ref = refs

    @pl.when(pl.program_id(2) == 0)
    def _():
        acc_ref[...] = jnp.zeros_like(acc_ref)

    lhs = x_ref[...]
    if prescale:
        # Fused BatchNorm-normalize + ReLU on the LHS tile (f32 VPU math).
        lhs = jnp.maximum(lhs.astype(jnp.float32) * s_ref[...] + t_ref[...], 0.0)
        lhs = lhs.astype(_COMPUTE_DTYPE)

    acc_ref[...] += jnp.dot(lhs, w_ref[...], preferred_element_type=jnp.float32)

    @pl.when(pl.program_id(2) == pl.num_programs(2) - 1)
    def _():
        y = acc_ref[...] + b_ref[...]
        if relu:
            y = jnp.maximum(y, 0.0)
        o_ref[...] = y.astype(o_ref.dtype)


def pallas_matmul(x, w, b, *, relu=False, prescale=None,
                  out_dtype=jnp.float32, tm_max=512, tk_max=4096, tn_max=512):
    """y = x @ w + b with optional fused prescale+ReLU on x and output ReLU.

    x:(M,K)  w:(K,N)  b:(N,)  prescale: optional ((K,),(K,)) f32 scale/shift.
    Operands are cast to bf16; accumulation is f32.
    """
    M, K = x.shape
    K2, N = w.shape
    assert K == K2 and b.shape == (N,)
    out_bytes = jnp.dtype(out_dtype).itemsize

    # ---- N (lane) tile -------------------------------------------------
    if N <= tn_max:                     # single lane tile (full N)
        tn, Np = N, N
    else:
        tn = 256
        Np = _round_up(N, tn)

    # ---- K (reduction) tile ---------------------------------------------
    if K <= tk_max:                     # single reduction step, no K padding
        tk, Kp = K, K
    else:
        tk = tk_max
        Kp = _round_up(K, tk)

    # ---- M (sublane) tile, shrunk until the working set fits VMEM --------
    tm = min(tm_max, _round_up(M, 16))

    def vmem_need(tm_):
        return (2 * (tm_ * tk + tk * tn) * 2          # double-buffered bf16 ins
                + 2 * tn * 4                           # bias (f32)
                + (4 * tk * 4 if prescale is not None else 0)
                + 2 * tm_ * tn * out_bytes             # double-buffered out
                + tm_ * tn * 4)                        # f32 accumulator

    while vmem_need(tm) > (_VMEM_BUDGET * 3) // 5 and tm > 128:
        tm = max(128, tm // 2)
    Mp = _round_up(M, tm)

    x_p = jnp.pad(x.astype(_COMPUTE_DTYPE), ((0, Mp - M), (0, Kp - K)))
    w_p = jnp.pad(w.astype(_COMPUTE_DTYPE), ((0, Kp - K), (0, Np - N)))
    b_p = jnp.pad(b.astype(jnp.float32), (0, Np - N)).reshape(1, Np)

    inputs = [x_p, w_p, b_p]
    in_specs = [
        pl.BlockSpec((tm, tk), lambda i, j, k: (i, k)),
        pl.BlockSpec((tk, tn), lambda i, j, k: (k, j)),
        pl.BlockSpec((1, tn), lambda i, j, k: (0, j)),
    ]
    if prescale is not None:
        scale, shift = prescale
        s_p = jnp.pad(scale.astype(jnp.float32), (0, Kp - K)).reshape(1, Kp)
        t_p = jnp.pad(shift.astype(jnp.float32), (0, Kp - K)).reshape(1, Kp)
        inputs += [s_p, t_p]
        in_specs += [pl.BlockSpec((1, tk), lambda i, j, k: (0, k)),
                     pl.BlockSpec((1, tk), lambda i, j, k: (0, k))]

    vmem_limit = min(max(2 * vmem_need(tm) + (4 << 20), 16 << 20), _VMEM_BUDGET)

    grid = (Mp // tm, Np // tn, Kp // tk)
    out = pl.pallas_call(
        functools.partial(_matmul_kernel, relu=relu,
                          prescale=prescale is not None),
        out_shape=jax.ShapeDtypeStruct((Mp, Np), out_dtype),
        grid_spec=pltpu.PrefetchScalarGridSpec(
            num_scalar_prefetch=0,
            grid=grid,
            in_specs=in_specs,
            out_specs=pl.BlockSpec((tm, tn), lambda i, j, k: (i, j)),
            scratch_shapes=[pltpu.VMEM((tm, tn), jnp.float32)],
        ),
        compiler_params=pltpu.CompilerParams(
            dimension_semantics=("parallel", "parallel", "arbitrary"),
            vmem_limit_bytes=vmem_limit,
        ),
    )(*inputs)
    if Mp != M or Np != N:
        out = out[:M, :N]
    return out


# ----------------------------------------------------------------------------
# Tiled BatchNorm statistics: per-channel sum and sum of squares over M rows
# ----------------------------------------------------------------------------
def _bn_stats_kernel(x_ref, sum_ref, sq_ref):
    @pl.when(pl.program_id(0) == 0)
    def _():
        sum_ref[...] = jnp.zeros_like(sum_ref)
        sq_ref[...] = jnp.zeros_like(sq_ref)

    x = x_ref[...].astype(jnp.float32)
    sum_ref[...] += jnp.sum(x, axis=0, keepdims=True)
    sq_ref[...] += jnp.sum(x * x, axis=0, keepdims=True)


def bn_stats(x, *, tm_max=4096):
    """x:(M, C) -> (sum_c, sumsq_c) each (C,) float32, tiled over M."""
    M, C = x.shape
    tm = min(tm_max, _round_up(M, 16))
    while 2 * tm * C * x.dtype.itemsize > (_VMEM_BUDGET * 3) // 5 and tm > 128:
        tm = max(128, tm // 2)
    Mp = _round_up(M, tm)
    x_p = jnp.pad(x, ((0, Mp - M), (0, 0)))     # zero rows don't change sums

    vmem_need = 2 * tm * C * x.dtype.itemsize + 4 * C * 4
    vmem_limit = min(max(2 * vmem_need + (4 << 20), 16 << 20), _VMEM_BUDGET)

    s, sq = pl.pallas_call(
        _bn_stats_kernel,
        out_shape=(jax.ShapeDtypeStruct((1, C), jnp.float32),
                   jax.ShapeDtypeStruct((1, C), jnp.float32)),
        grid_spec=pltpu.PrefetchScalarGridSpec(
            num_scalar_prefetch=0,
            grid=(Mp // tm,),
            in_specs=[pl.BlockSpec((tm, C), lambda i: (i, 0))],
            out_specs=(pl.BlockSpec((1, C), lambda i: (0, 0)),
                       pl.BlockSpec((1, C), lambda i: (0, 0))),
        ),
        compiler_params=pltpu.CompilerParams(
            dimension_semantics=("arbitrary",),
            vmem_limit_bytes=vmem_limit,
        ),
    )(x_p)
    return s[0], sq[0]


# ----------------------------------------------------------------------------
# Conv2d via im2col (bf16 XLA glue) + tiled Pallas matmul
# ----------------------------------------------------------------------------
def _conv_out(n, k, s, p):
    return (n + 2 * p - k) // s + 1


def im2col(x_nhwc, k, stride, pad):
    # TODO(synk): generate the 3x3 taps inside the matmul kernel via manual DMA
    # of shifted/strided windows (memory_space=pl.ANY) instead of materializing
    # the 9x-expanded patches in HBM; overlapping strided windows are not
    # expressible with plain BlockSpecs.
    N, H, W, C = x_nhwc.shape
    if pad:
        x_nhwc = jnp.pad(x_nhwc, ((0, 0), (pad, pad), (pad, pad), (0, 0)))
    Ho = _conv_out(H, k, stride, pad)
    Wo = _conv_out(W, k, stride, pad)
    cols = []
    for di in range(k):
        for dj in range(k):
            cols.append(
                x_nhwc[:, di:di + (Ho - 1) * stride + 1:stride,
                          dj:dj + (Wo - 1) * stride + 1:stride, :])
    patches = jnp.stack(cols, axis=3)                # (N, Ho, Wo, k*k, C)
    return patches.reshape(N * Ho * Wo, k * k * C), Ho, Wo


def conv2d(x_nhwc, w, b, *, stride, pad, relu, prescale=None,
           out_dtype=_COMPUTE_DTYPE, tm_max=2048):
    """w:(k,k,Cin,Cout); prescale: optional per-input-channel (scale, shift)
    applied (with ReLU) to the gathered patches before the matmul (fused BN)."""
    k, _, cin, cout = w.shape
    cols, Ho, Wo = im2col(x_nhwc, k, stride, pad)
    if prescale is not None:
        scale_c, shift_c = prescale
        # im2col column order is (tap-major, channel-minor) -> tile per tap.
        prescale = (jnp.tile(scale_c, k * k), jnp.tile(shift_c, k * k))
    y = pallas_matmul(cols, w.reshape(k * k * cin, cout), b,
                      relu=relu, prescale=prescale, out_dtype=out_dtype,
                      tm_max=tm_max)
    return y.reshape(x_nhwc.shape[0], Ho, Wo, cout)


# ----------------------------------------------------------------------------
# Encoder: parameters + forward
# ----------------------------------------------------------------------------
def init_encoder_params(key, input_shape=(3, 32, 48), encoded_space_dim=64):
    C, H, W = input_shape
    h1, w1 = _conv_out(H, 3, 2, 1), _conv_out(W, 3, 2, 1)
    h2, w2 = _conv_out(h1, 3, 2, 1), _conv_out(w1, 3, 2, 1)
    h3, w3 = _conv_out(h2, 3, 2, 0), _conv_out(w2, 3, 2, 0)
    lin_in = h3 * w3 * 128     # NHWC flatten order (w4 rows stored this way)

    ks = jax.random.split(key, 5)

    def conv_w(k_, kh, cin, cout):
        fan_in = kh * kh * cin
        w = jax.random.normal(k_, (kh, kh, cin, cout), jnp.float32)
        return (w * (2.0 / fan_in) ** 0.5).astype(_COMPUTE_DTYPE)

    def lin_w(k_, fin, fout):
        w = jax.random.normal(k_, (fin, fout), jnp.float32)
        return (w * (2.0 / fin) ** 0.5).astype(_COMPUTE_DTYPE)

    return dict(
        w1=conv_w(ks[0], 3, C, 32),    b1=jnp.zeros((32,), jnp.float32),
        w2=conv_w(ks[1], 3, 32, 64),   b2=jnp.zeros((64,), jnp.float32),
        gamma=jnp.ones((64,), jnp.float32), beta=jnp.zeros((64,), jnp.float32),
        w3=conv_w(ks[2], 3, 64, 128),  b3=jnp.zeros((128,), jnp.float32),
        # w4 rows are in NHWC-flatten order (no activation transpose needed).
        w4=lin_w(ks[3], lin_in, 512),  b4=jnp.zeros((512,), jnp.float32),
        w5=lin_w(ks[4], 512, encoded_space_dim),
        b5=jnp.zeros((encoded_space_dim,), jnp.float32),
    )


def encoder_forward(params, x_nchw):
    # NCHW (PyTorch) -> NHWC (kernel layout), bf16 activations end-to-end.
    x = jnp.transpose(x_nchw, (0, 2, 3, 1)).astype(_COMPUTE_DTYPE)
    batch = x.shape[0]

    # Conv2d(3, 32, 3, stride=2, padding=1) + ReLU.
    # cout=32 (<128 lanes) keeps masked stores, but padding to 128 would 4x
    # conv2's im2col HBM traffic for a ~MB-scale store; not worth it.
    x = conv2d(x, params["w1"], params["b1"], stride=2, pad=1, relu=True,
               tm_max=2048)

    # Conv2d(32, 64, 3, stride=2, padding=1): cout zero-padded 64 -> 128 so the
    # activation, BN-stats input and conv3 output are all lane-dense.
    w2p = jnp.pad(params["w2"], ((0, 0), (0, 0), (0, 0), (0, 64)))
    b2p = jnp.pad(params["b2"], (0, 64))
    x = conv2d(x, w2p, b2p, stride=2, pad=1, relu=False, tm_max=2048)

    # BatchNorm2d(64), PyTorch training-mode batch statistics (biased var),
    # computed on the 128-lane activation (padded channels are exactly zero).
    n, h, w, c = x.shape
    flat = x.reshape(n * h * w, c)
    s, sq = bn_stats(flat, tm_max=4096)
    m = float(n * h * w)
    mean = s / m
    var = jnp.maximum(sq / m - mean * mean, 0.0)   # clamp (cancellation guard)
    inv = jax.lax.rsqrt(var + 1e-5)
    gamma = jnp.pad(params["gamma"], (0, 64))      # padded channels -> scale 0
    beta = jnp.pad(params["beta"], (0, 64))        # padded channels -> shift 0
    scale = gamma * inv
    shift = beta - mean * scale
    # TODO(synk): running_mean/var (eval-mode BN) are not tracked.
    # TODO(synk): fuse the sum/sumsq reduction into conv2's matmul finalize to
    # remove the extra HBM read of the conv2 activation.

    # Conv2d(64, 128, 3, stride=2, padding=0) + ReLU, with BN-normalize + ReLU
    # fused into the matmul's LHS path (valid because padding=0 here).
    # Input channels padded 64 -> 128 with zero weight rows to match.
    w3p = jnp.pad(params["w3"], ((0, 0), (0, 0), (0, 64), (0, 0)))
    x = conv2d(x, w3p, params["b3"], stride=2, pad=0, relu=True,
               prescale=(scale, shift), tm_max=2048)

    # Flatten in NHWC order (w4 rows stored to match -> no transpose copy).
    x = x.reshape(batch, -1)

    # Linear(lin_in, 512) + ReLU: tk up to 4096 (few K-steps even at the real
    # 218k lin_in) and tn=256 so the grid has 2 parallel N tiles (v7x's 2nd TC).
    x = pallas_matmul(x, params["w4"], params["b4"], relu=True,
                      out_dtype=_COMPUTE_DTYPE, tk_max=4096, tn_max=256)
    # Linear(512, encoded_space_dim).
    x = pallas_matmul(x, params["w5"], params["b5"], relu=False,
                      out_dtype=jnp.float32)
    return x


if __name__ == "__main__":
    key = jax.random.PRNGKey(0)
    kx, kp = jax.random.split(key)

    input_shape = (3, 32, 48)          # small stand-in for (3, 256, 448)
    encoded_space_dim = 64
    batch = 2

    x = jax.random.normal(kx, (batch,) + input_shape, jnp.float32)
    params = init_encoder_params(kp, input_shape=input_shape,
                                 encoded_space_dim=encoded_space_dim)

    out = jax.jit(encoder_forward)(params, x)
    out = jax.block_until_ready(out)
    assert out.shape == (batch, encoded_space_dim), out.shape
    assert bool(jnp.all(jnp.isfinite(out)))
    print("KERNEL_OK")
</pallas_src>

<mosaic_0001>
module attributes {stable_mosaic.version = 11 : i64} {
  func.func @_matmul_kernel(%arg0: i32, %arg1: i32, %arg2: i32, %arg3: memref<768x27xbf16, #tpu.memory_space<vmem>>, %arg4: memref<27x32xbf16, #tpu.memory_space<vmem>>, %arg5: memref<1x32xf32, #tpu.memory_space<vmem>>, %arg6: memref<768x32xbf16, #tpu.memory_space<vmem>>, %arg7: memref<768x32xf32, #tpu.memory_space<vmem>>) attributes {dimension_semantics = [#tpu.dimension_semantics<parallel>, #tpu.dimension_semantics<parallel>, #tpu.dimension_semantics<arbitrary>], iteration_bounds = array<i64: 1, 1, 1>, scalar_prefetch = 0 : i64, scratch_operands = 1 : i64, tpu.core_type = #tpu.core_type<tc>, window_params = [{transform_indices = @transform_0, window_bounds = array<i64: 768, 27>}, {transform_indices = @transform_1, window_bounds = array<i64: 27, 32>}, {transform_indices = @transform_2, window_bounds = array<i64: 1, 32>}, {transform_indices = @transform_3, window_bounds = array<i64: 768, 32>}]} {
    %c0_i32 = arith.constant 0 : i32
    %0 = arith.cmpi eq, %arg2, %c0_i32 : i32
    %1 = arith.extui %0 : i1 to i32
    %c0_i32_0 = arith.constant 0 : i32
    %2 = arith.cmpi ne, %1, %c0_i32_0 : i32
    scf.if %2 {
      %cst_10 = arith.constant 0.000000e+00 : f32
      %12 = vector.broadcast %cst_10 : f32 to vector<768x32xf32>
      %c0_11 = arith.constant 0 : index
      %c0_12 = arith.constant 0 : index
      %13 = vector.load %arg7[%c0_11, %c0_12] : memref<768x32xf32, #tpu.memory_space<vmem>>, vector<768x32xf32>
      tpu.vector_store %arg7[%c0_11, %c0_12], %12 {strides = array<i32>} : memref<768x32xf32, #tpu.memory_space<vmem>>, vector<768x32xf32>,
    } else {
    }
    %c0 = arith.constant 0 : index
    %c0_1 = arith.constant 0 : index
    %3 = vector.load %arg3[%c0, %c0_1] : memref<768x27xbf16, #tpu.memory_space<vmem>>, vector<768x27xbf16>
    %c0_2 = arith.constant 0 : index
    %c0_3 = arith.constant 0 : index
    %4 = vector.load %arg7[%c0_2, %c0_3] : memref<768x32xf32, #tpu.memory_space<vmem>>, vector<768x32xf32>
    %c0_4 = arith.constant 0 : index
    %c0_5 = arith.constant 0 : index
    %5 = vector.load %arg4[%c0_4, %c0_5] : memref<27x32xbf16, #tpu.memory_space<vmem>>, vector<27x32xbf16>
    %cst = arith.constant dense<0.000000e+00> : vector<768x32xf32>
    %6 = tpu.matmul %3, %5, %cst {dimension_numbers = #tpu.dot_dimension_numbers<[1], [0], [0], [1], [0, 0, 1, 1], [], []>} : vector<768x27xbf16>, vector<27x32xbf16>, vector<768x32xf32> -> vector<768x32xf32>
    %7 = arith.addf %4, %6 : vector<768x32xf32>
    %c0_6 = arith.constant 0 : index
    %c0_7 = arith.constant 0 : index
    %8 = vector.load %arg7[%c0_6, %c0_7] : memref<768x32xf32, #tpu.memory_space<vmem>>, vector<768x32xf32>
    tpu.vector_store %arg7[%c0_6, %c0_7], %7 {strides = array<i32>} : memref<768x32xf32, #tpu.memory_space<vmem>>, vector<768x32xf32>,
    %c0_i32_8 = arith.constant 0 : i32
    %9 = arith.cmpi eq, %arg2, %c0_i32_8 : i32
    %10 = arith.extui %9 : i1 to i32
    %c0_i32_9 = arith.constant 0 : i32
    %11 = arith.cmpi ne, %10, %c0_i32_9 : i32
    scf.if %11 {
      %c0_10 = arith.constant 0 : index
      %c0_11 = arith.constant 0 : index
      %12 = vector.load %arg7[%c0_10, %c0_11] : memref<768x32xf32, #tpu.memory_space<vmem>>, vector<768x32xf32>
      %c0_12 = arith.constant 0 : index
      %c0_13 = arith.constant 0 : index
      %13 = vector.load %arg5[%c0_12, %c0_13] : memref<1x32xf32, #tpu.memory_space<vmem>>, vector<1x32xf32>
      %14 = vector.broadcast %13 : vector<1x32xf32> to vector<768x32xf32>
      %15 = arith.addf %12, %14 : vector<768x32xf32>
      %cst_14 = arith.constant 0.000000e+00 : f32
      %16 = vector.broadcast %cst_14 : f32 to vector<768x32xf32>
      %17 = arith.maximumf %15, %16 : vector<768x32xf32>
      %18 = arith.truncf %17 : vector<768x32xf32> to vector<768x32xbf16>
      %c0_15 = arith.constant 0 : index
      %c0_16 = arith.constant 0 : index
      %19 = vector.load %arg6[%c0_15, %c0_16] : memref<768x32xbf16, #tpu.memory_space<vmem>>, vector<768x32xbf16>
      tpu.vector_store %arg6[%c0_15, %c0_16], %18 {strides = array<i32>} : memref<768x32xbf16, #tpu.memory_space<vmem>>, vector<768x32xbf16>,
    } else {
    }
    return
  }
  func.func @transform_0(%arg0: i32, %arg1: i32, %arg2: i32) -> (i32, i32) {
    %c0_i32 = arith.constant 0 : i32
    return %arg0, %arg2 : i32, i32
  }
  func.func @transform_1(%arg0: i32, %arg1: i32, %arg2: i32) -> (i32, i32) {
    %c0_i32 = arith.constant 0 : i32
    return %arg2, %arg1 : i32, i32
  }
  func.func @transform_2(%arg0: i32, %arg1: i32, %arg2: i32) -> (i32, i32) {
    %c0_i32 = arith.constant 0 : i32
    %c0_i32_0 = arith.constant 0 : i32
    return %c0_i32, %arg1 : i32, i32
  }
  func.func @transform_3(%arg0: i32, %arg1: i32, %arg2: i32) -> (i32, i32) {
    %c0_i32 = arith.constant 0 : i32
    return %arg0, %arg1 : i32, i32
  }
}

module attributes {stable_mosaic.version = 11 : i64} {
  func.func @_bn_stats_kernel(%arg0: i32, %arg1: memref<192x128xbf16, #tpu.memory_space<vmem>>, %arg2: memref<1x128xf32, #tpu.memory_space<vmem>>, %arg3: memref<1x128xf32, #tpu.memory_space<vmem>>) attributes {dimension_semantics = [#tpu.dimension_semantics<arbitrary>], iteration_bounds = array<i64: 1>, scalar_prefetch = 0 : i64, scratch_operands = 0 : i64, tpu.core_type = #tpu.core_type<tc>, window_params = [{transform_indices = @transform_0, window_bounds = array<i64: 192, 128>}, {pipeline_mode = #tpu.pipeline_mode<synchronous>, transform_indices = @transform_1, window_bounds = array<i64: 1, 128>}, {pipeline_mode = #tpu.pipeline_mode<synchronous>, transform_indices = @transform_2, window_bounds = array<i64: 1, 128>}]} {
    %c0_i32 = arith.constant 0 : i32
    %0 = arith.cmpi eq, %arg0, %c0_i32 : i32
    %1 = arith.extui %0 : i1 to i32
    %c0_i32_0 = arith.constant 0 : i32
    %2 = arith.cmpi ne, %1, %c0_i32_0 : i32
    scf.if %2 {
      %cst_11 = arith.constant 0.000000e+00 : f32
      %16 = vector.broadcast %cst_11 : f32 to vector<1x128xf32>
      %c0_12 = arith.constant 0 : index
      %c0_13 = arith.constant 0 : index
      %17 = vector.load %arg2[%c0_12, %c0_13] : memref<1x128xf32, #tpu.memory_space<vmem>>, vector<1x128xf32>
      tpu.vector_store %arg2[%c0_12, %c0_13], %16 {strides = array<i32>} : memref<1x128xf32, #tpu.memory_space<vmem>>, vector<1x128xf32>,
      %cst_14 = arith.constant 0.000000e+00 : f32
      %18 = vector.broadcast %cst_14 : f32 to vector<1x128xf32>
      %c0_15 = arith.constant 0 : index
      %c0_16 = arith.constant 0 : index
      %19 = vector.load %arg3[%c0_15, %c0_16] : memref<1x128xf32, #tpu.memory_space<vmem>>, vector<1x128xf32>
      tpu.vector_store %arg3[%c0_15, %c0_16], %18 {strides = array<i32>} : memref<1x128xf32, #tpu.memory_space<vmem>>, vector<1x128xf32>,
    } else {
    }
    %c0 = arith.constant 0 : index
    %c0_1 = arith.constant 0 : index
    %3 = vector.load %arg1[%c0, %c0_1] : memref<192x128xbf16, #tpu.memory_space<vmem>>, vector<192x128xbf16>
    %4 = arith.extf %3 : vector<192x128xbf16> to vector<192x128xf32>
    %c0_2 = arith.constant 0 : index
    %c0_3 = arith.constant 0 : index
    %5 = vector.load %arg2[%c0_2, %c0_3] : memref<1x128xf32, #tpu.memory_space<vmem>>, vector<1x128xf32>
    %cst = arith.constant dense<0.000000e+00> : vector<128xf32>
    %6 = vector.multi_reduction <add>, %4, %cst [0] : vector<192x128xf32> to vector<128xf32>
    %7 = vector.shape_cast %6 : vector<128xf32> to vector<1x128xf32>
    %8 = arith.addf %5, %7 : vector<1x128xf32>
    %c0_4 = arith.constant 0 : index
    %c0_5 = arith.constant 0 : index
    %9 = vector.load %arg2[%c0_4, %c0_5] : memref<1x128xf32, #tpu.memory_space<vmem>>, vector<1x128xf32>
    tpu.vector_store %arg2[%c0_4, %c0_5], %8 {strides = array<i32>} : memref<1x128xf32, #tpu.memory_space<vmem>>, vector<1x128xf32>,
    %c0_6 = arith.constant 0 : index
    %c0_7 = arith.constant 0 : index
    %10 = vector.load %arg3[%c0_6, %c0_7] : memref<1x128xf32, #tpu.memory_space<vmem>>, vector<1x128xf32>
    %11 = arith.mulf %4, %4 : vector<192x128xf32>
    %cst_8 = arith.constant dense<0.000000e+00> : vector<128xf32>
    %12 = vector.multi_reduction <add>, %11, %cst_8 [0] : vector<192x128xf32> to vector<128xf32>
    %13 = vector.shape_cast %12 : vector<128xf32> to vector<1x128xf32>
    %14 = arith.addf %10, %13 : vector<1x128xf32>
    %c0_9 = arith.constant 0 : index
    %c0_10 = arith.constant 0 : index
    %15 = vector.load %arg3[%c0_9, %c0_10] : memref<1x128xf32, #tpu.memory_space<vmem>>, vector<1x128xf32>
    tpu.vector_store %arg3[%c0_9, %c0_10], %14 {strides = array<i32>} : memref<1x128xf32, #tpu.memory_space<vmem>>, vector<1x128xf32>,
    return
  }
  func.func @transform_0(%arg0: i32) -> (i32, i32) {
    %c0_i32 = arith.constant 0 : i32
    %c0_i32_0 = arith.constant 0 : i32
    return %arg0, %c0_i32 : i32, i32
  }
  func.func @transform_1(%arg0: i32) -> (i32, i32) {
    %c0_i32 = arith.constant 0 : i32
    %c0_i32_0 = arith.constant 0 : i32
    %c0_i32_1 = arith.constant 0 : i32
    return %c0_i32, %c0_i32_0 : i32, i32
  }
  func.func @transform_2(%arg0: i32) -> (i32, i32) {
    %c0_i32 = arith.constant 0 : i32
    %c0_i32_0 = arith.constant 0 : i32
    %c0_i32_1 = arith.constant 0 : i32
    return %c0_i32, %c0_i32_0 : i32, i32
  }
}

module attributes {stable_mosaic.version = 11 : i64} {
  func.func @_matmul_kernel(%arg0: i32, %arg1: i32, %arg2: i32, %arg3: memref<192x288xbf16, #tpu.memory_space<vmem>>, %arg4: memref<288x128xbf16, #tpu.memory_space<vmem>>, %arg5: memref<1x128xf32, #tpu.memory_space<vmem>>, %arg6: memref<192x128xbf16, #tpu.memory_space<vmem>>, %arg7: memref<192x128xf32, #tpu.memory_space<vmem>>) attributes {dimension_semantics = [#tpu.dimension_semantics<parallel>, #tpu.dimension_semantics<parallel>, #tpu.dimension_semantics<arbitrary>], iteration_bounds = array<i64: 1, 1, 1>, scalar_prefetch = 0 : i64, scratch_operands = 1 : i64, tpu.core_type = #tpu.core_type<tc>, window_params = [{transform_indices = @transform_0, window_bounds = array<i64: 192, 288>}, {transform_indices = @transform_1, window_bounds = array<i64: 288, 128>}, {transform_indices = @transform_2, window_bounds = array<i64: 1, 128>}, {transform_indices = @transform_3, window_bounds = array<i64: 192, 128>}]} {
    %c0_i32 = arith.constant 0 : i32
    %0 = arith.cmpi eq, %arg2, %c0_i32 : i32
    %1 = arith.extui %0 : i1 to i32
    %c0_i32_0 = arith.constant 0 : i32
    %2 = arith.cmpi ne, %1, %c0_i32_0 : i32
    scf.if %2 {
      %cst_10 = arith.constant 0.000000e+00 : f32
      %12 = vector.broadcast %cst_10 : f32 to vector<192x128xf32>
      %c0_11 = arith.constant 0 : index
      %c0_12 = arith.constant 0 : index
      %13 = vector.load %arg7[%c0_11, %c0_12] : memref<192x128xf32, #tpu.memory_space<vmem>>, vector<192x128xf32>
      tpu.vector_store %arg7[%c0_11, %c0_12], %12 {strides = array<i32>} : memref<192x128xf32, #tpu.memory_space<vmem>>, vector<192x128xf32>,
    } else {
    }
    %c0 = arith.constant 0 : index
    %c0_1 = arith.constant 0 : index
    %3 = vector.load %arg3[%c0, %c0_1] : memref<192x288xbf16, #tpu.memory_space<vmem>>, vector<192x288xbf16>
    %c0_2 = arith.constant 0 : index
    %c0_3 = arith.constant 0 : index
    %4 = vector.load %arg7[%c0_2, %c0_3] : memref<192x128xf32, #tpu.memory_space<vmem>>, vector<192x128xf32>
    %c0_4 = arith.constant 0 : index
    %c0_5 = arith.constant 0 : index
    %5 = vector.load %arg4[%c0_4, %c0_5] : memref<288x128xbf16, #tpu.memory_space<vmem>>, vector<288x128xbf16>
    %cst = arith.constant dense<0.000000e+00> : vector<192x128xf32>
    %6 = tpu.matmul %3, %5, %cst {dimension_numbers = #tpu.dot_dimension_numbers<[1], [0], [0], [1], [0, 0, 1, 1], [], []>} : vector<192x288xbf16>, vector<288x128xbf16>, vector<192x128xf32> -> vector<192x128xf32>
    %7 = arith.addf %4, %6 : vector<192x128xf32>
    %c0_6 = arith.constant 0 : index
    %c0_7 = arith.constant 0 : index
    %8 = vector.load %arg7[%c0_6, %c0_7] : memref<192x128xf32, #tpu.memory_space<vmem>>, vector<192x128xf32>
    tpu.vector_store %arg7[%c0_6, %c0_7], %7 {strides = array<i32>} : memref<192x128xf32, #tpu.memory_space<vmem>>, vector<192x128xf32>,
    %c0_i32_8 = arith.constant 0 : i32
    %9 = arith.cmpi eq, %arg2, %c0_i32_8 : i32
    %10 = arith.extui %9 : i1 to i32
    %c0_i32_9 = arith.constant 0 : i32
    %11 = arith.cmpi ne, %10, %c0_i32_9 : i32
    scf.if %11 {
      %c0_10 = arith.constant 0 : index
      %c0_11 = arith.constant 0 : index
      %12 = vector.load %arg7[%c0_10, %c0_11] : memref<192x128xf32, #tpu.memory_space<vmem>>, vector<192x128xf32>
      %c0_12 = arith.constant 0 : index
      %c0_13 = arith.constant 0 : index
      %13 = vector.load %arg5[%c0_12, %c0_13] : memref<1x128xf32, #tpu.memory_space<vmem>>, vector<1x128xf32>
      %14 = vector.broadcast %13 : vector<1x128xf32> to vector<192x128xf32>
      %15 = arith.addf %12, %14 : vector<192x128xf32>
      %16 = arith.truncf %15 : vector<192x128xf32> to vector<192x128xbf16>
      %c0_14 = arith.constant 0 : index
      %c0_15 = arith.constant 0 : index
      %17 = vector.load %arg6[%c0_14, %c0_15] : memref<192x128xbf16, #tpu.memory_space<vmem>>, vector<192x128xbf16>
      tpu.vector_store %arg6[%c0_14, %c0_15], %16 {strides = array<i32>} : memref<192x128xbf16, #tpu.memory_space<vmem>>, vector<192x128xbf16>,
    } else {
    }
    return
  }
  func.func @transform_0(%arg0: i32, %arg1: i32, %arg2: i32) -> (i32, i32) {
    %c0_i32 = arith.constant 0 : i32
    return %arg0, %arg2 : i32, i32
  }
  func.func @transform_1(%arg0: i32, %arg1: i32, %arg2: i32) -> (i32, i32) {
    %c0_i32 = arith.constant 0 : i32
    return %arg2, %arg1 : i32, i32
  }
  func.func @transform_2(%arg0: i32, %arg1: i32, %arg2: i32) -> (i32, i32) {
    %c0_i32 = arith.constant 0 : i32
    %c0_i32_0 = arith.constant 0 : i32
    return %c0_i32, %arg1 : i32, i32
  }
  func.func @transform_3(%arg0: i32, %arg1: i32, %arg2: i32) -> (i32, i32) {
    %c0_i32 = arith.constant 0 : i32
    return %arg0, %arg1 : i32, i32
  }
}

module attributes {stable_mosaic.version = 11 : i64} {
  func.func @_matmul_kernel(%arg0: i32, %arg1: i32, %arg2: i32, %arg3: memref<32x1152xbf16, #tpu.memory_space<vmem>>, %arg4: memref<1152x128xbf16, #tpu.memory_space<vmem>>, %arg5: memref<1x128xf32, #tpu.memory_space<vmem>>, %arg6: memref<1x1152xf32, #tpu.memory_space<vmem>>, %arg7: memref<1x1152xf32, #tpu.memory_space<vmem>>, %arg8: memref<32x128xbf16, #tpu.memory_space<vmem>>, %arg9: memref<32x128xf32, #tpu.memory_space<vmem>>) attributes {dimension_semantics = [#tpu.dimension_semantics<parallel>, #tpu.dimension_semantics<parallel>, #tpu.dimension_semantics<arbitrary>], iteration_bounds = array<i64: 1, 1, 1>, scalar_prefetch = 0 : i64, scratch_operands = 1 : i64, tpu.core_type = #tpu.core_type<tc>, window_params = [{transform_indices = @transform_0, window_bounds = array<i64: 32, 1152>}, {transform_indices = @transform_1, window_bounds = array<i64: 1152, 128>}, {transform_indices = @transform_2, window_bounds = array<i64: 1, 128>}, {transform_indices = @transform_3, window_bounds = array<i64: 1, 1152>}, {transform_indices = @transform_4, window_bounds = array<i64: 1, 1152>}, {transform_indices = @transform_5, window_bounds = array<i64: 32, 128>}]} {
    %c0_i32 = arith.constant 0 : i32
    %0 = arith.cmpi eq, %arg2, %c0_i32 : i32
    %1 = arith.extui %0 : i1 to i32
    %c0_i32_0 = arith.constant 0 : i32
    %2 = arith.cmpi ne, %1, %c0_i32_0 : i32
    scf.if %2 {
      %cst_15 = arith.constant 0.000000e+00 : f32
      %22 = vector.broadcast %cst_15 : f32 to vector<32x128xf32>
      %c0_16 = arith.constant 0 : index
      %c0_17 = arith.constant 0 : index
      %23 = vector.load %arg9[%c0_16, %c0_17] : memref<32x128xf32, #tpu.memory_space<vmem>>, vector<32x128xf32>
      tpu.vector_store %arg9[%c0_16, %c0_17], %22 {strides = array<i32>} : memref<32x128xf32, #tpu.memory_space<vmem>>, vector<32x128xf32>,
    } else {
    }
    %c0 = arith.constant 0 : index
    %c0_1 = arith.constant 0 : index
    %3 = vector.load %arg3[%c0, %c0_1] : memref<32x1152xbf16, #tpu.memory_space<vmem>>, vector<32x1152xbf16>
    %4 = arith.extf %3 : vector<32x1152xbf16> to vector<32x1152xf32>
    %c0_2 = arith.constant 0 : index
    %c0_3 = arith.constant 0 : index
    %5 = vector.load %arg6[%c0_2, %c0_3] : memref<1x1152xf32, #tpu.memory_space<vmem>>, vector<1x1152xf32>
    %6 = vector.broadcast %5 : vector<1x1152xf32> to vector<32x1152xf32>
    %7 = arith.mulf %4, %6 : vector<32x1152xf32>
    %c0_4 = arith.constant 0 : index
    %c0_5 = arith.constant 0 : index
    %8 = vector.load %arg7[%c0_4, %c0_5] : memref<1x1152xf32, #tpu.memory_space<vmem>>, vector<1x1152xf32>
    %9 = vector.broadcast %8 : vector<1x1152xf32> to vector<32x1152xf32>
    %10 = arith.addf %7, %9 : vector<32x1152xf32>
    %cst = arith.constant 0.000000e+00 : f32
    %11 = vector.broadcast %cst : f32 to vector<32x1152xf32>
    %12 = arith.maximumf %10, %11 : vector<32x1152xf32>
    %13 = arith.truncf %12 : vector<32x1152xf32> to vector<32x1152xbf16>
    %c0_6 = arith.constant 0 : index
    %c0_7 = arith.constant 0 : index
    %14 = vector.load %arg9[%c0_6, %c0_7] : memref<32x128xf32, #tpu.memory_space<vmem>>, vector<32x128xf32>
    %c0_8 = arith.constant 0 : index
    %c0_9 = arith.constant 0 : index
    %15 = vector.load %arg4[%c0_8, %c0_9] : memref<1152x128xbf16, #tpu.memory_space<vmem>>, vector<1152x128xbf16>
    %cst_10 = arith.constant dense<0.000000e+00> : vector<32x128xf32>
    %16 = tpu.matmul %13, %15, %cst_10 {dimension_numbers = #tpu.dot_dimension_numbers<[1], [0], [0], [1], [0, 0, 1, 1], [], []>} : vector<32x1152xbf16>, vector<1152x128xbf16>, vector<32x128xf32> -> vector<32x128xf32>
    %17 = arith.addf %14, %16 : vector<32x128xf32>
    %c0_11 = arith.constant 0 : index
    %c0_12 = arith.constant 0 : index
    %18 = vector.load %arg9[%c0_11, %c0_12] : memref<32x128xf32, #tpu.memory_space<vmem>>, vector<32x128xf32>
    tpu.vector_store %arg9[%c0_11, %c0_12], %17 {strides = array<i32>} : memref<32x128xf32, #tpu.memory_space<vmem>>, vector<32x128xf32>,
    %c0_i32_13 = arith.constant 0 : i32
    %19 = arith.cmpi eq, %arg2, %c0_i32_13 : i32
    %20 = arith.extui %19 : i1 to i32
    %c0_i32_14 = arith.constant 0 : i32
    %21 = arith.cmpi ne, %20, %c0_i32_14 : i32
    scf.if %21 {
      %c0_15 = arith.constant 0 : index
      %c0_16 = arith.constant 0 : index
      %22 = vector.load %arg9[%c0_15, %c0_16] : memref<32x128xf32, #tpu.memory_space<vmem>>, vector<32x128xf32>
      %c0_17 = arith.constant 0 : index
      %c0_18 = arith.constant 0 : index
      %23 = vector.load %arg5[%c0_17, %c0_18] : memref<1x128xf32, #tpu.memory_space<vmem>>, vector<1x128xf32>
      %24 = vector.broadcast %23 : vector<1x128xf32> to vector<32x128xf32>
      %25 = arith.addf %22, %24 : vector<32x128xf32>
      %cst_19 = arith.constant 0.000000e+00 : f32
      %26 = vector.broadcast %cst_19 : f32 to vector<32x128xf32>
      %27 = arith.maximumf %25, %26 : vector<32x128xf32>
      %28 = arith.truncf %27 : vector<32x128xf32> to vector<32x128xbf16>
      %c0_20 = arith.constant 0 : index
      %c0_21 = arith.constant 0 : index
      %29 = vector.load %arg8[%c0_20, %c0_21] : memref<32x128xbf16, #tpu.memory_space<vmem>>, vector<32x128xbf16>
      tpu.vector_store %arg8[%c0_20, %c0_21], %28 {strides = array<i32>} : memref<32x128xbf16, #tpu.memory_space<vmem>>, vector<32x128xbf16>,
    } else {
    }
    return
  }
  func.func @transform_0(%arg0: i32, %arg1: i32, %arg2: i32) -> (i32, i32) {
    %c0_i32 = arith.constant 0 : i32
    return %arg0, %arg2 : i32, i32
  }
  func.func @transform_1(%arg0: i32, %arg1: i32, %arg2: i32) -> (i32, i32) {
    %c0_i32 = arith.constant 0 : i32
    return %arg2, %arg1 : i32, i32
  }
  func.func @transform_2(%arg0: i32, %arg1: i32, %arg2: i32) -> (i32, i32) {
    %c0_i32 = arith.constant 0 : i32
    %c0_i32_0 = arith.constant 0 : i32
    return %c0_i32, %arg1 : i32, i32
  }
  func.func @transform_3(%arg0: i32, %arg1: i32, %arg2: i32) -> (i32, i32) {
    %c0_i32 = arith.constant 0 : i32
    %c0_i32_0 = arith.constant 0 : i32
    return %c0_i32, %arg2 : i32, i32
  }
  func.func @transform_4(%arg0: i32, %arg1: i32, %arg2: i32) -> (i32, i32) {
    %c0_i32 = arith.constant 0 : i32
    %c0_i32_0 = arith.constant 0 : i32
    return %c0_i32, %arg2 : i32, i32
  }
  func.func @transform_5(%arg0: i32, %arg1: i32, %arg2: i32) -> (i32, i32) {
    %c0_i32 = arith.constant 0 : i32
    return %arg0, %arg1 : i32, i32
  }
}

module attributes {stable_mosaic.version = 11 : i64} {
  func.func @_matmul_kernel(%arg0: i32, %arg1: i32, %arg2: i32, %arg3: memref<16x1920xbf16, #tpu.memory_space<vmem>>, %arg4: memref<1920x256xbf16, #tpu.memory_space<vmem>>, %arg5: memref<1x256xf32, #tpu.memory_space<vmem>>, %arg6: memref<16x256xbf16, #tpu.memory_space<vmem>>, %arg7: memref<16x256xf32, #tpu.memory_space<vmem>>) attributes {dimension_semantics = [#tpu.dimension_semantics<parallel>, #tpu.dimension_semantics<parallel>, #tpu.dimension_semantics<arbitrary>], iteration_bounds = array<i64: 1, 2, 1>, scalar_prefetch = 0 : i64, scratch_operands = 1 : i64, tpu.core_type = #tpu.core_type<tc>, window_params = [{transform_indices = @transform_0, window_bounds = array<i64: 16, 1920>}, {transform_indices = @transform_1, window_bounds = array<i64: 1920, 256>}, {transform_indices = @transform_2, window_bounds = array<i64: 1, 256>}, {transform_indices = @transform_3, window_bounds = array<i64: 16, 256>}]} {
    %c0_i32 = arith.constant 0 : i32
    %0 = arith.cmpi eq, %arg2, %c0_i32 : i32
    %1 = arith.extui %0 : i1 to i32
    %c0_i32_0 = arith.constant 0 : i32
    %2 = arith.cmpi ne, %1, %c0_i32_0 : i32
    scf.if %2 {
      %cst_10 = arith.constant 0.000000e+00 : f32
      %12 = vector.broadcast %cst_10 : f32 to vector<16x256xf32>
      %c0_11 = arith.constant 0 : index
      %c0_12 = arith.constant 0 : index
      %13 = vector.load %arg7[%c0_11, %c0_12] : memref<16x256xf32, #tpu.memory_space<vmem>>, vector<16x256xf32>
      tpu.vector_store %arg7[%c0_11, %c0_12], %12 {strides = array<i32>} : memref<16x256xf32, #tpu.memory_space<vmem>>, vector<16x256xf32>,
    } else {
    }
    %c0 = arith.constant 0 : index
    %c0_1 = arith.constant 0 : index
    %3 = vector.load %arg3[%c0, %c0_1] : memref<16x1920xbf16, #tpu.memory_space<vmem>>, vector<16x1920xbf16>
    %c0_2 = arith.constant 0 : index
    %c0_3 = arith.constant 0 : index
    %4 = vector.load %arg7[%c0_2, %c0_3] : memref<16x256xf32, #tpu.memory_space<vmem>>, vector<16x256xf32>
    %c0_4 = arith.constant 0 : index
    %c0_5 = arith.constant 0 : index
    %5 = vector.load %arg4[%c0_4, %c0_5] : memref<1920x256xbf16, #tpu.memory_space<vmem>>, vector<1920x256xbf16>
    %cst = arith.constant dense<0.000000e+00> : vector<16x256xf32>
    %6 = tpu.matmul %3, %5, %cst {dimension_numbers = #tpu.dot_dimension_numbers<[1], [0], [0], [1], [0, 0, 1, 1], [], []>} : vector<16x1920xbf16>, vector<1920x256xbf16>, vector<16x256xf32> -> vector<16x256xf32>
    %7 = arith.addf %4, %6 : vector<16x256xf32>
    %c0_6 = arith.constant 0 : index
    %c0_7 = arith.constant 0 : index
    %8 = vector.load %arg7[%c0_6, %c0_7] : memref<16x256xf32, #tpu.memory_space<vmem>>, vector<16x256xf32>
    tpu.vector_store %arg7[%c0_6, %c0_7], %7 {strides = array<i32>} : memref<16x256xf32, #tpu.memory_space<vmem>>, vector<16x256xf32>,
    %c0_i32_8 = arith.constant 0 : i32
    %9 = arith.cmpi eq, %arg2, %c0_i32_8 : i32
    %10 = arith.extui %9 : i1 to i32
    %c0_i32_9 = arith.constant 0 : i32
    %11 = arith.cmpi ne, %10, %c0_i32_9 : i32
    scf.if %11 {
      %c0_10 = arith.constant 0 : index
      %c0_11 = arith.constant 0 : index
      %12 = vector.load %arg7[%c0_10, %c0_11] : memref<16x256xf32, #tpu.memory_space<vmem>>, vector<16x256xf32>
      %c0_12 = arith.constant 0 : index
      %c0_13 = arith.constant 0 : index
      %13 = vector.load %arg5[%c0_12, %c0_13] : memref<1x256xf32, #tpu.memory_space<vmem>>, vector<1x256xf32>
      %14 = vector.broadcast %13 : vector<1x256xf32> to vector<16x256xf32>
      %15 = arith.addf %12, %14 : vector<16x256xf32>
      %cst_14 = arith.constant 0.000000e+00 : f32
      %16 = vector.broadcast %cst_14 : f32 to vector<16x256xf32>
      %17 = arith.maximumf %15, %16 : vector<16x256xf32>
      %18 = arith.truncf %17 : vector<16x256xf32> to vector<16x256xbf16>
      %c0_15 = arith.constant 0 : index
      %c0_16 = arith.constant 0 : index
      %19 = vector.load %arg6[%c0_15, %c0_16] : memref<16x256xbf16, #tpu.memory_space<vmem>>, vector<16x256xbf16>
      tpu.vector_store %arg6[%c0_15, %c0_16], %18 {strides = array<i32>} : memref<16x256xbf16, #tpu.memory_space<vmem>>, vector<16x256xbf16>,
    } else {
    }
    return
  }
  func.func @transform_0(%arg0: i32, %arg1: i32, %arg2: i32) -> (i32, i32) {
    %c0_i32 = arith.constant 0 : i32
    return %arg0, %arg2 : i32, i32
  }
  func.func @transform_1(%arg0: i32, %arg1: i32, %arg2: i32) -> (i32, i32) {
    %c0_i32 = arith.constant 0 : i32
    return %arg2, %arg1 : i32, i32
  }
  func.func @transform_2(%arg0: i32, %arg1: i32, %arg2: i32) -> (i32, i32) {
    %c0_i32 = arith.constant 0 : i32
    %c0_i32_0 = arith.constant 0 : i32
    return %c0_i32, %arg1 : i32, i32
  }
  func.func @transform_3(%arg0: i32, %arg1: i32, %arg2: i32) -> (i32, i32) {
    %c0_i32 = arith.constant 0 : i32
    return %arg0, %arg1 : i32, i32
  }
}

module attributes {stable_mosaic.version = 11 : i64} {
  func.func @_matmul_kernel(%arg0: i32, %arg1: i32, %arg2: i32, %arg3: memref<16x512xbf16, #tpu.memory_space<vmem>>, %arg4: memref<512x64xbf16, #tpu.memory_space<vmem>>, %arg5: memref<1x64xf32, #tpu.memory_space<vmem>>, %arg6: memref<16x64xf32, #tpu.memory_space<vmem>>, %arg7: memref<16x64xf32, #tpu.memory_space<vmem>>) attributes {dimension_semantics = [#tpu.dimension_semantics<parallel>, #tpu.dimension_semantics<parallel>, #tpu.dimension_semantics<arbitrary>], iteration_bounds = array<i64: 1, 1, 1>, scalar_prefetch = 0 : i64, scratch_operands = 1 : i64, tpu.core_type = #tpu.core_type<tc>, window_params = [{transform_indices = @transform_0, window_bounds = array<i64: 16, 512>}, {transform_indices = @transform_1, window_bounds = array<i64: 512, 64>}, {transform_indices = @transform_2, window_bounds = array<i64: 1, 64>}, {transform_indices = @transform_3, window_bounds = array<i64: 16, 64>}]} {
    %c0_i32 = arith.constant 0 : i32
    %0 = arith.cmpi eq, %arg2, %c0_i32 : i32
    %1 = arith.extui %0 : i1 to i32
    %c0_i32_0 = arith.constant 0 : i32
    %2 = arith.cmpi ne, %1, %c0_i32_0 : i32
    scf.if %2 {
      %cst_10 = arith.constant 0.000000e+00 : f32
      %12 = vector.broadcast %cst_10 : f32 to vector<16x64xf32>
      %c0_11 = arith.constant 0 : index
      %c0_12 = arith.constant 0 : index
      %13 = vector.load %arg7[%c0_11, %c0_12] : memref<16x64xf32, #tpu.memory_space<vmem>>, vector<16x64xf32>
      tpu.vector_store %arg7[%c0_11, %c0_12], %12 {strides = array<i32>} : memref<16x64xf32, #tpu.memory_space<vmem>>, vector<16x64xf32>,
    } else {
    }
    %c0 = arith.constant 0 : index
    %c0_1 = arith.constant 0 : index
    %3 = vector.load %arg3[%c0, %c0_1] : memref<16x512xbf16, #tpu.memory_space<vmem>>, vector<16x512xbf16>
    %c0_2 = arith.constant 0 : index
    %c0_3 = arith.constant 0 : index
    %4 = vector.load %arg7[%c0_2, %c0_3] : memref<16x64xf32, #tpu.memory_space<vmem>>, vector<16x64xf32>
    %c0_4 = arith.constant 0 : index
    %c0_5 = arith.constant 0 : index
    %5 = vector.load %arg4[%c0_4, %c0_5] : memref<512x64xbf16, #tpu.memory_space<vmem>>, vector<512x64xbf16>
    %cst = arith.constant dense<0.000000e+00> : vector<16x64xf32>
    %6 = tpu.matmul %3, %5, %cst {dimension_numbers = #tpu.dot_dimension_numbers<[1], [0], [0], [1], [0, 0, 1, 1], [], []>} : vector<16x512xbf16>, vector<512x64xbf16>, vector<16x64xf32> -> vector<16x64xf32>
    %7 = arith.addf %4, %6 : vector<16x64xf32>
    %c0_6 = arith.constant 0 : index
    %c0_7 = arith.constant 0 : index
    %8 = vector.load %arg7[%c0_6, %c0_7] : memref<16x64xf32, #tpu.memory_space<vmem>>, vector<16x64xf32>
    tpu.vector_store %arg7[%c0_6, %c0_7], %7 {strides = array<i32>} : memref<16x64xf32, #tpu.memory_space<vmem>>, vector<16x64xf32>,
    %c0_i32_8 = arith.constant 0 : i32
    %9 = arith.cmpi eq, %arg2, %c0_i32_8 : i32
    %10 = arith.extui %9 : i1 to i32
    %c0_i32_9 = arith.constant 0 : i32
    %11 = arith.cmpi ne, %10, %c0_i32_9 : i32
    scf.if %11 {
      %c0_10 = arith.constant 0 : index
      %c0_11 = arith.constant 0 : index
      %12 = vector.load %arg7[%c0_10, %c0_11] : memref<16x64xf32, #tpu.memory_space<vmem>>, vector<16x64xf32>
      %c0_12 = arith.constant 0 : index
      %c0_13 = arith.constant 0 : index
      %13 = vector.load %arg5[%c0_12, %c0_13] : memref<1x64xf32, #tpu.memory_space<vmem>>, vector<1x64xf32>
      %14 = vector.broadcast %13 : vector<1x64xf32> to vector<16x64xf32>
      %15 = arith.addf %12, %14 : vector<16x64xf32>
      %c0_14 = arith.constant 0 : index
      %c0_15 = arith.constant 0 : index
      %16 = vector.load %arg6[%c0_14, %c0_15] : memref<16x64xf32, #tpu.memory_space<vmem>>, vector<16x64xf32>
      tpu.vector_store %arg6[%c0_14, %c0_15], %15 {strides = array<i32>} : memref<16x64xf32, #tpu.memory_space<vmem>>, vector<16x64xf32>,
    } else {
    }
    return
  }
  func.func @transform_0(%arg0: i32, %arg1: i32, %arg2: i32) -> (i32, i32) {
    %c0_i32 = arith.constant 0 : i32
    return %arg0, %arg2 : i32, i32
  }
  func.func @transform_1(%arg0: i32, %arg1: i32, %arg2: i32) -> (i32, i32) {
    %c0_i32 = arith.constant 0 : i32
    return %arg2, %arg1 : i32, i32
  }
  func.func @transform_2(%arg0: i32, %arg1: i32, %arg2: i32) -> (i32, i32) {
    %c0_i32 = arith.constant 0 : i32
    %c0_i32_0 = arith.constant 0 : i32
    return %c0_i32, %arg1 : i32, i32
  }
  func.func @transform_3(%arg0: i32, %arg1: i32, %arg2: i32) -> (i32, i32) {
    %c0_i32 = arith.constant 0 : i32
    return %arg0, %arg1 : i32, i32
  }
}

</mosaic_0001>

<bundles_post_ra>
// kernel: encoder_forward.6
= control target key start
LH: loop header
LB: loop body
LE: loop exit
PB: predicated region body
PF: predicated region fallthrough
CT: control target
= control target key end

     0   :  { %vm708_vm0 = vcmask 1044480   ;;  %vm709_vm1 = vcmask 1045504   ;;  %v1957_v2 = vmov 65535   ;;  %vm563_vm2 = vcmask 220160   ;;  %s3180_s1 = inlined_call_operand.vmem [shape: bf16[27,32], index: 1, kind: input, shape index: {}]   ;;  %s3181_s2 = inlined_call_operand.vmem [shape: f32[1,32], index: 2, kind: input, shape index: {}]   ;;  %s3182_s0 = inlined_call_operand.vmem [shape: bf16[768,27], index: 0, kind: input, shape index: {}]   ;;  %s3183_s3 = inlined_call_operand.vmem [shape: bf16[768,32], index: 3, kind: output, shape index: {}]  }
   0x1   :  { %v1847_v0 = vld [vmem:[%s3180_s1 + $0x8] sm:$0xf]  ;;  %v1946_v1 = vld [vmem:[%s3180_s1 + $0x8] sm:$0x30]  ;;  %v710_v3 = vsel %vm708_vm0, 4294967295, %v1957_v2  ;;  %v1945_v7 = vld [vmem:[%s3180_s1] sm:$0xff] }
   0x2   :  { %v1848_v4 = vor.u32 %v1946_v1, %v1847_v0  ;;  %v711_v5 = vsel %vm709_vm1, %v710_v3, 0  ;;  %v1897_v8 = vld [vmem:[%s3182_s0] sm:$0xff]  ;;  %v1898_v12 = vld [vmem:[%s3182_s0 + $0x8] sm:$0xff]  ;;  %v1899_v16 = vld [vmem:[%s3182_s0 + $0x10] sm:$0xff]  ;;  %vm19_vm3 = vcmask 261120   ;;  %v1958_v32 = vmov 0.0  }
   0x3   :  { %v1909_v9 = vld [vmem:[%s3182_s0 + $0x60] sm:$0xff]  ;;  %v1910_v13 = vld [vmem:[%s3182_s0 + $0x68] sm:$0xff]  ;;  %v1911_v17 = vld [vmem:[%s3182_s0 + $0x70] sm:$0xff]  ;;  %20 = vst.msk [vmem:[#allocation2] sm:$0xff] %vm19_vm3, %v1958_v32  ;;  %vm1548_vm4 = vcmask 257024  }
   0x4   :  { %v713_v6 = vand.u32 %v1848_v4, %v711_v5  ;;  %v1921_v10 = vld [vmem:[%s3182_s0 + $0xc0] sm:$0xff]  ;;  %v1922_v14 = vld [vmem:[%s3182_s0 + $0xc8] sm:$0xff]  ;;  %v1923_v18 = vld [vmem:[%s3182_s0 + $0xd0] sm:$0xff]  ;;  %21 = vst.msk [vmem:[#allocation2 + $0x8] sm:$0xff] %vm19_vm3, %v1958_v32 }
   0x5   :  { %v1933_v11 = vld [vmem:[%s3182_s0 + $0x120] sm:$0xff]  ;;  %v1934_v15 = vld [vmem:[%s3182_s0 + $0x128] sm:$0xff]  ;;  %v1935_v19 = vld [vmem:[%s3182_s0 + $0x130] sm:$0xff]  ;;  %22 = vst.msk [vmem:[#allocation2 + $0x10] sm:$0xff] %vm19_vm3, %v1958_v32 }
   0x6   :  { %721 = vmatpush.bf16.msra.mxu0 %v713_v6  ;;  %1947 = vmatpush.bf16.msra.mxu1 %v713_v6  ;;  %v1900_v20 = vld [vmem:[%s3182_s0 + $0x18] sm:$0xff]  ;;  %v1901_v24 = vld [vmem:[%s3182_s0 + $0x20] sm:$0xff]  ;;  %v1902_v28 = vld [vmem:[%s3182_s0 + $0x28] sm:$0xff]  ;;  %23 = vst.msk [vmem:[#allocation2 + $0x18] sm:$0xff] %vm19_vm3, %v1958_v32 }
   0x7   :  { %1948 = vmatpush.bf16.msra.mxu2 %v713_v6  ;;  %1949 = vmatpush.bf16.msra.mxu3 %v713_v6  ;;  %v1912_v21 = vld [vmem:[%s3182_s0 + $0x78] sm:$0xff]  ;;  %v1913_v25 = vld [vmem:[%s3182_s0 + $0x80] sm:$0xff]  ;;  %v1914_v29 = vld [vmem:[%s3182_s0 + $0x88] sm:$0xff]  ;;  %24 = vst.msk [vmem:[#allocation2 + $0x20] sm:$0xff] %vm19_vm3, %v1958_v32 }
   0x8   :  { %v1924_v22 = vld [vmem:[%s3182_s0 + $0xd8] sm:$0xff]  ;;  %v1925_v26 = vld [vmem:[%s3182_s0 + $0xe0] sm:$0xff]  ;;  %v1926_v30 = vld [vmem:[%s3182_s0 + $0xe8] sm:$0xff]  ;;  %25 = vst.msk [vmem:[#allocation2 + $0x28] sm:$0xff] %vm19_vm3, %v1958_v32 }
   0x9   :  { %v1936_v23 = vld [vmem:[%s3182_s0 + $0x138] sm:$0xff]  ;;  %v1937_v27 = vld [vmem:[%s3182_s0 + $0x140] sm:$0xff]  ;;  %v1938_v31 = vld [vmem:[%s3182_s0 + $0x148] sm:$0xff]  ;;  %26 = vst.msk [vmem:[#allocation2 + $0x30] sm:$0xff] %vm19_vm3, %v1958_v32 }
   0xa   :  { %722 = vmatpush.bf16.msra.mxu0 %v1945_v7  ;;  %1950 = vmatpush.bf16.msra.mxu1 %v1945_v7  ;;  %27 = vst.msk [vmem:[#allocation2 + $0x38] sm:$0xff] %vm19_vm3, %v1958_v32  ;;  %v1903_v33 = vld [vmem:[%s3182_s0 + $0x30] sm:$0xff]  ;;  %v1904_v37 = vld [vmem:[%s3182_s0 + $0x38] sm:$0xff]  ;;  %v212_v41 = vld [vmem:[#allocation2] sm:$0xff] }
   0xb   :  { %1951 = vmatpush.bf16.msra.mxu2 %v1945_v7  ;;  %1952 = vmatpush.bf16.msra.mxu3 %v1945_v7  ;;  %28 = vst.msk [vmem:[#allocation2 + $0x40] sm:$0xff] %vm19_vm3, %v1958_v32  ;;  %v1915_v34 = vld [vmem:[%s3182_s0 + $0x90] sm:$0xff]  ;;  %v1916_v38 = vld [vmem:[%s3182_s0 + $0x98] sm:$0xff]  ;;  %v2218_v44 = vld [vmem:[%s3181_s2] ss:$0 sm:$0xff] }
   0xc   :  { %29 = vst.msk [vmem:[#allocation2 + $0x48] sm:$0xff] %vm19_vm3, %v1958_v32  ;;  %v1927_v35 = vld [vmem:[%s3182_s0 + $0xf0] sm:$0xff]  ;;  %v1928_v39 = vld [vmem:[%s3182_s0 + $0xf8] sm:$0xff]  ;;  %v1905_v50 = vld [vmem:[%s3182_s0 + $0x40] sm:$0xff] }
   0xd   :  { %1849 = vmatmul.msk.bf16.vlgmr.msra.gmra.mxu0 %vm563_vm2, %v1897_v8  ;;  %1861 = vmatmul.msk.bf16.vlgmr.msra.gmra.mxu1 %vm563_vm2, %v1909_v9  ;;  %30 = vst.msk [vmem:[#allocation2 + $0x50] sm:$0xff] %vm19_vm3, %v1958_v32  ;;  %v1939_v36 = vld [vmem:[%s3182_s0 + $0x150] sm:$0xff]  ;;  %v1940_v40 = vld [vmem:[%s3182_s0 + $0x158] sm:$0xff]  ;;  %v1917_v51 = vld [vmem:[%s3182_s0 + $0xa0] sm:$0xff] }
   0xe   :  { %1873 = vmatmul.msk.bf16.vlgmr.msra.gmra.mxu2 %vm563_vm2, %v1921_v10  ;;  %1885 = vmatmul.msk.bf16.vlgmr.msra.gmra.mxu3 %vm563_vm2, %v1933_v11  ;;  %31 = vst.msk [vmem:[#allocation2 + $0x58] sm:$0xff] %vm19_vm3, %v1958_v32  ;;  %v1929_v52 = vld [vmem:[%s3182_s0 + $0x100] sm:$0xff]  ;;  %v1906_v62 = vld [vmem:[%s3182_s0 + $0x48] sm:$0xff] }
   0xf   :  { %32 = vst.msk [vmem:[#allocation2 + $0x60] sm:$0xff] %vm19_vm3, %v1958_v32  ;;  %v1941_v53 = vld [vmem:[%s3182_s0 + $0x160] sm:$0xff]  ;;  %v1918_v63 = vld [vmem:[%s3182_s0 + $0xa8] sm:$0xff] }
  0x10   :  { %33 = vst.msk [vmem:[#allocation2 + $0x68] sm:$0xff] %vm19_vm3, %v1958_v32  ;;  %v1930_v0 = vld [vmem:[%s3182_s0 + $0x108] sm:$0xff] }
  0x11   :  { %34 = vst.msk [vmem:[#allocation2 + $0x70] sm:$0xff] %vm19_vm3, %v1958_v32  ;;  %v1942_v1 = vld [vmem:[%s3182_s0 + $0x168] sm:$0xff] }
  0x12   :  { %35 = vst.msk [vmem:[#allocation2 + $0x78] sm:$0xff] %vm19_vm3, %v1958_v32  ;;  %v213_v11 = vld [vmem:[#allocation2 + $0x8] sm:$0xff] }
  0x13   :  { %36 = vst.msk [vmem:[#allocation2 + $0x80] sm:$0xff] %vm19_vm3, %v1958_v32 }
  0x14   :  { %37 = vst.msk [vmem:[#allocation2 + $0x88] sm:$0xff] %vm19_vm3, %v1958_v32 }
  0x15   :  { %38 = vst.msk [vmem:[#allocation2 + $0x90] sm:$0xff] %vm19_vm3, %v1958_v32 }
  0x16   :  { %39 = vst.msk [vmem:[#allocation2 + $0x98] sm:$0xff] %vm19_vm3, %v1958_v32 }
  0x17   :  { %40 = vst.msk [vmem:[#allocation2 + $0xa0] sm:$0xff] %vm19_vm3, %v1958_v32 }
  0x18   :  { %41 = vst.msk [vmem:[#allocation2 + $0xa8] sm:$0xff] %vm19_vm3, %v1958_v32 }
  0x19   :  { %42 = vst.msk [vmem:[#allocation2 + $0xb0] sm:$0xff] %vm19_vm3, %v1958_v32 }
  0x1a   :  { %43 = vst.msk [vmem:[#allocation2 + $0xb8] sm:$0xff] %vm19_vm3, %v1958_v32 }
  0x1b   :  { %44 = vst.msk [vmem:[#allocation2 + $0xc0] sm:$0xff] %vm19_vm3, %v1958_v32 }
  0x1c   :  { %45 = vst.msk [vmem:[#allocation2 + $0xc8] sm:$0xff] %vm19_vm3, %v1958_v32 }
  0x1d   :  { %1850 = vmatmul.msk.bf16.gmra.mxu0 %vm563_vm2, %v1898_v12  ;;  %1862 = vmatmul.msk.bf16.gmra.mxu1 %vm563_vm2, %v1910_v13  ;;  %46 = vst.msk [vmem:[#allocation2 + $0xd0] sm:$0xff] %vm19_vm3, %v1958_v32 }
  0x1e   :  { %1874 = vmatmul.msk.bf16.gmra.mxu2 %vm563_vm2, %v1922_v14  ;;  %1886 = vmatmul.msk.bf16.gmra.mxu3 %vm563_vm2, %v1934_v15  ;;  %47 = vst.msk [vmem:[#allocation2 + $0xd8] sm:$0xff] %vm19_vm3, %v1958_v32  ;;  %v1907_v15 = vld [vmem:[%s3182_s0 + $0x50] sm:$0xff] }
  0x1f   :  { %48 = vst.msk [vmem:[#allocation2 + $0xe0] sm:$0xff] %vm19_vm3, %v1958_v32 }
  0x20   :  { %49 = vst.msk [vmem:[#allocation2 + $0xe8] sm:$0xff] %vm19_vm3, %v1958_v32 }
  0x21   :  { %50 = vst.msk [vmem:[#allocation2 + $0xf0] sm:$0xff] %vm19_vm3, %v1958_v32 }
  0x22   :  { %51 = vst.msk [vmem:[#allocation2 + $0xf8] sm:$0xff] %vm19_vm3, %v1958_v32  ;;  %v236_v8 = vld [vmem:[#allocation2 + $0xc0] sm:$0xff] }
  0x23   :  { %52 = vst.msk [vmem:[#allocation2 + $0x100] sm:$0xff] %vm19_vm3, %v1958_v32 }
  0x24   :  { %53 = vst.msk [vmem:[#allocation2 + $0x108] sm:$0xff] %vm19_vm3, %v1958_v32 }
  0x25   :  { %54 = vst.msk [vmem:[#allocation2 + $0x110] sm:$0xff] %vm19_vm3, %v1958_v32 }
  0x26   :  { %55 = vst.msk [vmem:[#allocation2 + $0x118] sm:$0xff] %vm19_vm3, %v1958_v32 }
  0x27   :  { %56 = vst.msk [vmem:[#allocation2 + $0x120] sm:$0xff] %vm19_vm3, %v1958_v32 }
  0x28   :  { %57 = vst.msk [vmem:[#allocation2 + $0x128] sm:$0xff] %vm19_vm3, %v1958_v32 }
  0x29   :  { %58 = vst.msk [vmem:[#allocation2 + $0x130] sm:$0xff] %vm19_vm3, %v1958_v32 }
  0x2a   :  { %59 = vst.msk [vmem:[#allocation2 + $0x138] sm:$0xff] %vm19_vm3, %v1958_v32 }
  0x2b   :  { %60 = vst.msk [vmem:[#allocation2 + $0x140] sm:$0xff] %vm19_vm3, %v1958_v32 }
  0x2c   :  { %61 = vst.msk [vmem:[#allocation2 + $0x148] sm:$0xff] %vm19_vm3, %v1958_v32 }
  0x2d   :  { %1851 = vmatmul.msk.bf16.gmra.mxu0 %vm563_vm2, %v1899_v16  ;;  %1863 = vmatmul.msk.bf16.gmra.mxu1 %vm563_vm2, %v1911_v17  ;;  %62 = vst.msk [vmem:[#allocation2 + $0x150] sm:$0xff] %vm19_vm3, %v1958_v32  ;;  %v1919_v16 = vld [vmem:[%s3182_s0 + $0xb0] sm:$0xff] }
  0x2e   :  { %1875 = vmatmul.msk.bf16.gmra.mxu2 %vm563_vm2, %v1923_v18  ;;  %1887 = vmatmul.msk.bf16.gmra.mxu3 %vm563_vm2, %v1935_v19  ;;  %63 = vst.msk [vmem:[#allocation2 + $0x158] sm:$0xff] %vm19_vm3, %v1958_v32  ;;  %v1931_v17 = vld [vmem:[%s3182_s0 + $0x110] sm:$0xff]  ;;  %v237_v19 = vld [vmem:[#allocation2 + $0xc8] sm:$0xff] }
  0x2f   :  { %64 = vst.msk [vmem:[#allocation2 + $0x160] sm:$0xff] %vm19_vm3, %v1958_v32 }
  0x30   :  { %65 = vst.msk [vmem:[#allocation2 + $0x168] sm:$0xff] %vm19_vm3, %v1958_v32 }
  0x31   :  { %66 = vst.msk [vmem:[#allocation2 + $0x170] sm:$0xff] %vm19_vm3, %v1958_v32 }
  0x32   :  { %67 = vst.msk [vmem:[#allocation2 + $0x178] sm:$0xff] %vm19_vm3, %v1958_v32 }
  0x33   :  { %68 = vst.msk [vmem:[#allocation2 + $0x180] sm:$0xff] %vm19_vm3, %v1958_v32 }
  0x34   :  { %69 = vst.msk [vmem:[#allocation2 + $0x188] sm:$0xff] %vm19_vm3, %v1958_v32 }
  0x35   :  { %70 = vst.msk [vmem:[#allocation2 + $0x190] sm:$0xff] %vm19_vm3, %v1958_v32 }
  0x36   :  { %71 = vst.msk [vmem:[#allocation2 + $0x198] sm:$0xff] %vm19_vm3, %v1958_v32 }
  0x37   :  { %72 = vst.msk [vmem:[#allocation2 + $0x1a0] sm:$0xff] %vm19_vm3, %v1958_v32 }
  0x38   :  { %73 = vst.msk [vmem:[#allocation2 + $0x1a8] sm:$0xff] %vm19_vm3, %v1958_v32 }
  0x39   :  { %74 = vst.msk [vmem:[#allocation2 + $0x1b0] sm:$0xff] %vm19_vm3, %v1958_v32 }
  0x3a   :  { %75 = vst.msk [vmem:[#allocation2 + $0x1b8] sm:$0xff] %vm19_vm3, %v1958_v32  ;;  %v260_v9 = vld [vmem:[#allocation2 + $0x180] sm:$0xff] }
  0x3b   :  { %76 = vst.msk [vmem:[#allocation2 + $0x1c0] sm:$0xff] %vm19_vm3, %v1958_v32 }
  0x3c   :  { %77 = vst.msk [vmem:[#allocation2 + $0x1c8] sm:$0xff] %vm19_vm3, %v1958_v32 }
  0x3d   :  { %1852 = vmatmul.msk.bf16.gmra.mxu0 %vm563_vm2, %v1900_v20  ;;  %1864 = vmatmul.msk.bf16.gmra.mxu1 %vm563_vm2, %v1912_v21  ;;  %78 = vst.msk [vmem:[#allocation2 + $0x1d0] sm:$0xff] %vm19_vm3, %v1958_v32  ;;  %v1943_v20 = vld [vmem:[%s3182_s0 + $0x170] sm:$0xff] }
  0x3e   :  { %1876 = vmatmul.msk.bf16.gmra.mxu2 %vm563_vm2, %v1924_v22  ;;  %1888 = vmatmul.msk.bf16.gmra.mxu3 %vm563_vm2, %v1936_v23  ;;  %79 = vst.msk [vmem:[#allocation2 + $0x1d8] sm:$0xff] %vm19_vm3, %v1958_v32  ;;  %v261_v22 = vld [vmem:[#allocation2 + $0x188] sm:$0xff] }
  0x3f   :  { %80 = vst.msk [vmem:[#allocation2 + $0x1e0] sm:$0xff] %vm19_vm3, %v1958_v32 }
  0x40   :  { %81 = vst.msk [vmem:[#allocation2 + $0x1e8] sm:$0xff] %vm19_vm3, %v1958_v32 }
  0x41   :  { %82 = vst.msk [vmem:[#allocation2 + $0x1f0] sm:$0xff] %vm19_vm3, %v1958_v32 }
  0x42   :  { %83 = vst.msk [vmem:[#allocation2 + $0x1f8] sm:$0xff] %vm19_vm3, %v1958_v32 }
  0x43   :  { %84 = vst.msk [vmem:[#allocation2 + $0x200] sm:$0xff] %vm19_vm3, %v1958_v32 }
  0x44   :  { %85 = vst.msk [vmem:[#allocation2 + $0x208] sm:$0xff] %vm19_vm3, %v1958_v32 }
  0x45   :  { %86 = vst.msk [vmem:[#allocation2 + $0x210] sm:$0xff] %vm19_vm3, %v1958_v32 }
  0x46   :  { %87 = vst.msk [vmem:[#allocation2 + $0x218] sm:$0xff] %vm19_vm3, %v1958_v32 }
  0x47   :  { %88 = vst.msk [vmem:[#allocation2 + $0x220] sm:$0xff] %vm19_vm3, %v1958_v32 }
  0x48   :  { %89 = vst.msk [vmem:[#allocation2 + $0x228] sm:$0xff] %vm19_vm3, %v1958_v32 }
  0x49   :  { %90 = vst.msk [vmem:[#allocation2 + $0x230] sm:$0xff] %vm19_vm3, %v1958_v32 }
  0x4a   :  { %91 = vst.msk [vmem:[#allocation2 + $0x238] sm:$0xff] %vm19_vm3, %v1958_v32 }
  0x4b   :  { %92 = vst.msk [vmem:[#allocation2 + $0x240] sm:$0xff] %vm19_vm3, %v1958_v32 }
  0x4c   :  { %93 = vst.msk [vmem:[#allocation2 + $0x248] sm:$0xff] %vm19_vm3, %v1958_v32 }
  0x4d   :  { %1853 = vmatmul.msk.bf16.gmra.mxu0 %vm563_vm2, %v1901_v24  ;;  %1865 = vmatmul.msk.bf16.gmra.mxu1 %vm563_vm2, %v1913_v25  ;;  %94 = vst.msk [vmem:[#allocation2 + $0x250] sm:$0xff] %vm19_vm3, %v1958_v32 }
  0x4e   :  { %1877 = vmatmul.msk.bf16.gmra.mxu2 %vm563_vm2, %v1925_v26  ;;  %1889 = vmatmul.msk.bf16.gmra.mxu3 %vm563_vm2, %v1937_v27  ;;  %95 = vst.msk [vmem:[#allocation2 + $0x258] sm:$0xff] %vm19_vm3, %v1958_v32  ;;  %v214_v26 = vld [vmem:[#allocation2 + $0x10] sm:$0xff] }
  0x4f   :  { %96 = vst.msk [vmem:[#allocation2 + $0x260] sm:$0xff] %vm19_vm3, %v1958_v32 }
  0x50   :  { %97 = vst.msk [vmem:[#allocation2 + $0x268] sm:$0xff] %vm19_vm3, %v1958_v32 }
  0x51   :  { %98 = vst.msk [vmem:[#allocation2 + $0x270] sm:$0xff] %vm19_vm3, %v1958_v32 }
  0x52   :  { %99 = vst.msk [vmem:[#allocation2 + $0x278] sm:$0xff] %vm19_vm3, %v1958_v32  ;;  %v284_v10 = vld [vmem:[#allocation2 + $0x240] sm:$0xff] }
  0x53   :  { %100 = vst.msk [vmem:[#allocation2 + $0x280] sm:$0xff] %vm19_vm3, %v1958_v32  ;;  %v285_v24 = vld [vmem:[#allocation2 + $0x248] sm:$0xff] }
  0x54   :  { %101 = vst.msk [vmem:[#allocation2 + $0x288] sm:$0xff] %vm19_vm3, %v1958_v32 }
  0x55   :  { %102 = vst.msk [vmem:[#allocation2 + $0x290] sm:$0xff] %vm19_vm3, %v1958_v32 }
  0x56   :  { %103 = vst.msk [vmem:[#allocation2 + $0x298] sm:$0xff] %vm19_vm3, %v1958_v32 }
  0x57   :  { %104 = vst.msk [vmem:[#allocation2 + $0x2a0] sm:$0xff] %vm19_vm3, %v1958_v32 }
  0x58   :  { %105 = vst.msk [vmem:[#allocation2 + $0x2a8] sm:$0xff] %vm19_vm3, %v1958_v32 }
  0x59   :  { %106 = vst.msk [vmem:[#allocation2 + $0x2b0] sm:$0xff] %vm19_vm3, %v1958_v32 }
  0x5a   :  { %107 = vst.msk [vmem:[#allocation2 + $0x2b8] sm:$0xff] %vm19_vm3, %v1958_v32 }
  0x5b   :  { %108 = vst.msk [vmem:[#allocation2 + $0x2c0] sm:$0xff] %vm19_vm3, %v1958_v32 }
  0x5c   :  { %109 = vst.msk [vmem:[#allocation2 + $0x2c8] sm:$0xff] %vm19_vm3, %v1958_v32 }
  0x5d   :  { %1854 = vmatmul.msk.bf16.gmra.mxu0 %vm563_vm2, %v1902_v28  ;;  %1866 = vmatmul.msk.bf16.gmra.mxu1 %vm563_vm2, %v1914_v29  ;;  %110 = vst.msk [vmem:[#allocation2 + $0x2d0] sm:$0xff] %vm19_vm3, %v1958_v32  ;;  %v238_v28 = vld [vmem:[#allocation2 + $0xd0] sm:$0xff] }
  0x5e   :  { %1878 = vmatmul.msk.bf16.gmra.mxu2 %vm563_vm2, %v1926_v30  ;;  %1890 = vmatmul.msk.bf16.gmra.mxu3 %vm563_vm2, %v1938_v31  ;;  %111 = vst.msk [vmem:[#allocation2 + $0x2d8] sm:$0xff] %vm19_vm3, %v1958_v32 }
  0x5f   :  { %112 = vst.msk [vmem:[#allocation2 + $0x2e0] sm:$0xff] %vm19_vm3, %v1958_v32 }
  0x60   :  { %113 = vst.msk [vmem:[#allocation2 + $0x2e8] sm:$0xff] %vm19_vm3, %v1958_v32 }
  0x61   :  { %114 = vst.msk [vmem:[#allocation2 + $0x2f0] sm:$0xff] %vm19_vm3, %v1958_v32 }
  0x62   :  { %115 = vst.msk [vmem:[#allocation2 + $0x2f8] sm:$0xff] %vm19_vm3, %v1958_v32  ;;  %v262_v32 = vld [vmem:[#allocation2 + $0x190] sm:$0xff] }
  0x6d   :  { %1855 = vmatmul.msk.bf16.gmra.mxu0 %vm563_vm2, %v1903_v33  ;;  %1867 = vmatmul.msk.bf16.gmra.mxu1 %vm563_vm2, %v1915_v34  ;;  %v286_v34 = vld [vmem:[#allocation2 + $0x250] sm:$0xff] }
  0x6e   :  { %1879 = vmatmul.msk.bf16.gmra.mxu2 %vm563_vm2, %v1927_v35  ;;  %1891 = vmatmul.msk.bf16.gmra.mxu3 %vm563_vm2, %v1939_v36 }
  0x7d   :  { %1856 = vmatmul.msk.bf16.gmra.mxu0 %vm563_vm2, %v1904_v37  ;;  %1868 = vmatmul.msk.bf16.gmra.mxu1 %vm563_vm2, %v1916_v38  ;;  %v215_v38 = vld [vmem:[#allocation2 + $0x18] sm:$0xff] }
  0x7e   :  { %1880 = vmatmul.msk.bf16.gmra.mxu2 %vm563_vm2, %v1928_v39  ;;  %1892 = vmatmul.msk.bf16.gmra.mxu3 %vm563_vm2, %v1940_v40  ;;  %v239_v40 = vld [vmem:[#allocation2 + $0xd8] sm:$0xff] }
  0x8a   :  { %v724_v42 = vpop.f32.mrf.mxu0  ;;  %v2237_v48 = vpop.f32.mrf.mxu1 }
  0x8b   :  { %v964_v43 = vadd.f32 %v724_v42, %v212_v41  ;;  %v988_v14 = vadd.f32 %v2237_v48, %v236_v8  ;;  %v263_v42 = vld [vmem:[#allocation2 + $0x198] sm:$0xff] }
  0x8d   :  { %1061 = vst.msk [vmem:[#allocation2] sm:$0xff] %vm19_vm3, %v964_v43  ;;  %1857 = vmatmul.msk.bf16.gmra.mxu0 %vm563_vm2, %v1905_v50  ;;  %1869 = vmatmul.msk.bf16.gmra.mxu1 %vm563_vm2, %v1917_v51 }
  0x8e   :  { %1881 = vmatmul.msk.bf16.gmra.mxu2 %vm563_vm2, %v1929_v52  ;;  %1893 = vmatmul.msk.bf16.gmra.mxu3 %vm563_vm2, %v1941_v53  ;;  %1085 = vst.msk [vmem:[#allocation2 + $0xc0] sm:$0xff] %vm19_vm3, %v988_v14 }
  0x91   :  { %v2269_v54 = vpop.f32.mrf.mxu2  ;;  %v2273_v55 = vpop.f32.mrf.mxu3 }
  0x92   :  { %v2281_v56 = vpop.f32.mrf.mxu0  ;;  %v2283_v57 = vpop.f32.mrf.mxu1  ;;  %v1012_v18 = vadd.f32 %v2269_v54, %v260_v9  ;;  %v1036_v21 = vadd.f32 %v2273_v55, %v284_v10  ;;  %v1932_v9 = vld [vmem:[%s3182_s0 + $0x118] sm:$0xff] }
  0x93   :  { %v965_v23 = vadd.f32 %v2281_v56, %v213_v11  ;;  %v989_v25 = vadd.f32 %v2283_v57, %v237_v19  ;;  %v1944_v10 = vld [vmem:[%s3182_s0 + $0x178] sm:$0xff] }
  0x94   :  { %v1160_v45 = vld [vmem:[#allocation2] sm:$0xff]  ;;  %1109 = vst.msk [vmem:[#allocation2 + $0x180] sm:$0xff] %vm19_vm3, %v1012_v18 }
  0x95   :  { %v1260_v46 = vadd.f32 %v2218_v44, %v1160_v45  ;;  %1133 = vst.msk [vmem:[#allocation2 + $0x240] sm:$0xff] %vm19_vm3, %v1036_v21  ;;  %v1184_v43 = vld [vmem:[#allocation2 + $0xc0] sm:$0xff] }
  0x96   :  { %1062 = vst.msk [vmem:[#allocation2 + $0x8] sm:$0xff] %vm19_vm3, %v965_v23 }
  0x97   :  { %v1356_v47 = vmax.f32 %v1260_v46, 0.0  ;;  %1086 = vst.msk [vmem:[#allocation2 + $0xc8] sm:$0xff] %vm19_vm3, %v989_v25  ;;  %v1284_v46 = vadd.f32 %v2218_v44, %v1184_v43 }
  0x99   :  { %v1452_v49 = vpack.c.bf16 %v1356_v47, %v1356_v47  ;;  %v2297_v58 = vpop.f32.mrf.mxu2  ;;  %v2299_v59 = vpop.f32.mrf.mxu3  ;;  %v1380_v54 = vmax.f32 %v1284_v46, 0.0 }
  0x9a   :  { %v2305_v60 = vpop.f32.mrf.mxu0  ;;  %v2307_v61 = vpop.f32.mrf.mxu1  ;;  %v1013_v27 = vadd.f32 %v2297_v58, %v261_v22  ;;  %v1037_v31 = vadd.f32 %v2299_v59, %v285_v24 }
  0x9b   :  { %1549 = vst.msk [vmem:[%s3183_s3] sm:$0xf] %vm1548_vm4, %v1452_v49  ;;  %v966_v33 = vadd.f32 %v2305_v60, %v214_v26  ;;  %v990_v37 = vadd.f32 %v2307_v61, %v238_v28  ;;  %v1208_v47 = vld [vmem:[#allocation2 + $0x180] sm:$0xff] }
  0x9c   :  { %1110 = vst.msk [vmem:[#allocation2 + $0x188] sm:$0xff] %vm19_vm3, %v1013_v27  ;;  %v1308_v49 = vadd.f32 %v2218_v44, %v1208_v47  ;;  %v1232_v50 = vld [vmem:[#allocation2 + $0x240] sm:$0xff] }
  0x9d   :  { %1858 = vmatmul.msk.bf16.gmra.mxu0 %vm563_vm2, %v1906_v62  ;;  %1870 = vmatmul.msk.bf16.gmra.mxu1 %vm563_vm2, %v1918_v63  ;;  %1134 = vst.msk [vmem:[#allocation2 + $0x248] sm:$0xff] %vm19_vm3, %v1037_v31  ;;  %v1332_v55 = vadd.f32 %v2218_v44, %v1232_v50  ;;  %v1161_v56 = vld [vmem:[#allocation2 + $0x8] sm:$0xff]  ;;  %v1476_v62 = vpack.c.bf16 %v1380_v54, %v1380_v54 }
  0x9e   :  { %1882 = vmatmul.msk.bf16.gmra.mxu2 %vm563_vm2, %v1930_v0  ;;  %1894 = vmatmul.msk.bf16.gmra.mxu3 %vm563_vm2, %v1942_v1  ;;  %1063 = vst.msk [vmem:[#allocation2 + $0x10] sm:$0xff] %vm19_vm3, %v966_v33  ;;  %v1404_v57 = vmax.f32 %v1308_v49, 0.0  ;;  %v1261_v58 = vadd.f32 %v2218_v44, %v1161_v56  ;;  %v1185_v59 = vld [vmem:[#allocation2 + $0xc8] sm:$0xff] }
  0x9f   :  { %1087 = vst.msk [vmem:[#allocation2 + $0xd0] sm:$0xff] %vm19_vm3, %v990_v37  ;;  %v1428_v63 = vmax.f32 %v1332_v55, 0.0  ;;  %v1285_v0 = vadd.f32 %v2218_v44, %v1185_v59  ;;  %v287_v55 = vld [vmem:[#allocation2 + $0x258] sm:$0xff] }
  0xa0   :  { %1573 = vst.msk [vmem:[%s3183_s3 + $0x60] sm:$0xf] %vm1548_vm4, %v1476_v62 }
  0xa1   :  { %v2337_v2 = vpop.f32.mrf.mxu2  ;;  %v2339_v3 = vpop.f32.mrf.mxu3  ;;  %v1524_v11 = vpack.c.bf16 %v1428_v63, %v1428_v63  ;;  %v1381_v14 = vmax.f32 %v1285_v0, 0.0  ;;  %v240_v63 = vld [vmem:[#allocation2 + $0xe0] sm:$0xff] }
  0xa2   :  { %v2345_v4 = vpop.f32.mrf.mxu0  ;;  %v2347_v5 = vpop.f32.mrf.mxu1  ;;  %v1014_v39 = vadd.f32 %v2337_v2, %v262_v32  ;;  %v1038_v41 = vadd.f32 %v2339_v3, %v286_v34  ;;  %v1908_v2 = vld [vmem:[%s3182_s0 + $0x58] sm:$0xff] }
  0xa3   :  { %v967_v45 = vadd.f32 %v2345_v4, %v215_v38  ;;  %v991_v48 = vadd.f32 %v2347_v5, %v239_v40  ;;  %v1209_v1 = vld [vmem:[#allocation2 + $0x188] sm:$0xff]  ;;  %v1920_v3 = vld [vmem:[%s3182_s0 + $0xb8] sm:$0xff]  ;;  %v1500_v4 = vpack.c.bf16 %v1404_v57, %v1404_v57  ;;  %v1357_v5 = vmax.f32 %v1261_v58, 0.0  ;;  %1621 = vst.msk [vmem:[%s3183_s3 + $0x120] sm:$0xf] %vm1548_vm4, %v1524_v11  ;;  %v216_v58 = vld [vmem:[#allocation2 + $0x20] sm:$0xff] }
  0xa4   :  { %1111 = vst.msk [vmem:[#allocation2 + $0x190] sm:$0xff] %vm19_vm3, %v1014_v39  ;;  %v1233_v8 = vld [vmem:[#allocation2 + $0x248] sm:$0xff]  ;;  %v1477_v21 = vpack.c.bf16 %v1381_v14, %v1381_v14 }
  0xa5   :  { %1135 = vst.msk [vmem:[#allocation2 + $0x250] sm:$0xff] %vm19_vm3, %v1038_v41  ;;  %v265_v14 = vld [vmem:[#allocation2 + $0x1a8] sm:$0xff] }
  0xa6   :  { %1064 = vst.msk [vmem:[#allocation2 + $0x18] sm:$0xff] %vm19_vm3, %v967_v45 }
  0xa7   :  { %1088 = vst.msk [vmem:[#allocation2 + $0xd8] sm:$0xff] %vm19_vm3, %v991_v48 }
  0xa8   :  { %1597 = vst.msk [vmem:[%s3183_s3 + $0xc0] sm:$0xf] %vm1548_vm4, %v1500_v4 }
  0xa9   :  { %v2361_v6 = vpop.f32.mrf.mxu2  ;;  %v2363_v7 = vpop.f32.mrf.mxu3  ;;  %1574 = vst.msk [vmem:[%s3183_s3 + $0x64] sm:$0xf] %vm1548_vm4, %v1477_v21 }
  0xaa   :  { %v2373_v12 = vpop.f32.mrf.mxu0  ;;  %v2375_v13 = vpop.f32.mrf.mxu1  ;;  %v1015_v51 = vadd.f32 %v2361_v6, %v263_v42  ;;  %v1309_v6 = vadd.f32 %v2218_v44, %v1209_v1  ;;  %v1039_v1 = vadd.f32 %v2363_v7, %v287_v55 }
  0xab   :  { %v1210_v24 = vld [vmem:[#allocation2 + $0x190] sm:$0xff]  ;;  %v968_v4 = vadd.f32 %v2373_v12, %v216_v58 }
  0xac   :  { %1112 = vst.msk [vmem:[#allocation2 + $0x198] sm:$0xff] %vm19_vm3, %v1015_v51  ;;  %v1405_v18 = vmax.f32 %v1309_v6, 0.0  ;;  %v1310_v27 = vadd.f32 %v2218_v44, %v1210_v24  ;;  %v1234_v28 = vld [vmem:[#allocation2 + $0x250] sm:$0xff]  ;;  %v992_v6 = vadd.f32 %v2375_v13, %v240_v63 }
  0xad   :  { %1859 = vmatmul.msk.bf16.gmra.mxu0 %vm563_vm2, %v1907_v15  ;;  %1871 = vmatmul.msk.bf16.gmra.mxu1 %vm563_vm2, %v1919_v16  ;;  %v1333_v15 = vadd.f32 %v2218_v44, %v1233_v8  ;;  %v1162_v16 = vld [vmem:[#allocation2 + $0x10] sm:$0xff]  ;;  %v1334_v37 = vadd.f32 %v2218_v44, %v1234_v28  ;;  %v1163_v38 = vld [vmem:[#allocation2 + $0x18] sm:$0xff]  ;;  %v217_v8 = vld [vmem:[#allocation2 + $0x28] sm:$0xff]  ;;  %1136 = vst.msk [vmem:[#allocation2 + $0x258] sm:$0xff] %vm19_vm3, %v1039_v1 }
  0xae   :  { %1883 = vmatmul.msk.bf16.gmra.mxu2 %vm563_vm2, %v1931_v17  ;;  %1895 = vmatmul.msk.bf16.gmra.mxu3 %vm563_vm2, %v1943_v20  ;;  %v1453_v17 = vpack.c.bf16 %v1357_v5, %v1357_v5  ;;  %v1262_v19 = vadd.f32 %v2218_v44, %v1162_v16  ;;  %v1186_v20 = vld [vmem:[#allocation2 + $0xd0] sm:$0xff]  ;;  %v1501_v25 = vpack.c.bf16 %v1405_v18, %v1405_v18  ;;  %v1406_v40 = vmax.f32 %v1310_v27, 0.0  ;;  %v1187_v42 = vld [vmem:[#allocation2 + $0xd8] sm:$0xff]  ;;  %v288_v5 = vld [vmem:[#allocation2 + $0x260] sm:$0xff] }
  0xaf   :  { %v1429_v22 = vmax.f32 %v1333_v15, 0.0  ;;  %v1286_v23 = vadd.f32 %v2218_v44, %v1186_v20  ;;  %v1263_v41 = vadd.f32 %v2218_v44, %v1163_v38  ;;  %v1430_v47 = vmax.f32 %v1334_v37, 0.0  ;;  %1065 = vst.msk [vmem:[#allocation2 + $0x20] sm:$0xff] %vm19_vm3, %v968_v4  ;;  %v289_v15 = vld [vmem:[#allocation2 + $0x268] sm:$0xff]  ;;  %v218_v18 = vld [vmem:[#allocation2 + $0x30] sm:$0xff] }
  0xb0   :  { %1550 = vst.msk [vmem:[%s3183_s3 + $0x4] sm:$0xf] %vm1548_vm4, %v1453_v17  ;;  %v1358_v26 = vmax.f32 %v1262_v19, 0.0  ;;  %v1287_v48 = vadd.f32 %v2218_v44, %v1187_v42  ;;  %v1502_v50 = vpack.c.bf16 %v1406_v40, %v1406_v40 }
  0xb1   :  { %v2409_v29 = vpop.f32.mrf.mxu2  ;;  %v2411_v30 = vpop.f32.mrf.mxu3  ;;  %v1525_v33 = vpack.c.bf16 %v1429_v22, %v1429_v22  ;;  %v1382_v34 = vmax.f32 %v1286_v23, 0.0  ;;  %1598 = vst.msk [vmem:[%s3183_s3 + $0xc4] sm:$0xf] %vm1548_vm4, %v1501_v25  ;;  %v1359_v51 = vmax.f32 %v1263_v41, 0.0  ;;  %v1526_v56 = vpack.c.bf16 %v1430_v47, %v1430_v47  ;;  %v290_v22 = vld [vmem:[#allocation2 + $0x270] sm:$0xff]  ;;  %v219_v23 = vld [vmem:[#allocation2 + $0x38] sm:$0xff] }
  0xb2   :  { %v2417_v35 = vpop.f32.mrf.mxu0  ;;  %v2419_v36 = vpop.f32.mrf.mxu1  ;;  %v1454_v39 = vpack.c.bf16 %v1358_v26, %v1358_v26  ;;  %v1383_v57 = vmax.f32 %v1287_v48, 0.0  ;;  %1599 = vst.msk [vmem:[%s3183_s3 + $0xc8] sm:$0xf] %vm1548_vm4, %v1502_v50  ;;  %v1040_v11 = vadd.f32 %v2411_v30, %v288_v5  ;;  %v242_v30 = vld [vmem:[#allocation2 + $0xf0] sm:$0xff] }
  0xb3   :  { %1622 = vst.msk [vmem:[%s3183_s3 + $0x124] sm:$0xf] %vm1548_vm4, %v1525_v33  ;;  %v1478_v46 = vpack.c.bf16 %v1382_v34, %v1382_v34  ;;  %v1211_v49 = vld [vmem:[#allocation2 + $0x198] sm:$0xff]  ;;  %v1455_v59 = vpack.c.bf16 %v1359_v51, %v1359_v51  ;;  %v969_v13 = vadd.f32 %v2417_v35, %v217_v8  ;;  %v266_v35 = vld [vmem:[#allocation2 + $0x1b0] sm:$0xff] }
  0xb4   :  { %1551 = vst.msk [vmem:[%s3183_s3 + $0x8] sm:$0xf] %vm1548_vm4, %v1454_v39  ;;  %v1311_v54 = vadd.f32 %v2218_v44, %v1211_v49  ;;  %v1479_v0 = vpack.c.bf16 %v1383_v57, %v1383_v57  ;;  %v1235_v24 = vld [vmem:[#allocation2 + $0x258] sm:$0xff] }
  0xb5   :  { %1575 = vst.msk [vmem:[%s3183_s3 + $0x68] sm:$0xf] %vm1548_vm4, %v1478_v46 }
  0xb6   :  { %v1407_v62 = vmax.f32 %v1311_v54, 0.0  ;;  %1623 = vst.msk [vmem:[%s3183_s3 + $0x128] sm:$0xf] %vm1548_vm4, %v1526_v56  ;;  %v1164_v27 = vld [vmem:[#allocation2 + $0x20] sm:$0xff] }
  0xb7   :  { %1552 = vst.msk [vmem:[%s3183_s3 + $0xc] sm:$0xf] %vm1548_vm4, %v1455_v59  ;;  %v1264_v28 = vadd.f32 %v2218_v44, %v1164_v27  ;;  %v243_v27 = vld [vmem:[#allocation2 + $0xf8] sm:$0xff] }
  0xb8   :  { %1576 = vst.msk [vmem:[%s3183_s3 + $0x6c] sm:$0xf] %vm1548_vm4, %v1479_v0 }
  0xb9   :  { %v2435_v52 = vpop.f32.mrf.mxu2  ;;  %v2437_v53 = vpop.f32.mrf.mxu3  ;;  %1089 = vst.msk [vmem:[#allocation2 + $0xe0] sm:$0xff] %vm19_vm3, %v992_v6  ;;  %v1360_v40 = vmax.f32 %v1264_v28, 0.0 }
  0xba   :  { %v2443_v60 = vpop.f32.mrf.mxu0  ;;  %v2445_v61 = vpop.f32.mrf.mxu1  ;;  %v1017_v19 = vadd.f32 %v2435_v52, %v265_v14  ;;  %1137 = vst.msk [vmem:[#allocation2 + $0x260] sm:$0xff] %vm19_vm3, %v1040_v11  ;;  %v1041_v20 = vadd.f32 %v2437_v53, %v289_v15  ;;  %v1335_v53 = vadd.f32 %v2218_v44, %v1235_v24 }
  0xbb   :  { %1066 = vst.msk [vmem:[#allocation2 + $0x28] sm:$0xff] %vm19_vm3, %v969_v13  ;;  %v970_v21 = vadd.f32 %v2443_v60, %v218_v18  ;;  %v1456_v48 = vpack.c.bf16 %v1360_v40, %v1360_v40 }
  0xbc   :  { %1114 = vst.msk [vmem:[#allocation2 + $0x1a8] sm:$0xff] %vm19_vm3, %v1017_v19  ;;  %v1431_v37 = vmax.f32 %v1335_v53, 0.0 }
  0xbd   :  { %1860 = vmatmul.msk.bf16.gmra.mxu0 %vm563_vm2, %v1908_v2  ;;  %1872 = vmatmul.msk.bf16.gmra.mxu1 %vm563_vm2, %v1920_v3  ;;  %v264_v2 = vld [vmem:[#allocation2 + $0x1a0] sm:$0xff]  ;;  %v1503_v3 = vpack.c.bf16 %v1407_v62, %v1407_v62  ;;  %1138 = vst.msk [vmem:[#allocation2 + $0x268] sm:$0xff] %vm19_vm3, %v1041_v20 }
  0xbe   :  { %1884 = vmatmul.msk.bf16.gmra.mxu2 %vm563_vm2, %v1932_v9  ;;  %1896 = vmatmul.msk.bf16.gmra.mxu3 %vm563_vm2, %v1944_v10  ;;  %v1016_v7 = vadd.f32 %v2409_v29, %v264_v2  ;;  %v241_v9 = vld [vmem:[#allocation2 + $0xe8] sm:$0xff]  ;;  %1067 = vst.msk [vmem:[#allocation2 + $0x30] sm:$0xff] %vm19_vm3, %v970_v21  ;;  %v1527_v42 = vpack.c.bf16 %v1431_v37, %v1431_v37 }
  0xbf   :  { %1600 = vst.msk [vmem:[%s3183_s3 + $0xcc] sm:$0xf] %vm1548_vm4, %v1503_v3  ;;  %v993_v29 = vadd.f32 %v2419_v36, %v241_v9  ;;  %v994_v36 = vadd.f32 %v2445_v61, %v242_v30 }
  0xc0   :  { %1113 = vst.msk [vmem:[#allocation2 + $0x1a0] sm:$0xff] %vm19_vm3, %v1016_v7  ;;  %v1188_v61 = vld [vmem:[#allocation2 + $0xe0] sm:$0xff] }
  0xc1   :  { %v2487_v31 = vpop.f32.mrf.mxu2  ;;  %v2489_v32 = vpop.f32.mrf.mxu3  ;;  %1090 = vst.msk [vmem:[#allocation2 + $0xe8] sm:$0xff] %vm19_vm3, %v993_v29  ;;  %v1288_v38 = vadd.f32 %v2218_v44, %v1188_v61  ;;  %v1236_v41 = vld [vmem:[#allocation2 + $0x260] sm:$0xff]  ;;  %v267_v61 = vld [vmem:[#allocation2 + $0x1b8] sm:$0xff] }
  0xc2   :  { %v2501_v43 = vpop.f32.mrf.mxu0  ;;  %v2503_v45 = vpop.f32.mrf.mxu1  ;;  %v1018_v52 = vadd.f32 %v2487_v31, %v266_v35  ;;  %v1042_v60 = vadd.f32 %v2489_v32, %v290_v22  ;;  %1091 = vst.msk [vmem:[#allocation2 + $0xf0] sm:$0xff] %vm19_vm3, %v994_v36  ;;  %v1165_v47 = vld [vmem:[#allocation2 + $0x28] sm:$0xff] }
  0xc3   :  { %v971_v33 = vadd.f32 %v2501_v43, %v219_v23  ;;  %v1384_v46 = vmax.f32 %v1288_v38, 0.0  ;;  %v1336_v43 = vadd.f32 %v2218_v44, %v1236_v41  ;;  %v1265_v50 = vadd.f32 %v2218_v44, %v1165_v47  ;;  %1624 = vst.msk [vmem:[%s3183_s3 + $0x12c] sm:$0xf] %vm1548_vm4, %v1527_v42  ;;  %v1213_v57 = vld [vmem:[#allocation2 + $0x1a8] sm:$0xff]  ;;  %v291_v38 = vld [vmem:[#allocation2 + $0x278] sm:$0xff]  ;;  %v220_v42 = vld [vmem:[#allocation2 + $0x40] sm:$0xff] }
  0xc4   :  { %1115 = vst.msk [vmem:[#allocation2 + $0x1b0] sm:$0xff] %vm19_vm3, %v1018_v52  ;;  %v1313_v62 = vadd.f32 %v2218_v44, %v1213_v57  ;;  %v1237_v63 = vld [vmem:[#allocation2 + $0x268] sm:$0xff]  ;;  %v995_v41 = vadd.f32 %v2503_v45, %v243_v27  ;;  %v244_v47 = vld [vmem:[#allocation2 + $0x100] sm:$0xff] }
  0xc5   :  { %1139 = vst.msk [vmem:[#allocation2 + $0x270] sm:$0xff] %vm19_vm3, %v1042_v60  ;;  %v1480_v54 = vpack.c.bf16 %v1384_v46, %v1384_v46  ;;  %v1432_v55 = vmax.f32 %v1336_v43, 0.0  ;;  %v1361_v59 = vmax.f32 %v1265_v50, 0.0  ;;  %v1337_v4 = vadd.f32 %v2218_v44, %v1237_v63  ;;  %v1166_v5 = vld [vmem:[#allocation2 + $0x30] sm:$0xff]  ;;  %v268_v50 = vld [vmem:[#allocation2 + $0x1c0] sm:$0xff]  ;;  %v245_v57 = vld [vmem:[#allocation2 + $0x108] sm:$0xff] }
  0xc6   :  { %1068 = vst.msk [vmem:[#allocation2 + $0x38] sm:$0xff] %vm19_vm3, %v971_v33  ;;  %v1409_v8 = vmax.f32 %v1313_v62, 0.0  ;;  %v1266_v7 = vadd.f32 %v2218_v44, %v1166_v5  ;;  %v270_v5 = vld [vmem:[#allocation2 + $0x1d0] sm:$0xff] }
  0xc7   :  { %v1212_v39 = vld [vmem:[#allocation2 + $0x1a0] sm:$0xff]  ;;  %1553 = vst.msk [vmem:[%s3183_s3 + $0x10] sm:$0xf] %vm1548_vm4, %v1456_v48  ;;  %v1528_v2 = vpack.c.bf16 %v1432_v55, %v1432_v55  ;;  %v1457_v6 = vpack.c.bf16 %v1361_v59, %v1361_v59  ;;  %v1433_v15 = vmax.f32 %v1337_v4, 0.0  ;;  %v221_v55 = vld [vmem:[#allocation2 + $0x48] sm:$0xff] }
  0xc8   :  { %v1312_v32 = vadd.f32 %v2218_v44, %v1212_v39  ;;  %v1189_v51 = vld [vmem:[#allocation2 + $0xe8] sm:$0xff]  ;;  %1577 = vst.msk [vmem:[%s3183_s3 + $0x70] sm:$0xf] %vm1548_vm4, %v1480_v54  ;;  %v1505_v19 = vpack.c.bf16 %v1409_v8, %v1409_v8  ;;  %v1362_v30 = vmax.f32 %v1266_v7, 0.0 }
  0xc9   :  { %v2543_v10 = vpop.f32.mrf.mxu2  ;;  %v2545_v12 = vpop.f32.mrf.mxu3  ;;  %v1289_v56 = vadd.f32 %v2218_v44, %v1189_v51  ;;  %v1190_v9 = vld [vmem:[#allocation2 + $0xf0] sm:$0xff]  ;;  %1625 = vst.msk [vmem:[%s3183_s3 + $0x130] sm:$0xf] %vm1548_vm4, %v1528_v2  ;;  %v1529_v21 = vpack.c.bf16 %v1433_v15, %v1433_v15  ;;  %v292_v51 = vld [vmem:[#allocation2 + $0x280] sm:$0xff]  ;;  %v293_v59 = vld [vmem:[#allocation2 + $0x288] sm:$0xff] }
  0xca   :  { %v2551_v16 = vpop.f32.mrf.mxu0  ;;  %v2553_v17 = vpop.f32.mrf.mxu1  ;;  %v1408_v49 = vmax.f32 %v1312_v32, 0.0  ;;  %v1290_v29 = vadd.f32 %v2218_v44, %v1190_v9  ;;  %1554 = vst.msk [vmem:[%s3183_s3 + $0x14] sm:$0xf] %vm1548_vm4, %v1457_v6  ;;  %v1458_v24 = vpack.c.bf16 %v1362_v30, %v1362_v30  ;;  %v1019_v43 = vadd.f32 %v2543_v10, %v267_v61 }
  0xcb   :  { %v1385_v3 = vmax.f32 %v1289_v56, 0.0  ;;  %v1214_v18 = vld [vmem:[#allocation2 + $0x1b0] sm:$0xff]  ;;  %1602 = vst.msk [vmem:[%s3183_s3 + $0xd4] sm:$0xf] %vm1548_vm4, %v1505_v19  ;;  %v1043_v45 = vadd.f32 %v2545_v12, %v291_v38  ;;  %v972_v10 = vadd.f32 %v2551_v16, %v220_v42  ;;  %v996_v54 = vadd.f32 %v2553_v17, %v244_v47 }
  0xcc   :  { %v1504_v58 = vpack.c.bf16 %v1408_v49, %v1408_v49  ;;  %v1314_v20 = vadd.f32 %v2218_v44, %v1214_v18  ;;  %v1238_v35 = vld [vmem:[#allocation2 + $0x270] sm:$0xff]  ;;  %v1386_v22 = vmax.f32 %v1290_v29, 0.0  ;;  %1626 = vst.msk [vmem:[%s3183_s3 + $0x134] sm:$0xf] %vm1548_vm4, %v1529_v21 }
  0xcd   :  { %v1481_v13 = vpack.c.bf16 %v1385_v3, %v1385_v3  ;;  %v1338_v36 = vadd.f32 %v2218_v44, %v1238_v35  ;;  %v1167_v23 = vld [vmem:[#allocation2 + $0x38] sm:$0xff]  ;;  %1555 = vst.msk [vmem:[%s3183_s3 + $0x18] sm:$0xf] %vm1548_vm4, %v1458_v24 }
  0xce   :  { %1601 = vst.msk [vmem:[%s3183_s3 + $0xd0] sm:$0xf] %vm1548_vm4, %v1504_v58  ;;  %v1410_v52 = vmax.f32 %v1314_v20, 0.0  ;;  %v1267_v53 = vadd.f32 %v2218_v44, %v1167_v23  ;;  %v1482_v60 = vpack.c.bf16 %v1386_v22, %v1386_v22  ;;  %v269_v58 = vld [vmem:[#allocation2 + $0x1c8] sm:$0xff] }
  0xcf   :  { %1578 = vst.msk [vmem:[%s3183_s3 + $0x74] sm:$0xf] %vm1548_vm4, %v1481_v13  ;;  %v1434_v28 = vmax.f32 %v1338_v36, 0.0 }
  0xd0   :  { %v1506_v33 = vpack.c.bf16 %v1410_v52, %v1410_v52  ;;  %v1363_v37 = vmax.f32 %v1267_v53, 0.0  ;;  %1579 = vst.msk [vmem:[%s3183_s3 + $0x78] sm:$0xf] %vm1548_vm4, %v1482_v60 }
  0xd1   :  { %v2567_v25 = vpop.f32.mrf.mxu2  ;;  %v2569_v26 = vpop.f32.mrf.mxu3  ;;  %v1530_v32 = vpack.c.bf16 %v1434_v28, %v1434_v28  ;;  %1092 = vst.msk [vmem:[#allocation2 + $0xf8] sm:$0xff] %vm19_vm3, %v995_v41 }
  0xd2   :  { %v2577_v34 = vpop.f32.mrf.mxu0  ;;  %v2579_v31 = vpop.f32.mrf.mxu1  ;;  %1603 = vst.msk [vmem:[%s3183_s3 + $0xd8] sm:$0xf] %vm1548_vm4, %v1506_v33  ;;  %v1459_v46 = vpack.c.bf16 %v1363_v37, %v1363_v37  ;;  %v1020_v56 = vadd.f32 %v2567_v25, %v268_v50  ;;  %v1044_v12 = vadd.f32 %v2569_v26, %v292_v51  ;;  %v222_v25 = vld [vmem:[#allocation2 + $0x50] sm:$0xff] }
  0xd3   :  { %1627 = vst.msk [vmem:[%s3183_s3 + $0x138] sm:$0xf] %vm1548_vm4, %v1530_v32  ;;  %v973_v16 = vadd.f32 %v2577_v34, %v221_v55  ;;  %v997_v17 = vadd.f32 %v2579_v31, %v245_v57  ;;  %v246_v26 = vld [vmem:[#allocation2 + $0x110] sm:$0xff] }
  0xd4   :  { %1556 = vst.msk [vmem:[%s3183_s3 + $0x1c] sm:$0xf] %vm1548_vm4, %v1459_v46 }
  0xd5   :  { %1116 = vst.msk [vmem:[#allocation2 + $0x1b8] sm:$0xff] %vm19_vm3, %v1019_v43 }
  0xd6   :  { %1140 = vst.msk [vmem:[#allocation2 + $0x278] sm:$0xff] %vm19_vm3, %v1043_v45 }
  0xd7   :  { %1069 = vst.msk [vmem:[#allocation2 + $0x40] sm:$0xff] %vm19_vm3, %v972_v10 }
  0xd8   :  { %1093 = vst.msk [vmem:[#allocation2 + $0x100] sm:$0xff] %vm19_vm3, %v996_v54  ;;  %v1191_v6 = vld [vmem:[#allocation2 + $0xf8] sm:$0xff] }
  0xd9   :  { %v2599_v0 = vpop.f32.mrf.mxu2  ;;  %v2601_v1 = vpop.f32.mrf.mxu3  ;;  %1117 = vst.msk [vmem:[#allocation2 + $0x1c0] sm:$0xff] %vm19_vm3, %v1020_v56  ;;  %v1291_v8 = vadd.f32 %v2218_v44, %v1191_v6 }
  0xda   :  { %v2613_v11 = vpop.f32.mrf.mxu0  ;;  %v2615_v14 = vpop.f32.mrf.mxu1  ;;  %v1021_v2 = vadd.f32 %v2599_v0, %v269_v58  ;;  %1141 = vst.msk [vmem:[#allocation2 + $0x280] sm:$0xff] %vm19_vm3, %v1044_v12  ;;  %v1045_v34 = vadd.f32 %v2601_v1, %v293_v59 }
  0xdb   :  { %1070 = vst.msk [vmem:[#allocation2 + $0x48] sm:$0xff] %vm19_vm3, %v973_v16  ;;  %v974_v31 = vadd.f32 %v2613_v11, %v222_v25  ;;  %v998_v0 = vadd.f32 %v2615_v14, %v246_v26  ;;  %v1387_v1 = vmax.f32 %v1291_v8, 0.0 }
  0xdc   :  { %v1215_v7 = vld [vmem:[#allocation2 + $0x1b8] sm:$0xff]  ;;  %1094 = vst.msk [vmem:[#allocation2 + $0x108] sm:$0xff] %vm19_vm3, %v997_v17 }
  0xdd   :  { %v1315_v9 = vadd.f32 %v2218_v44, %v1215_v7  ;;  %v1239_v13 = vld [vmem:[#allocation2 + $0x278] sm:$0xff]  ;;  %1118 = vst.msk [vmem:[#allocation2 + $0x1c8] sm:$0xff] %vm19_vm3, %v1021_v2  ;;  %v1483_v35 = vpack.c.bf16 %v1387_v1, %v1387_v1  ;;  %v294_v7 = vld [vmem:[#allocation2 + $0x290] sm:$0xff] }
  0xde   :  { %v1339_v29 = vadd.f32 %v2218_v44, %v1239_v13  ;;  %v1168_v18 = vld [vmem:[#allocation2 + $0x40] sm:$0xff]  ;;  %1142 = vst.msk [vmem:[#allocation2 + $0x288] sm:$0xff] %vm19_vm3, %v1045_v34 }
  0xdf   :  { %v1411_v11 = vmax.f32 %v1315_v9, 0.0  ;;  %v1268_v19 = vadd.f32 %v2218_v44, %v1168_v18  ;;  %v1192_v30 = vld [vmem:[#allocation2 + $0x100] sm:$0xff]  ;;  %1071 = vst.msk [vmem:[#allocation2 + $0x50] sm:$0xff] %vm19_vm3, %v974_v31  ;;  %v247_v18 = vld [vmem:[#allocation2 + $0x118] sm:$0xff] }
  0xe0   :  { %v1435_v21 = vmax.f32 %v1339_v29, 0.0  ;;  %v1292_v22 = vadd.f32 %v2218_v44, %v1192_v30  ;;  %v1216_v36 = vld [vmem:[#allocation2 + $0x1c0] sm:$0xff]  ;;  %1095 = vst.msk [vmem:[#allocation2 + $0x110] sm:$0xff] %vm19_vm3, %v998_v0  ;;  %v271_v30 = vld [vmem:[#allocation2 + $0x1d8] sm:$0xff] }
  0xe1   :  { %v869_v39 = vpop.f32.mrf.mxu2  ;;  %v2645_v40 = vpop.f32.mrf.mxu3  ;;  %v1507_v23 = vpack.c.bf16 %v1411_v11, %v1411_v11  ;;  %v1364_v24 = vmax.f32 %v1268_v19, 0.0  ;;  %v1316_v52 = vadd.f32 %v2218_v44, %v1216_v36  ;;  %v1240_v53 = vld [vmem:[#allocation2 + $0x280] sm:$0xff]  ;;  %1580 = vst.msk [vmem:[%s3183_s3 + $0x7c] sm:$0xf] %vm1548_vm4, %v1483_v35 }
  0xe2   :  { %v2657_v48 = vpop.f32.mrf.mxu0  ;;  %v2659_v49 = vpop.f32.mrf.mxu1  ;;  %v1022_v15 = vadd.f32 %v869_v39, %v270_v5  ;;  %v1531_v28 = vpack.c.bf16 %v1435_v21, %v1435_v21  ;;  %v1388_v61 = vmax.f32 %v1292_v22, 0.0  ;;  %v1340_v33 = vadd.f32 %v2218_v44, %v1240_v53  ;;  %v1169_v37 = vld [vmem:[#allocation2 + $0x48] sm:$0xff]  ;;  %v295_v22 = vld [vmem:[#allocation2 + $0x298] sm:$0xff] }
  0xe3   :  { %1604 = vst.msk [vmem:[%s3183_s3 + $0xdc] sm:$0xf] %vm1548_vm4, %v1507_v23  ;;  %v1460_v38 = vpack.c.bf16 %v1364_v24, %v1364_v24  ;;  %v1412_v39 = vmax.f32 %v1316_v52, 0.0  ;;  %v1269_v32 = vadd.f32 %v2218_v44, %v1169_v37  ;;  %v1193_v41 = vld [vmem:[#allocation2 + $0x108] sm:$0xff]  ;;  %v1046_v19 = vadd.f32 %v2645_v40, %v294_v7  ;;  %v224_v23 = vld [vmem:[#allocation2 + $0x60] sm:$0xff] }
  0xe4   :  { %1119 = vst.msk [vmem:[#allocation2 + $0x1d0] sm:$0xff] %vm19_vm3, %v1022_v15  ;;  %v1484_v42 = vpack.c.bf16 %v1388_v61, %v1388_v61  ;;  %v1436_v46 = vmax.f32 %v1340_v33, 0.0  ;;  %v1293_v43 = vadd.f32 %v2218_v44, %v1193_v41  ;;  %v1217_v47 = vld [vmem:[#allocation2 + $0x1c8] sm:$0xff]  ;;  %v223_v15 = vld [vmem:[#allocation2 + $0x58] sm:$0xff]  ;;  %v999_v36 = vadd.f32 %v2659_v49, %v247_v18  ;;  %v248_v24 = vld [vmem:[#allocation2 + $0x120] sm:$0xff] }
  0xe5   :  { %1628 = vst.msk [vmem:[%s3183_s3 + $0x13c] sm:$0xf] %vm1548_vm4, %v1531_v28  ;;  %v1508_v45 = vpack.c.bf16 %v1412_v39, %v1412_v39  ;;  %v1365_v50 = vmax.f32 %v1269_v32, 0.0  ;;  %v1317_v10 = vadd.f32 %v2218_v44, %v1217_v47  ;;  %v1241_v51 = vld [vmem:[#allocation2 + $0x288] sm:$0xff]  ;;  %v975_v21 = vadd.f32 %v2657_v48, %v223_v15  ;;  %v272_v28 = vld [vmem:[#allocation2 + $0x1e0] sm:$0xff] }
  0xe6   :  { %1557 = vst.msk [vmem:[%s3183_s3 + $0x20] sm:$0xf] %vm1548_vm4, %v1460_v38  ;;  %v1532_v54 = vpack.c.bf16 %v1436_v46, %v1436_v46  ;;  %v1389_v55 = vmax.f32 %v1293_v43, 0.0  ;;  %v1341_v56 = vadd.f32 %v2218_v44, %v1241_v51  ;;  %v1170_v57 = vld [vmem:[#allocation2 + $0x50] sm:$0xff]  ;;  %v296_v61 = vld [vmem:[#allocation2 + $0x2a0] sm:$0xff]  ;;  %v249_v39 = vld [vmem:[#allocation2 + $0x128] sm:$0xff] }
  0xe7   :  { %1581 = vst.msk [vmem:[%s3183_s3 + $0x80] sm:$0xf] %vm1548_vm4, %v1484_v42  ;;  %v1461_v12 = vpack.c.bf16 %v1365_v50, %v1365_v50  ;;  %v1413_v58 = vmax.f32 %v1317_v10, 0.0  ;;  %v1270_v16 = vadd.f32 %v2218_v44, %v1170_v57  ;;  %v1194_v59 = vld [vmem:[#allocation2 + $0x110] sm:$0xff]  ;;  %v273_v32 = vld [vmem:[#allocation2 + $0x1e8] sm:$0xff] }
  0xe8   :  { %1605 = vst.msk [vmem:[%s3183_s3 + $0xe0] sm:$0xf] %vm1548_vm4, %v1508_v45  ;;  %v1485_v2 = vpack.c.bf16 %v1389_v55, %v1389_v55  ;;  %v1437_v26 = vmax.f32 %v1341_v56, 0.0  ;;  %v1294_v34 = vadd.f32 %v2218_v44, %v1194_v59  ;;  %v297_v41 = vld [vmem:[#allocation2 + $0x2a8] sm:$0xff]  ;;  %v226_v46 = vld [vmem:[#allocation2 + $0x70] sm:$0xff] }
  0xe9   :  { %v2679_v62 = vpop.f32.mrf.mxu2  ;;  %v2681_v63 = vpop.f32.mrf.mxu3  ;;  %1629 = vst.msk [vmem:[%s3183_s3 + $0x140] sm:$0xf] %vm1548_vm4, %v1532_v54  ;;  %v1509_v6 = vpack.c.bf16 %v1413_v58, %v1413_v58  ;;  %v1366_v31 = vmax.f32 %v1270_v16, 0.0 }
  0xea   :  { %v2687_v3 = vpop.f32.mrf.mxu0  ;;  %v2689_v4 = vpop.f32.mrf.mxu1  ;;  %1558 = vst.msk [vmem:[%s3183_s3 + $0x24] sm:$0xf] %vm1548_vm4, %v1461_v12  ;;  %v1533_v9 = vpack.c.bf16 %v1437_v26, %v1437_v26  ;;  %v1390_v13 = vmax.f32 %v1294_v34, 0.0  ;;  %v1023_v40 = vadd.f32 %v2679_v62, %v271_v30  ;;  %v1047_v53 = vadd.f32 %v2681_v63, %v295_v22  ;;  %v225_v62 = vld [vmem:[#allocation2 + $0x68] sm:$0xff] }
  0xeb   :  { %v1218_v5 = vld [vmem:[#allocation2 + $0x1d0] sm:$0xff]  ;;  %1582 = vst.msk [vmem:[%s3183_s3 + $0x84] sm:$0xf] %vm1548_vm4, %v1485_v2  ;;  %v1462_v1 = vpack.c.bf16 %v1366_v31, %v1366_v31  ;;  %v976_v49 = vadd.f32 %v2687_v3, %v224_v23  ;;  %v1000_v33 = vadd.f32 %v2689_v4, %v248_v24 }
  0xec   :  { %v1318_v8 = vadd.f32 %v2218_v44, %v1218_v5  ;;  %1606 = vst.msk [vmem:[%s3183_s3 + $0xe4] sm:$0xf] %vm1548_vm4, %v1509_v6  ;;  %v1486_v44 = vpack.c.bf16 %v1390_v13, %v1390_v13 }
  0xed   :  { %1630 = vst.msk [vmem:[%s3183_s3 + $0x144] sm:$0xf] %vm1548_vm4, %v1533_v9 }
  0xee   :  { %v1414_v29 = vmax.f32 %v1318_v8, 0.0  ;;  %1559 = vst.msk [vmem:[%s3183_s3 + $0x28] sm:$0xf] %vm1548_vm4, %v1462_v1 }
  0xef   :  { %1583 = vst.msk [vmem:[%s3183_s3 + $0x88] sm:$0xf] %vm1548_vm4, %v1486_v44 }
  0xf0   :  { %v1510_v35 = vpack.c.bf16 %v1414_v29, %v1414_v29  ;;  %1143 = vst.msk [vmem:[#allocation2 + $0x290] sm:$0xff] %vm19_vm3, %v1046_v19 }
  0xf1   :  { %v2704_v20 = vpop.f32.mrf.mxu2  ;;  %v2706_v14 = vpop.f32.mrf.mxu3  ;;  %1072 = vst.msk [vmem:[#allocation2 + $0x58] sm:$0xff] %vm19_vm3, %v975_v21 }
  0xf2   :  { %v2712_v27 = vpop.f32.mrf.mxu0  ;;  %v2714_v60 = vpop.f32.mrf.mxu1  ;;  %1607 = vst.msk [vmem:[%s3183_s3 + $0xe8] sm:$0xf] %vm1548_vm4, %v1510_v35  ;;  %v1024_v38 = vadd.f32 %v2704_v20, %v272_v28  ;;  %v1048_v63 = vadd.f32 %v2706_v14, %v296_v61 }
  0xf3   :  { %1096 = vst.msk [vmem:[#allocation2 + $0x118] sm:$0xff] %vm19_vm3, %v999_v36  ;;  %v977_v3 = vadd.f32 %v2712_v27, %v225_v62  ;;  %v1001_v4 = vadd.f32 %v2714_v60, %v249_v39  ;;  %v2821_v27 = vld [vmem:[%s3181_s2] ss:$0 sm:$0xff] }
  0xf4   :  { %1120 = vst.msk [vmem:[#allocation2 + $0x1d8] sm:$0xff] %vm19_vm3, %v1023_v40 }
  0xf5   :  { %1144 = vst.msk [vmem:[#allocation2 + $0x298] sm:$0xff] %vm19_vm3, %v1047_v53 }
  0xf6   :  { %1073 = vst.msk [vmem:[#allocation2 + $0x60] sm:$0xff] %vm19_vm3, %v976_v49 }
  0xf7   :  { %1097 = vst.msk [vmem:[#allocation2 + $0x120] sm:$0xff] %vm19_vm3, %v1000_v33  ;;  %v1242_v43 = vld [vmem:[#allocation2 + $0x290] sm:$0xff] }
  0xf8   :  { %1121 = vst.msk [vmem:[#allocation2 + $0x1e0] sm:$0xff] %vm19_vm3, %v1024_v38  ;;  %v1342_v45 = vadd.f32 %v2821_v27, %v1242_v43  ;;  %v1171_v50 = vld [vmem:[#allocation2 + $0x58] sm:$0xff] }
  0xf9   :  { %v2746_v17 = vpop.f32.mrf.mxu2  ;;  %v2748_v25 = vpop.f32.mrf.mxu3  ;;  %1145 = vst.msk [vmem:[#allocation2 + $0x2a0] sm:$0xff] %vm19_vm3, %v1048_v63  ;;  %v1271_v10 = vadd.f32 %v2821_v27, %v1171_v50 }
  0xfa   :  { %v759_v0 = vpop.f32.mrf.mxu0  ;;  %v2768_v11 = vpop.f32.mrf.mxu1  ;;  %v1025_v20 = vadd.f32 %v2746_v17, %v273_v32  ;;  %v1049_v60 = vadd.f32 %v2748_v25, %v297_v41  ;;  %v1195_v51 = vld [vmem:[#allocation2 + $0x118] sm:$0xff]  ;;  %1074 = vst.msk [vmem:[#allocation2 + $0x68] sm:$0xff] %vm19_vm3, %v977_v3  ;;  %v1438_v55 = vmax.f32 %v1342_v45, 0.0 }
  0xfb   :  { %v978_v54 = vadd.f32 %v759_v0, %v226_v46  ;;  %v1295_v56 = vadd.f32 %v2821_v27, %v1195_v51  ;;  %v1219_v57 = vld [vmem:[#allocation2 + $0x1d8] sm:$0xff]  ;;  %1098 = vst.msk [vmem:[#allocation2 + $0x128] sm:$0xff] %vm19_vm3, %v1001_v4  ;;  %v1367_v12 = vmax.f32 %v1271_v10, 0.0 }
  0xfc   :  { %v1319_v58 = vadd.f32 %v2821_v27, %v1219_v57  ;;  %v1243_v16 = vld [vmem:[#allocation2 + $0x298] sm:$0xff]  ;;  %1122 = vst.msk [vmem:[#allocation2 + $0x1e8] sm:$0xff] %vm19_vm3, %v1025_v20  ;;  %v1534_v59 = vpack.c.bf16 %v1438_v55, %v1438_v55  ;;  %v250_v20 = vld [vmem:[#allocation2 + $0x130] sm:$0xff] }
  0xfd   :  { %v1391_v17 = vmax.f32 %v1295_v56, 0.0  ;;  %v1343_v25 = vadd.f32 %v2821_v27, %v1243_v16  ;;  %v1172_v2 = vld [vmem:[#allocation2 + $0x60] sm:$0xff]  ;;  %1146 = vst.msk [vmem:[#allocation2 + $0x2a8] sm:$0xff] %vm19_vm3, %v1049_v60  ;;  %v1463_v34 = vpack.c.bf16 %v1367_v12, %v1367_v12  ;;  %v274_v60 = vld [vmem:[#allocation2 + $0x1f0] sm:$0xff]  ;;  %v1002_v57 = vadd.f32 %v2768_v11, %v250_v20  ;;  %v227_v12 = vld [vmem:[#allocation2 + $0x78] sm:$0xff] }
  0xfe   :  { %v1415_v5 = vmax.f32 %v1319_v58, 0.0  ;;  %v1272_v6 = vadd.f32 %v2821_v27, %v1172_v2  ;;  %v1196_v31 = vld [vmem:[#allocation2 + $0x120] sm:$0xff]  ;;  %1075 = vst.msk [vmem:[#allocation2 + $0x70] sm:$0xff] %vm19_vm3, %v978_v54  ;;  %v298_v55 = vld [vmem:[#allocation2 + $0x2b0] sm:$0xff]  ;;  %v275_v2 = vld [vmem:[#allocation2 + $0x1f8] sm:$0xff] }
  0xff   :  { %1631 = vst.msk [vmem:[%s3183_s3 + $0x148] sm:$0xf] %vm1548_vm4, %v1534_v59  ;;  %v1487_v8 = vpack.c.bf16 %v1391_v17, %v1391_v17  ;;  %v1439_v7 = vmax.f32 %v1343_v25, 0.0  ;;  %v1296_v0 = vadd.f32 %v2821_v27, %v1196_v31  ;;  %v1220_v9 = vld [vmem:[#allocation2 + $0x1e0] sm:$0xff]  ;;  %v251_v59 = vld [vmem:[#allocation2 + $0x138] sm:$0xff] }
 0x100   :  { %1560 = vst.msk [vmem:[%s3183_s3 + $0x2c] sm:$0xf] %vm1548_vm4, %v1463_v34  ;;  %v1511_v13 = vpack.c.bf16 %v1415_v5, %v1415_v5  ;;  %v1368_v15 = vmax.f32 %v1272_v6, 0.0  ;;  %v1320_v1 = vadd.f32 %v2821_v27, %v1220_v9  ;;  %v1244_v29 = vld [vmem:[#allocation2 + $0x2a0] sm:$0xff]  ;;  %v299_v5 = vld [vmem:[#allocation2 + $0x2b8] sm:$0xff] }
 0x101   :  { %v2790_v52 = vpop.f32.mrf.mxu2  ;;  %v2792_v48 = vpop.f32.mrf.mxu3  ;;  %1584 = vst.msk [vmem:[%s3183_s3 + $0x8c] sm:$0xf] %vm1548_vm4, %v1487_v8  ;;  %v1535_v44 = vpack.c.bf16 %v1439_v7, %v1439_v7  ;;  %v1392_v19 = vmax.f32 %v1296_v0, 0.0  ;;  %v1344_v30 = vadd.f32 %v2821_v27, %v1244_v29  ;;  %v1173_v35 = vld [vmem:[#allocation2 + $0x68] sm:$0xff]  ;;  %v228_v31 = vld [vmem:[#allocation2 + $0x80] sm:$0xff] }
 0x102   :  { %v2800_v37 = vpop.f32.mrf.mxu0  ;;  %v2808_v42 = vpop.f32.mrf.mxu1  ;;  %1608 = vst.msk [vmem:[%s3183_s3 + $0xec] sm:$0xf] %vm1548_vm4, %v1511_v13  ;;  %v1464_v22 = vpack.c.bf16 %v1368_v15, %v1368_v15  ;;  %v1416_v36 = vmax.f32 %v1320_v1, 0.0  ;;  %v1273_v23 = vadd.f32 %v2821_v27, %v1173_v35  ;;  %v1197_v40 = vld [vmem:[#allocation2 + $0x128] sm:$0xff]  ;;  %v1026_v16 = vadd.f32 %v2790_v52, %v274_v60  ;;  %v252_v8 = vld [vmem:[#allocation2 + $0x140] sm:$0xff] }
 0x103   :  { %1632 = vst.msk [vmem:[%s3183_s3 + $0x14c] sm:$0xf] %vm1548_vm4, %v1535_v44  ;;  %v1488_v53 = vpack.c.bf16 %v1392_v19, %v1392_v19  ;;  %v1440_v28 = vmax.f32 %v1344_v30, 0.0  ;;  %v1297_v49 = vadd.f32 %v2821_v27, %v1197_v40  ;;  %v1221_v61 = vld [vmem:[#allocation2 + $0x1e8] sm:$0xff]  ;;  %v1050_v25 = vadd.f32 %v2792_v48, %v298_v55  ;;  %v276_v0 = vld [vmem:[#allocation2 + $0x200] sm:$0xff] }
 0x104   :  { %1561 = vst.msk [vmem:[%s3183_s3 + $0x30] sm:$0xf] %vm1548_vm4, %v1464_v22  ;;  %v1512_v33 = vpack.c.bf16 %v1416_v36, %v1416_v36  ;;  %v1369_v62 = vmax.f32 %v1273_v23, 0.0  ;;  %v1321_v38 = vadd.f32 %v2821_v27, %v1221_v61  ;;  %v1245_v39 = vld [vmem:[#allocation2 + $0x2a8] sm:$0xff]  ;;  %v979_v34 = vadd.f32 %v2800_v37, %v227_v12  ;;  %v300_v9 = vld [vmem:[#allocation2 + $0x2c0] sm:$0xff] }
 0x105   :  { %1585 = vst.msk [vmem:[%s3183_s3 + $0x90] sm:$0xf] %vm1548_vm4, %v1488_v53  ;;  %v1536_v63 = vpack.c.bf16 %v1440_v28, %v1440_v28  ;;  %v1393_v32 = vmax.f32 %v1297_v49, 0.0  ;;  %v1345_v3 = vadd.f32 %v2821_v27, %v1245_v39  ;;  %v1174_v41 = vld [vmem:[#allocation2 + $0x70] sm:$0xff]  ;;  %v1003_v6 = vadd.f32 %v2808_v42, %v251_v59  ;;  %v229_v13 = vld [vmem:[#allocation2 + $0x88] sm:$0xff] }
 0x106   :  { %1609 = vst.msk [vmem:[%s3183_s3 + $0xf0] sm:$0xf] %vm1548_vm4, %v1512_v33  ;;  %v1465_v4 = vpack.c.bf16 %v1369_v62, %v1369_v62  ;;  %v1417_v46 = vmax.f32 %v1321_v38, 0.0  ;;  %v1274_v43 = vadd.f32 %v2821_v27, %v1174_v41  ;;  %v253_v1 = vld [vmem:[#allocation2 + $0x148] sm:$0xff] }
 0x107   :  { %1633 = vst.msk [vmem:[%s3183_s3 + $0x150] sm:$0xf] %vm1548_vm4, %v1536_v63  ;;  %v1489_v45 = vpack.c.bf16 %v1393_v32, %v1393_v32  ;;  %v1441_v50 = vmax.f32 %v1345_v3, 0.0  ;;  %v277_v29 = vld [vmem:[#allocation2 + $0x208] sm:$0xff] }
 0x108   :  { %1562 = vst.msk [vmem:[%s3183_s3 + $0x34] sm:$0xf] %vm1548_vm4, %v1465_v4  ;;  %v1513_v51 = vpack.c.bf16 %v1417_v46, %v1417_v46  ;;  %v1370_v54 = vmax.f32 %v1274_v43, 0.0 }
 0x109   :  { %v2814_v47 = vpop.f32.mrf.mxu2  ;;  %v2816_v14 = vpop.f32.mrf.mxu3  ;;  %1586 = vst.msk [vmem:[%s3183_s3 + $0x94] sm:$0xf] %vm1548_vm4, %v1489_v45  ;;  %v1537_v56 = vpack.c.bf16 %v1441_v50, %v1441_v50 }
 0x10a   :  { %v2834_v26 = vpop.f32.mrf.mxu0  ;;  %v2848_v18 = vpop.f32.mrf.mxu1  ;;  %1610 = vst.msk [vmem:[%s3183_s3 + $0xf4] sm:$0xf] %vm1548_vm4, %v1513_v51  ;;  %v1466_v58 = vpack.c.bf16 %v1370_v54, %v1370_v54  ;;  %v1027_v48 = vadd.f32 %v2814_v47, %v275_v2  ;;  %v1051_v7 = vadd.f32 %v2816_v14, %v299_v5 }
 0x10b   :  { %1634 = vst.msk [vmem:[%s3183_s3 + $0x154] sm:$0xf] %vm1548_vm4, %v1537_v56  ;;  %v980_v37 = vadd.f32 %v2834_v26, %v228_v31  ;;  %v1004_v42 = vadd.f32 %v2848_v18, %v252_v8 }
 0x10c   :  { %1563 = vst.msk [vmem:[%s3183_s3 + $0x38] sm:$0xf] %vm1548_vm4, %v1466_v58 }
 0x10d   :  { %1099 = vst.msk [vmem:[#allocation2 + $0x130] sm:$0xff] %vm19_vm3, %v1002_v57 }
 0x10e   :  { %1123 = vst.msk [vmem:[#allocation2 + $0x1f0] sm:$0xff] %vm19_vm3, %v1026_v16 }
 0x10f   :  { %1147 = vst.msk [vmem:[#allocation2 + $0x2b0] sm:$0xff] %vm19_vm3, %v1050_v25 }
 0x110   :  { %1076 = vst.msk [vmem:[#allocation2 + $0x78] sm:$0xff] %vm19_vm3, %v979_v34 }
 0x111   :  { %v2855_v21 = vpop.f32.mrf.mxu2  ;;  %v2862_v24 = vpop.f32.mrf.mxu3  ;;  %1100 = vst.msk [vmem:[#allocation2 + $0x138] sm:$0xff] %vm19_vm3, %v1003_v6 }
 0x112   :  { %v766_v10 = vpop.f32.mrf.mxu0  ;;  %v826_v17 = vpop.f32.mrf.mxu1  ;;  %1124 = vst.msk [vmem:[#allocation2 + $0x1f8] sm:$0xff] %vm19_vm3, %v1027_v48  ;;  %v1028_v47 = vadd.f32 %v2855_v21, %v276_v0  ;;  %v1052_v14 = vadd.f32 %v2862_v24, %v300_v9 }
 0x113   :  { %1148 = vst.msk [vmem:[#allocation2 + $0x2b8] sm:$0xff] %vm19_vm3, %v1051_v7  ;;  %v981_v26 = vadd.f32 %v766_v10, %v229_v13  ;;  %v1005_v35 = vadd.f32 %v826_v17, %v253_v1 }
 0x114   :  { %v1198_v44 = vld [vmem:[#allocation2 + $0x130] sm:$0xff]  ;;  %1077 = vst.msk [vmem:[#allocation2 + $0x80] sm:$0xff] %vm19_vm3, %v980_v37 }
 0x115   :  { %v1298_v18 = vadd.f32 %v2821_v27, %v1198_v44  ;;  %v1222_v30 = vld [vmem:[#allocation2 + $0x1f0] sm:$0xff]  ;;  %1101 = vst.msk [vmem:[#allocation2 + $0x140] sm:$0xff] %vm19_vm3, %v1004_v42 }
 0x116   :  { %v1322_v21 = vadd.f32 %v2821_v27, %v1222_v30  ;;  %v1246_v36 = vld [vmem:[#allocation2 + $0x2b0] sm:$0xff]  ;;  %1125 = vst.msk [vmem:[#allocation2 + $0x200] sm:$0xff] %vm19_vm3, %v1028_v47 }
 0x117   :  { %v1394_v24 = vmax.f32 %v1298_v18, 0.0  ;;  %v1346_v53 = vadd.f32 %v2821_v27, %v1246_v36  ;;  %v1175_v28 = vld [vmem:[#allocation2 + $0x78] sm:$0xff]  ;;  %1149 = vst.msk [vmem:[#allocation2 + $0x2c0] sm:$0xff] %vm19_vm3, %v1052_v14  ;;  %v230_v18 = vld [vmem:[#allocation2 + $0x90] sm:$0xff] }
 0x118   :  { %v1418_v49 = vmax.f32 %v1322_v21, 0.0  ;;  %v1275_v61 = vadd.f32 %v2821_v27, %v1175_v28  ;;  %v1199_v33 = vld [vmem:[#allocation2 + $0x138] sm:$0xff]  ;;  %1078 = vst.msk [vmem:[#allocation2 + $0x88] sm:$0xff] %vm19_vm3, %v981_v26  ;;  %v254_v21 = vld [vmem:[#allocation2 + $0x150] sm:$0xff] }
 0x119   :  { %v886_v11 = vpop.f32.mrf.mxu2  ;;  %v2912_v52 = vpop.f32.mrf.mxu3  ;;  %v1490_v62 = vpack.c.bf16 %v1394_v24, %v1394_v24  ;;  %v1442_v38 = vmax.f32 %v1346_v53, 0.0  ;;  %v1299_v39 = vadd.f32 %v2821_v27, %v1199_v33  ;;  %v1223_v63 = vld [vmem:[#allocation2 + $0x1f8] sm:$0xff]  ;;  %1102 = vst.msk [vmem:[#allocation2 + $0x148] sm:$0xff] %vm19_vm3, %v1005_v35  ;;  %v278_v24 = vld [vmem:[#allocation2 + $0x210] sm:$0xff] }
 0x11a   :  { %v2924_v15 = vpop.f32.mrf.mxu0  ;;  %v2931_v19 = vpop.f32.mrf.mxu1  ;;  %v1029_v23 = vadd.f32 %v886_v11, %v277_v29  ;;  %v1514_v32 = vpack.c.bf16 %v1418_v49, %v1418_v49  ;;  %v1371_v3 = vmax.f32 %v1275_v61, 0.0  ;;  %v1323_v41 = vadd.f32 %v2821_v27, %v1223_v63  ;;  %v1247_v4 = vld [vmem:[#allocation2 + $0x2b8] sm:$0xff]  ;;  %v301_v29 = vld [vmem:[#allocation2 + $0x2c8] sm:$0xff]  ;;  %v302_v61 = vld [vmem:[#allocation2 + $0x2d0] sm:$0xff] }
 0x11b   :  { %1587 = vst.msk [vmem:[%s3183_s3 + $0x98] sm:$0xf] %vm1548_vm4, %v1490_v62  ;;  %v1538_v46 = vpack.c.bf16 %v1442_v38, %v1442_v38  ;;  %v1395_v43 = vmax.f32 %v1299_v39, 0.0  ;;  %v1347_v20 = vadd.f32 %v2821_v27, %v1247_v4  ;;  %v1176_v45 = vld [vmem:[#allocation2 + $0x80] sm:$0xff]  ;;  %v982_v49 = vadd.f32 %v2924_v15, %v230_v18  ;;  %v231_v62 = vld [vmem:[#allocation2 + $0x98] sm:$0xff] }
 0x11c   :  { %1126 = vst.msk [vmem:[#allocation2 + $0x208] sm:$0xff] %vm19_vm3, %v1029_v23  ;;  %v1467_v60 = vpack.c.bf16 %v1371_v3, %v1371_v3  ;;  %v1419_v10 = vmax.f32 %v1323_v41, 0.0  ;;  %v1276_v51 = vadd.f32 %v2821_v27, %v1176_v45  ;;  %v1200_v54 = vld [vmem:[#allocation2 + $0x140] sm:$0xff]  ;;  %v1053_v23 = vadd.f32 %v2912_v52, %v301_v29  ;;  %v255_v38 = vld [vmem:[#allocation2 + $0x158] sm:$0xff] }
 0x11d   :  { %1611 = vst.msk [vmem:[%s3183_s3 + $0xf8] sm:$0xf] %vm1548_vm4, %v1514_v32  ;;  %v1491_v55 = vpack.c.bf16 %v1395_v43, %v1395_v43  ;;  %v1443_v56 = vmax.f32 %v1347_v20, 0.0  ;;  %v1300_v57 = vadd.f32 %v2821_v27, %v1200_v54  ;;  %v1224_v12 = vld [vmem:[#allocation2 + $0x200] sm:$0xff]  ;;  %v1006_v33 = vadd.f32 %v2931_v19, %v254_v21  ;;  %v279_v63 = vld [vmem:[#allocation2 + $0x218] sm:$0xff] }
 0x11e   :  { %1635 = vst.msk [vmem:[%s3183_s3 + $0x158] sm:$0xf] %vm1548_vm4, %v1538_v46  ;;  %v1515_v58 = vpack.c.bf16 %v1419_v10, %v1419_v10  ;;  %v1372_v16 = vmax.f32 %v1276_v51, 0.0  ;;  %v1324_v59 = vadd.f32 %v2821_v27, %v1224_v12  ;;  %v1248_v17 = vld [vmem:[#allocation2 + $0x2c0] sm:$0xff]  ;;  %v303_v3 = vld [vmem:[#allocation2 + $0x2d8] sm:$0xff]  ;;  %v233_v10 = vld [vmem:[#allocation2 + $0xa8] sm:$0xff] }
 0x11f   :  { %1564 = vst.msk [vmem:[%s3183_s3 + $0x3c] sm:$0xf] %vm1548_vm4, %v1467_v60  ;;  %v1539_v2 = vpack.c.bf16 %v1443_v56, %v1443_v56  ;;  %v1396_v11 = vmax.f32 %v1300_v57, 0.0  ;;  %v1348_v34 = vadd.f32 %v2821_v27, %v1248_v17  ;;  %v1177_v5 = vld [vmem:[#allocation2 + $0x88] sm:$0xff]  ;;  %v232_v46 = vld [vmem:[#allocation2 + $0xa0] sm:$0xff] }
 0x120   :  { %1588 = vst.msk [vmem:[%s3183_s3 + $0x9c] sm:$0xf] %vm1548_vm4, %v1491_v55  ;;  %v1468_v31 = vpack.c.bf16 %v1372_v16, %v1372_v16  ;;  %v1420_v48 = vmax.f32 %v1324_v59, 0.0  ;;  %v1277_v8 = vadd.f32 %v2821_v27, %v1177_v5  ;;  %v1201_v7 = vld [vmem:[#allocation2 + $0x148] sm:$0xff]  ;;  %v256_v43 = vld [vmem:[#allocation2 + $0x160] sm:$0xff] }
 0x121   :  { %v2935_v22 = vpop.f32.mrf.mxu2  ;;  %v2939_v40 = vpop.f32.mrf.mxu3  ;;  %1612 = vst.msk [vmem:[%s3183_s3 + $0xfc] sm:$0xf] %vm1548_vm4, %v1515_v58  ;;  %v1492_v37 = vpack.c.bf16 %v1396_v11, %v1396_v11  ;;  %v1444_v9 = vmax.f32 %v1348_v34, 0.0  ;;  %v1301_v42 = vadd.f32 %v2821_v27, %v1201_v7  ;;  %v304_v60 = vld [vmem:[#allocation2 + $0x2e0] sm:$0xff] }
 0x122   :  { %v2954_v50 = vpop.f32.mrf.mxu0  ;;  %v831_v25 = vpop.f32.mrf.mxu1  ;;  %1636 = vst.msk [vmem:[%s3183_s3 + $0x15c] sm:$0xf] %vm1548_vm4, %v1539_v2  ;;  %v1516_v47 = vpack.c.bf16 %v1420_v48, %v1420_v48  ;;  %v1373_v1 = vmax.f32 %v1277_v8, 0.0  ;;  %v1030_v52 = vadd.f32 %v2935_v22, %v278_v24  ;;  %v1054_v15 = vadd.f32 %v2939_v40, %v302_v61  ;;  %v280_v40 = vld [vmem:[#allocation2 + $0x220] sm:$0xff] }
 0x123   :  { %v1225_v13 = vld [vmem:[#allocation2 + $0x208] sm:$0xff]  ;;  %1565 = vst.msk [vmem:[%s3183_s3 + $0x40] sm:$0xf] %vm1548_vm4, %v1468_v31  ;;  %v1540_v44 = vpack.c.bf16 %v1444_v9, %v1444_v9  ;;  %v1397_v26 = vmax.f32 %v1301_v42, 0.0  ;;  %v983_v19 = vadd.f32 %v2954_v50, %v231_v62  ;;  %v1007_v4 = vadd.f32 %v831_v25, %v255_v38 }
 0x124   :  { %v1325_v14 = vadd.f32 %v2821_v27, %v1225_v13  ;;  %1589 = vst.msk [vmem:[%s3183_s3 + $0xa0] sm:$0xf] %vm1548_vm4, %v1492_v37  ;;  %v1469_v30 = vpack.c.bf16 %v1373_v1, %v1373_v1 }
 0x125   :  { %1613 = vst.msk [vmem:[%s3183_s3 + $0x100] sm:$0xf] %vm1548_vm4, %v1516_v47  ;;  %v1493_v36 = vpack.c.bf16 %v1397_v26, %v1397_v26 }
 0x126   :  { %v1421_v35 = vmax.f32 %v1325_v14, 0.0  ;;  %1637 = vst.msk [vmem:[%s3183_s3 + $0x160] sm:$0xf] %vm1548_vm4, %v1540_v44 }
 0x127   :  { %1566 = vst.msk [vmem:[%s3183_s3 + $0x44] sm:$0xf] %vm1548_vm4, %v1469_v30 }
 0x128   :  { %v1517_v28 = vpack.c.bf16 %v1421_v35, %v1421_v35  ;;  %1590 = vst.msk [vmem:[%s3183_s3 + $0xa4] sm:$0xf] %vm1548_vm4, %v1493_v36 }
 0x129   :  { %v891_v6 = vpop.f32.mrf.mxu2  ;;  %v951_v0 = vpop.f32.mrf.mxu3  ;;  %1150 = vst.msk [vmem:[#allocation2 + $0x2c8] sm:$0xff] %vm19_vm3, %v1053_v23 }
 0x12a   :  { %v774_v53 = vpop.f32.mrf.mxu0  ;;  %1614 = vst.msk [vmem:[%s3183_s3 + $0x104] sm:$0xf] %vm1548_vm4, %v1517_v28  ;;  %v834_v39 = vpop.f32.mrf.mxu1  ;;  %v1031_v22 = vadd.f32 %v891_v6, %v279_v63  ;;  %v1055_v20 = vadd.f32 %v951_v0, %v303_v3 }
 0x12b   :  { %1079 = vst.msk [vmem:[#allocation2 + $0x90] sm:$0xff] %vm19_vm3, %v982_v49  ;;  %v984_v45 = vadd.f32 %v774_v53, %v232_v46  ;;  %v1008_v50 = vadd.f32 %v834_v39, %v256_v43 }
 0x12c   :  { %1103 = vst.msk [vmem:[#allocation2 + $0x150] sm:$0xff] %vm19_vm3, %v1006_v33 }
 0x12d   :  { %1127 = vst.msk [vmem:[#allocation2 + $0x210] sm:$0xff] %vm19_vm3, %v1030_v52 }
 0x12e   :  { %1151 = vst.msk [vmem:[#allocation2 + $0x2d0] sm:$0xff] %vm19_vm3, %v1054_v15 }
 0x12f   :  { %1080 = vst.msk [vmem:[#allocation2 + $0x98] sm:$0xff] %vm19_vm3, %v983_v19 }
 0x130   :  { %1104 = vst.msk [vmem:[#allocation2 + $0x158] sm:$0xff] %vm19_vm3, %v1007_v4  ;;  %v1249_v54 = vld [vmem:[#allocation2 + $0x2c8] sm:$0xff] }
 0x131   :  { %v894_v32 = vpop.f32.mrf.mxu2  ;;  %v954_v41 = vpop.f32.mrf.mxu3  ;;  %1128 = vst.msk [vmem:[#allocation2 + $0x218] sm:$0xff] %vm19_vm3, %v1031_v22  ;;  %v1349_v56 = vadd.f32 %v2821_v27, %v1249_v54  ;;  %v281_v54 = vld [vmem:[#allocation2 + $0x228] sm:$0xff] }
 0x132   :  { %v776_v51 = vpop.f32.mrf.mxu0  ;;  %v1032_v55 = vadd.f32 %v894_v32, %v280_v40  ;;  %v1178_v57 = vld [vmem:[#allocation2 + $0x90] sm:$0xff]  ;;  %1152 = vst.msk [vmem:[#allocation2 + $0x2d8] sm:$0xff] %vm19_vm3, %v1055_v20  ;;  %v1056_v12 = vadd.f32 %v954_v41, %v304_v60  ;;  %v3033_v17 = vpop.f32.mrf.mxu1  ;;  %v257_v60 = vld [vmem:[#allocation2 + $0x168] sm:$0xff] }
 0x133   :  { %v1278_v58 = vadd.f32 %v2821_v27, %v1178_v57  ;;  %v1202_v16 = vld [vmem:[#allocation2 + $0x150] sm:$0xff]  ;;  %1081 = vst.msk [vmem:[#allocation2 + $0xa0] sm:$0xff] %vm19_vm3, %v984_v45  ;;  %v985_v59 = vadd.f32 %v776_v51, %v233_v10  ;;  %v1445_v25 = vmax.f32 %v1349_v56, 0.0  ;;  %v305_v57 = vld [vmem:[#allocation2 + $0x2e8] sm:$0xff] }
 0x134   :  { %v1302_v2 = vadd.f32 %v2821_v27, %v1202_v16  ;;  %v1226_v11 = vld [vmem:[#allocation2 + $0x210] sm:$0xff]  ;;  %1105 = vst.msk [vmem:[#allocation2 + $0x160] sm:$0xff] %vm19_vm3, %v1008_v50 }
 0x135   :  { %v1374_v5 = vmax.f32 %v1278_v58, 0.0  ;;  %v1326_v6 = vadd.f32 %v2821_v27, %v1226_v11  ;;  %v1250_v31 = vld [vmem:[#allocation2 + $0x2d0] sm:$0xff]  ;;  %1129 = vst.msk [vmem:[#allocation2 + $0x220] sm:$0xff] %vm19_vm3, %v1032_v55  ;;  %v1541_v8 = vpack.c.bf16 %v1445_v25, %v1445_v25  ;;  %v1009_v58 = vadd.f32 %v3033_v17, %v257_v60 }
 0x136   :  { %v1398_v7 = vmax.f32 %v1302_v2, 0.0  ;;  %v1350_v0 = vadd.f32 %v2821_v27, %v1250_v31  ;;  %v1179_v37 = vld [vmem:[#allocation2 + $0x98] sm:$0xff]  ;;  %1153 = vst.msk [vmem:[#allocation2 + $0x2e0] sm:$0xff] %vm19_vm3, %v1056_v12  ;;  %v234_v16 = vld [vmem:[#allocation2 + $0xb0] sm:$0xff] }
 0x137   :  { %v1470_v9 = vpack.c.bf16 %v1374_v5, %v1374_v5  ;;  %v1422_v42 = vmax.f32 %v1326_v6, 0.0  ;;  %v1279_v13 = vadd.f32 %v2821_v27, %v1179_v37  ;;  %v1203_v47 = vld [vmem:[#allocation2 + $0x158] sm:$0xff]  ;;  %1082 = vst.msk [vmem:[#allocation2 + $0xa8] sm:$0xff] %vm19_vm3, %v985_v59  ;;  %v258_v2 = vld [vmem:[#allocation2 + $0x170] sm:$0xff] }
 0x138   :  { %1638 = vst.msk [vmem:[%s3183_s3 + $0x164] sm:$0xf] %vm1548_vm4, %v1541_v8  ;;  %v1494_v1 = vpack.c.bf16 %v1398_v7, %v1398_v7  ;;  %v1446_v14 = vmax.f32 %v1350_v0, 0.0  ;;  %v1303_v29 = vadd.f32 %v2821_v27, %v1203_v47  ;;  %v1227_v44 = vld [vmem:[#allocation2 + $0x218] sm:$0xff]  ;;  %v282_v5 = vld [vmem:[#allocation2 + $0x230] sm:$0xff] }
 0x139   :  { %v3037_v34 = vpop.f32.mrf.mxu2  ;;  %v3041_v48 = vpop.f32.mrf.mxu3  ;;  %1567 = vst.msk [vmem:[%s3183_s3 + $0x48] sm:$0xf] %vm1548_vm4, %v1470_v9  ;;  %v1518_v26 = vpack.c.bf16 %v1422_v42, %v1422_v42  ;;  %v1375_v18 = vmax.f32 %v1279_v13, 0.0  ;;  %v1327_v30 = vadd.f32 %v2821_v27, %v1227_v44  ;;  %v1251_v35 = vld [vmem:[#allocation2 + $0x2d8] sm:$0xff]  ;;  %v306_v6 = vld [vmem:[#allocation2 + $0x2f0] sm:$0xff] }
 0x13a   :  { %1591 = vst.msk [vmem:[%s3183_s3 + $0xa8] sm:$0xf] %vm1548_vm4, %v1494_v1  ;;  %v1542_v21 = vpack.c.bf16 %v1446_v14, %v1446_v14  ;;  %v1399_v36 = vmax.f32 %v1303_v29, 0.0  ;;  %v1351_v23 = vadd.f32 %v2821_v27, %v1251_v35  ;;  %v1180_v24 = vld [vmem:[#allocation2 + $0xa0] sm:$0xff]  ;;  %v779_v39 = vpop.f32.mrf.mxu0  ;;  %v839_v3 = vpop.f32.mrf.mxu1  ;;  %v1033_v25 = vadd.f32 %v3037_v34, %v281_v54  ;;  %v235_v34 = vld [vmem:[#allocation2 + $0xb8] sm:$0xff] }
 0x13b   :  { %1615 = vst.msk [vmem:[%s3183_s3 + $0x108] sm:$0xf] %vm1548_vm4, %v1518_v26  ;;  %v1471_v53 = vpack.c.bf16 %v1375_v18, %v1375_v18  ;;  %v1423_v28 = vmax.f32 %v1327_v30, 0.0  ;;  %v1280_v49 = vadd.f32 %v2821_v27, %v1180_v24  ;;  %v1204_v61 = vld [vmem:[#allocation2 + $0x160] sm:$0xff]  ;;  %v1057_v11 = vadd.f32 %v3041_v48, %v305_v57  ;;  %v259_v0 = vld [vmem:[#allocation2 + $0x178] sm:$0xff] }
 0x13c   :  { %1639 = vst.msk [vmem:[%s3183_s3 + $0x168] sm:$0xf] %vm1548_vm4, %v1542_v21  ;;  %v1495_v33 = vpack.c.bf16 %v1399_v36, %v1399_v36  ;;  %v1447_v62 = vmax.f32 %v1351_v23, 0.0  ;;  %v1304_v52 = vadd.f32 %v2821_v27, %v1204_v61  ;;  %v1228_v38 = vld [vmem:[#allocation2 + $0x220] sm:$0xff]  ;;  %v986_v17 = vadd.f32 %v779_v39, %v234_v16  ;;  %v283_v9 = vld [vmem:[#allocation2 + $0x238] sm:$0xff] }
 0x13d   :  { %1568 = vst.msk [vmem:[%s3183_s3 + $0x4c] sm:$0xf] %vm1548_vm4, %v1471_v53  ;;  %v1519_v15 = vpack.c.bf16 %v1423_v28, %v1423_v28  ;;  %v1376_v63 = vmax.f32 %v1280_v49, 0.0  ;;  %v1328_v32 = vadd.f32 %v2821_v27, %v1228_v38  ;;  %v1252_v19 = vld [vmem:[#allocation2 + $0x2e0] sm:$0xff]  ;;  %v1010_v31 = vadd.f32 %v839_v3, %v258_v2  ;;  %v307_v47 = vld [vmem:[#allocation2 + $0x2f8] sm:$0xff] }
 0x13e   :  { %1592 = vst.msk [vmem:[%s3183_s3 + $0xac] sm:$0xf] %vm1548_vm4, %v1495_v33  ;;  %v1543_v41 = vpack.c.bf16 %v1447_v62, %v1447_v62  ;;  %v1400_v4 = vmax.f32 %v1304_v52, 0.0  ;;  %v1352_v46 = vadd.f32 %v2821_v27, %v1252_v19  ;;  %v1181_v22 = vld [vmem:[#allocation2 + $0xa8] sm:$0xff] }
 0x13f   :  { %1616 = vst.msk [vmem:[%s3183_s3 + $0x10c] sm:$0xf] %vm1548_vm4, %v1519_v15  ;;  %v1472_v20 = vpack.c.bf16 %v1376_v63, %v1376_v63  ;;  %v1424_v40 = vmax.f32 %v1328_v32, 0.0  ;;  %v1281_v45 = vadd.f32 %v2821_v27, %v1181_v22 }
 0x140   :  { %1640 = vst.msk [vmem:[%s3183_s3 + $0x16c] sm:$0xf] %vm1548_vm4, %v1543_v41  ;;  %v1496_v10 = vpack.c.bf16 %v1400_v4, %v1400_v4  ;;  %v1448_v51 = vmax.f32 %v1352_v46, 0.0 }
 0x141   :  { %v899_v43 = vpop.f32.mrf.mxu2  ;;  %v959_v50 = vpop.f32.mrf.mxu3  ;;  %1569 = vst.msk [vmem:[%s3183_s3 + $0x50] sm:$0xf] %vm1548_vm4, %v1472_v20  ;;  %v1520_v55 = vpack.c.bf16 %v1424_v40, %v1424_v40  ;;  %v1377_v56 = vmax.f32 %v1281_v45, 0.0 }
 0x142   :  { %1593 = vst.msk [vmem:[%s3183_s3 + $0xb0] sm:$0xf] %vm1548_vm4, %v1496_v10  ;;  %v1544_v12 = vpack.c.bf16 %v1448_v51, %v1448_v51  ;;  %v781_v8 = vpop.f32.mrf.mxu0  ;;  %v1034_v7 = vadd.f32 %v899_v43, %v282_v5  ;;  %v841_v37 = vpop.f32.mrf.mxu1  ;;  %v1058_v48 = vadd.f32 %v959_v50, %v306_v6 }
 0x143   :  { %1617 = vst.msk [vmem:[%s3183_s3 + $0x110] sm:$0xf] %vm1548_vm4, %v1520_v55  ;;  %v1473_v59 = vpack.c.bf16 %v1377_v56, %v1377_v56  ;;  %v987_v13 = vadd.f32 %v781_v8, %v235_v34  ;;  %v1011_v14 = vadd.f32 %v841_v37, %v259_v0 }
 0x144   :  { %1641 = vst.msk [vmem:[%s3183_s3 + $0x170] sm:$0xf] %vm1548_vm4, %v1544_v12 }
 0x145   :  { %1570 = vst.msk [vmem:[%s3183_s3 + $0x54] sm:$0xf] %vm1548_vm4, %v1473_v59 }
 0x146   :  { %1106 = vst.msk [vmem:[#allocation2 + $0x168] sm:$0xff] %vm19_vm3, %v1009_v58 }
 0x147   :  { %1130 = vst.msk [vmem:[#allocation2 + $0x228] sm:$0xff] %vm19_vm3, %v1033_v25 }
 0x148   :  { %1154 = vst.msk [vmem:[#allocation2 + $0x2e8] sm:$0xff] %vm19_vm3, %v1057_v11 }
 0x149   :  { %v901_v42 = vpop.f32.mrf.mxu2  ;;  %1083 = vst.msk [vmem:[#allocation2 + $0xb0] sm:$0xff] %vm19_vm3, %v986_v17  ;;  %v961_v1 = vpop.f32.mrf.mxu3 }
 0x14a   :  { %1107 = vst.msk [vmem:[#allocation2 + $0x170] sm:$0xff] %vm19_vm3, %v1010_v31  ;;  %v1035_v29 = vadd.f32 %v901_v42, %v283_v9  ;;  %v1059_v44 = vadd.f32 %v961_v1, %v307_v47 }
 0x14b   :  { %1131 = vst.msk [vmem:[#allocation2 + $0x230] sm:$0xff] %vm19_vm3, %v1034_v7 }
 0x14c   :  { %1155 = vst.msk [vmem:[#allocation2 + $0x2f0] sm:$0xff] %vm19_vm3, %v1058_v48 }
 0x14d   :  { %v1205_v26 = vld [vmem:[#allocation2 + $0x168] sm:$0xff]  ;;  %1084 = vst.msk [vmem:[#allocation2 + $0xb8] sm:$0xff] %vm19_vm3, %v987_v13 }
 0x14e   :  { %v1305_v18 = vadd.f32 %v2821_v27, %v1205_v26  ;;  %v1229_v30 = vld [vmem:[#allocation2 + $0x228] sm:$0xff]  ;;  %1108 = vst.msk [vmem:[#allocation2 + $0x178] sm:$0xff] %vm19_vm3, %v1011_v14 }
 0x14f   :  { %v1329_v35 = vadd.f32 %v2821_v27, %v1229_v30  ;;  %v1253_v21 = vld [vmem:[#allocation2 + $0x2e8] sm:$0xff]  ;;  %1132 = vst.msk [vmem:[#allocation2 + $0x238] sm:$0xff] %vm19_vm3, %v1035_v29 }
 0x150   :  { %v1401_v36 = vmax.f32 %v1305_v18, 0.0  ;;  %v1353_v23 = vadd.f32 %v2821_v27, %v1253_v21  ;;  %v1182_v24 = vld [vmem:[#allocation2 + $0xb0] sm:$0xff]  ;;  %1156 = vst.msk [vmem:[#allocation2 + $0x2f8] sm:$0xff] %vm19_vm3, %v1059_v44 }
 0x151   :  { %v1425_v53 = vmax.f32 %v1329_v35, 0.0  ;;  %v1282_v28 = vadd.f32 %v2821_v27, %v1182_v24  ;;  %v1206_v49 = vld [vmem:[#allocation2 + $0x170] sm:$0xff] }
 0x152   :  { %v1497_v61 = vpack.c.bf16 %v1401_v36, %v1401_v36  ;;  %v1449_v33 = vmax.f32 %v1353_v23, 0.0  ;;  %v1306_v62 = vadd.f32 %v2821_v27, %v1206_v49  ;;  %v1230_v52 = vld [vmem:[#allocation2 + $0x230] sm:$0xff] }
 0x153   :  { %v1521_v38 = vpack.c.bf16 %v1425_v53, %v1425_v53  ;;  %v1378_v39 = vmax.f32 %v1282_v28, 0.0  ;;  %v1330_v15 = vadd.f32 %v2821_v27, %v1230_v52  ;;  %v1254_v63 = vld [vmem:[#allocation2 + $0x2f0] sm:$0xff] }
 0x154   :  { %1594 = vst.msk [vmem:[%s3183_s3 + $0xb4] sm:$0xf] %vm1548_vm4, %v1497_v61  ;;  %v1545_v32 = vpack.c.bf16 %v1449_v33, %v1449_v33  ;;  %v1402_v19 = vmax.f32 %v1306_v62, 0.0  ;;  %v1354_v3 = vadd.f32 %v2821_v27, %v1254_v63  ;;  %v1183_v41 = vld [vmem:[#allocation2 + $0xb8] sm:$0xff] }
 0x155   :  { %1618 = vst.msk [vmem:[%s3183_s3 + $0x114] sm:$0xf] %vm1548_vm4, %v1521_v38  ;;  %v1474_v4 = vpack.c.bf16 %v1378_v39, %v1378_v39  ;;  %v1426_v46 = vmax.f32 %v1330_v15, 0.0  ;;  %v1283_v22 = vadd.f32 %v2821_v27, %v1183_v41  ;;  %v1207_v43 = vld [vmem:[#allocation2 + $0x178] sm:$0xff] }
 0x156   :  { %1642 = vst.msk [vmem:[%s3183_s3 + $0x174] sm:$0xf] %vm1548_vm4, %v1545_v32  ;;  %v1498_v20 = vpack.c.bf16 %v1402_v19, %v1402_v19  ;;  %v1450_v40 = vmax.f32 %v1354_v3, 0.0  ;;  %v1307_v45 = vadd.f32 %v2821_v27, %v1207_v43  ;;  %v1231_v60 = vld [vmem:[#allocation2 + $0x238] sm:$0xff] }
 0x157   :  { %1571 = vst.msk [vmem:[%s3183_s3 + $0x58] sm:$0xf] %vm1548_vm4, %v1474_v4  ;;  %v1522_v50 = vpack.c.bf16 %v1426_v46, %v1426_v46  ;;  %v1379_v10 = vmax.f32 %v1283_v22, 0.0  ;;  %v1331_v51 = vadd.f32 %v2821_v27, %v1231_v60  ;;  %v1255_v54 = vld [vmem:[#allocation2 + $0x2f8] sm:$0xff] }
 0x158   :  { %1595 = vst.msk [vmem:[%s3183_s3 + $0xb8] sm:$0xf] %vm1548_vm4, %v1498_v20  ;;  %v1546_v55 = vpack.c.bf16 %v1450_v40, %v1450_v40  ;;  %v1403_v56 = vmax.f32 %v1307_v45, 0.0  ;;  %v1355_v57 = vadd.f32 %v2821_v27, %v1255_v54 }
 0x159   :  { %1619 = vst.msk [vmem:[%s3183_s3 + $0x118] sm:$0xf] %vm1548_vm4, %v1522_v50  ;;  %v1475_v12 = vpack.c.bf16 %v1379_v10, %v1379_v10  ;;  %v1427_v58 = vmax.f32 %v1331_v51, 0.0 }
 0x15a   :  { %1643 = vst.msk [vmem:[%s3183_s3 + $0x178] sm:$0xf] %vm1548_vm4, %v1546_v55  ;;  %v1499_v16 = vpack.c.bf16 %v1403_v56, %v1403_v56  ;;  %v1451_v59 = vmax.f32 %v1355_v57, 0.0 }
 0x15b   :  { %1572 = vst.msk [vmem:[%s3183_s3 + $0x5c] sm:$0xf] %vm1548_vm4, %v1475_v12  ;;  %v1523_v27 = vpack.c.bf16 %v1427_v58, %v1427_v58 }
 0x15c   :  { %1596 = vst.msk [vmem:[%s3183_s3 + $0xbc] sm:$0xf] %vm1548_vm4, %v1499_v16  ;;  %v1547_v25 = vpack.c.bf16 %v1451_v59, %v1451_v59 }
 0x15d   :  { %1620 = vst.msk [vmem:[%s3183_s3 + $0x11c] sm:$0xf] %vm1548_vm4, %v1523_v27 }
 0x15e   :  { %1644 = vst.msk [vmem:[%s3183_s3 + $0x17c] sm:$0xf] %vm1548_vm4, %v1547_v25 }

// kernel: encoder_forward.8
= control target key start
LH: loop header
LB: loop body
LE: loop exit
PB: predicated region body
PF: predicated region fallthrough
CT: control target
= control target key end

     0   :  { %v220_v0 = vmov 0.0   ;;  %s290_s1 = inlined_call_operand.vmem [shape: f32[1,128], index: 1, kind: output, shape index: {0}]   ;;  %s291_s2 = inlined_call_operand.vmem [shape: f32[1,128], index: 2, kind: output, shape index: {1}]   ;;  %s292_s0 = inlined_call_operand.vmem [shape: bf16[192,128], index: 0, kind: input, shape index: {}]  }
   0x1   :  { %14 = vst [vmem:[%s290_s1] sm:$0x1] %v220_v0  ;;  %v161_v1 = vld [vmem:[%s292_s0] sm:$0xff]   ;;  %v208_v2 = vld [vmem:[%s292_s0 + $0x8] sm:$0xff]   ;;  %v209_v6 = vld [vmem:[%s292_s0 + $0x10] sm:$0xff]  }
   0x2   :  { %15 = vst [vmem:[%s291_s2] sm:$0x1] %v220_v0  ;;  %v162_v3 = vunpack.c.l.bf16 %v161_v1  ;;  %v163_v4 = vunpack.c.h.bf16 %v161_v1  ;;  %v166_v5 = vunpack.c.l.bf16 %v208_v2  ;;  %v167_v8 = vunpack.c.h.bf16 %v208_v2  ;;  %v210_v14 = vld [vmem:[%s292_s0 + $0x18] sm:$0xff]   ;;  %v211_v23 = vld [vmem:[%s292_s0 + $0x20] sm:$0xff]   ;;  %v212_v32 = vld [vmem:[%s292_s0 + $0x28] sm:$0xff]  }
   0x3   :  { %v170_v12 = vunpack.c.l.bf16 %v209_v6  ;;  %v171_v16 = vunpack.c.h.bf16 %v209_v6  ;;  %v174_v20 = vunpack.c.l.bf16 %v210_v14  ;;  %v175_v25 = vunpack.c.h.bf16 %v210_v14  ;;  %v213_v41 = vld [vmem:[%s292_s0 + $0x30] sm:$0xff]   ;;  %v214_v50 = vld [vmem:[%s292_s0 + $0x38] sm:$0xff]   ;;  %v215_v59 = vld [vmem:[%s292_s0 + $0x40] sm:$0xff]  }
   0x4   :  { %v65_v7 = vadd.f32 %v163_v4, %v162_v3  ;;  %v97_v9 = vmul.f32 %v162_v3, %v162_v3  ;;  %v98_v10 = vmul.f32 %v163_v4, %v163_v4  ;;  %v99_v13 = vmul.f32 %v166_v5, %v166_v5  ;;  %v216_v4 = vld [vmem:[%s292_s0 + $0x48] sm:$0xff]  }
   0x5   :  { %v100_v17 = vmul.f32 %v167_v8, %v167_v8  ;;  %v101_v21 = vmul.f32 %v170_v12, %v170_v12  ;;  %v102_v26 = vmul.f32 %v171_v16, %v171_v16  ;;  %v178_v29 = vunpack.c.l.bf16 %v211_v23 }
   0x6   :  { %v66_v11 = vadd.f32 %v166_v5, %v65_v7  ;;  %v121_v18 = vadd.f32 %v98_v10, %v97_v9  ;;  %v103_v30 = vmul.f32 %v174_v20, %v174_v20  ;;  %v179_v34 = vunpack.c.h.bf16 %v211_v23 }
   0x7   :  { %v104_v35 = vmul.f32 %v175_v25, %v175_v25  ;;  %v182_v38 = vunpack.c.l.bf16 %v212_v32  ;;  %v105_v39 = vmul.f32 %v178_v29, %v178_v29  ;;  %v183_v43 = vunpack.c.h.bf16 %v212_v32 }
   0x8   :  { %v67_v15 = vadd.f32 %v167_v8, %v66_v11  ;;  %v122_v22 = vadd.f32 %v121_v18, %v99_v13  ;;  %v106_v44 = vmul.f32 %v179_v34, %v179_v34  ;;  %v186_v47 = vunpack.c.l.bf16 %v213_v41  ;;  %v217_v13 = vld [vmem:[%s292_s0 + $0x50] sm:$0xff]  }
   0x9   :  { %v107_v48 = vmul.f32 %v182_v38, %v182_v38  ;;  %v187_v52 = vunpack.c.h.bf16 %v213_v41  ;;  %v108_v53 = vmul.f32 %v183_v43, %v183_v43  ;;  %v190_v56 = vunpack.c.l.bf16 %v214_v50 }
   0xa   :  { %v68_v19 = vadd.f32 %v170_v12, %v67_v15  ;;  %v123_v27 = vadd.f32 %v122_v22, %v100_v17  ;;  %v109_v57 = vmul.f32 %v186_v47, %v186_v47  ;;  %v191_v61 = vunpack.c.h.bf16 %v214_v50  ;;  %v218_v22 = vld [vmem:[%s292_s0 + $0x58] sm:$0xff]   ;;  %v64_v50 = vld [vmem:[%s290_s1] sm:$0x1] }
   0xb   :  { %v110_v62 = vmul.f32 %v187_v52, %v187_v52  ;;  %v194_v1 = vunpack.c.l.bf16 %v215_v59  ;;  %v111_v2 = vmul.f32 %v190_v56, %v190_v56  ;;  %v195_v6 = vunpack.c.h.bf16 %v215_v59 }
   0xc   :  { %v69_v24 = vadd.f32 %v171_v16, %v68_v19  ;;  %v124_v31 = vadd.f32 %v123_v27, %v101_v21  ;;  %v112_v7 = vmul.f32 %v191_v61, %v191_v61  ;;  %v198_v10 = vunpack.c.l.bf16 %v216_v4 }
   0xd   :  { %v113_v11 = vmul.f32 %v194_v1, %v194_v1  ;;  %v199_v15 = vunpack.c.h.bf16 %v216_v4  ;;  %v114_v16 = vmul.f32 %v195_v6, %v195_v6  ;;  %v202_v19 = vunpack.c.l.bf16 %v217_v13 }
   0xe   :  { %v70_v28 = vadd.f32 %v174_v20, %v69_v24  ;;  %v125_v36 = vadd.f32 %v124_v31, %v102_v26  ;;  %v115_v20 = vmul.f32 %v198_v10, %v198_v10  ;;  %v203_v24 = vunpack.c.h.bf16 %v217_v13 }
   0xf   :  { %v207_v32 = vunpack.c.h.bf16 %v218_v22 }
  0x10   :  { %v71_v33 = vadd.f32 %v175_v25, %v70_v28  ;;  %v126_v40 = vadd.f32 %v125_v36, %v103_v30  ;;  %v116_v25 = vmul.f32 %v199_v15, %v199_v15  ;;  %v206_v28 = vunpack.c.l.bf16 %v218_v22 }
  0x12   :  { %v72_v37 = vadd.f32 %v178_v29, %v71_v33  ;;  %v127_v45 = vadd.f32 %v126_v40, %v104_v35  ;;  %v117_v29 = vmul.f32 %v202_v19, %v202_v19  ;;  %v118_v33 = vmul.f32 %v203_v24, %v203_v24 }
  0x13   :  { %v119_v36 = vmul.f32 %v206_v28, %v206_v28 }
  0x14   :  { %v73_v42 = vadd.f32 %v179_v34, %v72_v37  ;;  %v128_v49 = vadd.f32 %v127_v45, %v105_v39  ;;  %v120_v39 = vmul.f32 %v207_v32, %v207_v32 }
  0x16   :  { %v74_v46 = vadd.f32 %v182_v38, %v73_v42  ;;  %v129_v54 = vadd.f32 %v128_v49, %v106_v44 }
  0x18   :  { %v75_v51 = vadd.f32 %v183_v43, %v74_v46  ;;  %v130_v58 = vadd.f32 %v129_v54, %v107_v48 }
  0x1a   :  { %v76_v55 = vadd.f32 %v186_v47, %v75_v51  ;;  %v131_v63 = vadd.f32 %v130_v58, %v108_v53 }
  0x1c   :  { %v77_v60 = vadd.f32 %v187_v52, %v76_v55  ;;  %v132_v3 = vadd.f32 %v131_v63, %v109_v57 }
  0x1e   :  { %v78_v0 = vadd.f32 %v190_v56, %v77_v60  ;;  %v133_v8 = vadd.f32 %v132_v3, %v110_v62  ;;  %v96_v56 = vld [vmem:[%s291_s2] sm:$0x1] }
  0x20   :  { %v79_v5 = vadd.f32 %v191_v61, %v78_v0  ;;  %v134_v12 = vadd.f32 %v133_v8, %v111_v2 }
  0x22   :  { %v80_v9 = vadd.f32 %v194_v1, %v79_v5  ;;  %v135_v17 = vadd.f32 %v134_v12, %v112_v7 }
  0x24   :  { %v81_v14 = vadd.f32 %v195_v6, %v80_v9  ;;  %v136_v21 = vadd.f32 %v135_v17, %v113_v11 }
  0x26   :  { %v82_v18 = vadd.f32 %v198_v10, %v81_v14  ;;  %v137_v26 = vadd.f32 %v136_v21, %v114_v16 }
  0x28   :  { %v83_v23 = vadd.f32 %v199_v15, %v82_v18  ;;  %v138_v30 = vadd.f32 %v137_v26, %v115_v20 }
  0x2a   :  { %v84_v27 = vadd.f32 %v202_v19, %v83_v23  ;;  %v139_v34 = vadd.f32 %v138_v30, %v116_v25 }
  0x2c   :  { %v85_v31 = vadd.f32 %v203_v24, %v84_v27  ;;  %v140_v37 = vadd.f32 %v139_v34, %v117_v29 }
  0x2e   :  { %v86_v35 = vadd.f32 %v206_v28, %v85_v31  ;;  %v141_v40 = vadd.f32 %v140_v37, %v118_v33 }
  0x30   :  { %v87_v38 = vadd.f32 %v207_v32, %v86_v35  ;;  %v142_v42 = vadd.f32 %v141_v40, %v119_v36 }
  0x32   :  { %v88_v41 = vrot.slane %v87_v38, 4  ;;  %v143_v44 = vadd.f32 %v142_v42, %v120_v39 }
  0x34   :  { %v89_v43 = vadd.f32 %v88_v41, %v87_v38  ;;  %v144_v46 = vrot.slane %v143_v44, 4 }
  0x36   :  { %v90_v45 = vrot.slane %v89_v43, 2  ;;  %v145_v48 = vadd.f32 %v144_v46, %v143_v44 }
  0x38   :  { %v91_v47 = vadd.f32 %v90_v45, %v89_v43  ;;  %v146_v51 = vrot.slane %v145_v48, 2 }
  0x3a   :  { %v92_v49 = vrot.slane %v91_v47, 1  ;;  %v147_v53 = vadd.f32 %v146_v51, %v145_v48 }
  0x3c   :  { %v93_v52 = vadd.f32 %v92_v49, %v91_v47  ;;  %v148_v55 = vrot.slane %v147_v53, 1 }
  0x3e   :  { %v94_v54 = vadd.f32 %v93_v52, %v64_v50  ;;  %v149_v57 = vadd.f32 %v148_v55, %v147_v53 }
  0x40   :  { %95 = vst [vmem:[%s290_s1] sm:$0x1] %v94_v54  ;;  %v150_v58 = vadd.f32 %v149_v57, %v96_v56 }
  0x42   :  { %151 = vst [vmem:[%s291_s2] sm:$0x1] %v150_v58 }

// kernel: encoder_forward.7
= control target key start
LH: loop header
LB: loop body
LE: loop exit
PB: predicated region body
PF: predicated region fallthrough
CT: control target
= control target key end

     0   :  { %vm439_vm0 = vcmask 261120   ;;  %s1603_s1 = inlined_call_operand.vmem [shape: bf16[288,128], index: 1, kind: input, shape index: {}]   ;;  %s1604_s0 = inlined_call_operand.vmem [shape: bf16[192,288], index: 0, kind: input, shape index: {}]   ;;  %s1605_s2 = inlined_call_operand.vmem [shape: f32[1,128], index: 2, kind: input, shape index: {}]   ;;  %s1606_s3 = inlined_call_operand.vmem [shape: bf16[192,128], index: 3, kind: output, shape index: {}]  }
   0x1   :  { %v1109_v0 = vld [vmem:[%s1603_s1 + $0x38] sm:$0xff]  ;;  %v1239_v2 = vld [vmem:[%s1603_s1 + $0x88] sm:$0xff]  ;;  %v1108_v3 = vld [vmem:[%s1603_s1 + $0x30] sm:$0xff] }
   0x2   :  { %v1117_v1 = vld [vmem:[%s1603_s1 + $0x78] sm:$0xff]  ;;  %476 = vmatpush.bf16.msra.mxu0 %v1109_v0  ;;  %1191 = vmatpush.bf16.msra.mxu3 %v1109_v0  ;;  %v1116_v4 = vld [vmem:[%s1603_s1 + $0x70] sm:$0xff]  ;;  %v1251_v5 = vld [vmem:[%s1603_s1 + $0x80] sm:$0xff] }
   0x3   :  { %545 = vmatpush.bf16.msra.mxu1 %v1117_v1  ;;  %620 = vmatpush.bf16.msra.mxu2 %v1239_v2  ;;  %v848_v6 = vld [vmem:[%s1604_s0 + $0x8] sm:$0xf]  ;;  %v1068_v7 = vld [vmem:[%s1604_s0 + $0x10] sm:$0xf0]  ;;  %v1106_v11 = vld [vmem:[%s1603_s1 + $0x20] sm:$0xff] }
   0x4   :  { %v849_v8 = vor.u32 %v1068_v7, %v848_v6  ;;  %v1107_v9 = vld [vmem:[%s1603_s1 + $0x28] sm:$0xff]  ;;  %v1114_v12 = vld [vmem:[%s1603_s1 + $0x60] sm:$0xff]  ;;  %v1105_v13 = vld [vmem:[%s1603_s1 + $0x18] sm:$0xff] }
   0x5   :  { %v1115_v10 = vld [vmem:[%s1603_s1 + $0x68] sm:$0xff]  ;;  %v1113_v14 = vld [vmem:[%s1603_s1 + $0x58] sm:$0xff]  ;;  %v1104_v15 = vld [vmem:[%s1603_s1 + $0x10] sm:$0xff] }
   0x6   :  { %477 = vmatpush.bf16.msra.mxu0 %v1108_v3  ;;  %1192 = vmatpush.bf16.msra.mxu3 %v1108_v3  ;;  %v1112_v16 = vld [vmem:[%s1603_s1 + $0x50] sm:$0xff]  ;;  %v860_v17 = vld [vmem:[%s1604_s0 + $0x20] sm:$0xf]  ;;  %v1071_v18 = vld [vmem:[%s1604_s0 + $0x28] sm:$0xf0] }
   0x7   :  { %546 = vmatpush.bf16.msra.mxu1 %v1116_v4  ;;  %621 = vmatpush.bf16.msra.mxu2 %v1251_v5  ;;  %v861_v19 = vor.u32 %v1071_v18, %v860_v17  ;;  %v1103_v20 = vld [vmem:[%s1603_s1 + $0x8] sm:$0xff]  ;;  %v1102_v22 = vld [vmem:[%s1603_s1] sm:$0xff]  ;;  %v948_v26 = vld [vmem:[%s1604_s0 + $0xd8] sm:$0xf] }
   0x8   :  { %v1111_v21 = vld [vmem:[%s1603_s1 + $0x48] sm:$0xff]  ;;  %v1110_v23 = vld [vmem:[%s1603_s1 + $0x40] sm:$0xff]  ;;  %v842_v29 = vld [vmem:[%s1604_s0 + $0xc] sm:$0xf0] }
   0x9   :  { %v840_v24 = vld [vmem:[%s1604_s0] sm:$0xf]  ;;  %v1067_v25 = vld [vmem:[%s1604_s0 + $0x8] sm:$0xf0]  ;;  %v1094_v27 = vld [vmem:[%s1604_s0 + $0xe0] sm:$0xf0] }
   0xa   :  { %1054 = vmatmul.msk.bf16.vlgmr.msra.gmra.mxu2 %vm439_vm0, %v849_v8  ;;  %478 = vmatpush.bf16.msra.mxu0 %v1107_v9  ;;  %v1066_v28 = vld [vmem:[%s1604_s0 + $0x4] sm:$0xf]  ;;  %v841_v30 = vor.u32 %v1067_v25, %v840_v24  ;;  %v949_v31 = vor.u32 %v1094_v27, %v948_v26  ;;  %v872_v33 = vld [vmem:[%s1604_s0 + $0x38] sm:$0xf]  ;;  %v960_v38 = vld [vmem:[%s1604_s0 + $0xf0] sm:$0xf] }
   0xb   :  { %1193 = vmatpush.bf16.msra.mxu3 %v1107_v9  ;;  %547 = vmatpush.bf16.msra.mxu1 %v1115_v10  ;;  %v845_v32 = vor.u32 %v1066_v28, %v842_v29  ;;  %v1074_v34 = vld [vmem:[%s1604_s0 + $0x40] sm:$0xf0]  ;;  %v852_v36 = vld [vmem:[%s1604_s0 + $0x18] sm:$0xf]  ;;  %v1097_v39 = vld [vmem:[%s1604_s0 + $0xf8] sm:$0xf0] }
   0xc   :  { %v873_v35 = vor.u32 %v1074_v34, %v872_v33  ;;  %v1070_v37 = vld [vmem:[%s1604_s0 + $0x20] sm:$0xf0]  ;;  %v1069_v40 = vld [vmem:[%s1604_s0 + $0x1c] sm:$0xf]  ;;  %v854_v41 = vld [vmem:[%s1604_s0 + $0x24] sm:$0xf0]  ;;  %v961_v43 = vor.u32 %v1097_v39, %v960_v38 }
   0xd   :  { %v853_v42 = vor.u32 %v1070_v37, %v852_v36  ;;  %v857_v44 = vor.u32 %v1069_v40, %v854_v41  ;;  %v884_v45 = vld [vmem:[%s1604_s0 + $0x50] sm:$0xf]  ;;  %v1077_v46 = vld [vmem:[%s1604_s0 + $0x58] sm:$0xf0]  ;;  %v972_v50 = vld [vmem:[%s1604_s0 + $0x108] sm:$0xf] }
   0xe   :  { %479 = vmatpush.bf16.msra.mxu0 %v1106_v11  ;;  %v885_v47 = vor.u32 %v1077_v46, %v884_v45  ;;  %v864_v48 = vld [vmem:[%s1604_s0 + $0x30] sm:$0xf]  ;;  %v1073_v49 = vld [vmem:[%s1604_s0 + $0x38] sm:$0xf0]  ;;  %v1100_v51 = vld [vmem:[%s1604_s0 + $0x110] sm:$0xf0] }
   0xf   :  { %1194 = vmatpush.bf16.msra.mxu3 %v1106_v11  ;;  %548 = vmatpush.bf16.msra.mxu1 %v1114_v12  ;;  %v1072_v52 = vld [vmem:[%s1604_s0 + $0x34] sm:$0xf]  ;;  %v866_v53 = vld [vmem:[%s1604_s0 + $0x3c] sm:$0xf0]  ;;  %v865_v54 = vor.u32 %v1073_v49, %v864_v48  ;;  %v973_v55 = vor.u32 %v1100_v51, %v972_v50  ;;  %v896_v57 = vld [vmem:[%s1604_s0 + $0x68] sm:$0xf] }
  0x10   :  { %v869_v56 = vor.u32 %v1072_v52, %v866_v53  ;;  %v1080_v58 = vld [vmem:[%s1604_s0 + $0x70] sm:$0xf0]  ;;  %v876_v60 = vld [vmem:[%s1604_s0 + $0x48] sm:$0xf]  ;;  %v1075_v62 = vld [vmem:[%s1604_s0 + $0x4c] sm:$0xf] }
  0x11   :  { %v897_v59 = vor.u32 %v1080_v58, %v896_v57  ;;  %v1076_v61 = vld [vmem:[%s1604_s0 + $0x50] sm:$0xf0]  ;;  %v878_v63 = vld [vmem:[%s1604_s0 + $0x54] sm:$0xf0]  ;;  %v1093_v0 = vld [vmem:[%s1604_s0 + $0xdc] sm:$0xf] }
  0x12   :  { %480 = vmatpush.bf16.msra.mxu0 %v1105_v13  ;;  %v881_v3 = vor.u32 %v1075_v62, %v878_v63  ;;  %v1083_v6 = vld [vmem:[%s1604_s0 + $0x88] sm:$0xf0]  ;;  %v888_v8 = vld [vmem:[%s1604_s0 + $0x60] sm:$0xf]  ;;  %v890_v11 = vld [vmem:[%s1604_s0 + $0x6c] sm:$0xf0] }
  0x13   :  { %1195 = vmatpush.bf16.msra.mxu3 %v1105_v13  ;;  %549 = vmatpush.bf16.msra.mxu1 %v1113_v14  ;;  %v1079_v9 = vld [vmem:[%s1604_s0 + $0x68] sm:$0xf0]  ;;  %v962_v13 = vld [vmem:[%s1604_s0 + $0xfc] sm:$0xf0]  ;;  %v920_v17 = vld [vmem:[%s1604_s0 + $0x98] sm:$0xf] }
  0x14   :  { %v1086_v18 = vld [vmem:[%s1604_s0 + $0xa0] sm:$0xf0]  ;;  %v1099_v24 = vld [vmem:[%s1604_s0 + $0x10c] sm:$0xf]  ;;  %v974_v25 = vld [vmem:[%s1604_s0 + $0x114] sm:$0xf0] }
  0x15   :  { %v977_v28 = vor.u32 %v1099_v24, %v974_v25  ;;  %v932_v29 = vld [vmem:[%s1604_s0 + $0xb0] sm:$0xf]  ;;  %v1085_v33 = vld [vmem:[%s1604_s0 + $0x98] sm:$0xf0]  ;;  %v1084_v34 = vld [vmem:[%s1604_s0 + $0x94] sm:$0xf] }
  0x16   :  { %481 = vmatpush.bf16.msra.mxu0 %v1104_v15  ;;  %v980_v36 = vld [vmem:[%s1604_s0 + $0x110] sm:$0xf]  ;;  %v1101_v37 = vld [vmem:[%s1604_s0 + $0x118] sm:$0xf0]  ;;  %v944_v41 = vld [vmem:[%s1604_s0 + $0xc8] sm:$0xf] }
  0x17   :  { %1196 = vmatpush.bf16.msra.mxu3 %v1104_v15  ;;  %550 = vmatpush.bf16.msra.mxu1 %v1112_v16  ;;  %v981_v40 = vor.u32 %v1101_v37, %v980_v36  ;;  %v1088_v45 = vld [vmem:[%s1604_s0 + $0xb0] sm:$0xf0]  ;;  %v1087_v46 = vld [vmem:[%s1604_s0 + $0xac] sm:$0xf]  ;;  %v956_v51 = vld [vmem:[%s1604_s0 + $0xe0] sm:$0xf] }
  0x18   :  { %v1095_v52 = vld [vmem:[%s1604_s0 + $0xe8] sm:$0xf0]  ;;  %v1090_v57 = vld [vmem:[%s1604_s0 + $0xc4] sm:$0xf]  ;;  %v938_v58 = vld [vmem:[%s1604_s0 + $0xcc] sm:$0xf0] }
  0x19   :  { %v941_v62 = vor.u32 %v1090_v57, %v938_v58 }
  0x1a   :  { %1055 = vmatmul.msk.bf16.gmra.mxu2 %vm439_vm0, %v861_v19  ;;  %482 = vmatpush.bf16.msra.mxu0 %v1103_v20  ;;  %v921_v19 = vor.u32 %v1086_v18, %v920_v17 }
  0x1b   :  { %1197 = vmatpush.bf16.msra.mxu3 %v1103_v20  ;;  %551 = vmatpush.bf16.msra.mxu1 %v1111_v21  ;;  %v900_v20 = vld [vmem:[%s1604_s0 + $0x78] sm:$0xf] }
  0x1e   :  { %483 = vmatpush.bf16.msra.mxu0 %v1102_v22 }
  0x1f   :  { %1198 = vmatpush.bf16.msra.mxu3 %v1102_v22  ;;  %552 = vmatpush.bf16.msra.mxu1 %v1110_v23  ;;  %v1081_v22 = vld [vmem:[%s1604_s0 + $0x7c] sm:$0xf] }
  0x21   :  { %484 = vmatmul.bf16.vlgmr.msra.gmra.mxu0 %v841_v30  ;;  %v1089_v30 = vld [vmem:[%s1604_s0 + $0xb8] sm:$0xf0] }
  0x22   :  { %529 = vmatmul.bf16.vlgmr.msra.gmra.mxu3 %v949_v31  ;;  %553 = vmatmul.bf16.vlgmr.msra.gmra.mxu1 %v845_v32  ;;  %v933_v31 = vor.u32 %v1089_v30, %v932_v29  ;;  %v912_v32 = vld [vmem:[%s1604_s0 + $0x90] sm:$0xf] }
  0x23   :  { %1199 = vmatpush.bf16.msrb.mxu3 %v1117_v1  ;;  %v950_v1 = vld [vmem:[%s1604_s0 + $0xe4] sm:$0xf0]  ;;  %v913_v38 = vor.u32 %v1085_v33, %v912_v32 }
  0x27   :  { %1200 = vmatpush.bf16.msrb.mxu3 %v1116_v4  ;;  %v953_v4 = vor.u32 %v1093_v0, %v950_v1  ;;  %v968_v0 = vld [vmem:[%s1604_s0 + $0xf8] sm:$0xf]  ;;  %v1098_v1 = vld [vmem:[%s1604_s0 + $0x100] sm:$0xf0] }
  0x2a   :  { %1056 = vmatmul.msk.bf16.gmra.mxu2 %vm439_vm0, %v873_v35  ;;  %v914_v35 = vld [vmem:[%s1604_s0 + $0x9c] sm:$0xf0] }
  0x2b   :  { %1201 = vmatpush.bf16.msrb.mxu3 %v1115_v10  ;;  %v1078_v10 = vld [vmem:[%s1604_s0 + $0x64] sm:$0xf]  ;;  %v917_v39 = vor.u32 %v1084_v34, %v914_v35 }
  0x2c   :  { %v893_v15 = vor.u32 %v1078_v10, %v890_v11 }
  0x2f   :  { %1202 = vmatpush.bf16.msrb.mxu3 %v1114_v12  ;;  %v1096_v12 = vld [vmem:[%s1604_s0 + $0xf4] sm:$0xf] }
  0x31   :  { %489 = vmatmul.bf16.gmra.mxu0 %v853_v42  ;;  %v1092_v42 = vld [vmem:[%s1604_s0 + $0xd0] sm:$0xf0] }
  0x32   :  { %534 = vmatmul.bf16.gmra.mxu3 %v961_v43  ;;  %558 = vmatmul.bf16.gmra.mxu1 %v857_v44  ;;  %v945_v43 = vor.u32 %v1092_v42, %v944_v41  ;;  %v924_v44 = vld [vmem:[%s1604_s0 + $0xa8] sm:$0xf] }
  0x33   :  { %1203 = vmatpush.bf16.msrb.mxu3 %v1113_v14  ;;  %v889_v14 = vor.u32 %v1079_v9, %v888_v8  ;;  %v925_v49 = vor.u32 %v1088_v45, %v924_v44  ;;  %v1522_v9 = vld [vmem:[%s1605_s2] ss:$0 sm:$0xff] }
  0x37   :  { %1204 = vmatpush.bf16.msrb.mxu3 %v1112_v16  ;;  %v965_v16 = vor.u32 %v1096_v12, %v962_v13 }
  0x3a   :  { %1057 = vmatmul.msk.bf16.gmra.mxu2 %vm439_vm0, %v885_v47  ;;  %v926_v47 = vld [vmem:[%s1604_s0 + $0xb4] sm:$0xf0] }
  0x3b   :  { %1205 = vmatpush.bf16.msrb.mxu3 %v1111_v21  ;;  %v1082_v21 = vld [vmem:[%s1604_s0 + $0x80] sm:$0xf0]  ;;  %v929_v50 = vor.u32 %v1087_v46, %v926_v47 }
  0x3c   :  { %v901_v26 = vor.u32 %v1082_v21, %v900_v20 }
  0x3f   :  { %1206 = vmatpush.bf16.msrb.mxu3 %v1110_v23  ;;  %v902_v23 = vld [vmem:[%s1604_s0 + $0x84] sm:$0xf0] }
  0x40   :  { %v905_v27 = vor.u32 %v1081_v22, %v902_v23 }
  0x41   :  { %494 = vmatmul.bf16.gmra.mxu0 %v865_v54  ;;  %v957_v54 = vor.u32 %v1095_v52, %v956_v51 }
  0x42   :  { %539 = vmatmul.bf16.gmra.mxu3 %v973_v55  ;;  %563 = vmatmul.bf16.gmra.mxu1 %v869_v56  ;;  %v936_v55 = vld [vmem:[%s1604_s0 + $0xc0] sm:$0xf]  ;;  %v1091_v56 = vld [vmem:[%s1604_s0 + $0xc8] sm:$0xf0] }
  0x43   :  { %1207 = vmatpush.bf16.msra.mxu3 %v1239_v2  ;;  %v877_v2 = vor.u32 %v1076_v61, %v876_v60  ;;  %v937_v60 = vor.u32 %v1091_v56, %v936_v55 }
  0x47   :  { %1208 = vmatpush.bf16.msra.mxu3 %v1251_v5  ;;  %v908_v5 = vld [vmem:[%s1604_s0 + $0x80] sm:$0xf] }
  0x48   :  { %v909_v7 = vor.u32 %v1083_v6, %v908_v5  ;;  %v969_v6 = vor.u32 %v1098_v1, %v968_v0 }
  0x4a   :  { %1058 = vmatmul.msk.bf16.gmra.mxu2 %vm439_vm0, %v897_v59 }
  0x51   :  { %499 = vmatmul.bf16.gmra.mxu0 %v877_v2 }
  0x52   :  { %568 = vmatmul.bf16.gmra.mxu1 %v881_v3  ;;  %598 = vmatmul.bf16.vlgmr.msrb.gmra.mxu3 %v953_v4 }
  0x5a   :  { %1059 = vmatmul.msk.bf16.gmra.mxu2 %vm439_vm0, %v909_v7 }
  0x61   :  { %504 = vmatmul.bf16.gmra.mxu0 %v889_v14 }
  0x62   :  { %573 = vmatmul.bf16.gmra.mxu1 %v893_v15  ;;  %603 = vmatmul.bf16.gmra.mxu3 %v965_v16 }
  0x6a   :  { %1060 = vmatmul.msk.bf16.gmra.mxu2 %vm439_vm0, %v921_v19 }
  0x71   :  { %509 = vmatmul.bf16.gmra.mxu0 %v901_v26 }
  0x72   :  { %578 = vmatmul.bf16.gmra.mxu1 %v905_v27  ;;  %608 = vmatmul.bf16.gmra.mxu3 %v977_v28 }
  0x7a   :  { %1061 = vmatmul.msk.bf16.gmra.mxu2 %vm439_vm0, %v933_v31 }
  0x81   :  { %514 = vmatmul.bf16.gmra.mxu0 %v913_v38 }
  0x82   :  { %583 = vmatmul.bf16.gmra.mxu1 %v917_v39  ;;  %1065 = vmatmul.msk.bf16.vlgmr.msra.gmra.mxu3 %vm439_vm0, %v981_v40 }
  0x8a   :  { %1062 = vmatmul.msk.bf16.gmra.mxu2 %vm439_vm0, %v945_v43 }
  0x8d   :  { %v623_v48 = vpop.f32.mrf.mxu2 }
  0x91   :  { %519 = vmatmul.bf16.gmra.mxu0 %v925_v49 }
  0x92   :  { %588 = vmatmul.bf16.gmra.mxu1 %v929_v50 }
  0x95   :  { %v625_v53 = vpop.f32.mrf.mxu2 }
  0x9a   :  { %1063 = vmatmul.msk.bf16.gmra.mxu2 %vm439_vm0, %v957_v54 }
  0x9d   :  { %v628_v59 = vpop.f32.mrf.mxu2 }
  0x9e   :  { %v485_v61 = vpop.f32.mrf.mxu0 }
  0x9f   :  { %v554_v63 = vpop.f32.mrf.mxu1 }
  0xa0   :  { %v555_v2 = vadd.f32 %v554_v63, %v485_v61 }
  0xa1   :  { %524 = vmatmul.bf16.gmra.mxu0 %v937_v60 }
  0xa2   :  { %593 = vmatmul.bf16.gmra.mxu1 %v941_v62  ;;  %v624_v8 = vadd.f32 %v623_v48, %v555_v2 }
  0xa4   :  { %v762_v12 = vadd.f32 %v1522_v9, %v624_v8 }
  0xa5   :  { %v530_v3 = vpop.f32.mrf.mxu3  ;;  %v630_v4 = vpop.f32.mrf.mxu2 }
  0xa6   :  { %v487_v5 = vpop.f32.mrf.mxu0 }
  0xa7   :  { %v556_v7 = vpop.f32.mrf.mxu1 }
  0xa8   :  { %v557_v10 = vadd.f32 %v556_v7, %v487_v5 }
  0xaa   :  { %v626_v11 = vadd.f32 %v625_v53, %v557_v10  ;;  %1064 = vmatmul.msk.bf16.gmra.mxu2 %vm439_vm0, %v969_v6 }
  0xac   :  { %v763_v13 = vadd.f32 %v1522_v9, %v626_v11 }
  0xad   :  { %v532_v14 = vpop.f32.mrf.mxu3  ;;  %v633_v15 = vpop.f32.mrf.mxu2 }
  0xae   :  { %v1123_v16 = vpack.c.bf16 %v763_v13, %v762_v12  ;;  %v490_v17 = vpop.f32.mrf.mxu0 }
  0xaf   :  { %v559_v18 = vpop.f32.mrf.mxu1 }
  0xb0   :  { %1124 = vst [vmem:[%s1606_s3] sm:$0xff] %v1123_v16   ;;  %v560_v19 = vadd.f32 %v559_v18, %v490_v17 }
  0xb2   :  { %v629_v24 = vadd.f32 %v628_v59, %v560_v19 }
  0xb4   :  { %v764_v27 = vadd.f32 %v1522_v9, %v629_v24 }
  0xb5   :  { %v535_v20 = vpop.f32.mrf.mxu3  ;;  %v635_v21 = vpop.f32.mrf.mxu2 }
  0xb6   :  { %v492_v22 = vpop.f32.mrf.mxu0 }
  0xb7   :  { %v561_v23 = vpop.f32.mrf.mxu1 }
  0xb8   :  { %v562_v25 = vadd.f32 %v561_v23, %v492_v22 }
  0xba   :  { %v631_v26 = vadd.f32 %v630_v4, %v562_v25 }
  0xbc   :  { %v765_v28 = vadd.f32 %v1522_v9, %v631_v26 }
  0xbd   :  { %v537_v29 = vpop.f32.mrf.mxu3  ;;  %v638_v30 = vpop.f32.mrf.mxu2 }
  0xbe   :  { %v1128_v31 = vpack.c.bf16 %v765_v28, %v764_v27  ;;  %v495_v32 = vpop.f32.mrf.mxu0 }
  0xbf   :  { %v564_v33 = vpop.f32.mrf.mxu1 }
  0xc0   :  { %1180 = vst [vmem:[%s1606_s3 + $0x8] sm:$0xff] %v1128_v31   ;;  %v565_v34 = vadd.f32 %v564_v33, %v495_v32 }
  0xc2   :  { %v634_v39 = vadd.f32 %v633_v15, %v565_v34 }
  0xc4   :  { %v766_v42 = vadd.f32 %v1522_v9, %v634_v39 }
  0xc5   :  { %v1535_v35 = vpop.f32.mrf.mxu3  ;;  %v640_v36 = vpop.f32.mrf.mxu2 }
  0xc6   :  { %v497_v37 = vpop.f32.mrf.mxu0 }
  0xc7   :  { %v566_v38 = vpop.f32.mrf.mxu1 }
  0xc8   :  { %v567_v40 = vadd.f32 %v566_v38, %v497_v37 }
  0xca   :  { %v636_v41 = vadd.f32 %v635_v21, %v567_v40 }
  0xcc   :  { %v767_v43 = vadd.f32 %v1522_v9, %v636_v41 }
  0xcd   :  { %v1539_v44 = vpop.f32.mrf.mxu3  ;;  %v643_v45 = vpop.f32.mrf.mxu2 }
  0xce   :  { %v1133_v46 = vpack.c.bf16 %v767_v43, %v766_v42  ;;  %v500_v47 = vpop.f32.mrf.mxu0 }
  0xcf   :  { %v569_v48 = vpop.f32.mrf.mxu1 }
  0xd0   :  { %1181 = vst [vmem:[%s1606_s3 + $0x10] sm:$0xff] %v1133_v46   ;;  %v570_v49 = vadd.f32 %v569_v48, %v500_v47 }
  0xd2   :  { %v639_v55 = vadd.f32 %v638_v30, %v570_v49 }
  0xd4   :  { %v768_v58 = vadd.f32 %v1522_v9, %v639_v55 }
  0xd5   :  { %v599_v50 = vpop.f32.mrf.mxu3  ;;  %v645_v51 = vpop.f32.mrf.mxu2 }
  0xd6   :  { %v1544_v52 = vadd.f32 %v599_v50, %v530_v3  ;;  %v502_v53 = vpop.f32.mrf.mxu0 }
  0xd7   :  { %v571_v54 = vpop.f32.mrf.mxu1 }
  0xd8   :  { %v572_v56 = vadd.f32 %v571_v54, %v502_v53 }
  0xda   :  { %v641_v57 = vadd.f32 %v640_v36, %v572_v56 }
  0xdc   :  { %v769_v59 = vadd.f32 %v1522_v9, %v641_v57 }
  0xdd   :  { %v601_v60 = vpop.f32.mrf.mxu3  ;;  %v648_v61 = vpop.f32.mrf.mxu2 }
  0xde   :  { %v1138_v62 = vpack.c.bf16 %v769_v59, %v768_v58  ;;  %v1548_v63 = vadd.f32 %v601_v60, %v532_v14  ;;  %v505_v0 = vpop.f32.mrf.mxu0 }
  0xdf   :  { %v574_v1 = vpop.f32.mrf.mxu1 }
  0xe0   :  { %1182 = vst [vmem:[%s1606_s3 + $0x18] sm:$0xff] %v1138_v62   ;;  %v575_v2 = vadd.f32 %v574_v1, %v505_v0 }
  0xe2   :  { %v644_v8 = vadd.f32 %v643_v45, %v575_v2 }
  0xe4   :  { %v770_v12 = vadd.f32 %v1522_v9, %v644_v8 }
  0xe5   :  { %v604_v3 = vpop.f32.mrf.mxu3  ;;  %v650_v4 = vpop.f32.mrf.mxu2 }
  0xe6   :  { %v1553_v5 = vadd.f32 %v604_v3, %v535_v20  ;;  %v507_v6 = vpop.f32.mrf.mxu0 }
  0xe7   :  { %v576_v7 = vpop.f32.mrf.mxu1 }
  0xe8   :  { %v577_v10 = vadd.f32 %v576_v7, %v507_v6 }
  0xea   :  { %v646_v11 = vadd.f32 %v645_v51, %v577_v10 }
  0xec   :  { %v771_v13 = vadd.f32 %v1522_v9, %v646_v11 }
  0xed   :  { %v606_v14 = vpop.f32.mrf.mxu3  ;;  %v653_v15 = vpop.f32.mrf.mxu2 }
  0xee   :  { %v1143_v16 = vpack.c.bf16 %v771_v13, %v770_v12  ;;  %v1557_v17 = vadd.f32 %v606_v14, %v537_v29  ;;  %v510_v18 = vpop.f32.mrf.mxu0 }
  0xef   :  { %v579_v19 = vpop.f32.mrf.mxu1 }
  0xf0   :  { %1183 = vst [vmem:[%s1606_s3 + $0x20] sm:$0xff] %v1143_v16   ;;  %v580_v20 = vadd.f32 %v579_v19, %v510_v18 }
  0xf2   :  { %v649_v25 = vadd.f32 %v648_v61, %v580_v20 }
  0xf4   :  { %v772_v28 = vadd.f32 %v1522_v9, %v649_v25 }
  0xf5   :  { %v609_v21 = vpop.f32.mrf.mxu3  ;;  %v655_v22 = vpop.f32.mrf.mxu2 }
  0xf6   :  { %v512_v23 = vpop.f32.mrf.mxu0  ;;  %v610_v43 = vadd.f32 %v609_v21, %v1535_v35 }
  0xf7   :  { %v581_v24 = vpop.f32.mrf.mxu1 }
  0xf8   :  { %v582_v26 = vadd.f32 %v581_v24, %v512_v23 }
  0xfa   :  { %v651_v27 = vadd.f32 %v650_v4, %v582_v26 }
  0xfc   :  { %v773_v30 = vadd.f32 %v1522_v9, %v651_v27 }
  0xfd   :  { %v611_v29 = vpop.f32.mrf.mxu3  ;;  %v658_v31 = vpop.f32.mrf.mxu2 }
  0xfe   :  { %v1148_v32 = vpack.c.bf16 %v773_v30, %v772_v28  ;;  %v515_v33 = vpop.f32.mrf.mxu0  ;;  %v612_v46 = vadd.f32 %v611_v29, %v1539_v44 }
  0xff   :  { %v584_v34 = vpop.f32.mrf.mxu1 }
 0x100   :  { %1184 = vst [vmem:[%s1606_s3 + $0x28] sm:$0xff] %v1148_v32   ;;  %v585_v36 = vadd.f32 %v584_v34, %v515_v33 }
 0x102   :  { %v654_v41 = vadd.f32 %v653_v15, %v585_v36 }
 0x104   :  { %v774_v47 = vadd.f32 %v1522_v9, %v654_v41 }
 0x105   :  { %v660_v37 = vpop.f32.mrf.mxu2  ;;  %v678_v38 = vpop.f32.mrf.mxu3 }
 0x106   :  { %v517_v39 = vpop.f32.mrf.mxu0  ;;  %v679_v48 = vadd.f32 %v678_v38, %v610_v43 }
 0x107   :  { %v586_v40 = vpop.f32.mrf.mxu1 }
 0x108   :  { %v587_v42 = vadd.f32 %v586_v40, %v517_v39  ;;  %v784_v57 = vadd.f32 %v1522_v9, %v679_v48 }
 0x10a   :  { %v656_v45 = vadd.f32 %v655_v22, %v587_v42 }
 0x10c   :  { %v775_v49 = vadd.f32 %v1522_v9, %v656_v45 }
 0x10d   :  { %v663_v50 = vpop.f32.mrf.mxu2  ;;  %v680_v51 = vpop.f32.mrf.mxu3 }
 0x10e   :  { %v1153_v53 = vpack.c.bf16 %v775_v49, %v774_v47  ;;  %v681_v54 = vadd.f32 %v680_v51, %v612_v46  ;;  %v520_v55 = vpop.f32.mrf.mxu0 }
 0x10f   :  { %v589_v56 = vpop.f32.mrf.mxu1 }
 0x110   :  { %1185 = vst [vmem:[%s1606_s3 + $0x30] sm:$0xff] %v1153_v53   ;;  %v785_v35 = vadd.f32 %v1522_v9, %v681_v54  ;;  %v590_v58 = vadd.f32 %v589_v56, %v520_v55 }
 0x112   :  { %v1178_v44 = vpack.c.bf16 %v785_v35, %v784_v57  ;;  %v659_v62 = vadd.f32 %v658_v31, %v590_v58 }
 0x114   :  { %1190 = vst [vmem:[%s1606_s3 + $0x58] sm:$0xff] %v1178_v44   ;;  %v776_v2 = vadd.f32 %v1522_v9, %v659_v62 }
 0x115   :  { %v665_v59 = vpop.f32.mrf.mxu2 }
 0x116   :  { %v522_v60 = vpop.f32.mrf.mxu0 }
 0x117   :  { %v591_v61 = vpop.f32.mrf.mxu1 }
 0x118   :  { %v592_v0 = vadd.f32 %v591_v61, %v522_v60 }
 0x11a   :  { %v661_v1 = vadd.f32 %v660_v37, %v592_v0 }
 0x11c   :  { %v777_v3 = vadd.f32 %v1522_v9, %v661_v1 }
 0x11d   :  { %v668_v4 = vpop.f32.mrf.mxu2 }
 0x11e   :  { %v1158_v6 = vpack.c.bf16 %v777_v3, %v776_v2  ;;  %v525_v7 = vpop.f32.mrf.mxu0  ;;  %v669_v10 = vadd.f32 %v668_v4, %v1544_v52 }
 0x11f   :  { %v594_v8 = vpop.f32.mrf.mxu1 }
 0x120   :  { %1186 = vst [vmem:[%s1606_s3 + $0x38] sm:$0xff] %v1158_v6   ;;  %v595_v11 = vadd.f32 %v594_v8, %v525_v7  ;;  %v780_v16 = vadd.f32 %v1522_v9, %v669_v10 }
 0x122   :  { %v664_v18 = vadd.f32 %v663_v50, %v595_v11 }
 0x124   :  { %v778_v23 = vadd.f32 %v1522_v9, %v664_v18 }
 0x125   :  { %v670_v12 = vpop.f32.mrf.mxu2 }
 0x126   :  { %v671_v13 = vadd.f32 %v670_v12, %v1548_v63  ;;  %v527_v14 = vpop.f32.mrf.mxu0 }
 0x127   :  { %v596_v15 = vpop.f32.mrf.mxu1 }
 0x128   :  { %v781_v19 = vadd.f32 %v1522_v9, %v671_v13  ;;  %v597_v20 = vadd.f32 %v596_v15, %v527_v14 }
 0x12a   :  { %v1168_v21 = vpack.c.bf16 %v781_v19, %v780_v16  ;;  %v666_v22 = vadd.f32 %v665_v59, %v597_v20 }
 0x12c   :  { %1188 = vst [vmem:[%s1606_s3 + $0x48] sm:$0xff] %v1168_v21   ;;  %v779_v52 = vadd.f32 %v1522_v9, %v666_v22 }
 0x12d   :  { %v673_v24 = vpop.f32.mrf.mxu2 }
 0x12e   :  { %v1163_v63 = vpack.c.bf16 %v779_v52, %v778_v23  ;;  %v674_v25 = vadd.f32 %v673_v24, %v1553_v5 }
 0x130   :  { %1187 = vst [vmem:[%s1606_s3 + $0x40] sm:$0xff] %v1163_v63   ;;  %v782_v28 = vadd.f32 %v1522_v9, %v674_v25 }
 0x135   :  { %v675_v26 = vpop.f32.mrf.mxu2 }
 0x136   :  { %v676_v27 = vadd.f32 %v675_v26, %v1557_v17 }
 0x138   :  { %v783_v30 = vadd.f32 %v1522_v9, %v676_v27 }
 0x13a   :  { %v1173_v29 = vpack.c.bf16 %v783_v30, %v782_v28 }
 0x13c   :  { %1189 = vst [vmem:[%s1606_s3 + $0x50] sm:$0xff] %v1173_v29  }

// kernel: encoder_forward.9
= control target key start
LH: loop header
LB: loop body
LE: loop exit
PB: predicated region body
PF: predicated region fallthrough
CT: control target
= control target key end

     0   :  { %s1873_s1 = inlined_call_operand.vmem [shape: bf16[1152,128], index: 1, kind: input, shape index: {}]   ;;  %s1874_s0 = inlined_call_operand.vmem [shape: bf16[32,1152], index: 0, kind: input, shape index: {}]   ;;  %s1875_s3 = inlined_call_operand.vmem [shape: f32[1,1152], index: 3, kind: input, shape index: {}]   ;;  %s1876_s4 = inlined_call_operand.vmem [shape: f32[1,1152], index: 4, kind: input, shape index: {}]   ;;  %s1877_s2 = inlined_call_operand.vmem [shape: f32[1,128], index: 2, kind: input, shape index: {}]   ;;  %s1878_s5 = inlined_call_operand.vmem [shape: bf16[32,128], index: 5, kind: output, shape index: {}]  }
   0x1   :  { %v1339_v0 = vld [vmem:[%s1873_s1 + $0x38] sm:$0xff]  ;;  %v1338_v4 = vld [vmem:[%s1873_s1 + $0x30] sm:$0xff]  ;;  %v1337_v8 = vld [vmem:[%s1873_s1 + $0x28] sm:$0xff] }
   0x2   :  { %v1347_v1 = vld [vmem:[%s1873_s1 + $0x78] sm:$0xff]  ;;  %834 = vmatpush.bf16.msra.mxu0 %v1339_v0  ;;  %v1346_v5 = vld [vmem:[%s1873_s1 + $0x70] sm:$0xff]  ;;  %v1345_v9 = vld [vmem:[%s1873_s1 + $0x68] sm:$0xff] }
   0x3   :  { %v1355_v2 = vld [vmem:[%s1873_s1 + $0xb8] sm:$0xff]  ;;  %853 = vmatpush.bf16.msra.mxu1 %v1347_v1  ;;  %v1354_v6 = vld [vmem:[%s1873_s1 + $0xb0] sm:$0xff]  ;;  %v1353_v10 = vld [vmem:[%s1873_s1 + $0xa8] sm:$0xff] }
   0x4   :  { %v1363_v3 = vld [vmem:[%s1873_s1 + $0xf8] sm:$0xff]  ;;  %872 = vmatpush.bf16.msra.mxu2 %v1355_v2  ;;  %v1362_v7 = vld [vmem:[%s1873_s1 + $0xf0] sm:$0xff]  ;;  %v1361_v11 = vld [vmem:[%s1873_s1 + $0xe8] sm:$0xff] }
   0x5   :  { %891 = vmatpush.bf16.msra.mxu3 %v1363_v3  ;;  %v1336_v12 = vld [vmem:[%s1873_s1 + $0x20] sm:$0xff]  ;;  %v29_v25 = vld [vmem:[%s1874_s0 + $0x8] sm:$0xff]  ;;  %v1335_v30 = vld [vmem:[%s1873_s1 + $0x18] sm:$0xff] }
   0x6   :  { %835 = vmatpush.bf16.msra.mxu0 %v1338_v4  ;;  %v1344_v13 = vld [vmem:[%s1873_s1 + $0x60] sm:$0xff]  ;;  %v34_v26 = vld [vmem:[%s1874_s0 + $0x2c] sm:$0xff]  ;;  %v50_v28 = vunpack.c.l.bf16 %v29_v25  ;;  %v1343_v31 = vld [vmem:[%s1873_s1 + $0x58] sm:$0xff]  ;;  %v51_v37 = vunpack.c.h.bf16 %v29_v25 }
   0x7   :  { %854 = vmatpush.bf16.msra.mxu1 %v1346_v5  ;;  %v1352_v14 = vld [vmem:[%s1873_s1 + $0xa0] sm:$0xff]  ;;  %v59_v29 = vunpack.c.l.bf16 %v34_v26  ;;  %v1351_v33 = vld [vmem:[%s1873_s1 + $0x98] sm:$0xff]  ;;  %v60_v38 = vunpack.c.h.bf16 %v34_v26  ;;  %v1334_v47 = vld [vmem:[%s1873_s1 + $0x10] sm:$0xff] }
   0x8   :  { %873 = vmatpush.bf16.msra.mxu2 %v1354_v6  ;;  %v28_v15 = vld [vmem:[%s1874_s0] sm:$0xff]  ;;  %v1359_v34 = vld [vmem:[%s1873_s1 + $0xd8] sm:$0xff]  ;;  %v1342_v48 = vld [vmem:[%s1873_s1 + $0x50] sm:$0xff] }
   0x9   :  { %892 = vmatpush.bf16.msra.mxu3 %v1362_v7  ;;  %v1360_v16 = vld [vmem:[%s1873_s1 + $0xe0] sm:$0xff]  ;;  %v48_v18 = vunpack.c.l.bf16 %v28_v15  ;;  %v49_v23 = vunpack.c.h.bf16 %v28_v15  ;;  %v1350_v50 = vld [vmem:[%s1873_s1 + $0x90] sm:$0xff]  ;;  %v1333_v58 = vld [vmem:[%s1873_s1 + $0x8] sm:$0xff] }
   0xa   :  { %836 = vmatpush.bf16.msra.mxu0 %v1337_v8  ;;  %v33_v17 = vld [vmem:[%s1874_s0 + $0x24] sm:$0xff]  ;;  %v1358_v51 = vld [vmem:[%s1873_s1 + $0xd0] sm:$0xff]  ;;  %v1371_v25 = vld [vmem:[%s1873_s1 + $0x138] sm:$0xff] }
   0xb   :  { %855 = vmatpush.bf16.msra.mxu1 %v1345_v9  ;;  %v1513_v19 = vld [vmem:[%s1875_s3] sm:$0xff]  ;;  %v57_v20 = vunpack.c.l.bf16 %v33_v17  ;;  %v58_v24 = vunpack.c.h.bf16 %v33_v17  ;;  %v1341_v59 = vld [vmem:[%s1873_s1 + $0x48] sm:$0xff]  ;;  %v1379_v26 = vld [vmem:[%s1873_s1 + $0x178] sm:$0xff] }
   0xc   :  { %874 = vmatpush.bf16.msra.mxu2 %v1353_v10  ;;  %v1516_v21 = vperm.slane %v1513_v19, 0  ;;  %v1521_v22 = vld [vmem:[%s1876_s4] sm:$0xff]  ;;  %v1530_v27 = vperm.slane %v1513_v19, 1  ;;  %v1539_v32 = vperm.slane %v1513_v19, 2  ;;  %v1563_v46 = vperm.slane %v1513_v19, 3  ;;  %v38_v62 = vld [vmem:[%s1874_s0 + $0x48] sm:$0xff] }
   0xd   :  { %893 = vmatpush.bf16.msra.mxu3 %v1361_v11  ;;  %v1549_v36 = vperm.slane %v1521_v22, 0  ;;  %v1555_v42 = vperm.slane %v1521_v22, 1  ;;  %v1560_v45 = vperm.slane %v1521_v22, 2  ;;  %v1572_v49 = vperm.slane %v1521_v22, 3  ;;  %v43_v1 = vld [vmem:[%s1874_s0 + $0x6c] sm:$0xff]  ;;  %v1348_v17 = vld [vmem:[%s1873_s1 + $0x80] sm:$0xff] }
   0xe   :  { %837 = vmatpush.bf16.msra.mxu0 %v1336_v12  ;;  %v106_v35 = vmul.f32 %v1516_v21, %v48_v18  ;;  %v115_v39 = vmul.f32 %v1516_v21, %v57_v20  ;;  %v107_v40 = vmul.f32 %v1530_v27, %v49_v23  ;;  %v116_v41 = vmul.f32 %v1530_v27, %v58_v24  ;;  %v1349_v2 = vld [vmem:[%s1873_s1 + $0x88] sm:$0xff]  ;;  %v1332_v12 = vld [vmem:[%s1873_s1] sm:$0xff]  ;;  %v44_v20 = vld [vmem:[%s1874_s0 + $0x74] sm:$0xff] }
   0xf   :  { %856 = vmatpush.bf16.msra.mxu1 %v1344_v13  ;;  %v108_v43 = vmul.f32 %v1539_v32, %v50_v28  ;;  %v117_v44 = vmul.f32 %v1539_v32, %v59_v29  ;;  %v109_v53 = vmul.f32 %v1563_v46, %v51_v37  ;;  %v118_v54 = vmul.f32 %v1563_v46, %v60_v38  ;;  %v1357_v3 = vld [vmem:[%s1873_s1 + $0xc8] sm:$0xff]  ;;  %v1340_v13 = vld [vmem:[%s1873_s1 + $0x40] sm:$0xff] }
  0x10   :  { %875 = vmatpush.bf16.msra.mxu2 %v1352_v14  ;;  %v164_v52 = vadd.f32 %v1549_v36, %v106_v35  ;;  %v173_v55 = vadd.f32 %v1549_v36, %v115_v39  ;;  %v165_v56 = vadd.f32 %v1555_v42, %v107_v40  ;;  %v174_v57 = vadd.f32 %v1555_v42, %v116_v41  ;;  %v1356_v18 = vld [vmem:[%s1873_s1 + $0xc0] sm:$0xff]  ;;  %v1387_v40 = vld [vmem:[%s1873_s1 + $0x1b8] sm:$0xff] }
  0x11   :  { %894 = vmatpush.bf16.msra.mxu3 %v1360_v16  ;;  %v166_v60 = vadd.f32 %v1560_v45, %v108_v43  ;;  %v175_v61 = vadd.f32 %v1560_v45, %v117_v44  ;;  %v167_v63 = vadd.f32 %v1572_v49, %v109_v53  ;;  %v176_v0 = vadd.f32 %v1572_v49, %v118_v54  ;;  %v39_v16 = vld [vmem:[%s1874_s0 + $0x50] sm:$0xff]  ;;  %v1395_v41 = vld [vmem:[%s1873_s1 + $0x1f8] sm:$0xff] }
  0x12   :  { %838 = vmatpush.bf16.msra.mxu0 %v1335_v30  ;;  %v200_v4 = vmax.f32 %v164_v52, 0.0  ;;  %v209_v5 = vmax.f32 %v173_v55, 0.0  ;;  %v201_v6 = vmax.f32 %v165_v56, 0.0  ;;  %v210_v7 = vmax.f32 %v174_v57, 0.0  ;;  %v1378_v43 = vld [vmem:[%s1873_s1 + $0x170] sm:$0xff] }
  0x13   :  { %857 = vmatpush.bf16.msra.mxu1 %v1343_v31  ;;  %v66_v8 = vunpack.c.l.bf16 %v38_v62  ;;  %v202_v9 = vmax.f32 %v166_v60, 0.0  ;;  %v211_v10 = vmax.f32 %v175_v61, 0.0  ;;  %v75_v11 = vunpack.c.l.bf16 %v43_v1  ;;  %v1386_v55 = vld [vmem:[%s1873_s1 + $0x1b0] sm:$0xff] }
  0x14   :  { %876 = vmatpush.bf16.msra.mxu2 %v1351_v33  ;;  %v203_v14 = vmax.f32 %v167_v63, 0.0  ;;  %v212_v15 = vmax.f32 %v176_v0, 0.0  ;;  %v236_v23 = vpack.c.bf16 %v209_v5, %v200_v4  ;;  %v237_v24 = vpack.c.bf16 %v210_v7, %v201_v6  ;;  %v30_v56 = vld [vmem:[%s1874_s0 + $0x10] sm:$0xff] }
  0x15   :  { %895 = vmatpush.bf16.msra.mxu3 %v1359_v34  ;;  %v124_v28 = vmul.f32 %v1516_v21, %v66_v8  ;;  %v67_v29 = vunpack.c.h.bf16 %v38_v62  ;;  %v238_v30 = vpack.c.bf16 %v211_v10, %v202_v9  ;;  %v133_v31 = vmul.f32 %v1516_v21, %v75_v11  ;;  %v1370_v21 = vld [vmem:[%s1873_s1 + $0x130] sm:$0xff]  ;;  %v31_v8 = vld [vmem:[%s1874_s0 + $0x18] sm:$0xff] }
  0x16   :  { %839 = vmatpush.bf16.msra.mxu0 %v1334_v47  ;;  %v76_v33 = vunpack.c.h.bf16 %v43_v1  ;;  %v68_v34 = vunpack.c.l.bf16 %v39_v16  ;;  %v239_v35 = vpack.c.bf16 %v212_v15, %v203_v14  ;;  %v77_v37 = vunpack.c.l.bf16 %v44_v20  ;;  %v35_v61 = vld [vmem:[%s1874_s0 + $0x34] sm:$0xff]  ;;  %v1385_v1 = vld [vmem:[%s1873_s1 + $0x1a8] sm:$0xff]  ;;  %v36_v9 = vld [vmem:[%s1874_s0 + $0x3c] sm:$0xff] }
  0x17   :  { %858 = vmatpush.bf16.msra.mxu1 %v1342_v48  ;;  %v69_v38 = vunpack.c.h.bf16 %v39_v16  ;;  %v78_v39 = vunpack.c.h.bf16 %v44_v20  ;;  %v182_v44 = vadd.f32 %v1549_v36, %v124_v28  ;;  %v125_v47 = vmul.f32 %v1530_v27, %v67_v29  ;;  %v1392_v20 = vld [vmem:[%s1873_s1 + $0x1e0] sm:$0xff]  ;;  %v1367_v28 = vld [vmem:[%s1873_s1 + $0x118] sm:$0xff] }
  0x18   :  { %877 = vmatpush.bf16.msra.mxu2 %v1350_v50  ;;  %v191_v48 = vadd.f32 %v1549_v36, %v133_v31  ;;  %v134_v50 = vmul.f32 %v1530_v27, %v76_v33  ;;  %v135_v52 = vmul.f32 %v1539_v32, %v77_v37  ;;  %v1394_v27 = vld [vmem:[%s1873_s1 + $0x1f0] sm:$0xff]  ;;  %v1377_v36 = vld [vmem:[%s1873_s1 + $0x168] sm:$0xff]  ;;  %v61_v4 = vunpack.c.l.bf16 %v35_v61  ;;  %v1375_v29 = vld [vmem:[%s1873_s1 + $0x158] sm:$0xff] }
  0x19   :  { %896 = vmatpush.bf16.msra.mxu3 %v1358_v51  ;;  %v126_v51 = vmul.f32 %v1539_v32, %v68_v34  ;;  %v127_v53 = vmul.f32 %v1563_v46, %v69_v38  ;;  %v136_v54 = vmul.f32 %v1563_v46, %v78_v39  ;;  %v1369_v32 = vld [vmem:[%s1873_s1 + $0x128] sm:$0xff]  ;;  %v218_v46 = vmax.f32 %v182_v44, 0.0 }
  0x1a   :  { %840 = vmatpush.bf16.msra.mxu0 %v1333_v58  ;;  %v227_v57 = vmax.f32 %v191_v48, 0.0  ;;  %v183_v58 = vadd.f32 %v1555_v42, %v125_v47  ;;  %v193_v62 = vadd.f32 %v1560_v45, %v135_v52  ;;  %v53_v5 = vunpack.c.h.bf16 %v30_v56 }
  0x1b   :  { %859 = vmatpush.bf16.msra.mxu1 %v1341_v59  ;;  %v192_v59 = vadd.f32 %v1555_v42, %v134_v50  ;;  %v184_v60 = vadd.f32 %v1560_v45, %v126_v51  ;;  %v185_v63 = vadd.f32 %v1572_v49, %v127_v53  ;;  %v194_v0 = vadd.f32 %v1572_v49, %v136_v54  ;;  %v1393_v42 = vld [vmem:[%s1873_s1 + $0x1e8] sm:$0xff]  ;;  %v1376_v49 = vld [vmem:[%s1873_s1 + $0x160] sm:$0xff]  ;;  %v1366_v50 = vld [vmem:[%s1873_s1 + $0x110] sm:$0xff] }
  0x1c   :  { %878 = vmatpush.bf16.msra.mxu2 %v1349_v2  ;;  %v1368_v2 = vld [vmem:[%s1873_s1 + $0x120] sm:$0xff]  ;;  %v1688_v45 = vperm.slane %v1513_v19, 4  ;;  %v62_v6 = vunpack.c.h.bf16 %v35_v61  ;;  %v1694_v7 = vperm.slane %v1513_v19, 5  ;;  %v245_v10 = vpack.c.bf16 %v227_v57, %v218_v46  ;;  %v1374_v51 = vld [vmem:[%s1873_s1 + $0x150] sm:$0xff] }
  0x1d   :  { %897 = vmatpush.bf16.msra.mxu3 %v1357_v3  ;;  %v52_v3 = vunpack.c.l.bf16 %v30_v56  ;;  %v219_v11 = vmax.f32 %v183_v58, 0.0  ;;  %v229_v14 = vmax.f32 %v193_v62, 0.0  ;;  %v221_v15 = vmax.f32 %v185_v63, 0.0  ;;  %v1390_v46 = vld [vmem:[%s1873_s1 + $0x1d0] sm:$0xff]  ;;  %v1373_v58 = vld [vmem:[%s1873_s1 + $0x148] sm:$0xff] }
  0x1e   :  { %841 = vmatpush.bf16.msra.mxu0 %v1332_v12  ;;  %v228_v12 = vmax.f32 %v192_v59, 0.0  ;;  %v230_v16 = vmax.f32 %v194_v0, 0.0  ;;  %v111_v31 = vmul.f32 %v1694_v7, %v53_v5  ;;  %v120_v33 = vmul.f32 %v1694_v7, %v62_v6  ;;  %v1381_v63 = vld [vmem:[%s1873_s1 + $0x188] sm:$0xff] }
  0x1f   :  { %860 = vmatpush.bf16.msra.mxu1 %v1340_v13  ;;  %v220_v13 = vmax.f32 %v184_v60, 0.0  ;;  %v1725_v34 = vperm.slane %v1521_v22, 5  ;;  %v55_v37 = vunpack.c.h.bf16 %v31_v8  ;;  %v64_v38 = vunpack.c.h.bf16 %v36_v9  ;;  %v1389_v0 = vld [vmem:[%s1873_s1 + $0x1c8] sm:$0xff] }
  0x20   :  { %879 = vmatpush.bf16.msra.mxu2 %v1348_v17  ;;  %v1703_v17 = vperm.slane %v1521_v22, 4  ;;  %v1728_v39 = vperm.slane %v1513_v19, 7 }
  0x21   :  { %898 = vmatpush.bf16.msra.mxu3 %v1356_v18  ;;  %842 = vmatmul.bf16.vlgmr.msra.gmra.mxu0 %v236_v23  ;;  %v1384_v18 = vld [vmem:[%s1873_s1 + $0x1a0] sm:$0xff]  ;;  %v110_v23 = vmul.f32 %v1688_v45, %v52_v3  ;;  %v169_v53 = vadd.f32 %v1725_v34, %v111_v31  ;;  %v178_v54 = vadd.f32 %v1725_v34, %v120_v33 }
  0x22   :  { %910 = vmatpush.bf16.msrb.mxu0 %v1371_v25  ;;  %861 = vmatmul.bf16.vlgmr.msra.gmra.mxu1 %v237_v24  ;;  %v54_v24 = vunpack.c.l.bf16 %v31_v8  ;;  %v63_v25 = vunpack.c.l.bf16 %v36_v9  ;;  %v1372_v3 = vld [vmem:[%s1873_s1 + $0x140] sm:$0xff] }
  0x23   :  { %929 = vmatpush.bf16.msrb.mxu1 %v1379_v26  ;;  %880 = vmatmul.bf16.vlgmr.msra.gmra.mxu2 %v238_v30  ;;  %v1713_v26 = vperm.slane %v1513_v19, 6  ;;  %v119_v30 = vmul.f32 %v1688_v45, %v61_v4  ;;  %v168_v44 = vadd.f32 %v1703_v17, %v110_v23  ;;  %v1740_v19 = vperm.slane %v1521_v22, 6  ;;  %v1790_v4 = vld [vmem:[%s1874_s0 + $0x7c] sm:$0xff]  ;;  %v37_v9 = vld [vmem:[%s1874_s0 + $0x44] sm:$0xf] }
  0x24   :  { %899 = vmatmul.bf16.vlgmr.msra.gmra.mxu3 %v239_v35  ;;  %948 = vmatpush.bf16.msrb.mxu2 %v1387_v40  ;;  %v246_v35 = vpack.c.bf16 %v228_v12, %v219_v11  ;;  %v247_v40 = vpack.c.bf16 %v229_v14, %v220_v13  ;;  %v205_v61 = vmax.f32 %v169_v53, 0.0  ;;  %v214_v62 = vmax.f32 %v178_v54, 0.0  ;;  %v32_v8 = vld [vmem:[%s1874_s0 + $0x20] sm:$0xf]  ;;  %v1423_v14 = vld [vmem:[%s1875_s3 + $0x8] ss:$0 sm:$0xff] }
  0x25   :  { %967 = vmatpush.bf16.msrb.mxu3 %v1395_v41  ;;  %v248_v41 = vpack.c.bf16 %v230_v16, %v221_v15  ;;  %v112_v47 = vmul.f32 %v1713_v26, %v54_v24  ;;  %v121_v48 = vmul.f32 %v1713_v26, %v63_v25  ;;  %v177_v52 = vadd.f32 %v1703_v17, %v119_v30  ;;  %v42_v15 = vld [vmem:[%s1874_s0 + $0x68] sm:$0xf]  ;;  %v47_v16 = vld [vmem:[%s1874_s0 + $0x8c] sm:$0xf]  ;;  %v1403_v23 = vld [vmem:[%s1873_s1 + $0x238] sm:$0xff] }
  0x26   :  { %911 = vmatpush.bf16.msrb.mxu0 %v1370_v21  ;;  %v1383_v21 = vld [vmem:[%s1873_s1 + $0x198] sm:$0xff]  ;;  %v204_v59 = vmax.f32 %v168_v44, 0.0  ;;  %v241_v11 = vpack.c.bf16 %v214_v62, %v205_v61  ;;  %v56_v12 = vunpack.c.l.bf16 %v32_v8  ;;  %v65_v13 = vunpack.c.l.bf16 %v37_v9  ;;  %v41_v24 = vld [vmem:[%s1874_s0 + $0x60] sm:$0xff] }
  0x27   :  { %930 = vmatpush.bf16.msrb.mxu1 %v1378_v43  ;;  %v1391_v43 = vld [vmem:[%s1873_s1 + $0x1d8] sm:$0xff]  ;;  %v170_v56 = vadd.f32 %v1740_v19, %v112_v47  ;;  %v179_v57 = vadd.f32 %v1740_v19, %v121_v48  ;;  %v213_v60 = vmax.f32 %v177_v52, 0.0  ;;  %v74_v25 = vunpack.c.l.bf16 %v42_v15  ;;  %v46_v31 = vld [vmem:[%s1874_s0 + $0x84] sm:$0xff] }
  0x28   :  { %949 = vmatpush.bf16.msrb.mxu2 %v1386_v55  ;;  %v113_v55 = vmul.f32 %v1728_v39, %v55_v37  ;;  %v79_v30 = vunpack.c.l.bf16 %v1790_v4  ;;  %v114_v33 = vmul.f32 %v1423_v14, %v56_v12  ;;  %v1424_v37 = vld [vmem:[%s1876_s4 + $0x8] ss:$0 sm:$0xff]  ;;  %v80_v47 = vunpack.c.h.bf16 %v1790_v4  ;;  %v1400_v9 = vld [vmem:[%s1873_s1 + $0x220] sm:$0xff] }
  0x29   :  { %968 = vmatpush.bf16.msrb.mxu3 %v1394_v27  ;;  %v122_v27 = vmul.f32 %v1728_v39, %v64_v38  ;;  %v206_v5 = vmax.f32 %v170_v56, 0.0  ;;  %v215_v6 = vmax.f32 %v179_v57, 0.0  ;;  %v1380_v38 = vld [vmem:[%s1873_s1 + $0x180] sm:$0xff]  ;;  %v72_v48 = vunpack.c.l.bf16 %v41_v24  ;;  %v1402_v57 = vld [vmem:[%s1873_s1 + $0x230] sm:$0xff] }
  0x2a   :  { %912 = vmatpush.bf16.msrb.mxu0 %v1369_v32  ;;  %v1754_v32 = vperm.slane %v1521_v22, 7  ;;  %v1365_v22 = vld [vmem:[%s1873_s1 + $0x108] sm:$0xff]  ;;  %v81_v53 = vunpack.c.l.bf16 %v46_v31 }
  0x2b   :  { %931 = vmatpush.bf16.msrb.mxu1 %v1377_v36  ;;  %v1382_v36 = vld [vmem:[%s1873_s1 + $0x190] sm:$0xff] }
  0x2c   :  { %950 = vmatpush.bf16.msrb.mxu2 %v1385_v1  ;;  %v171_v1 = vadd.f32 %v1754_v32, %v113_v55 }
  0x2d   :  { %969 = vmatpush.bf16.msrb.mxu3 %v1393_v42  ;;  %v180_v42 = vadd.f32 %v1754_v32, %v122_v27  ;;  %v73_v27 = vunpack.c.h.bf16 %v41_v24  ;;  %v1397_v24 = vld [vmem:[%s1873_s1 + $0x208] sm:$0xff] }
  0x2e   :  { %913 = vmatpush.bf16.msrb.mxu0 %v1368_v2  ;;  %v1364_v2 = vld [vmem:[%s1873_s1 + $0x100] sm:$0xff] }
  0x2f   :  { %932 = vmatpush.bf16.msrb.mxu1 %v1376_v49  ;;  %v40_v49 = vld [vmem:[%s1874_s0 + $0x58] sm:$0xff] }
  0x30   :  { %951 = vmatpush.bf16.msrb.mxu2 %v1384_v18  ;;  %v207_v18 = vmax.f32 %v171_v1, 0.0 }
  0x31   :  { %970 = vmatpush.bf16.msrb.mxu3 %v1392_v20  ;;  %847 = vmatmul.bf16.gmra.mxu0 %v245_v10  ;;  %v240_v10 = vpack.c.bf16 %v213_v60, %v204_v59  ;;  %v216_v20 = vmax.f32 %v180_v42, 0.0  ;;  %v137_v60 = vmul.f32 %v1688_v45, %v79_v30  ;;  %v139_v42 = vmul.f32 %v1713_v26, %v81_v53 }
  0x32   :  { %914 = vmatpush.bf16.msrb.mxu0 %v1367_v28  ;;  %866 = vmatmul.bf16.gmra.mxu1 %v246_v35  ;;  %v83_v28 = vunpack.c.l.bf16 %v47_v16  ;;  %v123_v35 = vmul.f32 %v1423_v14, %v65_v13 }
  0x33   :  { %933 = vmatpush.bf16.msrb.mxu1 %v1375_v29  ;;  %885 = vmatmul.bf16.gmra.mxu2 %v247_v40  ;;  %v70_v29 = vunpack.c.l.bf16 %v40_v49  ;;  %v1388_v40 = vld [vmem:[%s1873_s1 + $0x1c0] sm:$0xff]  ;;  %v243_v52 = vpack.c.bf16 %v216_v20, %v207_v18 }
  0x34   :  { %904 = vmatmul.bf16.gmra.mxu3 %v248_v41  ;;  %952 = vmatpush.bf16.msrb.mxu2 %v1383_v21  ;;  %v242_v41 = vpack.c.bf16 %v215_v6, %v206_v5  ;;  %v71_v21 = vunpack.c.h.bf16 %v40_v49  ;;  %v141_v44 = vmul.f32 %v1423_v14, %v83_v28  ;;  %v197_v6 = vadd.f32 %v1740_v19, %v139_v42 }
  0x35   :  { %971 = vmatpush.bf16.msrb.mxu3 %v1391_v43  ;;  %v132_v43 = vmul.f32 %v1423_v14, %v74_v25  ;;  %v128_v59 = vmul.f32 %v1688_v45, %v70_v29  ;;  %v1401_v45 = vld [vmem:[%s1873_s1 + $0x228] sm:$0xff]  ;;  %v1396_v25 = vld [vmem:[%s1873_s1 + $0x200] sm:$0xff] }
  0x36   :  { %915 = vmatpush.bf16.msrb.mxu0 %v1366_v50  ;;  %v172_v50 = vadd.f32 %v1424_v37, %v114_v33  ;;  %v199_v55 = vadd.f32 %v1424_v37, %v141_v44  ;;  %v129_v61 = vmul.f32 %v1694_v7, %v71_v21 }
  0x37   :  { %934 = vmatpush.bf16.msrb.mxu1 %v1374_v51  ;;  %v181_v51 = vadd.f32 %v1424_v37, %v123_v35  ;;  %v190_v54 = vadd.f32 %v1424_v37, %v132_v43  ;;  %v186_v49 = vadd.f32 %v1703_v17, %v128_v59 }
  0x38   :  { %953 = vmatpush.bf16.msrb.mxu2 %v1382_v36  ;;  %v82_v36 = vunpack.c.h.bf16 %v46_v31  ;;  %v187_v4 = vadd.f32 %v1725_v34, %v129_v61 }
  0x39   :  { %972 = vmatpush.bf16.msrb.mxu3 %v1390_v46  ;;  %v208_v46 = vmax.f32 %v172_v50, 0.0  ;;  %v217_v56 = vmax.f32 %v181_v51, 0.0 }
  0x3a   :  { %916 = vmatpush.bf16.msrb.mxu0 %v1365_v22  ;;  %v226_v22 = vmax.f32 %v190_v54, 0.0 }
  0x3b   :  { %935 = vmatpush.bf16.msrb.mxu1 %v1373_v58  ;;  %v235_v58 = vmax.f32 %v199_v55, 0.0  ;;  %v244_v62 = vpack.c.bf16 %v217_v56, %v208_v46 }
  0x3c   :  { %954 = vmatpush.bf16.msrb.mxu2 %v1381_v63  ;;  %v138_v63 = vmul.f32 %v1694_v7, %v80_v47  ;;  %v195_v7 = vadd.f32 %v1703_v17, %v137_v60 }
  0x3d   :  { %973 = vmatpush.bf16.msrb.mxu3 %v1389_v0  ;;  %v130_v0 = vmul.f32 %v1713_v26, %v72_v48  ;;  %v253_v1 = vpack.c.bf16 %v235_v58, %v226_v22 }
  0x3e   :  { %917 = vmatpush.bf16.msrb.mxu0 %v1364_v2  ;;  %v131_v2 = vmul.f32 %v1728_v39, %v73_v27  ;;  %v196_v5 = vadd.f32 %v1725_v34, %v138_v63  ;;  %v231_v17 = vmax.f32 %v195_v7, 0.0  ;;  %v233_v34 = vmax.f32 %v197_v6, 0.0 }
  0x3f   :  { %936 = vmatpush.bf16.msrb.mxu1 %v1372_v3  ;;  %v140_v3 = vmul.f32 %v1728_v39, %v82_v36  ;;  %v188_v26 = vadd.f32 %v1740_v19, %v130_v0  ;;  %v1399_v19 = vld [vmem:[%s1873_s1 + $0x218] sm:$0xff] }
  0x40   :  { %955 = vmatpush.bf16.msrb.mxu2 %v1380_v38  ;;  %v189_v39 = vadd.f32 %v1754_v32, %v131_v2  ;;  %v232_v12 = vmax.f32 %v196_v5, 0.0 }
  0x41   :  { %974 = vmatpush.bf16.msrb.mxu3 %v1388_v40  ;;  %918 = vmatmul.bf16.vlgmr.msrb.gmra.mxu0 %v240_v10  ;;  %v198_v8 = vadd.f32 %v1754_v32, %v140_v3  ;;  %v222_v10 = vmax.f32 %v186_v49, 0.0  ;;  %v224_v13 = vmax.f32 %v188_v26, 0.0 }
  0x42   :  { %986 = vmatpush.bf16.msra.mxu0 %v1403_v23  ;;  %937 = vmatmul.bf16.vlgmr.msrb.gmra.mxu1 %v241_v11  ;;  %v223_v11 = vmax.f32 %v187_v4, 0.0  ;;  %v225_v14 = vmax.f32 %v189_v39, 0.0 }
  0x43   :  { %1415 = vmatpush.bf16.msra.mxu1 %v1403_v23  ;;  %956 = vmatmul.bf16.vlgmr.msrb.gmra.mxu2 %v242_v41  ;;  %v234_v15 = vmax.f32 %v198_v8, 0.0  ;;  %v249_v32 = vpack.c.bf16 %v231_v17, %v222_v10  ;;  %v251_v18 = vpack.c.bf16 %v233_v34, %v224_v13  ;;  %v1398_v23 = vld [vmem:[%s1873_s1 + $0x210] sm:$0xff] }
  0x44   :  { %975 = vmatmul.bf16.vlgmr.msrb.gmra.mxu3 %v243_v52  ;;  %v250_v16 = vpack.c.bf16 %v232_v12, %v223_v11 }
  0x45   :  { %v252_v20 = vpack.c.bf16 %v234_v15, %v225_v14 }
  0x46   :  { %987 = vmatpush.bf16.msra.mxu0 %v1402_v57 }
  0x47   :  { %1416 = vmatpush.bf16.msra.mxu1 %v1402_v57 }
  0x4a   :  { %988 = vmatpush.bf16.msra.mxu0 %v1401_v45 }
  0x4b   :  { %1417 = vmatpush.bf16.msra.mxu1 %v1401_v45 }
  0x4e   :  { %989 = vmatpush.bf16.msra.mxu0 %v1400_v9 }
  0x4f   :  { %1418 = vmatpush.bf16.msra.mxu1 %v1400_v9 }
  0x51   :  { %923 = vmatmul.bf16.gmra.mxu0 %v249_v32 }
  0x52   :  { %990 = vmatpush.bf16.msra.mxu0 %v1399_v19  ;;  %942 = vmatmul.bf16.gmra.mxu1 %v250_v16 }
  0x53   :  { %1419 = vmatpush.bf16.msra.mxu1 %v1399_v19  ;;  %961 = vmatmul.bf16.gmra.mxu2 %v251_v18 }
  0x54   :  { %980 = vmatmul.bf16.gmra.mxu3 %v252_v20  ;;  %v1425_v20 = vld [vmem:[%s1877_s2] ss:$0 sm:$0xff] }
  0x56   :  { %991 = vmatpush.bf16.msra.mxu0 %v1398_v23 }
  0x57   :  { %1420 = vmatpush.bf16.msra.mxu1 %v1398_v23 }
  0x5a   :  { %992 = vmatpush.bf16.msra.mxu0 %v1397_v24 }
  0x5b   :  { %1421 = vmatpush.bf16.msra.mxu1 %v1397_v24 }
  0x5e   :  { %993 = vmatpush.bf16.msra.mxu0 %v1396_v25 }
  0x5f   :  { %1422 = vmatpush.bf16.msra.mxu1 %v1396_v25 }
  0x61   :  { %994 = vmatmul.bf16.vlgmr.msra.gmra.mxu0 %v244_v62 }
  0x62   :  { %999 = vmatmul.bf16.vlgmr.msra.gmra.mxu1 %v253_v1 }
  0x9e   :  { %v843_v28 = vpop.f32.mrf.mxu0 }
  0x9f   :  { %v862_v29 = vpop.f32.mrf.mxu1 }
  0xa0   :  { %v863_v57 = vadd.f32 %v862_v29, %v843_v28 }
  0xa6   :  { %v881_v30 = vpop.f32.mrf.mxu2  ;;  %v845_v33 = vpop.f32.mrf.mxu0 }
  0xa7   :  { %v900_v31 = vpop.f32.mrf.mxu3  ;;  %v864_v35 = vpop.f32.mrf.mxu1  ;;  %v882_v59 = vadd.f32 %v881_v30, %v863_v57 }
  0xa8   :  { %v865_v61 = vadd.f32 %v864_v35, %v845_v33 }
  0xa9   :  { %v901_v63 = vadd.f32 %v900_v31, %v882_v59 }
  0xae   :  { %v883_v37 = vpop.f32.mrf.mxu2  ;;  %v848_v40 = vpop.f32.mrf.mxu0 }
  0xaf   :  { %v902_v38 = vpop.f32.mrf.mxu3  ;;  %v867_v41 = vpop.f32.mrf.mxu1  ;;  %v884_v0 = vadd.f32 %v883_v37, %v865_v61 }
  0xb0   :  { %v868_v22 = vadd.f32 %v867_v41, %v848_v40 }
  0xb1   :  { %v903_v4 = vadd.f32 %v902_v38, %v884_v0 }
  0xb6   :  { %v886_v21 = vpop.f32.mrf.mxu2  ;;  %v850_v44 = vpop.f32.mrf.mxu0 }
  0xb7   :  { %v905_v43 = vpop.f32.mrf.mxu3  ;;  %v869_v47 = vpop.f32.mrf.mxu1  ;;  %v887_v60 = vadd.f32 %v886_v21, %v868_v22 }
  0xb8   :  { %v870_v62 = vadd.f32 %v869_v47, %v850_v44 }
  0xb9   :  { %v906_v1 = vadd.f32 %v905_v43, %v887_v60 }
  0xbe   :  { %v888_v48 = vpop.f32.mrf.mxu2  ;;  %v919_v51 = vpop.f32.mrf.mxu0 }
  0xbf   :  { %v907_v50 = vpop.f32.mrf.mxu3  ;;  %v938_v52 = vpop.f32.mrf.mxu1  ;;  %v889_v42 = vadd.f32 %v888_v48, %v870_v62  ;;  %v920_v49 = vadd.f32 %v919_v51, %v901_v63 }
  0xc1   :  { %v908_v5 = vadd.f32 %v907_v50, %v889_v42  ;;  %v939_v6 = vadd.f32 %v938_v52, %v920_v49 }
  0xc6   :  { %v957_v53 = vpop.f32.mrf.mxu2  ;;  %v921_v55 = vpop.f32.mrf.mxu0 }
  0xc7   :  { %v976_v54 = vpop.f32.mrf.mxu3  ;;  %v940_v27 = vpop.f32.mrf.mxu1  ;;  %v922_v39 = vadd.f32 %v921_v55, %v903_v4  ;;  %v958_v10 = vadd.f32 %v957_v53, %v939_v6 }
  0xc9   :  { %v941_v34 = vadd.f32 %v940_v27, %v922_v39  ;;  %v977_v15 = vadd.f32 %v976_v54, %v958_v10 }
  0xce   :  { %v959_v36 = vpop.f32.mrf.mxu2  ;;  %v924_v46 = vpop.f32.mrf.mxu0 }
  0xcf   :  { %v943_v56 = vpop.f32.mrf.mxu1  ;;  %v978_v58 = vpop.f32.mrf.mxu3  ;;  %v925_v7 = vadd.f32 %v924_v46, %v906_v1  ;;  %v960_v19 = vadd.f32 %v959_v36, %v941_v34 }
  0xd1   :  { %v944_v8 = vadd.f32 %v943_v56, %v925_v7  ;;  %v979_v25 = vadd.f32 %v978_v58, %v960_v19 }
  0xd6   :  { %v962_v2 = vpop.f32.mrf.mxu2  ;;  %v926_v3 = vpop.f32.mrf.mxu0 }
  0xd7   :  { %v945_v45 = vpop.f32.mrf.mxu1  ;;  %v981_v26 = vpop.f32.mrf.mxu3  ;;  %v927_v9 = vadd.f32 %v926_v3, %v908_v5  ;;  %v963_v17 = vadd.f32 %v962_v2, %v944_v8 }
  0xd9   :  { %v946_v14 = vadd.f32 %v945_v45, %v927_v9  ;;  %v982_v32 = vadd.f32 %v981_v26, %v963_v17 }
  0xde   :  { %v964_v11 = vpop.f32.mrf.mxu2  ;;  %v995_v12 = vpop.f32.mrf.mxu0 }
  0xdf   :  { %v1000_v13 = vpop.f32.mrf.mxu1  ;;  %v965_v16 = vadd.f32 %v964_v11, %v946_v14  ;;  %v996_v18 = vadd.f32 %v995_v12, %v977_v15  ;;  %v983_v24 = vpop.f32.mrf.mxu3 }
  0xe0   :  { %v1001_v23 = vadd.f32 %v1000_v13, %v982_v32 }
  0xe1   :  { %v984_v28 = vadd.f32 %v983_v24, %v965_v16  ;;  %v1024_v31 = vadd.f32 %v1425_v20, %v996_v18 }
  0xe2   :  { %v1026_v33 = vadd.f32 %v1425_v20, %v1001_v23 }
  0xe3   :  { %v1028_v41 = vmax.f32 %v1024_v31, 0.0 }
  0xe4   :  { %v1030_v21 = vmax.f32 %v1026_v33, 0.0 }
  0xe6   :  { %v997_v29 = vpop.f32.mrf.mxu0 }
  0xe7   :  { %v1002_v30 = vpop.f32.mrf.mxu1  ;;  %v998_v35 = vadd.f32 %v997_v29, %v979_v25 }
  0xe8   :  { %v1003_v37 = vadd.f32 %v1002_v30, %v984_v28 }
  0xe9   :  { %v1025_v38 = vadd.f32 %v1425_v20, %v998_v35 }
  0xea   :  { %v1027_v40 = vadd.f32 %v1425_v20, %v1003_v37 }
  0xeb   :  { %v1029_v43 = vmax.f32 %v1025_v38, 0.0 }
  0xec   :  { %v1031_v44 = vmax.f32 %v1027_v40, 0.0 }
  0xed   :  { %v1407_v47 = vpack.c.bf16 %v1029_v43, %v1028_v41 }
  0xee   :  { %v1412_v48 = vpack.c.bf16 %v1031_v44, %v1030_v21 }
  0xef   :  { %1408 = vst [vmem:[%s1878_s5] sm:$0xff] %v1407_v47  }
  0xf0   :  { %1414 = vst [vmem:[%s1878_s5 + $0x8] sm:$0xff] %v1412_v48  }

// kernel: encoder_forward.11
= control target key start
LH: loop header
LB: loop body
LE: loop exit
PB: predicated region body
PF: predicated region fallthrough
CT: control target
= control target key end

     0   :  { %vm18_vm0 = vcmask 523264   ;;  %v563_v44 = vmov 0.0   ;;  %s719_s1 = inlined_call_operand.vmem [shape: bf16[512,64], index: 1, kind: input, shape index: {}]   ;;  %s720_s0 = inlined_call_operand.vmem [shape: bf16[16,512], index: 0, kind: input, shape index: {}]   ;;  %s721_s2 = inlined_call_operand.vmem [shape: f32[1,64], index: 2, kind: input, shape index: {}]   ;;  %s722_s3 = inlined_call_operand.vmem [shape: f32[16,64], index: 3, kind: output, shape index: {}]  }
   0x1   :  { %v536_v0 = vld [vmem:[%s719_s1 + $0x38] sm:$0xff]  ;;  %v535_v4 = vld [vmem:[%s719_s1 + $0x30] sm:$0xff]  ;;  %v534_v8 = vld [vmem:[%s719_s1 + $0x28] sm:$0xff]  ;;  %19 = vst.msk [vmem:[#allocation2] sm:$0xff] %vm18_vm0, %v563_v44 }
   0x2   :  { %v544_v1 = vld [vmem:[%s719_s1 + $0x78] sm:$0xff]  ;;  %303 = vmatpush.bf16.msra.mxu0 %v536_v0  ;;  %v543_v5 = vld [vmem:[%s719_s1 + $0x70] sm:$0xff]  ;;  %v542_v9 = vld [vmem:[%s719_s1 + $0x68] sm:$0xff]  ;;  %20 = vst.msk [vmem:[#allocation2 + $0x8] sm:$0xff] %vm18_vm0, %v563_v44 }
   0x3   :  { %v552_v2 = vld [vmem:[%s719_s1 + $0xb8] sm:$0xff]  ;;  %317 = vmatpush.bf16.msra.mxu1 %v544_v1  ;;  %v551_v6 = vld [vmem:[%s719_s1 + $0xb0] sm:$0xff]  ;;  %v550_v10 = vld [vmem:[%s719_s1 + $0xa8] sm:$0xff] }
   0x4   :  { %v560_v3 = vld [vmem:[%s719_s1 + $0xf8] sm:$0xff]  ;;  %331 = vmatpush.bf16.msra.mxu2 %v552_v2  ;;  %v559_v7 = vld [vmem:[%s719_s1 + $0xf0] sm:$0xff]  ;;  %v558_v11 = vld [vmem:[%s719_s1 + $0xe8] sm:$0xff] }
   0x5   :  { %345 = vmatpush.bf16.msra.mxu3 %v560_v3  ;;  %v533_v12 = vld [vmem:[%s719_s1 + $0x20] sm:$0xff]  ;;  %v532_v16 = vld [vmem:[%s719_s1 + $0x18] sm:$0xff]  ;;  %v531_v20 = vld [vmem:[%s719_s1 + $0x10] sm:$0xff] }
   0x6   :  { %304 = vmatpush.bf16.msra.mxu0 %v535_v4  ;;  %v541_v13 = vld [vmem:[%s719_s1 + $0x60] sm:$0xff]  ;;  %v540_v17 = vld [vmem:[%s719_s1 + $0x58] sm:$0xff]  ;;  %v539_v21 = vld [vmem:[%s719_s1 + $0x50] sm:$0xff] }
   0x7   :  { %318 = vmatpush.bf16.msra.mxu1 %v543_v5  ;;  %v549_v14 = vld [vmem:[%s719_s1 + $0xa0] sm:$0xff]  ;;  %v548_v18 = vld [vmem:[%s719_s1 + $0x98] sm:$0xff]  ;;  %v547_v22 = vld [vmem:[%s719_s1 + $0x90] sm:$0xff] }
   0x8   :  { %332 = vmatpush.bf16.msra.mxu2 %v551_v6  ;;  %v557_v15 = vld [vmem:[%s719_s1 + $0xe0] sm:$0xff]  ;;  %v556_v19 = vld [vmem:[%s719_s1 + $0xd8] sm:$0xff]  ;;  %v555_v23 = vld [vmem:[%s719_s1 + $0xd0] sm:$0xff] }
   0x9   :  { %346 = vmatpush.bf16.msra.mxu3 %v559_v7  ;;  %v530_v24 = vld [vmem:[%s719_s1 + $0x8] sm:$0xff]  ;;  %v529_v28 = vld [vmem:[%s719_s1] sm:$0xff]  ;;  %v527_v33 = vld [vmem:[%s720_s0 + $0xc] sm:$0xf0] }
   0xa   :  { %305 = vmatpush.bf16.msra.mxu0 %v534_v8  ;;  %v538_v25 = vld [vmem:[%s719_s1 + $0x48] sm:$0xff]  ;;  %v537_v29 = vld [vmem:[%s719_s1 + $0x40] sm:$0xff]  ;;  %v385_v35 = vld [vmem:[%s720_s0 + $0x10] sm:$0xf0] }
   0xb   :  { %319 = vmatpush.bf16.msra.mxu1 %v542_v9  ;;  %v546_v26 = vld [vmem:[%s719_s1 + $0x88] sm:$0xff]  ;;  %v545_v30 = vld [vmem:[%s719_s1 + $0x80] sm:$0xff]  ;;  %v528_v37 = vld [vmem:[%s720_s0 + $0x14] sm:$0xf0] }
   0xc   :  { %333 = vmatpush.bf16.msra.mxu2 %v550_v10  ;;  %v554_v27 = vld [vmem:[%s719_s1 + $0xc8] sm:$0xff]  ;;  %v553_v31 = vld [vmem:[%s719_s1 + $0xc0] sm:$0xff]  ;;  %v393_v39 = vld [vmem:[%s720_s0 + $0x18] sm:$0xf0] }
   0xd   :  { %347 = vmatpush.bf16.msra.mxu3 %v558_v11  ;;  %v383_v32 = vld [vmem:[%s720_s0] sm:$0xf]  ;;  %v525_v34 = vld [vmem:[%s720_s0 + $0x4] sm:$0xf]  ;;  %v391_v36 = vld [vmem:[%s720_s0 + $0x8] sm:$0xf] }
   0xe   :  { %306 = vmatpush.bf16.msra.mxu0 %v533_v12  ;;  %v526_v38 = vld [vmem:[%s720_s0 + $0xc] sm:$0xf]  ;;  %v384_v40 = vor.u32 %v527_v33, %v383_v32  ;;  %v388_v41 = vor.u32 %v525_v34, %v385_v35  ;;  %v392_v42 = vor.u32 %v528_v37, %v391_v36  ;;  %v25_v51 = vld [vmem:[#allocation2] sm:$0xff] }
   0xf   :  { %320 = vmatpush.bf16.msra.mxu1 %v541_v13  ;;  %v396_v43 = vor.u32 %v526_v38, %v393_v39  ;;  %v26_v59 = vld [vmem:[#allocation2 + $0x8] sm:$0xff]  ;;  %v562_v61 = vld [vmem:[%s721_s2] ss:$0 sm:$0xff] }
  0x10   :  { %334 = vmatpush.bf16.msra.mxu2 %v549_v14 }
  0x11   :  { %348 = vmatpush.bf16.msra.mxu3 %v557_v15 }
  0x12   :  { %307 = vmatpush.bf16.msra.mxu0 %v532_v16 }
  0x13   :  { %321 = vmatpush.bf16.msra.mxu1 %v540_v17 }
  0x14   :  { %335 = vmatpush.bf16.msra.mxu2 %v548_v18 }
  0x15   :  { %349 = vmatpush.bf16.msra.mxu3 %v556_v19 }
  0x16   :  { %308 = vmatpush.bf16.msra.mxu0 %v531_v20 }
  0x17   :  { %322 = vmatpush.bf16.msra.mxu1 %v539_v21 }
  0x18   :  { %336 = vmatpush.bf16.msra.mxu2 %v547_v22 }
  0x19   :  { %350 = vmatpush.bf16.msra.mxu3 %v555_v23 }
  0x1a   :  { %309 = vmatpush.bf16.msra.mxu0 %v530_v24 }
  0x1b   :  { %323 = vmatpush.bf16.msra.mxu1 %v538_v25 }
  0x1c   :  { %337 = vmatpush.bf16.msra.mxu2 %v546_v26 }
  0x1d   :  { %351 = vmatpush.bf16.msra.mxu3 %v554_v27 }
  0x1e   :  { %310 = vmatpush.bf16.msra.mxu0 %v529_v28 }
  0x1f   :  { %324 = vmatpush.bf16.msra.mxu1 %v537_v29 }
  0x20   :  { %338 = vmatpush.bf16.msra.mxu2 %v545_v30 }
  0x21   :  { %352 = vmatpush.bf16.msra.mxu3 %v553_v31  ;;  %311 = vmatmul.bf16.vlgmr.msra.gmra.mxu0 %v384_v40 }
  0x22   :  { %325 = vmatmul.bf16.vlgmr.msra.gmra.mxu1 %v388_v41 }
  0x23   :  { %339 = vmatmul.bf16.vlgmr.msra.gmra.mxu2 %v392_v42 }
  0x24   :  { %353 = vmatmul.bf16.vlgmr.msra.gmra.mxu3 %v396_v43 }
  0x9e   :  { %v312_v45 = vpop.f32.mrf.mxu0 }
  0x9f   :  { %v326_v46 = vpop.f32.mrf.mxu1 }
  0xa0   :  { %v327_v47 = vadd.f32 %v326_v46, %v312_v45 }
  0xa6   :  { %v340_v48 = vpop.f32.mrf.mxu2  ;;  %v314_v53 = vpop.f32.mrf.mxu0 }
  0xa7   :  { %v354_v49 = vpop.f32.mrf.mxu3  ;;  %v341_v50 = vadd.f32 %v340_v48, %v327_v47  ;;  %v328_v54 = vpop.f32.mrf.mxu1 }
  0xa8   :  { %v329_v56 = vadd.f32 %v328_v54, %v314_v53 }
  0xa9   :  { %v355_v52 = vadd.f32 %v354_v49, %v341_v50 }
  0xab   :  { %v359_v55 = vadd.f32 %v355_v52, %v25_v51 }
  0xad   :  { %362 = vst.msk [vmem:[#allocation2] sm:$0xff] %vm18_vm0, %v359_v55 }
  0xae   :  { %v342_v57 = vpop.f32.mrf.mxu2 }
  0xaf   :  { %v343_v58 = vadd.f32 %v342_v57, %v329_v56  ;;  %v356_v60 = vpop.f32.mrf.mxu3 }
  0xb1   :  { %v357_v62 = vadd.f32 %v356_v60, %v343_v58 }
  0xb3   :  { %v360_v63 = vadd.f32 %v357_v62, %v26_v59 }
  0xb4   :  { %v367_v0 = vld [vmem:[#allocation2] sm:$0xff] }
  0xb5   :  { %v373_v1 = vadd.f32 %v562_v61, %v367_v0  ;;  %363 = vst.msk [vmem:[#allocation2 + $0x8] sm:$0xff] %vm18_vm0, %v360_v63 }
  0xb7   :  { %375 = vst.msk [vmem:[%s722_s3] sm:$0xff] %vm18_vm0, %v373_v1 }
  0xbc   :  { %v368_v2 = vld [vmem:[#allocation2 + $0x8] sm:$0xff] }
  0xbd   :  { %v374_v3 = vadd.f32 %v562_v61, %v368_v2 }
  0xbf   :  { %376 = vst.msk [vmem:[%s722_s3 + $0x8] sm:$0xff] %vm18_vm0, %v374_v3 }

// kernel: encoder_forward.10
= control target key start
LH: loop header
LB: loop body
LE: loop exit
PB: predicated region body
PF: predicated region fallthrough
CT: control target
= control target key end

     0   :  { %s4792_s12 = smov 0   ;;  %s4794_s13 = smov 0   ;;  %s6012_s0 = inlined_call_operand.vmem [shape: bf16[16,1920], index: 0, kind: input, shape index: {}]   ;;  %s6013_s1 = inlined_call_operand.vmem [shape: bf16[1920,512], index: 1, kind: input, shape index: {}]   ;;  %s6014_s2 = inlined_call_operand.vmem [shape: f32[1,512], index: 2, kind: input, shape index: {}]   ;;  %s6015_s3 = inlined_call_operand.vmem [shape: bf16[16,512], index: 3, kind: output, shape index: {}]  }
   0x1   :  { %s4796_s14 = smov 0   ;;  %s4798_s15 = smov 0  }
   0x2   :  { %s4800_s16 = smov 0  }
   0x3 LB: > { %s28_s17 = sadd.s32 1, %s4766_s15  ;;  %s3398_s18 = sadd.s32 4294967295, %s4770_s16   ;;  %s4770_s16 = sphi %s4800_s16, %s13_s16   ;;  %s4766_s15 = sphi %s4798_s15, %s6020_s15   ;;  %s4762_s14 = sphi %s4796_s14, %s6019_s14   ;;  %s4758_s13 = sphi %s4794_s13, %s6018_s13   ;;  %s4754_s12 = sphi %s4792_s12, %s6017_s12  }
   0x4   : > { %p30_p0 = scmp.ge.s32.totalorder %s28_s17, 2  ;;  %p76_p1 = scmp.ne.s32.totalorder %s4758_s13, %s4754_s12 }
   0x5   : > { %p77_p2 = scmp.eq.s32.totalorder %s4770_s16, 0  ;;  %p134_p4 = scmp.eq.s32.totalorder %s3398_s18, 1 }
   0x6   : > { %s6022_s17 = smov (%p30_p0, %s28_s17), 0  ;;  %s69_s20 = sadd.s32 1, %s4758_s13 }
   0x7   : > { %p78_p3 = por %p77_p2, %p76_p1  ;;  %s65_s19 = ssub.s32 %s4766_s15, %s6022_s17 }
   0x8   : > { %p67_p5 = scmp.eq.s32.totalorder %s65_s19, 0  ;;  %p4827_p6 = por %p134_p4, %p76_p1 }
   0x9   : > { %p3402_p7 = scmp.ge.s32.totalorder %s4770_s16, 2 }
   0xa   : > { %s4832_s22 = scalar_select %p67_p5, %s4758_s13, %s69_s20  }
   0xb   : > { %171 = sbr.rel (%p3402_p7) target bundleno = 260 (0x104), region = 20 }
  0x10   : > { %174 = sbr.rel (!%p78_p3) target bundleno = 260 (0x104), region = 24  ;;  %s176_s23 = sand.u32 (%p78_p3), 1, %s4758_s13  }
  0x11   : > { %s4433_s24 = sshll.u32 (%p78_p3), %s4766_s15, 3  ;;  %s4690_s25 = smul.u32 (%p78_p3), 1920, %s176_s23 }
  0x12   : > { %s4840_s28 = scalar_lea.vmem (%p78_p3), %s6013_s1, %s4433_s24 }
  0x13   : > { %v691_v0 = vld [vmem:[%s4840_s28] sm:$0xff] (%p78_p3)  ;;  %v693_v1 = vld [vmem:[%s4840_s28 + $0x10] sm:$0xff] (%p78_p3)  ;;  %s4845_s29 = scalar_lea.vmem (%p78_p3), [#allocation3], %s4690_s25 }
  0x14   : > { %v695_v2 = vld [vmem:[%s4840_s28 + $0x20] sm:$0xff] (%p78_p3)  ;;  %692 = vst [vmem:[%s4845_s29] sm:$0xff] (%p78_p3), %v691_v0  ;;  %v697_v3 = vld [vmem:[%s4840_s28 + $0x30] sm:$0xff] (%p78_p3) }
  0x15   : > { %694 = vst [vmem:[%s4845_s29 + $0x8] sm:$0xff] %v693_v1  ;;  %v699_v4 = vld [vmem:[%s4840_s28 + $0x40] sm:$0xff]  ;;  %v701_v5 = vld [vmem:[%s4840_s28 + $0x50] sm:$0xff] }
  0x16   : > { %696 = vst [vmem:[%s4845_s29 + $0x10] sm:$0xff] %v695_v2  ;;  %v703_v6 = vld [vmem:[%s4840_s28 + $0x60] sm:$0xff]  ;;  %v705_v7 = vld [vmem:[%s4840_s28 + $0x70] sm:$0xff] }
  0x17   : > { %698 = vst [vmem:[%s4845_s29 + $0x18] sm:$0xff] %v697_v3  ;;  %v707_v8 = vld [vmem:[%s4840_s28 + $0x80] sm:$0xff]  ;;  %v709_v9 = vld [vmem:[%s4840_s28 + $0x90] sm:$0xff] }
  0x18   : > { %700 = vst [vmem:[%s4845_s29 + $0x20] sm:$0xff] %v699_v4  ;;  %v711_v10 = vld [vmem:[%s4840_s28 + $0xa0] sm:$0xff]  ;;  %v713_v11 = vld [vmem:[%s4840_s28 + $0xb0] sm:$0xff] }
  0x19   : > { %702 = vst [vmem:[%s4845_s29 + $0x28] sm:$0xff] %v701_v5  ;;  %v715_v12 = vld [vmem:[%s4840_s28 + $0xc0] sm:$0xff]  ;;  %v717_v13 = vld [vmem:[%s4840_s28 + $0xd0] sm:$0xff] }
  0x1a   : > { %704 = vst [vmem:[%s4845_s29 + $0x30] sm:$0xff] %v703_v6  ;;  %v719_v14 = vld [vmem:[%s4840_s28 + $0xe0] sm:$0xff]  ;;  %v721_v15 = vld [vmem:[%s4840_s28 + $0xf0] sm:$0xff] }
  0x1b   : > { %706 = vst [vmem:[%s4845_s29 + $0x38] sm:$0xff] %v705_v7  ;;  %v723_v16 = vld [vmem:[%s4840_s28 + $0x100] sm:$0xff]  ;;  %v725_v17 = vld [vmem:[%s4840_s28 + $0x110] sm:$0xff] }
  0x1c   : > { %708 = vst [vmem:[%s4845_s29 + $0x40] sm:$0xff] %v707_v8  ;;  %v727_v18 = vld [vmem:[%s4840_s28 + $0x120] sm:$0xff]  ;;  %v729_v19 = vld [vmem:[%s4840_s28 + $0x130] sm:$0xff] }
  0x1d   : > { %710 = vst [vmem:[%s4845_s29 + $0x48] sm:$0xff] %v709_v9  ;;  %v731_v20 = vld [vmem:[%s4840_s28 + $0x140] sm:$0xff]  ;;  %v733_v21 = vld [vmem:[%s4840_s28 + $0x150] sm:$0xff] }
  0x1e   : > { %712 = vst [vmem:[%s4845_s29 + $0x50] sm:$0xff] %v711_v10  ;;  %v735_v22 = vld [vmem:[%s4840_s28 + $0x160] sm:$0xff]  ;;  %v737_v23 = vld [vmem:[%s4840_s28 + $0x170] sm:$0xff] }
  0x1f   : > { %714 = vst [vmem:[%s4845_s29 + $0x58] sm:$0xff] %v713_v11  ;;  %v739_v24 = vld [vmem:[%s4840_s28 + $0x180] sm:$0xff]  ;;  %v741_v25 = vld [vmem:[%s4840_s28 + $0x190] sm:$0xff] }
  0x20   : > { %716 = vst [vmem:[%s4845_s29 + $0x60] sm:$0xff] %v715_v12  ;;  %v743_v26 = vld [vmem:[%s4840_s28 + $0x1a0] sm:$0xff]  ;;  %v745_v27 = vld [vmem:[%s4840_s28 + $0x1b0] sm:$0xff] }
  0x21   : > { %718 = vst [vmem:[%s4845_s29 + $0x68] sm:$0xff] %v717_v13  ;;  %v747_v28 = vld [vmem:[%s4840_s28 + $0x1c0] sm:$0xff]  ;;  %v749_v29 = vld [vmem:[%s4840_s28 + $0x1d0] sm:$0xff] }
  0x22   : > { %720 = vst [vmem:[%s4845_s29 + $0x70] sm:$0xff] %v719_v14  ;;  %v751_v30 = vld [vmem:[%s4840_s28 + $0x1e0] sm:$0xff]  ;;  %v753_v31 = vld [vmem:[%s4840_s28 + $0x1f0] sm:$0xff] }
  0x23   : > { %722 = vst [vmem:[%s4845_s29 + $0x78] sm:$0xff] %v721_v15  ;;  %v755_v32 = vld [vmem:[%s4840_s28 + $0x200] sm:$0xff]  ;;  %v757_v33 = vld [vmem:[%s4840_s28 + $0x210] sm:$0xff] }
  0x24   : > { %724 = vst [vmem:[%s4845_s29 + $0x80] sm:$0xff] %v723_v16  ;;  %v759_v34 = vld [vmem:[%s4840_s28 + $0x220] sm:$0xff]  ;;  %v761_v35 = vld [vmem:[%s4840_s28 + $0x230] sm:$0xff] }
  0x25   : > { %726 = vst [vmem:[%s4845_s29 + $0x88] sm:$0xff] %v725_v17  ;;  %v763_v36 = vld [vmem:[%s4840_s28 + $0x240] sm:$0xff]  ;;  %v765_v37 = vld [vmem:[%s4840_s28 + $0x250] sm:$0xff] }
  0x26   : > { %728 = vst [vmem:[%s4845_s29 + $0x90] sm:$0xff] %v727_v18  ;;  %v767_v38 = vld [vmem:[%s4840_s28 + $0x260] sm:$0xff]  ;;  %v769_v39 = vld [vmem:[%s4840_s28 + $0x270] sm:$0xff] }
  0x27   : > { %730 = vst [vmem:[%s4845_s29 + $0x98] sm:$0xff] %v729_v19  ;;  %v771_v40 = vld [vmem:[%s4840_s28 + $0x280] sm:$0xff]  ;;  %v773_v41 = vld [vmem:[%s4840_s28 + $0x290] sm:$0xff] }
  0x28   : > { %732 = vst [vmem:[%s4845_s29 + $0xa0] sm:$0xff] %v731_v20  ;;  %v775_v42 = vld [vmem:[%s4840_s28 + $0x2a0] sm:$0xff]  ;;  %v777_v43 = vld [vmem:[%s4840_s28 + $0x2b0] sm:$0xff] }
  0x29   : > { %734 = vst [vmem:[%s4845_s29 + $0xa8] sm:$0xff] %v733_v21  ;;  %v779_v44 = vld [vmem:[%s4840_s28 + $0x2c0] sm:$0xff]  ;;  %v781_v45 = vld [vmem:[%s4840_s28 + $0x2d0] sm:$0xff] }
  0x2a   : > { %736 = vst [vmem:[%s4845_s29 + $0xb0] sm:$0xff] %v735_v22  ;;  %v783_v46 = vld [vmem:[%s4840_s28 + $0x2e0] sm:$0xff]  ;;  %v785_v47 = vld [vmem:[%s4840_s28 + $0x2f0] sm:$0xff] }
  0x2b   : > { %738 = vst [vmem:[%s4845_s29 + $0xb8] sm:$0xff] %v737_v23  ;;  %v787_v48 = vld [vmem:[%s4840_s28 + $0x300] sm:$0xff]  ;;  %v789_v49 = vld [vmem:[%s4840_s28 + $0x310] sm:$0xff] }
  0x2c   : > { %740 = vst [vmem:[%s4845_s29 + $0xc0] sm:$0xff] %v739_v24  ;;  %v791_v50 = vld [vmem:[%s4840_s28 + $0x320] sm:$0xff]  ;;  %v793_v51 = vld [vmem:[%s4840_s28 + $0x330] sm:$0xff] }
  0x2d   : > { %742 = vst [vmem:[%s4845_s29 + $0xc8] sm:$0xff] %v741_v25  ;;  %v795_v52 = vld [vmem:[%s4840_s28 + $0x340] sm:$0xff]  ;;  %v797_v53 = vld [vmem:[%s4840_s28 + $0x350] sm:$0xff] }
  0x2e   : > { %744 = vst [vmem:[%s4845_s29 + $0xd0] sm:$0xff] %v743_v26  ;;  %v799_v54 = vld [vmem:[%s4840_s28 + $0x360] sm:$0xff]  ;;  %v801_v55 = vld [vmem:[%s4840_s28 + $0x370] sm:$0xff] }
  0x2f   : > { %746 = vst [vmem:[%s4845_s29 + $0xd8] sm:$0xff] %v745_v27  ;;  %v803_v56 = vld [vmem:[%s4840_s28 + $0x380] sm:$0xff]  ;;  %v805_v57 = vld [vmem:[%s4840_s28 + $0x390] sm:$0xff] }
  0x30   : > { %748 = vst [vmem:[%s4845_s29 + $0xe0] sm:$0xff] %v747_v28  ;;  %v807_v58 = vld [vmem:[%s4840_s28 + $0x3a0] sm:$0xff]  ;;  %v809_v59 = vld [vmem:[%s4840_s28 + $0x3b0] sm:$0xff] }
  0x31   : > { %750 = vst [vmem:[%s4845_s29 + $0xe8] sm:$0xff] %v749_v29  ;;  %v811_v60 = vld [vmem:[%s4840_s28 + $0x3c0] sm:$0xff]  ;;  %v813_v61 = vld [vmem:[%s4840_s28 + $0x3d0] sm:$0xff] }
  0x32   : > { %752 = vst [vmem:[%s4845_s29 + $0xf0] sm:$0xff] %v751_v30  ;;  %v815_v62 = vld [vmem:[%s4840_s28 + $0x3e0] sm:$0xff]  ;;  %v817_v63 = vld [vmem:[%s4840_s28 + $0x3f0] sm:$0xff] }
  0x33   : > { %754 = vst [vmem:[%s4845_s29 + $0xf8] sm:$0xff] %v753_v31  ;;  %v819_v0 = vld [vmem:[%s4840_s28 + $0x400] sm:$0xff]  ;;  %v821_v1 = vld [vmem:[%s4840_s28 + $0x410] sm:$0xff] }
  0x34   : > { %756 = vst [vmem:[%s4845_s29 + $0x100] sm:$0xff] %v755_v32  ;;  %v823_v2 = vld [vmem:[%s4840_s28 + $0x420] sm:$0xff]  ;;  %v825_v3 = vld [vmem:[%s4840_s28 + $0x430] sm:$0xff] }
  0x35   : > { %758 = vst [vmem:[%s4845_s29 + $0x108] sm:$0xff] %v757_v33  ;;  %v827_v4 = vld [vmem:[%s4840_s28 + $0x440] sm:$0xff]  ;;  %v829_v5 = vld [vmem:[%s4840_s28 + $0x450] sm:$0xff] }
  0x36   : > { %760 = vst [vmem:[%s4845_s29 + $0x110] sm:$0xff] %v759_v34  ;;  %v831_v6 = vld [vmem:[%s4840_s28 + $0x460] sm:$0xff]  ;;  %v833_v7 = vld [vmem:[%s4840_s28 + $0x470] sm:$0xff] }
  0x37   : > { %762 = vst [vmem:[%s4845_s29 + $0x118] sm:$0xff] %v761_v35  ;;  %v835_v8 = vld [vmem:[%s4840_s28 + $0x480] sm:$0xff]  ;;  %v837_v9 = vld [vmem:[%s4840_s28 + $0x490] sm:$0xff] }
  0x38   : > { %764 = vst [vmem:[%s4845_s29 + $0x120] sm:$0xff] %v763_v36  ;;  %v839_v10 = vld [vmem:[%s4840_s28 + $0x4a0] sm:$0xff]  ;;  %v841_v11 = vld [vmem:[%s4840_s28 + $0x4b0] sm:$0xff] }
  0x39   : > { %766 = vst [vmem:[%s4845_s29 + $0x128] sm:$0xff] %v765_v37  ;;  %v843_v12 = vld [vmem:[%s4840_s28 + $0x4c0] sm:$0xff]  ;;  %v845_v13 = vld [vmem:[%s4840_s28 + $0x4d0] sm:$0xff] }
  0x3a   : > { %768 = vst [vmem:[%s4845_s29 + $0x130] sm:$0xff] %v767_v38  ;;  %v847_v14 = vld [vmem:[%s4840_s28 + $0x4e0] sm:$0xff]  ;;  %v849_v15 = vld [vmem:[%s4840_s28 + $0x4f0] sm:$0xff] }
  0x3b   : > { %770 = vst [vmem:[%s4845_s29 + $0x138] sm:$0xff] %v769_v39  ;;  %v851_v16 = vld [vmem:[%s4840_s28 + $0x500] sm:$0xff]  ;;  %v853_v17 = vld [vmem:[%s4840_s28 + $0x510] sm:$0xff] }
  0x3c   : > { %772 = vst [vmem:[%s4845_s29 + $0x140] sm:$0xff] %v771_v40  ;;  %v855_v18 = vld [vmem:[%s4840_s28 + $0x520] sm:$0xff]  ;;  %v857_v19 = vld [vmem:[%s4840_s28 + $0x530] sm:$0xff] }
  0x3d   : > { %774 = vst [vmem:[%s4845_s29 + $0x148] sm:$0xff] %v773_v41  ;;  %v859_v20 = vld [vmem:[%s4840_s28 + $0x540] sm:$0xff]  ;;  %v861_v21 = vld [vmem:[%s4840_s28 + $0x550] sm:$0xff] }
  0x3e   : > { %776 = vst [vmem:[%s4845_s29 + $0x150] sm:$0xff] %v775_v42  ;;  %v863_v22 = vld [vmem:[%s4840_s28 + $0x560] sm:$0xff]  ;;  %v865_v23 = vld [vmem:[%s4840_s28 + $0x570] sm:$0xff] }
  0x3f   : > { %778 = vst [vmem:[%s4845_s29 + $0x158] sm:$0xff] %v777_v43  ;;  %v867_v24 = vld [vmem:[%s4840_s28 + $0x580] sm:$0xff]  ;;  %v869_v25 = vld [vmem:[%s4840_s28 + $0x590] sm:$0xff] }
  0x40   : > { %780 = vst [vmem:[%s4845_s29 + $0x160] sm:$0xff] %v779_v44  ;;  %v871_v26 = vld [vmem:[%s4840_s28 + $0x5a0] sm:$0xff]  ;;  %v873_v27 = vld [vmem:[%s4840_s28 + $0x5b0] sm:$0xff] }
  0x41   : > { %782 = vst [vmem:[%s4845_s29 + $0x168] sm:$0xff] %v781_v45  ;;  %v875_v28 = vld [vmem:[%s4840_s28 + $0x5c0] sm:$0xff]  ;;  %v877_v29 = vld [vmem:[%s4840_s28 + $0x5d0] sm:$0xff] }
  0x42   : > { %784 = vst [vmem:[%s4845_s29 + $0x170] sm:$0xff] %v783_v46  ;;  %v879_v30 = vld [vmem:[%s4840_s28 + $0x5e0] sm:$0xff]  ;;  %v881_v31 = vld [vmem:[%s4840_s28 + $0x5f0] sm:$0xff] }
  0x43   : > { %786 = vst [vmem:[%s4845_s29 + $0x178] sm:$0xff] %v785_v47  ;;  %v883_v32 = vld [vmem:[%s4840_s28 + $0x600] sm:$0xff]  ;;  %v885_v33 = vld [vmem:[%s4840_s28 + $0x610] sm:$0xff] }
  0x44   : > { %788 = vst [vmem:[%s4845_s29 + $0x180] sm:$0xff] %v787_v48  ;;  %v887_v34 = vld [vmem:[%s4840_s28 + $0x620] sm:$0xff]  ;;  %v889_v35 = vld [vmem:[%s4840_s28 + $0x630] sm:$0xff] }
  0x45   : > { %790 = vst [vmem:[%s4845_s29 + $0x188] sm:$0xff] %v789_v49  ;;  %v891_v36 = vld [vmem:[%s4840_s28 + $0x640] sm:$0xff]  ;;  %v893_v37 = vld [vmem:[%s4840_s28 + $0x650] sm:$0xff] }
  0x46   : > { %792 = vst [vmem:[%s4845_s29 + $0x190] sm:$0xff] %v791_v50  ;;  %v895_v38 = vld [vmem:[%s4840_s28 + $0x660] sm:$0xff]  ;;  %v897_v39 = vld [vmem:[%s4840_s28 + $0x670] sm:$0xff] }
  0x47   : > { %794 = vst [vmem:[%s4845_s29 + $0x198] sm:$0xff] %v793_v51  ;;  %v899_v40 = vld [vmem:[%s4840_s28 + $0x680] sm:$0xff]  ;;  %v901_v41 = vld [vmem:[%s4840_s28 + $0x690] sm:$0xff] }
  0x48   : > { %796 = vst [vmem:[%s4845_s29 + $0x1a0] sm:$0xff] %v795_v52  ;;  %v903_v42 = vld [vmem:[%s4840_s28 + $0x6a0] sm:$0xff]  ;;  %v905_v43 = vld [vmem:[%s4840_s28 + $0x6b0] sm:$0xff] }
  0x49   : > { %798 = vst [vmem:[%s4845_s29 + $0x1a8] sm:$0xff] %v797_v53  ;;  %v907_v44 = vld [vmem:[%s4840_s28 + $0x6c0] sm:$0xff]  ;;  %v909_v45 = vld [vmem:[%s4840_s28 + $0x6d0] sm:$0xff] }
  0x4a   : > { %800 = vst [vmem:[%s4845_s29 + $0x1b0] sm:$0xff] %v799_v54  ;;  %v911_v46 = vld [vmem:[%s4840_s28 + $0x6e0] sm:$0xff]  ;;  %v913_v47 = vld [vmem:[%s4840_s28 + $0x6f0] sm:$0xff] }
  0x4b   : > { %802 = vst [vmem:[%s4845_s29 + $0x1b8] sm:$0xff] %v801_v55  ;;  %v915_v48 = vld [vmem:[%s4840_s28 + $0x700] sm:$0xff]  ;;  %v917_v49 = vld [vmem:[%s4840_s28 + $0x710] sm:$0xff] }
  0x4c   : > { %804 = vst [vmem:[%s4845_s29 + $0x1c0] sm:$0xff] %v803_v56  ;;  %v919_v50 = vld [vmem:[%s4840_s28 + $0x720] sm:$0xff]  ;;  %v921_v51 = vld [vmem:[%s4840_s28 + $0x730] sm:$0xff] }
  0x4d   : > { %806 = vst [vmem:[%s4845_s29 + $0x1c8] sm:$0xff] %v805_v57  ;;  %v923_v52 = vld [vmem:[%s4840_s28 + $0x740] sm:$0xff]  ;;  %v925_v53 = vld [vmem:[%s4840_s28 + $0x750] sm:$0xff] }
  0x4e   : > { %808 = vst [vmem:[%s4845_s29 + $0x1d0] sm:$0xff] %v807_v58  ;;  %v927_v54 = vld [vmem:[%s4840_s28 + $0x760] sm:$0xff]  ;;  %v929_v55 = vld [vmem:[%s4840_s28 + $0x770] sm:$0xff] }
  0x4f   : > { %810 = vst [vmem:[%s4845_s29 + $0x1d8] sm:$0xff] %v809_v59  ;;  %v931_v56 = vld [vmem:[%s4840_s28 + $0x780] sm:$0xff]  ;;  %v933_v57 = vld [vmem:[%s4840_s28 + $0x790] sm:$0xff] }
  0x50   : > { %812 = vst [vmem:[%s4845_s29 + $0x1e0] sm:$0xff] %v811_v60  ;;  %v935_v58 = vld [vmem:[%s4840_s28 + $0x7a0] sm:$0xff]  ;;  %v937_v59 = vld [vmem:[%s4840_s28 + $0x7b0] sm:$0xff] }
  0x51   : > { %814 = vst [vmem:[%s4845_s29 + $0x1e8] sm:$0xff] %v813_v61  ;;  %v939_v60 = vld [vmem:[%s4840_s28 + $0x7c0] sm:$0xff]  ;;  %v941_v61 = vld [vmem:[%s4840_s28 + $0x7d0] sm:$0xff] }
  0x52   : > { %816 = vst [vmem:[%s4845_s29 + $0x1f0] sm:$0xff] %v815_v62  ;;  %v943_v62 = vld [vmem:[%s4840_s28 + $0x7e0] sm:$0xff] }
  0x53   : > { %818 = vst [vmem:[%s4845_s29 + $0x1f8] sm:$0xff] %v817_v63  ;;  %v945_v63 = vld [vmem:[%s4840_s28 + $0x7f0] sm:$0xff] }
  0x54   : > { %820 = vst [vmem:[%s4845_s29 + $0x200] sm:$0xff] %v819_v0  ;;  %v947_v0 = vld [vmem:[%s4840_s28 + $0x800] sm:$0xff] }
  0x55   : > { %822 = vst [vmem:[%s4845_s29 + $0x208] sm:$0xff] %v821_v1  ;;  %v949_v1 = vld [vmem:[%s4840_s28 + $0x810] sm:$0xff] }
  0x56   : > { %824 = vst [vmem:[%s4845_s29 + $0x210] sm:$0xff] %v823_v2  ;;  %v951_v2 = vld [vmem:[%s4840_s28 + $0x820] sm:$0xff] }
  0x57   : > { %826 = vst [vmem:[%s4845_s29 + $0x218] sm:$0xff] %v825_v3  ;;  %v953_v3 = vld [vmem:[%s4840_s28 + $0x830] sm:$0xff] }
  0x58   : > { %828 = vst [vmem:[%s4845_s29 + $0x220] sm:$0xff] %v827_v4  ;;  %v955_v4 = vld [vmem:[%s4840_s28 + $0x840] sm:$0xff] }
  0x59   : > { %830 = vst [vmem:[%s4845_s29 + $0x228] sm:$0xff] %v829_v5  ;;  %v957_v5 = vld [vmem:[%s4840_s28 + $0x850] sm:$0xff] }
  0x5a   : > { %832 = vst [vmem:[%s4845_s29 + $0x230] sm:$0xff] %v831_v6  ;;  %v959_v6 = vld [vmem:[%s4840_s28 + $0x860] sm:$0xff] }
  0x5b   : > { %834 = vst [vmem:[%s4845_s29 + $0x238] sm:$0xff] %v833_v7  ;;  %v961_v7 = vld [vmem:[%s4840_s28 + $0x870] sm:$0xff] }
  0x5c   : > { %836 = vst [vmem:[%s4845_s29 + $0x240] sm:$0xff] %v835_v8  ;;  %v963_v8 = vld [vmem:[%s4840_s28 + $0x880] sm:$0xff] }
  0x5d   : > { %838 = vst [vmem:[%s4845_s29 + $0x248] sm:$0xff] %v837_v9  ;;  %v965_v9 = vld [vmem:[%s4840_s28 + $0x890] sm:$0xff] }
  0x5e   : > { %840 = vst [vmem:[%s4845_s29 + $0x250] sm:$0xff] %v839_v10  ;;  %v967_v10 = vld [vmem:[%s4840_s28 + $0x8a0] sm:$0xff] }
  0x5f   : > { %842 = vst [vmem:[%s4845_s29 + $0x258] sm:$0xff] %v841_v11  ;;  %v969_v11 = vld [vmem:[%s4840_s28 + $0x8b0] sm:$0xff] }
  0x60   : > { %844 = vst [vmem:[%s4845_s29 + $0x260] sm:$0xff] %v843_v12  ;;  %v971_v12 = vld [vmem:[%s4840_s28 + $0x8c0] sm:$0xff] }
  0x61   : > { %846 = vst [vmem:[%s4845_s29 + $0x268] sm:$0xff] %v845_v13  ;;  %v973_v13 = vld [vmem:[%s4840_s28 + $0x8d0] sm:$0xff] }
  0x62   : > { %848 = vst [vmem:[%s4845_s29 + $0x270] sm:$0xff] %v847_v14  ;;  %v975_v14 = vld [vmem:[%s4840_s28 + $0x8e0] sm:$0xff] }
  0x63   : > { %850 = vst [vmem:[%s4845_s29 + $0x278] sm:$0xff] %v849_v15  ;;  %v977_v15 = vld [vmem:[%s4840_s28 + $0x8f0] sm:$0xff] }
  0x64   : > { %852 = vst [vmem:[%s4845_s29 + $0x280] sm:$0xff] %v851_v16  ;;  %v979_v16 = vld [vmem:[%s4840_s28 + $0x900] sm:$0xff] }
  0x65   : > { %854 = vst [vmem:[%s4845_s29 + $0x288] sm:$0xff] %v853_v17  ;;  %v981_v17 = vld [vmem:[%s4840_s28 + $0x910] sm:$0xff] }
  0x66   : > { %856 = vst [vmem:[%s4845_s29 + $0x290] sm:$0xff] %v855_v18  ;;  %v983_v18 = vld [vmem:[%s4840_s28 + $0x920] sm:$0xff] }
  0x67   : > { %858 = vst [vmem:[%s4845_s29 + $0x298] sm:$0xff] %v857_v19  ;;  %v985_v19 = vld [vmem:[%s4840_s28 + $0x930] sm:$0xff] }
  0x68   : > { %860 = vst [vmem:[%s4845_s29 + $0x2a0] sm:$0xff] %v859_v20  ;;  %v987_v20 = vld [vmem:[%s4840_s28 + $0x940] sm:$0xff] }
  0x69   : > { %862 = vst [vmem:[%s4845_s29 + $0x2a8] sm:$0xff] %v861_v21  ;;  %v989_v21 = vld [vmem:[%s4840_s28 + $0x950] sm:$0xff] }
  0x6a   : > { %864 = vst [vmem:[%s4845_s29 + $0x2b0] sm:$0xff] %v863_v22  ;;  %v991_v22 = vld [vmem:[%s4840_s28 + $0x960] sm:$0xff] }
  0x6b   : > { %866 = vst [vmem:[%s4845_s29 + $0x2b8] sm:$0xff] %v865_v23  ;;  %v993_v23 = vld [vmem:[%s4840_s28 + $0x970] sm:$0xff] }
  0x6c   : > { %868 = vst [vmem:[%s4845_s29 + $0x2c0] sm:$0xff] %v867_v24  ;;  %v995_v24 = vld [vmem:[%s4840_s28 + $0x980] sm:$0xff] }
  0x6d   : > { %870 = vst [vmem:[%s4845_s29 + $0x2c8] sm:$0xff] %v869_v25  ;;  %v997_v25 = vld [vmem:[%s4840_s28 + $0x990] sm:$0xff] }
  0x6e   : > { %872 = vst [vmem:[%s4845_s29 + $0x2d0] sm:$0xff] %v871_v26  ;;  %v999_v26 = vld [vmem:[%s4840_s28 + $0x9a0] sm:$0xff] }
  0x6f   : > { %874 = vst [vmem:[%s4845_s29 + $0x2d8] sm:$0xff] %v873_v27  ;;  %v1001_v27 = vld [vmem:[%s4840_s28 + $0x9b0] sm:$0xff] }
  0x70   : > { %876 = vst [vmem:[%s4845_s29 + $0x2e0] sm:$0xff] %v875_v28  ;;  %v1003_v28 = vld [vmem:[%s4840_s28 + $0x9c0] sm:$0xff] }
  0x71   : > { %878 = vst [vmem:[%s4845_s29 + $0x2e8] sm:$0xff] %v877_v29  ;;  %v1005_v29 = vld [vmem:[%s4840_s28 + $0x9d0] sm:$0xff] }
  0x72   : > { %880 = vst [vmem:[%s4845_s29 + $0x2f0] sm:$0xff] %v879_v30  ;;  %v1007_v30 = vld [vmem:[%s4840_s28 + $0x9e0] sm:$0xff] }
  0x73   : > { %882 = vst [vmem:[%s4845_s29 + $0x2f8] sm:$0xff] %v881_v31  ;;  %v1009_v31 = vld [vmem:[%s4840_s28 + $0x9f0] sm:$0xff] }
  0x74   : > { %884 = vst [vmem:[%s4845_s29 + $0x300] sm:$0xff] %v883_v32  ;;  %v1011_v32 = vld [vmem:[%s4840_s28 + $0xa00] sm:$0xff] }
  0x75   : > { %886 = vst [vmem:[%s4845_s29 + $0x308] sm:$0xff] %v885_v33  ;;  %v1013_v33 = vld [vmem:[%s4840_s28 + $0xa10] sm:$0xff] }
  0x76   : > { %888 = vst [vmem:[%s4845_s29 + $0x310] sm:$0xff] %v887_v34  ;;  %v1015_v34 = vld [vmem:[%s4840_s28 + $0xa20] sm:$0xff] }
  0x77   : > { %890 = vst [vmem:[%s4845_s29 + $0x318] sm:$0xff] %v889_v35  ;;  %v1017_v35 = vld [vmem:[%s4840_s28 + $0xa30] sm:$0xff] }
  0x78   : > { %892 = vst [vmem:[%s4845_s29 + $0x320] sm:$0xff] %v891_v36  ;;  %v1019_v36 = vld [vmem:[%s4840_s28 + $0xa40] sm:$0xff] }
  0x79   : > { %894 = vst [vmem:[%s4845_s29 + $0x328] sm:$0xff] %v893_v37  ;;  %v1021_v37 = vld [vmem:[%s4840_s28 + $0xa50] sm:$0xff] }
  0x7a   : > { %896 = vst [vmem:[%s4845_s29 + $0x330] sm:$0xff] %v895_v38  ;;  %v1023_v38 = vld [vmem:[%s4840_s28 + $0xa60] sm:$0xff] }
  0x7b   : > { %898 = vst [vmem:[%s4845_s29 + $0x338] sm:$0xff] %v897_v39  ;;  %v1025_v39 = vld [vmem:[%s4840_s28 + $0xa70] sm:$0xff] }
  0x7c   : > { %900 = vst [vmem:[%s4845_s29 + $0x340] sm:$0xff] %v899_v40  ;;  %v1027_v40 = vld [vmem:[%s4840_s28 + $0xa80] sm:$0xff] }
  0x7d   : > { %902 = vst [vmem:[%s4845_s29 + $0x348] sm:$0xff] %v901_v41  ;;  %v1029_v41 = vld [vmem:[%s4840_s28 + $0xa90] sm:$0xff] }
  0x7e   : > { %904 = vst [vmem:[%s4845_s29 + $0x350] sm:$0xff] %v903_v42  ;;  %v1031_v42 = vld [vmem:[%s4840_s28 + $0xaa0] sm:$0xff] }
  0x7f   : > { %906 = vst [vmem:[%s4845_s29 + $0x358] sm:$0xff] %v905_v43  ;;  %v1033_v43 = vld [vmem:[%s4840_s28 + $0xab0] sm:$0xff] }
  0x80   : > { %908 = vst [vmem:[%s4845_s29 + $0x360] sm:$0xff] %v907_v44  ;;  %v1035_v44 = vld [vmem:[%s4840_s28 + $0xac0] sm:$0xff] }
  0x81   : > { %910 = vst [vmem:[%s4845_s29 + $0x368] sm:$0xff] %v909_v45  ;;  %v1037_v45 = vld [vmem:[%s4840_s28 + $0xad0] sm:$0xff] }
  0x82   : > { %912 = vst [vmem:[%s4845_s29 + $0x370] sm:$0xff] %v911_v46  ;;  %v1039_v46 = vld [vmem:[%s4840_s28 + $0xae0] sm:$0xff] }
  0x83   : > { %914 = vst [vmem:[%s4845_s29 + $0x378] sm:$0xff] %v913_v47  ;;  %v1041_v47 = vld [vmem:[%s4840_s28 + $0xaf0] sm:$0xff] }
  0x84   : > { %916 = vst [vmem:[%s4845_s29 + $0x380] sm:$0xff] %v915_v48  ;;  %v1043_v48 = vld [vmem:[%s4840_s28 + $0xb00] sm:$0xff] }
  0x85   : > { %918 = vst [vmem:[%s4845_s29 + $0x388] sm:$0xff] %v917_v49  ;;  %v1045_v49 = vld [vmem:[%s4840_s28 + $0xb10] sm:$0xff] }
  0x86   : > { %920 = vst [vmem:[%s4845_s29 + $0x390] sm:$0xff] %v919_v50  ;;  %v1047_v50 = vld [vmem:[%s4840_s28 + $0xb20] sm:$0xff] }
  0x87   : > { %922 = vst [vmem:[%s4845_s29 + $0x398] sm:$0xff] %v921_v51  ;;  %v1049_v51 = vld [vmem:[%s4840_s28 + $0xb30] sm:$0xff] }
  0x88   : > { %924 = vst [vmem:[%s4845_s29 + $0x3a0] sm:$0xff] %v923_v52  ;;  %v1051_v52 = vld [vmem:[%s4840_s28 + $0xb40] sm:$0xff] }
  0x89   : > { %926 = vst [vmem:[%s4845_s29 + $0x3a8] sm:$0xff] %v925_v53  ;;  %v1053_v53 = vld [vmem:[%s4840_s28 + $0xb50] sm:$0xff] }
  0x8a   : > { %928 = vst [vmem:[%s4845_s29 + $0x3b0] sm:$0xff] %v927_v54  ;;  %v1055_v54 = vld [vmem:[%s4840_s28 + $0xb60] sm:$0xff] }
  0x8b   : > { %930 = vst [vmem:[%s4845_s29 + $0x3b8] sm:$0xff] %v929_v55  ;;  %v1057_v55 = vld [vmem:[%s4840_s28 + $0xb70] sm:$0xff] }
  0x8c   : > { %932 = vst [vmem:[%s4845_s29 + $0x3c0] sm:$0xff] %v931_v56  ;;  %v1059_v56 = vld [vmem:[%s4840_s28 + $0xb80] sm:$0xff] }
  0x8d   : > { %934 = vst [vmem:[%s4845_s29 + $0x3c8] sm:$0xff] %v933_v57  ;;  %v1061_v57 = vld [vmem:[%s4840_s28 + $0xb90] sm:$0xff] }
  0x8e   : > { %936 = vst [vmem:[%s4845_s29 + $0x3d0] sm:$0xff] %v935_v58  ;;  %v1063_v58 = vld [vmem:[%s4840_s28 + $0xba0] sm:$0xff] }
  0x8f   : > { %938 = vst [vmem:[%s4845_s29 + $0x3d8] sm:$0xff] %v937_v59  ;;  %v1065_v59 = vld [vmem:[%s4840_s28 + $0xbb0] sm:$0xff] }
  0x90   : > { %940 = vst [vmem:[%s4845_s29 + $0x3e0] sm:$0xff] %v939_v60  ;;  %v1067_v60 = vld [vmem:[%s4840_s28 + $0xbc0] sm:$0xff] }
  0x91   : > { %942 = vst [vmem:[%s4845_s29 + $0x3e8] sm:$0xff] %v941_v61  ;;  %v1069_v61 = vld [vmem:[%s4840_s28 + $0xbd0] sm:$0xff] }
  0x92   : > { %944 = vst [vmem:[%s4845_s29 + $0x3f0] sm:$0xff] %v943_v62  ;;  %v1071_v62 = vld [vmem:[%s4840_s28 + $0xbe0] sm:$0xff] }
  0x93   : > { %946 = vst [vmem:[%s4845_s29 + $0x3f8] sm:$0xff] %v945_v63  ;;  %v1073_v63 = vld [vmem:[%s4840_s28 + $0xbf0] sm:$0xff] }
  0x94   : > { %948 = vst [vmem:[%s4845_s29 + $0x400] sm:$0xff] %v947_v0  ;;  %v1075_v0 = vld [vmem:[%s4840_s28 + $0xc00] sm:$0xff] }
  0x95   : > { %950 = vst [vmem:[%s4845_s29 + $0x408] sm:$0xff] %v949_v1  ;;  %v1077_v1 = vld [vmem:[%s4840_s28 + $0xc10] sm:$0xff] }
  0x96   : > { %952 = vst [vmem:[%s4845_s29 + $0x410] sm:$0xff] %v951_v2  ;;  %v1079_v2 = vld [vmem:[%s4840_s28 + $0xc20] sm:$0xff] }
  0x97   : > { %954 = vst [vmem:[%s4845_s29 + $0x418] sm:$0xff] %v953_v3  ;;  %v1081_v3 = vld [vmem:[%s4840_s28 + $0xc30] sm:$0xff] }
  0x98   : > { %956 = vst [vmem:[%s4845_s29 + $0x420] sm:$0xff] %v955_v4  ;;  %v1083_v4 = vld [vmem:[%s4840_s28 + $0xc40] sm:$0xff] }
  0x99   : > { %958 = vst [vmem:[%s4845_s29 + $0x428] sm:$0xff] %v957_v5  ;;  %v1085_v5 = vld [vmem:[%s4840_s28 + $0xc50] sm:$0xff] }
  0x9a   : > { %960 = vst [vmem:[%s4845_s29 + $0x430] sm:$0xff] %v959_v6  ;;  %v1087_v6 = vld [vmem:[%s4840_s28 + $0xc60] sm:$0xff] }
  0x9b   : > { %962 = vst [vmem:[%s4845_s29 + $0x438] sm:$0xff] %v961_v7  ;;  %v1089_v7 = vld [vmem:[%s4840_s28 + $0xc70] sm:$0xff] }
  0x9c   : > { %964 = vst [vmem:[%s4845_s29 + $0x440] sm:$0xff] %v963_v8  ;;  %v1091_v8 = vld [vmem:[%s4840_s28 + $0xc80] sm:$0xff] }
  0x9d   : > { %966 = vst [vmem:[%s4845_s29 + $0x448] sm:$0xff] %v965_v9  ;;  %v1093_v9 = vld [vmem:[%s4840_s28 + $0xc90] sm:$0xff] }
  0x9e   : > { %968 = vst [vmem:[%s4845_s29 + $0x450] sm:$0xff] %v967_v10  ;;  %v1095_v10 = vld [vmem:[%s4840_s28 + $0xca0] sm:$0xff] }
  0x9f   : > { %970 = vst [vmem:[%s4845_s29 + $0x458] sm:$0xff] %v969_v11  ;;  %v1097_v11 = vld [vmem:[%s4840_s28 + $0xcb0] sm:$0xff] }
  0xa0   : > { %972 = vst [vmem:[%s4845_s29 + $0x460] sm:$0xff] %v971_v12  ;;  %v1099_v12 = vld [vmem:[%s4840_s28 + $0xcc0] sm:$0xff] }
  0xa1   : > { %974 = vst [vmem:[%s4845_s29 + $0x468] sm:$0xff] %v973_v13  ;;  %v1101_v13 = vld [vmem:[%s4840_s28 + $0xcd0] sm:$0xff] }
  0xa2   : > { %976 = vst [vmem:[%s4845_s29 + $0x470] sm:$0xff] %v975_v14  ;;  %v1103_v14 = vld [vmem:[%s4840_s28 + $0xce0] sm:$0xff] }
  0xa3   : > { %978 = vst [vmem:[%s4845_s29 + $0x478] sm:$0xff] %v977_v15  ;;  %v1105_v15 = vld [vmem:[%s4840_s28 + $0xcf0] sm:$0xff] }
  0xa4   : > { %980 = vst [vmem:[%s4845_s29 + $0x480] sm:$0xff] %v979_v16  ;;  %v1107_v16 = vld [vmem:[%s4840_s28 + $0xd00] sm:$0xff] }
  0xa5   : > { %982 = vst [vmem:[%s4845_s29 + $0x488] sm:$0xff] %v981_v17  ;;  %v1109_v17 = vld [vmem:[%s4840_s28 + $0xd10] sm:$0xff] }
  0xa6   : > { %984 = vst [vmem:[%s4845_s29 + $0x490] sm:$0xff] %v983_v18  ;;  %v1111_v18 = vld [vmem:[%s4840_s28 + $0xd20] sm:$0xff] }
  0xa7   : > { %986 = vst [vmem:[%s4845_s29 + $0x498] sm:$0xff] %v985_v19  ;;  %v1113_v19 = vld [vmem:[%s4840_s28 + $0xd30] sm:$0xff] }
  0xa8   : > { %988 = vst [vmem:[%s4845_s29 + $0x4a0] sm:$0xff] %v987_v20  ;;  %v1115_v20 = vld [vmem:[%s4840_s28 + $0xd40] sm:$0xff] }
  0xa9   : > { %990 = vst [vmem:[%s4845_s29 + $0x4a8] sm:$0xff] %v989_v21  ;;  %v1117_v21 = vld [vmem:[%s4840_s28 + $0xd50] sm:$0xff] }
  0xaa   : > { %992 = vst [vmem:[%s4845_s29 + $0x4b0] sm:$0xff] %v991_v22  ;;  %v1119_v22 = vld [vmem:[%s4840_s28 + $0xd60] sm:$0xff] }
  0xab   : > { %994 = vst [vmem:[%s4845_s29 + $0x4b8] sm:$0xff] %v993_v23  ;;  %v1121_v23 = vld [vmem:[%s4840_s28 + $0xd70] sm:$0xff] }
  0xac   : > { %996 = vst [vmem:[%s4845_s29 + $0x4c0] sm:$0xff] %v995_v24  ;;  %v1123_v24 = vld [vmem:[%s4840_s28 + $0xd80] sm:$0xff] }
  0xad   : > { %998 = vst [vmem:[%s4845_s29 + $0x4c8] sm:$0xff] %v997_v25  ;;  %v1125_v25 = vld [vmem:[%s4840_s28 + $0xd90] sm:$0xff] }
  0xae   : > { %1000 = vst [vmem:[%s4845_s29 + $0x4d0] sm:$0xff] %v999_v26  ;;  %v1127_v26 = vld [vmem:[%s4840_s28 + $0xda0] sm:$0xff] }
  0xaf   : > { %1002 = vst [vmem:[%s4845_s29 + $0x4d8] sm:$0xff] %v1001_v27  ;;  %v1129_v27 = vld [vmem:[%s4840_s28 + $0xdb0] sm:$0xff] }
  0xb0   : > { %1004 = vst [vmem:[%s4845_s29 + $0x4e0] sm:$0xff] %v1003_v28  ;;  %v1131_v28 = vld [vmem:[%s4840_s28 + $0xdc0] sm:$0xff] }
  0xb1   : > { %1006 = vst [vmem:[%s4845_s29 + $0x4e8] sm:$0xff] %v1005_v29  ;;  %v1133_v29 = vld [vmem:[%s4840_s28 + $0xdd0] sm:$0xff] }
  0xb2   : > { %1008 = vst [vmem:[%s4845_s29 + $0x4f0] sm:$0xff] %v1007_v30  ;;  %v1135_v30 = vld [vmem:[%s4840_s28 + $0xde0] sm:$0xff] }
  0xb3   : > { %1010 = vst [vmem:[%s4845_s29 + $0x4f8] sm:$0xff] %v1009_v31  ;;  %v1137_v31 = vld [vmem:[%s4840_s28 + $0xdf0] sm:$0xff] }
  0xb4   : > { %1012 = vst [vmem:[%s4845_s29 + $0x500] sm:$0xff] %v1011_v32  ;;  %v1139_v32 = vld [vmem:[%s4840_s28 + $0xe00] sm:$0xff] }
  0xb5   : > { %1014 = vst [vmem:[%s4845_s29 + $0x508] sm:$0xff] %v1013_v33  ;;  %v1141_v33 = vld [vmem:[%s4840_s28 + $0xe10] sm:$0xff] }
  0xb6   : > { %1016 = vst [vmem:[%s4845_s29 + $0x510] sm:$0xff] %v1015_v34  ;;  %v1143_v34 = vld [vmem:[%s4840_s28 + $0xe20] sm:$0xff] }
  0xb7   : > { %1018 = vst [vmem:[%s4845_s29 + $0x518] sm:$0xff] %v1017_v35  ;;  %v1145_v35 = vld [vmem:[%s4840_s28 + $0xe30] sm:$0xff] }
  0xb8   : > { %1020 = vst [vmem:[%s4845_s29 + $0x520] sm:$0xff] %v1019_v36  ;;  %v1147_v36 = vld [vmem:[%s4840_s28 + $0xe40] sm:$0xff] }
  0xb9   : > { %1022 = vst [vmem:[%s4845_s29 + $0x528] sm:$0xff] %v1021_v37  ;;  %v1149_v37 = vld [vmem:[%s4840_s28 + $0xe50] sm:$0xff] }
  0xba   : > { %1024 = vst [vmem:[%s4845_s29 + $0x530] sm:$0xff] %v1023_v38  ;;  %v1151_v38 = vld [vmem:[%s4840_s28 + $0xe60] sm:$0xff] }
  0xbb   : > { %1026 = vst [vmem:[%s4845_s29 + $0x538] sm:$0xff] %v1025_v39  ;;  %v1153_v39 = vld [vmem:[%s4840_s28 + $0xe70] sm:$0xff] }
  0xbc   : > { %1028 = vst [vmem:[%s4845_s29 + $0x540] sm:$0xff] %v1027_v40  ;;  %v1155_v40 = vld [vmem:[%s4840_s28 + $0xe80] sm:$0xff] }
  0xbd   : > { %1030 = vst [vmem:[%s4845_s29 + $0x548] sm:$0xff] %v1029_v41  ;;  %v1157_v41 = vld [vmem:[%s4840_s28 + $0xe90] sm:$0xff] }
  0xbe   : > { %1032 = vst [vmem:[%s4845_s29 + $0x550] sm:$0xff] %v1031_v42  ;;  %v1159_v42 = vld [vmem:[%s4840_s28 + $0xea0] sm:$0xff] }
  0xbf   : > { %1034 = vst [vmem:[%s4845_s29 + $0x558] sm:$0xff] %v1033_v43  ;;  %v1161_v43 = vld [vmem:[%s4840_s28 + $0xeb0] sm:$0xff] }
  0xc0   : > { %1036 = vst [vmem:[%s4845_s29 + $0x560] sm:$0xff] %v1035_v44  ;;  %v1163_v44 = vld [vmem:[%s4840_s28 + $0xec0] sm:$0xff] }
  0xc1   : > { %1038 = vst [vmem:[%s4845_s29 + $0x568] sm:$0xff] %v1037_v45  ;;  %v1165_v45 = vld [vmem:[%s4840_s28 + $0xed0] sm:$0xff] }
  0xc2   : > { %1040 = vst [vmem:[%s4845_s29 + $0x570] sm:$0xff] %v1039_v46  ;;  %v1167_v46 = vld [vmem:[%s4840_s28 + $0xee0] sm:$0xff] }
  0xc3   : > { %1042 = vst [vmem:[%s4845_s29 + $0x578] sm:$0xff] %v1041_v47  ;;  %v1169_v47 = vld [vmem:[%s4840_s28 + $0xef0] sm:$0xff] }
  0xc4   : > { %1044 = vst [vmem:[%s4845_s29 + $0x580] sm:$0xff] %v1043_v48 }
  0xc5   : > { %1046 = vst [vmem:[%s4845_s29 + $0x588] sm:$0xff] %v1045_v49 }
  0xc6   : > { %1048 = vst [vmem:[%s4845_s29 + $0x590] sm:$0xff] %v1047_v50 }
  0xc7   : > { %1050 = vst [vmem:[%s4845_s29 + $0x598] sm:$0xff] %v1049_v51 }
  0xc8   : > { %1052 = vst [vmem:[%s4845_s29 + $0x5a0] sm:$0xff] %v1051_v52 }
  0xc9   : > { %1054 = vst [vmem:[%s4845_s29 + $0x5a8] sm:$0xff] %v1053_v53 }
  0xca   : > { %1056 = vst [vmem:[%s4845_s29 + $0x5b0] sm:$0xff] %v1055_v54 }
  0xcb   : > { %1058 = vst [vmem:[%s4845_s29 + $0x5b8] sm:$0xff] %v1057_v55 }
  0xcc   : > { %1060 = vst [vmem:[%s4845_s29 + $0x5c0] sm:$0xff] %v1059_v56 }
  0xcd   : > { %1062 = vst [vmem:[%s4845_s29 + $0x5c8] sm:$0xff] %v1061_v57 }
  0xce   : > { %1064 = vst [vmem:[%s4845_s29 + $0x5d0] sm:$0xff] %v1063_v58 }
  0xcf   : > { %1066 = vst [vmem:[%s4845_s29 + $0x5d8] sm:$0xff] %v1065_v59 }
  0xd0   : > { %1068 = vst [vmem:[%s4845_s29 + $0x5e0] sm:$0xff] %v1067_v60 }
  0xd1   : > { %1070 = vst [vmem:[%s4845_s29 + $0x5e8] sm:$0xff] %v1069_v61 }
  0xd2   : > { %1072 = vst [vmem:[%s4845_s29 + $0x5f0] sm:$0xff] %v1071_v62 }
  0xd3   : > { %1074 = vst [vmem:[%s4845_s29 + $0x5f8] sm:$0xff] %v1073_v63 }
  0xd4   : > { %1076 = vst [vmem:[%s4845_s29 + $0x600] sm:$0xff] %v1075_v0 }
  0xd5   : > { %1078 = vst [vmem:[%s4845_s29 + $0x608] sm:$0xff] %v1077_v1 }
  0xd6   : > { %1080 = vst [vmem:[%s4845_s29 + $0x610] sm:$0xff] %v1079_v2 }
  0xd7   : > { %1082 = vst [vmem:[%s4845_s29 + $0x618] sm:$0xff] %v1081_v3 }
  0xd8   : > { %1084 = vst [vmem:[%s4845_s29 + $0x620] sm:$0xff] %v1083_v4 }
  0xd9   : > { %1086 = vst [vmem:[%s4845_s29 + $0x628] sm:$0xff] %v1085_v5 }
  0xda   : > { %1088 = vst [vmem:[%s4845_s29 + $0x630] sm:$0xff] %v1087_v6 }
  0xdb   : > { %1090 = vst [vmem:[%s4845_s29 + $0x638] sm:$0xff] %v1089_v7 }
  0xdc   : > { %1092 = vst [vmem:[%s4845_s29 + $0x640] sm:$0xff] %v1091_v8 }
  0xdd   : > { %1094 = vst [vmem:[%s4845_s29 + $0x648] sm:$0xff] %v1093_v9 }
  0xde   : > { %1096 = vst [vmem:[%s4845_s29 + $0x650] sm:$0xff] %v1095_v10 }
  0xdf   : > { %1098 = vst [vmem:[%s4845_s29 + $0x658] sm:$0xff] %v1097_v11 }
  0xe0   : > { %1100 = vst [vmem:[%s4845_s29 + $0x660] sm:$0xff] %v1099_v12 }
  0xe1   : > { %1102 = vst [vmem:[%s4845_s29 + $0x668] sm:$0xff] %v1101_v13 }
  0xe2   : > { %1104 = vst [vmem:[%s4845_s29 + $0x670] sm:$0xff] %v1103_v14 }
  0xe3   : > { %1106 = vst [vmem:[%s4845_s29 + $0x678] sm:$0xff] %v1105_v15 }
  0xe4   : > { %1108 = vst [vmem:[%s4845_s29 + $0x680] sm:$0xff] %v1107_v16 }
  0xe5   : > { %1110 = vst [vmem:[%s4845_s29 + $0x688] sm:$0xff] %v1109_v17 }
  0xe6   : > { %1112 = vst [vmem:[%s4845_s29 + $0x690] sm:$0xff] %v1111_v18 }
  0xe7   : > { %1114 = vst [vmem:[%s4845_s29 + $0x698] sm:$0xff] %v1113_v19 }
  0xe8   : > { %1116 = vst [vmem:[%s4845_s29 + $0x6a0] sm:$0xff] %v1115_v20 }
  0xe9   : > { %1118 = vst [vmem:[%s4845_s29 + $0x6a8] sm:$0xff] %v1117_v21 }
  0xea   : > { %1120 = vst [vmem:[%s4845_s29 + $0x6b0] sm:$0xff] %v1119_v22 }
  0xeb   : > { %1122 = vst [vmem:[%s4845_s29 + $0x6b8] sm:$0xff] %v1121_v23 }
  0xec   : > { %1124 = vst [vmem:[%s4845_s29 + $0x6c0] sm:$0xff] %v1123_v24 }
  0xed   : > { %1126 = vst [vmem:[%s4845_s29 + $0x6c8] sm:$0xff] %v1125_v25 }
  0xee   : > { %1128 = vst [vmem:[%s4845_s29 + $0x6d0] sm:$0xff] %v1127_v26 }
  0xef   : > { %1130 = vst [vmem:[%s4845_s29 + $0x6d8] sm:$0xff] %v1129_v27 }
  0xf0   : > { %1132 = vst [vmem:[%s4845_s29 + $0x6e0] sm:$0xff] %v1131_v28 }
  0xf1   : > { %1134 = vst [vmem:[%s4845_s29 + $0x6e8] sm:$0xff] %v1133_v29 }
  0xf2   : > { %1136 = vst [vmem:[%s4845_s29 + $0x6f0] sm:$0xff] %v1135_v30 }
  0xf3   : > { %1138 = vst [vmem:[%s4845_s29 + $0x6f8] sm:$0xff] %v1137_v31 }
  0xf4   : > { %1140 = vst [vmem:[%s4845_s29 + $0x700] sm:$0xff] %v1139_v32 }
  0xf5   : > { %1142 = vst [vmem:[%s4845_s29 + $0x708] sm:$0xff] %v1141_v33 }
  0xf6   : > { %1144 = vst [vmem:[%s4845_s29 + $0x710] sm:$0xff] %v1143_v34 }
  0xf7   : > { %1146 = vst [vmem:[%s4845_s29 + $0x718] sm:$0xff] %v1145_v35 }
  0xf8   : > { %1148 = vst [vmem:[%s4845_s29 + $0x720] sm:$0xff] %v1147_v36 }
  0xf9   : > { %1150 = vst [vmem:[%s4845_s29 + $0x728] sm:$0xff] %v1149_v37 }
  0xfa   : > { %1152 = vst [vmem:[%s4845_s29 + $0x730] sm:$0xff] %v1151_v38 }
  0xfb   : > { %1154 = vst [vmem:[%s4845_s29 + $0x738] sm:$0xff] %v1153_v39 }
  0xfc   : > { %1156 = vst [vmem:[%s4845_s29 + $0x740] sm:$0xff] %v1155_v40 }
  0xfd   : > { %1158 = vst [vmem:[%s4845_s29 + $0x748] sm:$0xff] %v1157_v41 }
  0xfe   : > { %1160 = vst [vmem:[%s4845_s29 + $0x750] sm:$0xff] %v1159_v42 }
  0xff   : > { %1162 = vst [vmem:[%s4845_s29 + $0x758] sm:$0xff] %v1161_v43 }
 0x100   : > { %1164 = vst [vmem:[%s4845_s29 + $0x760] sm:$0xff] %v1163_v44 }
 0x101   : > { %1166 = vst [vmem:[%s4845_s29 + $0x768] sm:$0xff] %v1165_v45 }
 0x102   : > { %1168 = vst [vmem:[%s4845_s29 + $0x770] sm:$0xff] %v1167_v46 }
 0x103   : > { %1170 = vst [vmem:[%s4845_s29 + $0x778] sm:$0xff] %v1169_v47 }
 0x104 PF: > { %p3405_p8 = scmp.ge.s32.totalorder %s4770_s16, 1  ;;  %p1183_p9 = scmp.lt.s32.totalorder %s4770_s16, 3 }
 0x106   : > { %p1184_p10 = pnand %p3405_p8, %p1183_p9 }
 0x107   : > { %s1190_s30 = sand.u32 (!%p1184_p10), 1, %s4754_s12  }
 0x108   : > { %1187 = sbr.rel (%p1184_p10) target bundleno = 680 (0x2a8), region = 66  ;;  %s3406_s26 = sshll.u32 (!%p1184_p10), %s1190_s30, 4 }
 0x109   : > { %s4691_s4 = smul.u32 (!%p1184_p10), 1920, %s1190_s30  ;;  %s1225_s27 = scalar_lea.vmem (!%p1184_p10), [#allocation4], %s3406_s26 }
 0x10b   : > { %s5329_s5 = scalar_lea.vmem (!%p1184_p10), [#allocation3], %s4691_s4 }
 0x10d   : > { %v3526_v48 = vld [vmem:[%s5329_s5 + $0x70] sm:$0xf]  ;;  %v4464_v49 = vld [vmem:[%s5329_s5 + $0x74] sm:$0xf0]  ;;  %v3518_v59 = vld [vmem:[%s5329_s5 + $0x60] sm:$0xf] }
 0x10e   : > { %v3590_v50 = vld [vmem:[%s5329_s5 + $0xf0] sm:$0xf]  ;;  %v3527_v51 = vor.u32 %v4464_v49, %v3526_v48  ;;  %v4480_v52 = vld [vmem:[%s5329_s5 + $0xf4] sm:$0xf0]  ;;  %v4462_v61 = vld [vmem:[%s5329_s5 + $0x64] sm:$0xf0] }
 0x10f   : > { %v3654_v53 = vld [vmem:[%s5329_s5 + $0x170] sm:$0xf]  ;;  %v4496_v54 = vld [vmem:[%s5329_s5 + $0x174] sm:$0xf0]  ;;  %v3591_v55 = vor.u32 %v4480_v52, %v3590_v50  ;;  %v3582_v62 = vld [vmem:[%s5329_s5 + $0xe0] sm:$0xf]  ;;  %v3519_v0 = vor.u32 %v4462_v61, %v3518_v59 }
 0x110   : > { %v3655_v56 = vor.u32 %v4496_v54, %v3654_v53  ;;  %v3718_v57 = vld [vmem:[%s5329_s5 + $0x1f0] sm:$0xf]  ;;  %v4512_v58 = vld [vmem:[%s5329_s5 + $0x1f4] sm:$0xf0]  ;;  %2791 = vmatpush.bf16.msra.mxu0 %v3527_v51  ;;  %v4478_v63 = vld [vmem:[%s5329_s5 + $0xe4] sm:$0xf0] }
 0x111   : > { %v3719_v60 = vor.u32 %v4512_v58, %v3718_v57  ;;  %2805 = vmatpush.bf16.msra.mxu1 %v3591_v55  ;;  %v3583_v1 = vor.u32 %v4478_v63, %v3582_v62  ;;  %v3646_v2 = vld [vmem:[%s5329_s5 + $0x160] sm:$0xf]  ;;  %v4494_v3 = vld [vmem:[%s5329_s5 + $0x164] sm:$0xf0]  ;;  %v3510_v7 = vld [vmem:[%s5329_s5 + $0x50] sm:$0xf] }
 0x112   : > { %2819 = vmatpush.bf16.msra.mxu2 %v3655_v56  ;;  %v3710_v4 = vld [vmem:[%s5329_s5 + $0x1e0] sm:$0xf]  ;;  %v3647_v5 = vor.u32 %v4494_v3, %v3646_v2  ;;  %v4510_v6 = vld [vmem:[%s5329_s5 + $0x1e4] sm:$0xf0]  ;;  %v4460_v8 = vld [vmem:[%s5329_s5 + $0x54] sm:$0xf0] }
 0x113   : > { %2833 = vmatpush.bf16.msra.mxu3 %v3719_v60  ;;  %v3711_v9 = vor.u32 %v4510_v6, %v3710_v4  ;;  %v3574_v10 = vld [vmem:[%s5329_s5 + $0xd0] sm:$0xf]  ;;  %v4476_v11 = vld [vmem:[%s5329_s5 + $0xd4] sm:$0xf0]  ;;  %v3511_v13 = vor.u32 %v4460_v8, %v3510_v7  ;;  %v3502_v19 = vld [vmem:[%s5329_s5 + $0x40] sm:$0xf] }
 0x114   : > { %v3638_v12 = vld [vmem:[%s5329_s5 + $0x150] sm:$0xf]  ;;  %2792 = vmatpush.bf16.msra.mxu0 %v3519_v0  ;;  %v4492_v14 = vld [vmem:[%s5329_s5 + $0x154] sm:$0xf0]  ;;  %v3575_v17 = vor.u32 %v4476_v11, %v3574_v10  ;;  %v4458_v20 = vld [vmem:[%s5329_s5 + $0x44] sm:$0xf0] }
 0x115   : > { %v3702_v15 = vld [vmem:[%s5329_s5 + $0x1d0] sm:$0xf]  ;;  %v4508_v16 = vld [vmem:[%s5329_s5 + $0x1d4] sm:$0xf0]  ;;  %2806 = vmatpush.bf16.msra.mxu1 %v3583_v1  ;;  %v3639_v18 = vor.u32 %v4492_v14, %v3638_v12  ;;  %v3566_v21 = vld [vmem:[%s5329_s5 + $0xc0] sm:$0xf]  ;;  %v3503_v28 = vor.u32 %v4458_v20, %v3502_v19 }
 0x116   : > { %2820 = vmatpush.bf16.msra.mxu2 %v3647_v5  ;;  %v3703_v22 = vor.u32 %v4508_v16, %v3702_v15  ;;  %v4474_v23 = vld [vmem:[%s5329_s5 + $0xc4] sm:$0xf0]  ;;  %v3630_v24 = vld [vmem:[%s5329_s5 + $0x140] sm:$0xf]  ;;  %v3494_v31 = vld [vmem:[%s5329_s5 + $0x30] sm:$0xf] }
 0x117   : > { %2834 = vmatpush.bf16.msra.mxu3 %v3711_v9  ;;  %v4490_v25 = vld [vmem:[%s5329_s5 + $0x144] sm:$0xf0]  ;;  %v3694_v26 = vld [vmem:[%s5329_s5 + $0x1c0] sm:$0xf]  ;;  %v3567_v29 = vor.u32 %v4474_v23, %v3566_v21  ;;  %v4456_v32 = vld [vmem:[%s5329_s5 + $0x34] sm:$0xf0] }
 0x118   : > { %v4506_v27 = vld [vmem:[%s5329_s5 + $0x1c4] sm:$0xf0]  ;;  %2793 = vmatpush.bf16.msra.mxu0 %v3511_v13  ;;  %v3631_v30 = vor.u32 %v4490_v25, %v3630_v24  ;;  %v3558_v33 = vld [vmem:[%s5329_s5 + $0xb0] sm:$0xf]  ;;  %v4472_v35 = vld [vmem:[%s5329_s5 + $0xb4] sm:$0xf0]  ;;  %v3495_v40 = vor.u32 %v4456_v32, %v3494_v31 }
 0x119   : > { %2807 = vmatpush.bf16.msra.mxu1 %v3575_v17  ;;  %v3695_v34 = vor.u32 %v4506_v27, %v3694_v26  ;;  %v3622_v36 = vld [vmem:[%s5329_s5 + $0x130] sm:$0xf]  ;;  %v4488_v37 = vld [vmem:[%s5329_s5 + $0x134] sm:$0xf0]  ;;  %v3559_v41 = vor.u32 %v4472_v35, %v3558_v33  ;;  %v3486_v43 = vld [vmem:[%s5329_s5 + $0x20] sm:$0xf] }
 0x11a   : > { %2821 = vmatpush.bf16.msra.mxu2 %v3639_v18  ;;  %v3686_v38 = vld [vmem:[%s5329_s5 + $0x1b0] sm:$0xf]  ;;  %v4504_v39 = vld [vmem:[%s5329_s5 + $0x1b4] sm:$0xf0]  ;;  %v3623_v42 = vor.u32 %v4488_v37, %v3622_v36  ;;  %v4454_v44 = vld [vmem:[%s5329_s5 + $0x24] sm:$0xf0] }
 0x11b   : > { %2835 = vmatpush.bf16.msra.mxu3 %v3703_v22  ;;  %v3550_v45 = vld [vmem:[%s5329_s5 + $0xa0] sm:$0xf]  ;;  %v3687_v46 = vor.u32 %v4504_v39, %v3686_v38  ;;  %v4470_v47 = vld [vmem:[%s5329_s5 + $0xa4] sm:$0xf0]  ;;  %v3487_v52 = vor.u32 %v4454_v44, %v3486_v43  ;;  %v3478_v55 = vld [vmem:[%s5329_s5 + $0x10] sm:$0xf] }
 0x11c   : > { %2794 = vmatpush.bf16.msra.mxu0 %v3503_v28  ;;  %v3614_v48 = vld [vmem:[%s5329_s5 + $0x120] sm:$0xf]  ;;  %v4486_v49 = vld [vmem:[%s5329_s5 + $0x124] sm:$0xf0]  ;;  %v3551_v53 = vor.u32 %v4470_v47, %v3550_v45  ;;  %v4452_v56 = vld [vmem:[%s5329_s5 + $0x14] sm:$0xf0] }
 0x11d   : > { %2808 = vmatpush.bf16.msra.mxu1 %v3567_v29  ;;  %v3678_v50 = vld [vmem:[%s5329_s5 + $0x1a0] sm:$0xf]  ;;  %v4502_v51 = vld [vmem:[%s5329_s5 + $0x1a4] sm:$0xf0]  ;;  %v3615_v54 = vor.u32 %v4486_v49, %v3614_v48  ;;  %v3542_v57 = vld [vmem:[%s5329_s5 + $0x90] sm:$0xf]  ;;  %v3479_v0 = vor.u32 %v4452_v56, %v3478_v55 }
 0x11e   : > { %2822 = vmatpush.bf16.msra.mxu2 %v3631_v30  ;;  %v3679_v58 = vor.u32 %v4502_v51, %v3678_v50  ;;  %v4468_v59 = vld [vmem:[%s5329_s5 + $0x94] sm:$0xf0]  ;;  %v3606_v60 = vld [vmem:[%s5329_s5 + $0x110] sm:$0xf]  ;;  %v3470_v1 = vld [vmem:[%s5329_s5] sm:$0xf] }
 0x11f   : > { %2836 = vmatpush.bf16.msra.mxu3 %v3695_v34  ;;  %v4484_v61 = vld [vmem:[%s5329_s5 + $0x114] sm:$0xf0]  ;;  %v3670_v62 = vld [vmem:[%s5329_s5 + $0x190] sm:$0xf]  ;;  %v4450_v2 = vld [vmem:[%s5329_s5 + $0x4] sm:$0xf0]  ;;  %v3543_v3 = vor.u32 %v4468_v59, %v3542_v57 }
 0x120   : > { %2795 = vmatpush.bf16.msra.mxu0 %v3495_v40  ;;  %v4500_v63 = vld [vmem:[%s5329_s5 + $0x194] sm:$0xf0]  ;;  %v3607_v4 = vor.u32 %v4484_v61, %v3606_v60  ;;  %v3534_v5 = vld [vmem:[%s5329_s5 + $0x80] sm:$0xf]  ;;  %v4466_v6 = vld [vmem:[%s5329_s5 + $0x84] sm:$0xf0]  ;;  %v3471_v15 = vor.u32 %v4450_v2, %v3470_v1 }
 0x121   : > { %2809 = vmatpush.bf16.msra.mxu1 %v3559_v41  ;;  %v3598_v7 = vld [vmem:[%s5329_s5 + $0x100] sm:$0xf]  ;;  %v3671_v8 = vor.u32 %v4500_v63, %v3670_v62  ;;  %v4482_v9 = vld [vmem:[%s5329_s5 + $0x104] sm:$0xf0]  ;;  %v3782_v10 = vld [vmem:[%s5329_s5 + $0x270] sm:$0xf]  ;;  %v3535_v19 = vor.u32 %v4466_v6, %v3534_v5 }
 0x122   : > { %2823 = vmatpush.bf16.msra.mxu2 %v3623_v42  ;;  %v4528_v11 = vld [vmem:[%s5329_s5 + $0x274] sm:$0xf0]  ;;  %v3846_v12 = vld [vmem:[%s5329_s5 + $0x2f0] sm:$0xf]  ;;  %v3662_v17 = vld [vmem:[%s5329_s5 + $0x180] sm:$0xf]  ;;  %v3599_v20 = vor.u32 %v4482_v9, %v3598_v7 }
 0x123   : > { %2837 = vmatpush.bf16.msra.mxu3 %v3687_v46  ;;  %v4544_v13 = vld [vmem:[%s5329_s5 + $0x2f4] sm:$0xf0]  ;;  %v3910_v14 = vld [vmem:[%s5329_s5 + $0x370] sm:$0xf]  ;;  %v4498_v18 = vld [vmem:[%s5329_s5 + $0x184] sm:$0xf0]  ;;  %v3783_v23 = vor.u32 %v4528_v11, %v3782_v10 }
 0x124   : > { %2796 = vmatpush.bf16.msra.mxu0 %v3487_v52  ;;  %v4560_v16 = vld [vmem:[%s5329_s5 + $0x374] sm:$0xf0]  ;;  %v3974_v21 = vld [vmem:[%s5329_s5 + $0x3f0] sm:$0xf]  ;;  %v3847_v24 = vor.u32 %v4544_v13, %v3846_v12  ;;  %v3774_v25 = vld [vmem:[%s5329_s5 + $0x260] sm:$0xf]  ;;  %v3663_v28 = vor.u32 %v4498_v18, %v3662_v17 }
 0x125   : > { %2810 = vmatpush.bf16.msra.mxu1 %v3551_v53  ;;  %v4576_v22 = vld [vmem:[%s5329_s5 + $0x3f4] sm:$0xf0]  ;;  %v4526_v26 = vld [vmem:[%s5329_s5 + $0x264] sm:$0xf0]  ;;  %v3911_v27 = vor.u32 %v4560_v16, %v3910_v14  ;;  %v3838_v29 = vld [vmem:[%s5329_s5 + $0x2e0] sm:$0xf] }
 0x126   : > { %2824 = vmatpush.bf16.msra.mxu2 %v3615_v54  ;;  %v4542_v30 = vld [vmem:[%s5329_s5 + $0x2e4] sm:$0xf0]  ;;  %v3902_v31 = vld [vmem:[%s5329_s5 + $0x360] sm:$0xf]  ;;  %v3975_v32 = vor.u32 %v4576_v22, %v3974_v21  ;;  %v3766_v36 = vld [vmem:[%s5329_s5 + $0x250] sm:$0xf]  ;;  %v3775_v40 = vor.u32 %v4526_v26, %v3774_v25 }
 0x127   : > { %2838 = vmatpush.bf16.msra.mxu3 %v3679_v58  ;;  %v4558_v33 = vld [vmem:[%s5329_s5 + $0x364] sm:$0xf0]  ;;  %v3966_v34 = vld [vmem:[%s5329_s5 + $0x3e0] sm:$0xf]  ;;  %v4441_v38 = vld [vmem:[%s6012_s0 + $0x38] sm:$0xf0]  ;;  %v3839_v41 = vor.u32 %v4542_v30, %v3838_v29 }
 0x128   : > { %2797 = vmatpush.bf16.msra.mxu0 %v3479_v0  ;;  %v4574_v35 = vld [vmem:[%s5329_s5 + $0x3e4] sm:$0xf0]  ;;  %v3410_v37 = vld [vmem:[%s6012_s0] sm:$0xf]  ;;  %v4524_v42 = vld [vmem:[%s5329_s5 + $0x254] sm:$0xf0]  ;;  %v3903_v46 = vor.u32 %v4558_v33, %v3902_v31 }
 0x129   : > { %2811 = vmatpush.bf16.msra.mxu1 %v3543_v3  ;;  %v3418_v39 = vld [vmem:[%s6012_s0 + $0x8] sm:$0xf]  ;;  %v3830_v43 = vld [vmem:[%s5329_s5 + $0x2d0] sm:$0xf]  ;;  %v5423_v44 = vor.u32 %v4441_v38, %v3410_v37  ;;  %v4442_v45 = vld [vmem:[%s6012_s0 + $0x40] sm:$0xf0]  ;;  %v3967_v51 = vor.u32 %v4574_v35, %v3966_v34  ;;  %v3767_v59 = vor.u32 %v4524_v42, %v3766_v36 }
 0x12a   : > { %2825 = vmatpush.bf16.msra.mxu2 %v3607_v4  ;;  %v4540_v47 = vld [vmem:[%s5329_s5 + $0x2d4] sm:$0xf0]  ;;  %v3894_v48 = vld [vmem:[%s5329_s5 + $0x350] sm:$0xf]  ;;  %v5431_v50 = vor.u32 %v4442_v45, %v3418_v39  ;;  %v4434_v53 = vld [vmem:[%s6012_s0 + $0x4] sm:$0xf] }
 0x12b   : > { %2839 = vmatpush.bf16.msra.mxu3 %v3671_v8  ;;  %v4556_v49 = vld [vmem:[%s5329_s5 + $0x354] sm:$0xf0]  ;;  %v3958_v52 = vld [vmem:[%s5329_s5 + $0x3d0] sm:$0xf]  ;;  %v3412_v54 = vld [vmem:[%s6012_s0 + $0x3c] sm:$0xf0]  ;;  %v3831_v60 = vor.u32 %v4540_v47, %v3830_v43 }
 0x12c   : > { %2798 = vmatpush.bf16.msra.mxu0 %v3471_v15  ;;  %v4572_v55 = vld [vmem:[%s5329_s5 + $0x3d4] sm:$0xf0]  ;;  %v5443_v56 = vor.u32 %v4434_v53, %v3412_v54  ;;  %v4435_v57 = vld [vmem:[%s6012_s0 + $0xc] sm:$0xf]  ;;  %v3420_v58 = vld [vmem:[%s6012_s0 + $0x44] sm:$0xf0]  ;;  %v3895_v63 = vor.u32 %v4556_v49, %v3894_v48 }
 0x12d   : > { %2812 = vmatpush.bf16.msra.mxu1 %v3535_v19  ;;  %v3758_v61 = vld [vmem:[%s5329_s5 + $0x240] sm:$0xf]  ;;  %v5452_v62 = vor.u32 %v4435_v57, %v3420_v58  ;;  %v4522_v0 = vld [vmem:[%s5329_s5 + $0x244] sm:$0xf0]  ;;  %v3959_v3 = vor.u32 %v4572_v55, %v3958_v52  ;;  %v3750_v10 = vld [vmem:[%s5329_s5 + $0x230] sm:$0xf] }
 0x12e   : > { %2826 = vmatpush.bf16.msra.mxu2 %v3599_v20  ;;  %v3822_v1 = vld [vmem:[%s5329_s5 + $0x2c0] sm:$0xf]  ;;  %v4538_v2 = vld [vmem:[%s5329_s5 + $0x2c4] sm:$0xf0]  ;;  %v3759_v8 = vor.u32 %v4522_v0, %v3758_v61  ;;  %v4520_v12 = vld [vmem:[%s5329_s5 + $0x234] sm:$0xf0] }
 0x12f   : > { %2840 = vmatpush.bf16.msra.mxu3 %v3663_v28  ;;  %2799 = vmatmul.bf16.vlgmr.msra.gmra.mxu0 %v5423_v44  ;;  %v3886_v4 = vld [vmem:[%s5329_s5 + $0x340] sm:$0xf]  ;;  %v4554_v5 = vld [vmem:[%s5329_s5 + $0x344] sm:$0xf0]  ;;  %v3823_v9 = vor.u32 %v4538_v2, %v3822_v1  ;;  %v3814_v13 = vld [vmem:[%s5329_s5 + $0x2b0] sm:$0xf]  ;;  %v3751_v20 = vor.u32 %v4520_v12, %v3750_v10 }
 0x130   : > { %2847 = vmatpush.bf16.msrb.mxu0 %v3783_v23  ;;  %2813 = vmatmul.bf16.vlgmr.msra.gmra.mxu1 %v5443_v56  ;;  %v3950_v6 = vld [vmem:[%s5329_s5 + $0x3c0] sm:$0xf]  ;;  %v4570_v7 = vld [vmem:[%s5329_s5 + $0x3c4] sm:$0xf0]  ;;  %v3887_v11 = vor.u32 %v4554_v5, %v3886_v4  ;;  %v4536_v14 = vld [vmem:[%s5329_s5 + $0x2b4] sm:$0xf0] }
 0x131   : > { %2861 = vmatpush.bf16.msrb.mxu1 %v3847_v24  ;;  %2827 = vmatmul.bf16.vlgmr.msra.gmra.mxu2 %v5431_v50  ;;  %v3951_v15 = vor.u32 %v4570_v7, %v3950_v6  ;;  %v3878_v16 = vld [vmem:[%s5329_s5 + $0x330] sm:$0xf]  ;;  %v4552_v17 = vld [vmem:[%s5329_s5 + $0x334] sm:$0xf0]  ;;  %v3815_v21 = vor.u32 %v4536_v14, %v3814_v13  ;;  %v3742_v22 = vld [vmem:[%s5329_s5 + $0x220] sm:$0xf] }
 0x132   : > { %2875 = vmatpush.bf16.msrb.mxu2 %v3911_v27  ;;  %2841 = vmatmul.bf16.vlgmr.msra.gmra.mxu3 %v5452_v62  ;;  %v3942_v18 = vld [vmem:[%s5329_s5 + $0x3b0] sm:$0xf]  ;;  %v4568_v19 = vld [vmem:[%s5329_s5 + $0x3b4] sm:$0xf0]  ;;  %v3879_v23 = vor.u32 %v4552_v17, %v3878_v16  ;;  %v4518_v24 = vld [vmem:[%s5329_s5 + $0x224] sm:$0xf0] }
 0x133   : > { %2889 = vmatpush.bf16.msrb.mxu3 %v3975_v32  ;;  %v3806_v25 = vld [vmem:[%s5329_s5 + $0x2a0] sm:$0xf]  ;;  %v4534_v26 = vld [vmem:[%s5329_s5 + $0x2a4] sm:$0xf0]  ;;  %v3943_v27 = vor.u32 %v4568_v19, %v3942_v18  ;;  %v3743_v32 = vor.u32 %v4518_v24, %v3742_v22  ;;  %v3734_v34 = vld [vmem:[%s5329_s5 + $0x210] sm:$0xf] }
 0x134   : > { %2848 = vmatpush.bf16.msrb.mxu0 %v3775_v40  ;;  %v3870_v28 = vld [vmem:[%s5329_s5 + $0x320] sm:$0xf]  ;;  %v4550_v29 = vld [vmem:[%s5329_s5 + $0x324] sm:$0xf0]  ;;  %v3807_v33 = vor.u32 %v4534_v26, %v3806_v25  ;;  %v4516_v35 = vld [vmem:[%s5329_s5 + $0x214] sm:$0xf0] }
 0x135   : > { %2862 = vmatpush.bf16.msrb.mxu1 %v3839_v41  ;;  %v3934_v30 = vld [vmem:[%s5329_s5 + $0x3a0] sm:$0xf]  ;;  %v4566_v31 = vld [vmem:[%s5329_s5 + $0x3a4] sm:$0xf0]  ;;  %v3871_v36 = vor.u32 %v4550_v29, %v3870_v28  ;;  %v3798_v37 = vld [vmem:[%s5329_s5 + $0x290] sm:$0xf]  ;;  %v3735_v49 = vor.u32 %v4516_v35, %v3734_v34 }
 0x136   : > { %2876 = vmatpush.bf16.msrb.mxu2 %v3903_v46  ;;  %v4532_v38 = vld [vmem:[%s5329_s5 + $0x294] sm:$0xf0]  ;;  %v3862_v39 = vld [vmem:[%s5329_s5 + $0x310] sm:$0xf]  ;;  %v3935_v40 = vor.u32 %v4566_v31, %v3934_v30  ;;  %v3726_v45 = vld [vmem:[%s5329_s5 + $0x200] sm:$0xf] }
 0x137   : > { %2890 = vmatpush.bf16.msrb.mxu3 %v3967_v51  ;;  %v4548_v41 = vld [vmem:[%s5329_s5 + $0x314] sm:$0xf0]  ;;  %v3926_v42 = vld [vmem:[%s5329_s5 + $0x390] sm:$0xf]  ;;  %v4514_v46 = vld [vmem:[%s5329_s5 + $0x204] sm:$0xf0]  ;;  %v3799_v51 = vor.u32 %v4532_v38, %v3798_v37 }
 0x138   : > { %2849 = vmatpush.bf16.msrb.mxu0 %v3767_v59  ;;  %v4564_v43 = vld [vmem:[%s5329_s5 + $0x394] sm:$0xf0]  ;;  %v3790_v47 = vld [vmem:[%s5329_s5 + $0x280] sm:$0xf]  ;;  %v4530_v48 = vld [vmem:[%s5329_s5 + $0x284] sm:$0xf0]  ;;  %v3863_v55 = vor.u32 %v4548_v41, %v3862_v39  ;;  %v3727_v4 = vor.u32 %v4514_v46, %v3726_v45 }
 0x139   : > { %2863 = vmatpush.bf16.msrb.mxu1 %v3831_v60  ;;  %v3854_v52 = vld [vmem:[%s5329_s5 + $0x300] sm:$0xf]  ;;  %v4546_v53 = vld [vmem:[%s5329_s5 + $0x304] sm:$0xf0]  ;;  %v4038_v54 = vld [vmem:[%s5329_s5 + $0x470] sm:$0xf]  ;;  %v3927_v60 = vor.u32 %v4564_v43, %v3926_v42  ;;  %v3791_v5 = vor.u32 %v4530_v48, %v3790_v47 }
 0x13a   : > { %2877 = vmatpush.bf16.msrb.mxu2 %v3895_v63  ;;  %v4592_v57 = vld [vmem:[%s5329_s5 + $0x474] sm:$0xf0]  ;;  %v4102_v58 = vld [vmem:[%s5329_s5 + $0x4f0] sm:$0xf]  ;;  %v3918_v0 = vld [vmem:[%s5329_s5 + $0x380] sm:$0xf] }
 0x13b   : > { %2891 = vmatpush.bf16.msrb.mxu3 %v3959_v3  ;;  %v4608_v59 = vld [vmem:[%s5329_s5 + $0x4f4] sm:$0xf0]  ;;  %v4166_v61 = vld [vmem:[%s5329_s5 + $0x570] sm:$0xf]  ;;  %v4562_v1 = vld [vmem:[%s5329_s5 + $0x384] sm:$0xf0]  ;;  %v4039_v10 = vor.u32 %v4592_v57, %v4038_v54 }
 0x13c   : > { %2850 = vmatpush.bf16.msrb.mxu0 %v3759_v8  ;;  %v4624_v63 = vld [vmem:[%s5329_s5 + $0x574] sm:$0xf0]  ;;  %v3426_v2 = vld [vmem:[%s6012_s0 + $0x10] sm:$0xf]  ;;  %v4443_v3 = vld [vmem:[%s6012_s0 + $0x48] sm:$0xf0]  ;;  %v4103_v14 = vor.u32 %v4608_v59, %v4102_v58  ;;  %v3919_v19 = vor.u32 %v4562_v1, %v3918_v0 }
 0x13d   : > { %2864 = vmatpush.bf16.msrb.mxu1 %v3823_v9  ;;  %v3434_v6 = vld [vmem:[%s6012_s0 + $0x18] sm:$0xf]  ;;  %v4444_v7 = vld [vmem:[%s6012_s0 + $0x50] sm:$0xf0]  ;;  %v4230_v8 = vld [vmem:[%s5329_s5 + $0x5f0] sm:$0xf]  ;;  %v3855_v9 = vor.u32 %v4546_v53, %v3854_v52 }
 0x13e   : > { %2878 = vmatpush.bf16.msrb.mxu2 %v3887_v11  ;;  %v4640_v11 = vld [vmem:[%s5329_s5 + $0x5f4] sm:$0xf0]  ;;  %v4436_v12 = vld [vmem:[%s6012_s0 + $0x14] sm:$0xf]  ;;  %v3428_v13 = vld [vmem:[%s6012_s0 + $0x4c] sm:$0xf0]  ;;  %v5533_v24 = vor.u32 %v4444_v7, %v3434_v6 }
 0x13f   : > { %2892 = vmatpush.bf16.msrb.mxu3 %v3951_v15  ;;  %v4167_v15 = vor.u32 %v4624_v63, %v4166_v61  ;;  %v4437_v16 = vld [vmem:[%s6012_s0 + $0x1c] sm:$0xf]  ;;  %v4030_v17 = vld [vmem:[%s5329_s5 + $0x460] sm:$0xf]  ;;  %v4590_v18 = vld [vmem:[%s5329_s5 + $0x464] sm:$0xf0]  ;;  %v4231_v25 = vor.u32 %v4640_v11, %v4230_v8  ;;  %v5537_v28 = vor.u32 %v4436_v12, %v3428_v13 }
 0x140   : > { %2851 = vmatpush.bf16.msrb.mxu0 %v3751_v20  ;;  %v5526_v20 = vor.u32 %v4443_v3, %v3426_v2  ;;  %v4094_v22 = vld [vmem:[%s5329_s5 + $0x4e0] sm:$0xf]  ;;  %v4031_v29 = vor.u32 %v4590_v18, %v4030_v17  ;;  %v4638_v31 = vld [vmem:[%s5329_s5 + $0x5e4] sm:$0xf0]  ;;  %v4022_v34 = vld [vmem:[%s5329_s5 + $0x450] sm:$0xf] }
 0x141   : > { %2865 = vmatpush.bf16.msrb.mxu1 %v3815_v21  ;;  %v3436_v21 = vld [vmem:[%s6012_s0 + $0x54] sm:$0xf0]  ;;  %v4158_v26 = vld [vmem:[%s5329_s5 + $0x560] sm:$0xf]  ;;  %v4086_v37 = vld [vmem:[%s5329_s5 + $0x4d0] sm:$0xf] }
 0x142   : > { %2879 = vmatpush.bf16.msrb.mxu2 %v3879_v23  ;;  %v4606_v23 = vld [vmem:[%s5329_s5 + $0x4e4] sm:$0xf0]  ;;  %v4222_v30 = vld [vmem:[%s5329_s5 + $0x5e0] sm:$0xf]  ;;  %v4588_v35 = vld [vmem:[%s5329_s5 + $0x454] sm:$0xf0] }
 0x143   : > { %2893 = vmatpush.bf16.msrb.mxu3 %v3943_v27  ;;  %v4622_v27 = vld [vmem:[%s5329_s5 + $0x564] sm:$0xf0]  ;;  %v4604_v38 = vld [vmem:[%s5329_s5 + $0x4d4] sm:$0xf0]  ;;  %v4223_v39 = vor.u32 %v4638_v31, %v4222_v30  ;;  %v4023_v42 = vor.u32 %v4588_v35, %v4022_v34  ;;  %v4214_v43 = vld [vmem:[%s5329_s5 + $0x5d0] sm:$0xf] }
 0x144   : > { %2852 = vmatpush.bf16.msrb.mxu0 %v3743_v32  ;;  %v5541_v32 = vor.u32 %v4437_v16, %v3436_v21  ;;  %v4620_v41 = vld [vmem:[%s5329_s5 + $0x554] sm:$0xf0]  ;;  %v4087_v46 = vor.u32 %v4604_v38, %v4086_v37  ;;  %v4014_v47 = vld [vmem:[%s5329_s5 + $0x440] sm:$0xf]  ;;  %v4586_v48 = vld [vmem:[%s5329_s5 + $0x444] sm:$0xf0] }
 0x145   : > { %2866 = vmatpush.bf16.msrb.mxu1 %v3807_v33  ;;  %v4095_v33 = vor.u32 %v4606_v23, %v4094_v22  ;;  %v4636_v45 = vld [vmem:[%s5329_s5 + $0x5d4] sm:$0xf0]  ;;  %v4602_v52 = vld [vmem:[%s5329_s5 + $0x4c4] sm:$0xf0]  ;;  %v4142_v54 = vld [vmem:[%s5329_s5 + $0x540] sm:$0xf]  ;;  %v4015_v57 = vor.u32 %v4586_v48, %v4014_v47 }
 0x146   : > { %2880 = vmatpush.bf16.msrb.mxu2 %v3871_v36  ;;  %v4159_v36 = vor.u32 %v4622_v27, %v4158_v26  ;;  %v4215_v53 = vor.u32 %v4636_v45, %v4214_v43  ;;  %v4206_v58 = vld [vmem:[%s5329_s5 + $0x5c0] sm:$0xf]  ;;  %v4634_v59 = vld [vmem:[%s5329_s5 + $0x5c4] sm:$0xf0]  ;;  %v4006_v61 = vld [vmem:[%s5329_s5 + $0x430] sm:$0xf] }
 0x147   : > { %2894 = vmatpush.bf16.msrb.mxu3 %v3935_v40  ;;  %v4150_v40 = vld [vmem:[%s5329_s5 + $0x550] sm:$0xf]  ;;  %v4584_v63 = vld [vmem:[%s5329_s5 + $0x434] sm:$0xf0]  ;;  %v4207_v3 = vor.u32 %v4634_v59, %v4206_v58  ;;  %v4582_v11 = vld [vmem:[%s5329_s5 + $0x424] sm:$0xf0] }
 0x148   : > { %2853 = vmatpush.bf16.msrb.mxu0 %v3735_v49  ;;  %v4151_v49 = vor.u32 %v4620_v41, %v4150_v40  ;;  %v4070_v1 = vld [vmem:[%s5329_s5 + $0x4b0] sm:$0xf]  ;;  %v4600_v2 = vld [vmem:[%s5329_s5 + $0x4b4] sm:$0xf0]  ;;  %v4007_v6 = vor.u32 %v4584_v63, %v4006_v61  ;;  %v4062_v13 = vld [vmem:[%s5329_s5 + $0x4a0] sm:$0xf] }
 0x149   : > { %2867 = vmatpush.bf16.msrb.mxu1 %v3799_v51  ;;  %v4078_v51 = vld [vmem:[%s5329_s5 + $0x4c0] sm:$0xf]  ;;  %v4198_v7 = vld [vmem:[%s5329_s5 + $0x5b0] sm:$0xf]  ;;  %v4632_v8 = vld [vmem:[%s5329_s5 + $0x5b4] sm:$0xf0] }
 0x14a   : > { %2881 = vmatpush.bf16.msrb.mxu2 %v3863_v55  ;;  %v4618_v55 = vld [vmem:[%s5329_s5 + $0x544] sm:$0xf0]  ;;  %v4126_v16 = vld [vmem:[%s5329_s5 + $0x520] sm:$0xf]  ;;  %v3990_v23 = vld [vmem:[%s5329_s5 + $0x410] sm:$0xf] }
 0x14b   : > { %2895 = vmatpush.bf16.msrb.mxu3 %v3927_v60  ;;  %v4079_v60 = vor.u32 %v4602_v52, %v4078_v51  ;;  %v4143_v0 = vor.u32 %v4618_v55, %v4142_v54  ;;  %v4614_v17 = vld [vmem:[%s5329_s5 + $0x524] sm:$0xf0]  ;;  %v4054_v26 = vld [vmem:[%s5329_s5 + $0x490] sm:$0xf]  ;;  %v4612_v31 = vld [vmem:[%s5329_s5 + $0x514] sm:$0xf0] }
 0x14c   : > { %2854 = vmatpush.bf16.msrb.mxu0 %v3727_v4  ;;  %v4134_v4 = vld [vmem:[%s5329_s5 + $0x530] sm:$0xf]  ;;  %v4630_v21 = vld [vmem:[%s5329_s5 + $0x5a4] sm:$0xf0]  ;;  %v4127_v27 = vor.u32 %v4614_v17, %v4126_v16  ;;  %v4628_v35 = vld [vmem:[%s5329_s5 + $0x594] sm:$0xf0] }
 0x14d   : > { %2868 = vmatpush.bf16.msrb.mxu1 %v3791_v5  ;;  %v4616_v5 = vld [vmem:[%s5329_s5 + $0x534] sm:$0xf0]  ;;  %v4118_v30 = vld [vmem:[%s5329_s5 + $0x510] sm:$0xf]  ;;  %v4578_v38 = vld [vmem:[%s5329_s5 + $0x404] sm:$0xf0] }
 0x14e   : > { %2882 = vmatpush.bf16.msrb.mxu2 %v3855_v9  ;;  %v4071_v9 = vor.u32 %v4600_v2, %v4070_v1  ;;  %v4135_v12 = vor.u32 %v4616_v5, %v4134_v4  ;;  %v4182_v34 = vld [vmem:[%s5329_s5 + $0x590] sm:$0xf]  ;;  %v4594_v40 = vld [vmem:[%s5329_s5 + $0x484] sm:$0xf0]  ;;  %v4119_v48 = vor.u32 %v4612_v31, %v4118_v30  ;;  %v4688_v52 = vld [vmem:[%s5329_s5 + $0x774] sm:$0xf0] }
 0x14f   : > { %2896 = vmatpush.bf16.msrb.mxu3 %v3919_v19  ;;  %2855 = vmatmul.bf16.vlgmr.msrb.gmra.mxu0 %v5526_v20  ;;  %v4190_v19 = vld [vmem:[%s5329_s5 + $0x5a0] sm:$0xf]  ;;  %v4610_v43 = vld [vmem:[%s5329_s5 + $0x504] sm:$0xf0]  ;;  %v4294_v45 = vld [vmem:[%s5329_s5 + $0x670] sm:$0xf] }
 0x150   : > { %2903 = vmatpush.bf16.msra.mxu0 %v4039_v10  ;;  %2869 = vmatmul.bf16.vlgmr.msrb.gmra.mxu1 %v5537_v28  ;;  %v3998_v10 = vld [vmem:[%s5329_s5 + $0x420] sm:$0xf]  ;;  %v4358_v47 = vld [vmem:[%s5329_s5 + $0x6f0] sm:$0xf]  ;;  %v4626_v55 = vld [vmem:[%s5329_s5 + $0x584] sm:$0xf0] }
 0x151   : > { %2917 = vmatpush.bf16.msra.mxu1 %v4103_v14  ;;  %2883 = vmatmul.bf16.vlgmr.msrb.gmra.mxu2 %v5533_v24  ;;  %v4598_v14 = vld [vmem:[%s5329_s5 + $0x4a4] sm:$0xf0]  ;;  %v3999_v18 = vor.u32 %v4582_v11, %v3998_v10  ;;  %v4422_v51 = vld [vmem:[%s5329_s5 + $0x770] sm:$0xf]  ;;  %v4174_v54 = vld [vmem:[%s5329_s5 + $0x580] sm:$0xf] }
 0x152   : > { %2931 = vmatpush.bf16.msra.mxu2 %v4167_v15  ;;  %2897 = vmatmul.bf16.vlgmr.msrb.gmra.mxu3 %v5541_v32  ;;  %v4199_v15 = vor.u32 %v4632_v8, %v4198_v7  ;;  %v4063_v22 = vor.u32 %v4598_v14, %v4062_v13  ;;  %v4445_v59 = vld [vmem:[%s6012_s0 + $0x58] sm:$0xf0]  ;;  %v4446_v61 = vld [vmem:[%s6012_s0 + $0x60] sm:$0xf0]  ;;  %v4463_v1 = vld [vmem:[%s5329_s5 + $0x74] sm:$0xf]  ;;  %v4175_v10 = vor.u32 %v4626_v55, %v4174_v54 }
 0x153   : > { %2945 = vmatpush.bf16.msra.mxu3 %v4231_v25  ;;  %v4580_v25 = vld [vmem:[%s5329_s5 + $0x414] sm:$0xf0]  ;;  %v3528_v2 = vld [vmem:[%s5329_s5 + $0x78] sm:$0xf0]  ;;  %v4439_v7 = vld [vmem:[%s6012_s0 + $0x2c] sm:$0xf] }
 0x154   : > { %2904 = vmatpush.bf16.msra.mxu0 %v4031_v29  ;;  %v4596_v29 = vld [vmem:[%s5329_s5 + $0x494] sm:$0xf0]  ;;  %v3991_v37 = vor.u32 %v4580_v25, %v3990_v23  ;;  %v3452_v8 = vld [vmem:[%s6012_s0 + $0x64] sm:$0xf0]  ;;  %v4286_v11 = vld [vmem:[%s5329_s5 + $0x660] sm:$0xf] }
 0x155   : > { %2918 = vmatpush.bf16.msra.mxu1 %v4095_v33  ;;  %v4191_v33 = vor.u32 %v4630_v21, %v4190_v19  ;;  %v4055_v41 = vor.u32 %v4596_v29, %v4054_v26  ;;  %v4350_v13 = vld [vmem:[%s5329_s5 + $0x6e0] sm:$0xf]  ;;  %v4670_v16 = vld [vmem:[%s5329_s5 + $0x6e4] sm:$0xf0]  ;;  %v3520_v23 = vld [vmem:[%s5329_s5 + $0x68] sm:$0xf0]  ;;  %v5641_v25 = vor.u32 %v4439_v7, %v3452_v8 }
 0x156   : > { %2932 = vmatpush.bf16.msra.mxu2 %v4159_v36  ;;  %v3982_v36 = vld [vmem:[%s5329_s5 + $0x400] sm:$0xf]  ;;  %v4278_v30 = vld [vmem:[%s5329_s5 + $0x650] sm:$0xf]  ;;  %v4652_v31 = vld [vmem:[%s5329_s5 + $0x654] sm:$0xf0] }
 0x157   : > { %2946 = vmatpush.bf16.msra.mxu3 %v4223_v39  ;;  %v4046_v39 = vld [vmem:[%s5329_s5 + $0x480] sm:$0xf]  ;;  %v3983_v58 = vor.u32 %v4578_v38, %v3982_v36  ;;  %v4406_v36 = vld [vmem:[%s5329_s5 + $0x750] sm:$0xf]  ;;  %v4459_v38 = vld [vmem:[%s5329_s5 + $0x54] sm:$0xf] }
 0x158   : > { %2905 = vmatpush.bf16.msra.mxu0 %v4023_v42  ;;  %v4110_v42 = vld [vmem:[%s5329_s5 + $0x500] sm:$0xf]  ;;  %v4047_v63 = vor.u32 %v4594_v40, %v4046_v39  ;;  %v3512_v39 = vld [vmem:[%s5329_s5 + $0x58] sm:$0xf0]  ;;  %v4279_v40 = vor.u32 %v4652_v31, %v4278_v30  ;;  %v4646_v8 = vld [vmem:[%s5329_s5 + $0x624] sm:$0xf0] }
 0x159   : > { %2919 = vmatpush.bf16.msra.mxu1 %v4087_v46  ;;  %v4656_v46 = vld [vmem:[%s5329_s5 + $0x674] sm:$0xf0]  ;;  %v4111_v4 = vor.u32 %v4610_v43, %v4110_v42  ;;  %v4414_v17 = vld [vmem:[%s5329_s5 + $0x760] sm:$0xf]  ;;  %v4374_v31 = vld [vmem:[%s5329_s5 + $0x710] sm:$0xf] }
 0x15a   : > { %2933 = vmatpush.bf16.msra.mxu2 %v4151_v49  ;;  %v4672_v49 = vld [vmem:[%s5329_s5 + $0x6f4] sm:$0xf0]  ;;  %v4270_v43 = vld [vmem:[%s5329_s5 + $0x640] sm:$0xf]  ;;  %s4689_s12 = sshll.u32 (%p4827_p6), %s4762_s14, 3 }
 0x15b   : > { %2947 = vmatpush.bf16.msra.mxu3 %v4215_v53  ;;  %v4183_v53 = vor.u32 %v4628_v35, %v4182_v34  ;;  %v4359_v5 = vor.u32 %v4672_v49, %v4358_v47  ;;  %v4668_v35 = vld [vmem:[%s5329_s5 + $0x6d4] sm:$0xf0]  ;;  %v3515_v47 = vor.u32 %v4459_v38, %v3512_v39  ;;  %v4398_v49 = vld [vmem:[%s5329_s5 + $0x740] sm:$0xf]  ;;  %s3256_s29 = scalar_lea.vmem (%p4827_p6), %s6015_s3, %s4689_s12 }
 0x15c   : > { %2906 = vmatpush.bf16.msra.mxu0 %v4015_v57  ;;  %v3442_v57 = vld [vmem:[%s6012_s0 + $0x20] sm:$0xf] }
 0x15d   : > { %2920 = vmatpush.bf16.msra.mxu1 %v4079_v60  ;;  %v3450_v60 = vld [vmem:[%s6012_s0 + $0x28] sm:$0xf]  ;;  %v5630_v14 = vor.u32 %v4445_v59, %v3442_v57  ;;  %v4648_v59 = vld [vmem:[%s5329_s5 + $0x634] sm:$0xf0]  ;;  %v4254_v7 = vld [vmem:[%s5329_s5 + $0x620] sm:$0xf] }
 0x15e   : > { %2934 = vmatpush.bf16.msra.mxu2 %v4143_v0  ;;  %v4295_v0 = vor.u32 %v4656_v46, %v4294_v45  ;;  %v5635_v19 = vor.u32 %v4446_v61, %v3450_v60  ;;  %v4650_v45 = vld [vmem:[%s5329_s5 + $0x644] sm:$0xf0]  ;;  %v4334_v46 = vld [vmem:[%s5329_s5 + $0x6c0] sm:$0xf]  ;;  %v4326_v60 = vld [vmem:[%s5329_s5 + $0x6b0] sm:$0xf] }
 0x15f   : > { %2948 = vmatpush.bf16.msra.mxu3 %v4207_v3  ;;  %v4438_v3 = vld [vmem:[%s6012_s0 + $0x24] sm:$0xf]  ;;  %v4271_v54 = vor.u32 %v4650_v45, %v4270_v43  ;;  %v4302_v39 = vld [vmem:[%s5329_s5 + $0x680] sm:$0xf]  ;;  %v4674_v45 = vld [vmem:[%s5329_s5 + $0x704] sm:$0xf0] }
 0x160   : > { %2907 = vmatpush.bf16.msra.mxu0 %v4007_v6  ;;  %v3444_v6 = vld [vmem:[%s6012_s0 + $0x5c] sm:$0xf0] }
 0x161   : > { %2921 = vmatpush.bf16.msra.mxu1 %v4071_v9  ;;  %v4423_v9 = vor.u32 %v4688_v52, %v4422_v51  ;;  %v5637_v21 = vor.u32 %v4438_v3, %v3444_v6  ;;  %v4682_v51 = vld [vmem:[%s5329_s5 + $0x744] sm:$0xf0]  ;;  %v4457_v52 = vld [vmem:[%s5329_s5 + $0x44] sm:$0xf]  ;;  %v3496_v3 = vld [vmem:[%s5329_s5 + $0x38] sm:$0xf0] }
 0x162   : > { %2935 = vmatpush.bf16.msra.mxu2 %v4135_v12  ;;  %v4654_v12 = vld [vmem:[%s5329_s5 + $0x664] sm:$0xf0]  ;;  %v4399_v57 = vor.u32 %v4682_v51, %v4398_v49  ;;  %v4495_v49 = vld [vmem:[%s5329_s5 + $0x174] sm:$0xf]  ;;  %v3656_v51 = vld [vmem:[%s5329_s5 + $0x178] sm:$0xf0] }
 0x163   : > { %2949 = vmatpush.bf16.msra.mxu3 %v4199_v15  ;;  %v3531_v15 = vor.u32 %v4463_v1, %v3528_v2  ;;  %v4287_v26 = vor.u32 %v4654_v12, %v4286_v11  ;;  %v4680_v1 = vld [vmem:[%s5329_s5 + $0x734] sm:$0xf0]  ;;  %v4455_v2 = vld [vmem:[%s5329_s5 + $0x34] sm:$0xf]  ;;  %v4662_v11 = vld [vmem:[%s5329_s5 + $0x6a4] sm:$0xf0] }
 0x164   : > { %2908 = vmatpush.bf16.msra.mxu0 %v3999_v18  ;;  %v4686_v18 = vld [vmem:[%s5329_s5 + $0x764] sm:$0xf0]  ;;  %v4382_v12 = vld [vmem:[%s5329_s5 + $0x720] sm:$0xf] }
 0x165   : > { %2922 = vmatpush.bf16.msra.mxu1 %v4063_v22  ;;  %v4461_v22 = vld [vmem:[%s5329_s5 + $0x64] sm:$0xf]  ;;  %v4415_v29 = vor.u32 %v4686_v18, %v4414_v17  ;;  %v4255_v17 = vor.u32 %v4646_v8, %v4254_v7  ;;  %v4246_v18 = vld [vmem:[%s5329_s5 + $0x610] sm:$0xf] }
 0x166   : > { %2936 = vmatpush.bf16.msra.mxu2 %v4127_v27  ;;  %v4351_v27 = vor.u32 %v4670_v16, %v4350_v13  ;;  %v3523_v34 = vor.u32 %v4461_v22, %v3520_v23  ;;  %v4678_v13 = vld [vmem:[%s5329_s5 + $0x724] sm:$0xf0]  ;;  %v3488_v16 = vld [vmem:[%s5329_s5 + $0x28] sm:$0xf0]  ;;  %v4477_v7 = vld [vmem:[%s5329_s5 + $0xe4] sm:$0xf] }
 0x167   : > { %2950 = vmatpush.bf16.msra.mxu3 %v4191_v33  ;;  %v4342_v33 = vld [vmem:[%s5329_s5 + $0x6d0] sm:$0xf]  ;;  %v4383_v23 = vor.u32 %v4678_v13, %v4382_v12  ;;  %v3648_v12 = vld [vmem:[%s5329_s5 + $0x168] sm:$0xf0] }
 0x168   : > { %2909 = vmatpush.bf16.msra.mxu0 %v3991_v37  ;;  %v4684_v37 = vld [vmem:[%s5329_s5 + $0x754] sm:$0xf0] }
 0x169   : > { %2923 = vmatpush.bf16.msra.mxu1 %v4055_v41  ;;  %v4343_v41 = vor.u32 %v4668_v35, %v4342_v33  ;;  %v4407_v42 = vor.u32 %v4684_v37, %v4406_v36  ;;  %v4676_v33 = vld [vmem:[%s5329_s5 + $0x714] sm:$0xf0]  ;;  %v3480_v35 = vld [vmem:[%s5329_s5 + $0x18] sm:$0xf0]  ;;  %v4238_v36 = vld [vmem:[%s5329_s5 + $0x600] sm:$0xf] }
 0x16a   : > { %2937 = vmatpush.bf16.msra.mxu2 %v4119_v48  ;;  %v4666_v48 = vld [vmem:[%s5329_s5 + $0x6c4] sm:$0xf0]  ;;  %v4375_v43 = vor.u32 %v4676_v33, %v4374_v31  ;;  %v3576_v33 = vld [vmem:[%s5329_s5 + $0xd8] sm:$0xf0] }
 0x16b   : > { %2951 = vmatpush.bf16.msra.mxu3 %v4183_v53  ;;  %v3504_v53 = vld [vmem:[%s5329_s5 + $0x48] sm:$0xf0]  ;;  %v4335_v55 = vor.u32 %v4666_v48, %v4334_v46  ;;  %v4642_v37 = vld [vmem:[%s5329_s5 + $0x604] sm:$0xf0]  ;;  %v4479_v46 = vld [vmem:[%s5329_s5 + $0xf4] sm:$0xf] }
 0x16c   : > { %2910 = vmatpush.bf16.msra.mxu0 %v3983_v58  ;;  %v4262_v58 = vld [vmem:[%s5329_s5 + $0x630] sm:$0xf]  ;;  %v3507_v61 = vor.u32 %v4457_v52, %v3504_v53  ;;  %v4511_v52 = vld [vmem:[%s5329_s5 + $0x1f4] sm:$0xf]  ;;  %v3720_v53 = vld [vmem:[%s5329_s5 + $0x1f8] sm:$0xf0] }
 0x16d   : > { %2924 = vmatpush.bf16.msra.mxu1 %v4047_v63  ;;  %v4664_v63 = vld [vmem:[%s5329_s5 + $0x6b4] sm:$0xf0]  ;;  %v3723_v8 = vor.u32 %v4511_v52, %v3720_v53 }
 0x16e   : > { %2938 = vmatpush.bf16.msra.mxu2 %v4111_v4  ;;  %v4263_v4 = vor.u32 %v4648_v59, %v4262_v58  ;;  %v3458_v58 = vld [vmem:[%s6012_s0 + $0x30] sm:$0xf]  ;;  %v4447_v59 = vld [vmem:[%s6012_s0 + $0x68] sm:$0xf0] }
 0x16f   : > { %2952 = vmatpush.bf16.msra.mxu3 %v4175_v10  ;;  %2911 = vmatmul.bf16.vlgmr.msra.gmra.mxu0 %v5630_v14  ;;  %v3499_v10 = vor.u32 %v4455_v2, %v3496_v3  ;;  %v3784_v2 = vld [vmem:[%s5329_s5 + $0x278] sm:$0xf0]  ;;  %v5725_v13 = vor.u32 %v4447_v59, %v3458_v58  ;;  %v4471_v58 = vld [vmem:[%s5329_s5 + $0xb4] sm:$0xf] }
 0x170   : > { %2959 = vmatpush.bf16.msrb.mxu0 %v4295_v0  ;;  %2925 = vmatmul.bf16.vlgmr.msra.gmra.mxu1 %v5637_v21  ;;  %v4390_v0 = vld [vmem:[%s5329_s5 + $0x730] sm:$0xf] }
 0x171   : > { %2973 = vmatpush.bf16.msrb.mxu1 %v4359_v5  ;;  %2939 = vmatmul.bf16.vlgmr.msra.gmra.mxu2 %v5635_v19  ;;  %v4327_v5 = vor.u32 %v4664_v63, %v4326_v60  ;;  %v4391_v6 = vor.u32 %v4680_v1, %v4390_v0  ;;  %v3466_v60 = vld [vmem:[%s6012_s0 + $0x38] sm:$0xf]  ;;  %v4448_v0 = vld [vmem:[%s6012_s0 + $0x70] sm:$0xf0] }
 0x172   : > { %2987 = vmatpush.bf16.msrb.mxu2 %v4423_v9  ;;  %2953 = vmatmul.bf16.vlgmr.msra.gmra.mxu3 %v5641_v25  ;;  %v4318_v9 = vld [vmem:[%s5329_s5 + $0x6a0] sm:$0xf]  ;;  %v4527_v1 = vld [vmem:[%s5329_s5 + $0x274] sm:$0xf] }
 0x173   : > { %3001 = vmatpush.bf16.msrb.mxu3 %v3531_v15  ;;  %v4453_v15 = vld [vmem:[%s5329_s5 + $0x24] sm:$0xf]  ;;  %v4319_v22 = vor.u32 %v4662_v11, %v4318_v9 }
 0x174   : > { %2960 = vmatpush.bf16.msrb.mxu0 %v4287_v26  ;;  %v4644_v26 = vld [vmem:[%s5329_s5 + $0x614] sm:$0xf0]  ;;  %v3491_v30 = vor.u32 %v4453_v15, %v3488_v16  ;;  %v4493_v11 = vld [vmem:[%s5329_s5 + $0x164] sm:$0xf]  ;;  %v5727_v15 = vor.u32 %v4448_v0, %v3466_v60  ;;  %v4487_v60 = vld [vmem:[%s5329_s5 + $0x134] sm:$0xf] }
 0x175   : > { %2974 = vmatpush.bf16.msrb.mxu1 %v4351_v27  ;;  %v4310_v27 = vld [vmem:[%s5329_s5 + $0x690] sm:$0xf]  ;;  %v4247_v38 = vor.u32 %v4644_v26, %v4246_v18  ;;  %v4509_v16 = vld [vmem:[%s5329_s5 + $0x1e4] sm:$0xf]  ;;  %v3787_v18 = vor.u32 %v4527_v1, %v3784_v2  ;;  %v3651_v26 = vor.u32 %v4493_v11, %v3648_v12  ;;  %v3688_v0 = vld [vmem:[%s5329_s5 + $0x1b8] sm:$0xf0] }
 0x176   : > { %2988 = vmatpush.bf16.msrb.mxu2 %v4415_v29  ;;  %v4660_v29 = vld [vmem:[%s5329_s5 + $0x694] sm:$0xf0]  ;;  %v4501_v11 = vld [vmem:[%s5329_s5 + $0x1a4] sm:$0xf]  ;;  %v3680_v12 = vld [vmem:[%s5329_s5 + $0x1a8] sm:$0xf0] }
 0x177   : > { %3002 = vmatpush.bf16.msrb.mxu3 %v3523_v34  ;;  %v4451_v34 = vld [vmem:[%s5329_s5 + $0x14] sm:$0xf] }
 0x178   : > { %2961 = vmatpush.bf16.msrb.mxu0 %v4279_v40  ;;  %v4658_v40 = vld [vmem:[%s5329_s5 + $0x684] sm:$0xf0]  ;;  %v3483_v48 = vor.u32 %v4451_v34, %v3480_v35  ;;  %v4491_v34 = vld [vmem:[%s5329_s5 + $0x154] sm:$0xf]  ;;  %v3640_v35 = vld [vmem:[%s5329_s5 + $0x158] sm:$0xf0] }
 0x179   : > { %2975 = vmatpush.bf16.msrb.mxu1 %v4343_v41  ;;  %v4366_v41 = vld [vmem:[%s5329_s5 + $0x700] sm:$0xf] }
 0x17a   : > { %2989 = vmatpush.bf16.msrb.mxu2 %v4407_v42  ;;  %v4311_v42 = vor.u32 %v4660_v29, %v4310_v27  ;;  %v4367_v63 = vor.u32 %v4674_v45, %v4366_v41  ;;  %v4525_v27 = vld [vmem:[%s5329_s5 + $0x264] sm:$0xf]  ;;  %v3776_v29 = vld [vmem:[%s5329_s5 + $0x268] sm:$0xf0]  ;;  %v4523_v41 = vld [vmem:[%s5329_s5 + $0x254] sm:$0xf] }
 0x17b   : > { %3003 = vmatpush.bf16.msrb.mxu3 %v3515_v47  ;;  %v3592_v47 = vld [vmem:[%s5329_s5 + $0xf8] sm:$0xf0] }
 0x17c   : > { %2962 = vmatpush.bf16.msrb.mxu0 %v4271_v54  ;;  %v4449_v54 = vld [vmem:[%s5329_s5 + $0x4] sm:$0xf]  ;;  %v3595_v3 = vor.u32 %v4479_v46, %v3592_v47  ;;  %v3568_v46 = vld [vmem:[%s5329_s5 + $0xc8] sm:$0xf0] }
 0x17d   : > { %2976 = vmatpush.bf16.msrb.mxu1 %v4335_v55  ;;  %v3472_v55 = vld [vmem:[%s5329_s5 + $0x8] sm:$0xf0]  ;;  %v4489_v47 = vld [vmem:[%s5329_s5 + $0x144] sm:$0xf] }
 0x17e   : > { %2990 = vmatpush.bf16.msrb.mxu2 %v4399_v57  ;;  %v4239_v57 = vor.u32 %v4642_v37, %v4238_v36  ;;  %v3475_v9 = vor.u32 %v4449_v54, %v3472_v55  ;;  %v4507_v36 = vld [vmem:[%s5329_s5 + $0x1d4] sm:$0xf]  ;;  %v3704_v37 = vld [vmem:[%s5329_s5 + $0x1d8] sm:$0xf0]  ;;  %v4521_v55 = vld [vmem:[%s5329_s5 + $0x244] sm:$0xf] }
 0x17f   : > { %3004 = vmatpush.bf16.msrb.mxu3 %v3507_v61  ;;  %v4303_v61 = vor.u32 %v4658_v40, %v4302_v39  ;;  %v3643_v40 = vor.u32 %v4491_v34, %v3640_v35  ;;  %v3707_v45 = vor.u32 %v4507_v36, %v3704_v37  ;;  %v4499_v34 = vld [vmem:[%s5329_s5 + $0x194] sm:$0xf]  ;;  %v3672_v35 = vld [vmem:[%s5329_s5 + $0x198] sm:$0xf0] }
 0x180   : > { %2963 = vmatpush.bf16.msrb.mxu0 %v4263_v4  ;;  %v3659_v4 = vor.u32 %v4495_v49, %v3656_v51  ;;  %v4505_v49 = vld [vmem:[%s5329_s5 + $0x1c4] sm:$0xf]  ;;  %v3696_v51 = vld [vmem:[%s5329_s5 + $0x1c8] sm:$0xf0]  ;;  %v4515_v37 = vld [vmem:[%s5329_s5 + $0x214] sm:$0xf] }
 0x181   : > { %2977 = vmatpush.bf16.msrb.mxu1 %v4327_v5  ;;  %v4440_v5 = vld [vmem:[%s6012_s0 + $0x34] sm:$0xf]  ;;  %v3699_v59 = vor.u32 %v4505_v49, %v3696_v51  ;;  %v3848_v51 = vld [vmem:[%s5329_s5 + $0x2f8] sm:$0xf0] }
 0x182   : > { %2991 = vmatpush.bf16.msrb.mxu2 %v4391_v6  ;;  %v3460_v6 = vld [vmem:[%s6012_s0 + $0x6c] sm:$0xf0]  ;;  %v4543_v49 = vld [vmem:[%s5329_s5 + $0x2f4] sm:$0xf] }
 0x183   : > { %3005 = vmatpush.bf16.msrb.mxu3 %v3499_v10  ;;  %v3584_v10 = vld [vmem:[%s5329_s5 + $0xe8] sm:$0xf0] }
 0x184   : > { %2964 = vmatpush.bf16.msrb.mxu0 %v4255_v17  ;;  %v3712_v17 = vld [vmem:[%s5329_s5 + $0x1e8] sm:$0xf0] }
 0x185   : > { %2978 = vmatpush.bf16.msrb.mxu1 %v4319_v22  ;;  %v5731_v22 = vor.u32 %v4440_v5, %v3460_v6  ;;  %v3715_v31 = vor.u32 %v4509_v16, %v3712_v17  ;;  %v3752_v5 = vld [vmem:[%s5329_s5 + $0x238] sm:$0xf0]  ;;  %v4469_v6 = vld [vmem:[%s5329_s5 + $0xa4] sm:$0xf] }
 0x186   : > { %2992 = vmatpush.bf16.msrb.mxu2 %v4383_v23  ;;  %v3587_v23 = vor.u32 %v4477_v7, %v3584_v10  ;;  %v3616_v10 = vld [vmem:[%s5329_s5 + $0x128] sm:$0xf0] }
 0x187   : > { %3006 = vmatpush.bf16.msrb.mxu3 %v3491_v30  ;;  %v4475_v30 = vld [vmem:[%s5329_s5 + $0xd4] sm:$0xf] }
 0x188   : > { %2965 = vmatpush.bf16.msrb.mxu0 %v4247_v38  ;;  %v3779_v38 = vor.u32 %v4525_v27, %v3776_v29  ;;  %v3579_v39 = vor.u32 %v4475_v30, %v3576_v33  ;;  %v4467_v27 = vld [vmem:[%s5329_s5 + $0x94] sm:$0xf]  ;;  %v3683_v29 = vor.u32 %v4501_v11, %v3680_v12  ;;  %v3544_v30 = vld [vmem:[%s5329_s5 + $0x98] sm:$0xf0] }
 0x189   : > { %2979 = vmatpush.bf16.msrb.mxu1 %v4311_v42  ;;  %v3768_v42 = vld [vmem:[%s5329_s5 + $0x258] sm:$0xf0] }
 0x18a   : > { %2993 = vmatpush.bf16.msrb.mxu2 %v4375_v43  ;;  %v4473_v43 = vld [vmem:[%s5329_s5 + $0xc4] sm:$0xf]  ;;  %v3771_v52 = vor.u32 %v4523_v41, %v3768_v42  ;;  %v3608_v33 = vld [vmem:[%s5329_s5 + $0x118] sm:$0xf0]  ;;  %v3536_v42 = vld [vmem:[%s5329_s5 + $0x88] sm:$0xf0] }
 0x18b   : > { %3007 = vmatpush.bf16.msrb.mxu3 %v3483_v48  ;;  %v3632_v48 = vld [vmem:[%s5329_s5 + $0x148] sm:$0xf0]  ;;  %v3571_v53 = vor.u32 %v4473_v43, %v3568_v46  ;;  %v4465_v41 = vld [vmem:[%s5329_s5 + $0x84] sm:$0xf] }
 0x18c   : > { %2966 = vmatpush.bf16.msrb.mxu0 %v4239_v57  ;;  %v3635_v54 = vor.u32 %v4489_v47, %v3632_v48  ;;  %v3760_v57 = vld [vmem:[%s5329_s5 + $0x248] sm:$0xf0]  ;;  %v4481_v43 = vld [vmem:[%s5329_s5 + $0x104] sm:$0xf] }
 0x18d   : > { %2980 = vmatpush.bf16.msrb.mxu1 %v4303_v61  ;;  %v3624_v61 = vld [vmem:[%s5329_s5 + $0x138] sm:$0xf0]  ;;  %v3763_v1 = vor.u32 %v4521_v55, %v3760_v57  ;;  %v3600_v46 = vld [vmem:[%s5329_s5 + $0x108] sm:$0xf0]  ;;  %v4497_v47 = vld [vmem:[%s5329_s5 + $0x184] sm:$0xf] }
 0x18e   : > { %2994 = vmatpush.bf16.msrb.mxu2 %v4367_v63  ;;  %v4503_v63 = vld [vmem:[%s5329_s5 + $0x1b4] sm:$0xf]  ;;  %v3664_v48 = vld [vmem:[%s5329_s5 + $0x188] sm:$0xf0]  ;;  %v3976_v57 = vld [vmem:[%s5329_s5 + $0x3f8] sm:$0xf0] }
 0x18f   : > { %3008 = vmatpush.bf16.msrb.mxu3 %v3475_v9  ;;  %2967 = vmatmul.bf16.vlgmr.msrb.gmra.mxu0 %v5725_v13  ;;  %v3691_v7 = vor.u32 %v4503_v63, %v3688_v0  ;;  %v4485_v9 = vld [vmem:[%s5329_s5 + $0x124] sm:$0xf]  ;;  %v4575_v55 = vld [vmem:[%s5329_s5 + $0x3f4] sm:$0xf]  ;;  %v3851_v63 = vor.u32 %v4543_v49, %v3848_v51 }
 0x190   : > { %3015 = vmatpush.bf16.msra.mxu0 %v3595_v3  ;;  %2981 = vmatmul.bf16.vlgmr.msrb.gmra.mxu1 %v5731_v22  ;;  %v3627_v3 = vor.u32 %v4487_v60, %v3624_v61  ;;  %v3728_v60 = vld [vmem:[%s5329_s5 + $0x208] sm:$0xf0]  ;;  %v3667_v61 = vor.u32 %v4497_v47, %v3664_v48  ;;  %v4591_v0 = vld [vmem:[%s5329_s5 + $0x474] sm:$0xf] }
 0x191   : > { %3029 = vmatpush.bf16.msra.mxu1 %v3659_v4  ;;  %2995 = vmatmul.bf16.vlgmr.msrb.gmra.mxu2 %v5727_v15  ;;  %v4519_v4 = vld [vmem:[%s5329_s5 + $0x234] sm:$0xf]  ;;  %v4016_v47 = vld [vmem:[%s5329_s5 + $0x448] sm:$0xf0] }
 0x192   : > { %3043 = vmatpush.bf16.msra.mxu2 %v3723_v8  ;;  %3009 = vmatmul.bf16.vlgmr.msrb.gmra.mxu3 %v5423_v44  ;;  %v3560_v44 = vld [vmem:[%s5329_s5 + $0xb8] sm:$0xf0]  ;;  %v3552_v8 = vld [vmem:[%s5329_s5 + $0xa8] sm:$0xf0]  ;;  %v3755_v16 = vor.u32 %v4519_v4, %v3752_v5  ;;  %v4541_v4 = vld [vmem:[%s5329_s5 + $0x2e4] sm:$0xf] }
 0x193   : > { %3057 = vmatpush.bf16.msra.mxu3 %v3787_v18  ;;  %v3563_v2 = vor.u32 %v4471_v58, %v3560_v44  ;;  %v3555_v17 = vor.u32 %v4469_v6, %v3552_v8  ;;  %v3619_v18 = vor.u32 %v4485_v9, %v3616_v10  ;;  %v3539_v58 = vor.u32 %v4465_v41, %v3536_v42  ;;  %v4513_v44 = vld [vmem:[%s5329_s5 + $0x204] sm:$0xf]  ;;  %v3840_v5 = vld [vmem:[%s5329_s5 + $0x2e8] sm:$0xf0]  ;;  %v4535_v51 = vld [vmem:[%s5329_s5 + $0x2b4] sm:$0xf] }
 0x194   : > { %3016 = vmatpush.bf16.msra.mxu0 %v3587_v23  ;;  %v4517_v23 = vld [vmem:[%s5329_s5 + $0x224] sm:$0xf]  ;;  %v3904_v8 = vld [vmem:[%s5329_s5 + $0x368] sm:$0xf0]  ;;  %v3843_v12 = vor.u32 %v4541_v4, %v3840_v5 }
 0x195   : > { %3030 = vmatpush.bf16.msra.mxu1 %v3651_v26  ;;  %v3744_v26 = vld [vmem:[%s5329_s5 + $0x228] sm:$0xf0]  ;;  %v4557_v6 = vld [vmem:[%s5329_s5 + $0x364] sm:$0xf] }
 0x196   : > { %3044 = vmatpush.bf16.msra.mxu2 %v3715_v31  ;;  %v4483_v31 = vld [vmem:[%s5329_s5 + $0x114] sm:$0xf]  ;;  %v3747_v36 = vor.u32 %v4517_v23, %v3744_v26  ;;  %v4573_v9 = vld [vmem:[%s5329_s5 + $0x3e4] sm:$0xf]  ;;  %v3968_v10 = vld [vmem:[%s5329_s5 + $0x3e8] sm:$0xf0] }
 0x197   : > { %3058 = vmatpush.bf16.msra.mxu3 %v3779_v38  ;;  %v3736_v38 = vld [vmem:[%s5329_s5 + $0x218] sm:$0xf0]  ;;  %v3971_v23 = vor.u32 %v4573_v9, %v3968_v10  ;;  %v4539_v26 = vld [vmem:[%s5329_s5 + $0x2d4] sm:$0xf]  ;;  %v4553_v41 = vld [vmem:[%s5329_s5 + $0x344] sm:$0xf] }
 0x198   : > { %3017 = vmatpush.bf16.msra.mxu0 %v3579_v39  ;;  %v3547_v39 = vor.u32 %v4467_v27, %v3544_v30  ;;  %v3832_v27 = vld [vmem:[%s5329_s5 + $0x2d8] sm:$0xf0]  ;;  %v3888_v42 = vld [vmem:[%s5329_s5 + $0x348] sm:$0xf0]  ;;  %v4581_v10 = vld [vmem:[%s5329_s5 + $0x424] sm:$0xf] }
 0x199   : > { %3031 = vmatpush.bf16.msra.mxu1 %v3643_v40  ;;  %v3611_v40 = vor.u32 %v4483_v31, %v3608_v33  ;;  %v3896_v30 = vld [vmem:[%s5329_s5 + $0x358] sm:$0xf0]  ;;  %v4571_v31 = vld [vmem:[%s5329_s5 + $0x3d4] sm:$0xf]  ;;  %v3891_v48 = vor.u32 %v4553_v41, %v3888_v42  ;;  %v3872_v5 = vld [vmem:[%s5329_s5 + $0x328] sm:$0xf0] }
 0x19a   : > { %3045 = vmatpush.bf16.msra.mxu2 %v3707_v45  ;;  %v3675_v45 = vor.u32 %v4499_v34, %v3672_v35  ;;  %v3960_v33 = vld [vmem:[%s5329_s5 + $0x3d8] sm:$0xf0]  ;;  %v3835_v35 = vor.u32 %v4539_v26, %v3832_v27  ;;  %v4547_v26 = vld [vmem:[%s5329_s5 + $0x314] sm:$0xf] }
 0x19b   : > { %3059 = vmatpush.bf16.msra.mxu3 %v3771_v52  ;;  %v4559_v52 = vld [vmem:[%s5329_s5 + $0x374] sm:$0xf]  ;;  %v3864_v27 = vld [vmem:[%s5329_s5 + $0x318] sm:$0xf0] }
 0x19c   : > { %3018 = vmatpush.bf16.msra.mxu0 %v3571_v53  ;;  %v3739_v53 = vor.u32 %v4515_v37, %v3736_v38  ;;  %v4024_v37 = vld [vmem:[%s5329_s5 + $0x458] sm:$0xf0] }
 0x19d   : > { %3032 = vmatpush.bf16.msra.mxu1 %v3635_v54  ;;  %v3912_v54 = vld [vmem:[%s5329_s5 + $0x378] sm:$0xf0] }
 0x19e   : > { %3046 = vmatpush.bf16.msra.mxu2 %v3699_v59  ;;  %v3603_v59 = vor.u32 %v4481_v43, %v3600_v46  ;;  %v3952_v43 = vld [vmem:[%s5329_s5 + $0x3c8] sm:$0xf0]  ;;  %v4585_v46 = vld [vmem:[%s5329_s5 + $0x444] sm:$0xf] }
 0x19f   : > { %3060 = vmatpush.bf16.msra.mxu3 %v3763_v1  ;;  %v4040_v1 = vld [vmem:[%s5329_s5 + $0x478] sm:$0xf0] }
 0x1a0   : > { %3019 = vmatpush.bf16.msra.mxu0 %v3563_v2  ;;  %v3915_v2 = vor.u32 %v4559_v52, %v3912_v54  ;;  %v4043_v11 = vor.u32 %v4591_v0, %v4040_v1  ;;  %v3816_v52 = vld [vmem:[%s5329_s5 + $0x2b8] sm:$0xf0]  ;;  %v4533_v1 = vld [vmem:[%s5329_s5 + $0x2a4] sm:$0xf] }
 0x1a1   : > { %3033 = vmatpush.bf16.msra.mxu1 %v3627_v3  ;;  %v3979_v3 = vor.u32 %v4575_v55, %v3976_v57  ;;  %v4567_v55 = vld [vmem:[%s5329_s5 + $0x3b4] sm:$0xf]  ;;  %v3944_v57 = vld [vmem:[%s5329_s5 + $0x3b8] sm:$0xf0] }
 0x1a2   : > { %3047 = vmatpush.bf16.msra.mxu2 %v3691_v7  ;;  %v3731_v7 = vor.u32 %v4513_v44, %v3728_v60  ;;  %v4583_v44 = vld [vmem:[%s5329_s5 + $0x434] sm:$0xf]  ;;  %v4008_v60 = vld [vmem:[%s5329_s5 + $0x438] sm:$0xf0]  ;;  %v3947_v0 = vor.u32 %v4567_v55, %v3944_v57  ;;  %v4577_v57 = vld [vmem:[%s5329_s5 + $0x404] sm:$0xf] }
 0x1a3   : > { %3061 = vmatpush.bf16.msra.mxu3 %v3755_v16  ;;  %v4589_v16 = vld [vmem:[%s5329_s5 + $0x464] sm:$0xf]  ;;  %v4232_v55 = vld [vmem:[%s5329_s5 + $0x5f8] sm:$0xf0] }
 0x1a4   : > { %3020 = vmatpush.bf16.msra.mxu0 %v3555_v17  ;;  %v4032_v17 = vld [vmem:[%s5329_s5 + $0x468] sm:$0xf0] }
 0x1a5   : > { %3034 = vmatpush.bf16.msra.mxu1 %v3619_v18  ;;  %v3907_v18 = vor.u32 %v4557_v6, %v3904_v8  ;;  %v4035_v34 = vor.u32 %v4589_v16, %v4032_v17  ;;  %v4565_v6 = vld [vmem:[%s5329_s5 + $0x3a4] sm:$0xf]  ;;  %v4011_v8 = vor.u32 %v4583_v44, %v4008_v60 }
 0x1a6   : > { %3048 = vmatpush.bf16.msra.mxu2 %v3683_v29  ;;  %v4555_v29 = vld [vmem:[%s5329_s5 + $0x354] sm:$0xf] }
 0x1a7   : > { %3062 = vmatpush.bf16.msra.mxu3 %v3747_v36  ;;  %v4587_v36 = vld [vmem:[%s5329_s5 + $0x454] sm:$0xf]  ;;  %v3899_v38 = vor.u32 %v4555_v29, %v3896_v30 }
 0x1a8   : > { %3021 = vmatpush.bf16.msra.mxu0 %v3547_v39  ;;  %v3963_v39 = vor.u32 %v4571_v31, %v3960_v33  ;;  %v4563_v30 = vld [vmem:[%s5329_s5 + $0x394] sm:$0xf]  ;;  %v3928_v31 = vld [vmem:[%s5329_s5 + $0x398] sm:$0xf0] }
 0x1a9   : > { %3035 = vmatpush.bf16.msra.mxu1 %v3611_v40  ;;  %v3824_v40 = vld [vmem:[%s5329_s5 + $0x2c8] sm:$0xf0]  ;;  %v3931_v42 = vor.u32 %v4563_v30, %v3928_v31  ;;  %v4088_v30 = vld [vmem:[%s5329_s5 + $0x4d8] sm:$0xf0]  ;;  %v4619_v31 = vld [vmem:[%s5329_s5 + $0x554] sm:$0xf] }
 0x1aa   : > { %3049 = vmatpush.bf16.msra.mxu2 %v3675_v45 }
 0x1ab   : > { %3063 = vmatpush.bf16.msra.mxu3 %v3739_v53  ;;  %v4551_v53 = vld [vmem:[%s5329_s5 + $0x334] sm:$0xf] }
 0x1ac   : > { %3022 = vmatpush.bf16.msra.mxu0 %v3539_v58  ;;  %v2800_v54 = vpop.f32.mrf.mxu0  ;;  %v4019_v58 = vor.u32 %v4585_v46, %v4016_v47  ;;  %v3920_v47 = vld [vmem:[%s5329_s5 + $0x388] sm:$0xf0] }
 0x1ad   : > { %3036 = vmatpush.bf16.msra.mxu1 %v3603_v59  ;;  %v3819_v59 = vor.u32 %v4535_v51, %v3816_v52  ;;  %v4623_v52 = vld [vmem:[%s5329_s5 + $0x574] sm:$0xf] }
 0x1ae   : > { %3050 = vmatpush.bf16.msra.mxu2 %v3667_v61  ;;  %v2814_v61 = vpop.f32.mrf.mxu1 }
 0x1af   : > { %3064 = vmatpush.bf16.msra.mxu3 %v3731_v7  ;;  %3023 = vmatmul.bf16.vlgmr.msra.gmra.mxu0 %v5443_v56  ;;  %v4537_v56 = vld [vmem:[%s5329_s5 + $0x2c4] sm:$0xf]  ;;  %v2815_v4 = vadd.f32 %v2814_v61, %v2800_v54  ;;  %v3936_v7 = vld [vmem:[%s5329_s5 + $0x3a8] sm:$0xf0]  ;;  %v4639_v54 = vld [vmem:[%s5329_s5 + $0x5f4] sm:$0xf] }
 0x1b0   : > { %3071 = vmatpush.bf16.msrb.mxu0 %v3851_v63  ;;  %3037 = vmatmul.bf16.vlgmr.msra.gmra.mxu1 %v5431_v50  ;;  %v4027_v50 = vor.u32 %v4587_v36, %v4024_v37  ;;  %v3827_v45 = vor.u32 %v4537_v56, %v3824_v40  ;;  %v3867_v37 = vor.u32 %v4547_v26, %v3864_v27  ;;  %v3792_v56 = vld [vmem:[%s5329_s5 + $0x288] sm:$0xf0] }
 0x1b1   : > { %3085 = vmatpush.bf16.msrb.mxu1 %v3915_v2  ;;  %3051 = vmatmul.bf16.vlgmr.msra.gmra.mxu2 %v5452_v62  ;;  %v4569_v62 = vld [vmem:[%s5329_s5 + $0x3c4] sm:$0xf]  ;;  %v3808_v2 = vld [vmem:[%s5329_s5 + $0x2a8] sm:$0xf0] }
 0x1b2   : > { %3099 = vmatpush.bf16.msrb.mxu2 %v3979_v3  ;;  %3065 = vmatmul.bf16.vlgmr.msra.gmra.mxu3 %v5526_v20  ;;  %v3955_v49 = vor.u32 %v4569_v62, %v3952_v43  ;;  %v3880_v20 = vld [vmem:[%s5329_s5 + $0x338] sm:$0xf0]  ;;  %v4549_v3 = vld [vmem:[%s5329_s5 + $0x324] sm:$0xf]  ;;  %v3811_v9 = vor.u32 %v4533_v1, %v3808_v2  ;;  %v3856_v43 = vld [vmem:[%s5329_s5 + $0x308] sm:$0xf0] }
 0x1b3   : > { %3113 = vmatpush.bf16.msrb.mxu3 %v4043_v11  ;;  %v3883_v63 = vor.u32 %v4551_v53, %v3880_v20  ;;  %v4000_v11 = vld [vmem:[%s5329_s5 + $0x428] sm:$0xf0]  ;;  %v3875_v17 = vor.u32 %v4549_v3, %v3872_v5  ;;  %v4545_v62 = vld [vmem:[%s5329_s5 + $0x304] sm:$0xf]  ;;  %v4168_v53 = vld [vmem:[%s5329_s5 + $0x578] sm:$0xf0]  ;;  %v4235_v3 = vor.u32 %v4639_v54, %v4232_v55 }
 0x1b4   : > { %3072 = vmatpush.bf16.msrb.mxu0 %v3843_v12  ;;  %v4531_v12 = vld [vmem:[%s5329_s5 + $0x294] sm:$0xf]  ;;  %v2828_v16 = vpop.f32.mrf.mxu2  ;;  %v4003_v33 = vor.u32 %v4581_v10, %v4000_v11  ;;  %v3859_v44 = vor.u32 %v4545_v62, %v3856_v43  ;;  %v4296_v2 = vld [vmem:[%s5329_s5 + $0x678] sm:$0xf0]  ;;  %v4605_v5 = vld [vmem:[%s5329_s5 + $0x4e4] sm:$0xf] }
 0x1b5   : > { %3086 = vmatpush.bf16.msrb.mxu1 %v3907_v18  ;;  %v3939_v18 = vor.u32 %v4565_v6, %v3936_v7  ;;  %v2829_v29 = vadd.f32 %v2828_v16, %v2815_v4  ;;  %v2842_v40 = vpop.f32.mrf.mxu3  ;;  %v4655_v1 = vld [vmem:[%s5329_s5 + $0x674] sm:$0xf]  ;;  %v4096_v6 = vld [vmem:[%s5329_s5 + $0x4e8] sm:$0xf0]  ;;  %v4621_v7 = vld [vmem:[%s5329_s5 + $0x564] sm:$0xf] }
 0x1b6   : > { %3100 = vmatpush.bf16.msrb.mxu2 %v3971_v23  ;;  %v3800_v23 = vld [vmem:[%s5329_s5 + $0x298] sm:$0xf0]  ;;  %v2816_v41 = vpop.f32.mrf.mxu1  ;;  %v4224_v10 = vld [vmem:[%s5329_s5 + $0x5e8] sm:$0xf0]  ;;  %v4615_v54 = vld [vmem:[%s5329_s5 + $0x534] sm:$0xf] }
 0x1b7   : > { %3114 = vmatpush.bf16.msrb.mxu3 %v4035_v34  ;;  %v4579_v34 = vld [vmem:[%s5329_s5 + $0x414] sm:$0xf]  ;;  %v3803_v36 = vor.u32 %v4531_v12, %v3800_v23  ;;  %v4299_v12 = vor.u32 %v4655_v1, %v4296_v2  ;;  %v4288_v23 = vld [vmem:[%s5329_s5 + $0x668] sm:$0xf0]  ;;  %v4136_v55 = vld [vmem:[%s5329_s5 + $0x538] sm:$0xf0] }
 0x1b8   : > { %3073 = vmatpush.bf16.msrb.mxu0 %v3835_v35  ;;  %v2802_v35 = vpop.f32.mrf.mxu0  ;;  %v4208_v62 = vld [vmem:[%s5329_s5 + $0x5c8] sm:$0xf0]  ;;  %v4597_v1 = vld [vmem:[%s5329_s5 + $0x4a4] sm:$0xf] }
 0x1b9   : > { %3087 = vmatpush.bf16.msrb.mxu1 %v3899_v38  ;;  %v3992_v38 = vld [vmem:[%s5329_s5 + $0x418] sm:$0xf0]  ;;  %v2817_v46 = vadd.f32 %v2816_v41, %v2802_v35  ;;  %v4617_v41 = vld [vmem:[%s5329_s5 + $0x544] sm:$0xf]  ;;  %v4064_v2 = vld [vmem:[%s5329_s5 + $0x4a8] sm:$0xf0] }
 0x1ba   : > { %3101 = vmatpush.bf16.msrb.mxu2 %v3963_v39  ;;  %v4529_v39 = vld [vmem:[%s5329_s5 + $0x284] sm:$0xf]  ;;  %v3995_v51 = vor.u32 %v4579_v34, %v3992_v38  ;;  %v4635_v34 = vld [vmem:[%s5329_s5 + $0x5d4] sm:$0xf]  ;;  %v4216_v35 = vld [vmem:[%s5329_s5 + $0x5d8] sm:$0xf0] }
 0x1bb   : > { %3115 = vmatpush.bf16.msrb.mxu3 %v4027_v50  ;;  %v4561_v50 = vld [vmem:[%s5329_s5 + $0x384] sm:$0xf]  ;;  %v3795_v20 = vor.u32 %v4529_v39, %v3792_v56  ;;  %v4280_v38 = vld [vmem:[%s5329_s5 + $0x658] sm:$0xf0]  ;;  %v4219_v39 = vor.u32 %v4635_v34, %v4216_v35 }
 0x1bc   : > { %3074 = vmatpush.bf16.msrb.mxu0 %v3827_v45  ;;  %v5852_v45 = vadd.f32 %v2842_v40, %v2829_v29  ;;  %v3923_v60 = vor.u32 %v4561_v50, %v3920_v47  ;;  %v4603_v29 = vld [vmem:[%s5329_s5 + $0x4d4] sm:$0xf]  ;;  %v4601_v56 = vld [vmem:[%s5329_s5 + $0x4c4] sm:$0xf]  ;;  %v4080_v40 = vld [vmem:[%s5329_s5 + $0x4c8] sm:$0xf0] }
 0x1bd   : > { %3088 = vmatpush.bf16.msrb.mxu1 %v3891_v48  ;;  %v4607_v48 = vld [vmem:[%s5329_s5 + $0x4f4] sm:$0xf]  ;;  %v2844_v11 = vpop.f32.mrf.mxu3  ;;  %v4083_v50 = vor.u32 %v4601_v56, %v4080_v40  ;;  %v4272_v47 = vld [vmem:[%s5329_s5 + $0x648] sm:$0xf0]  ;;  %v4120_v35 = vld [vmem:[%s5329_s5 + $0x518] sm:$0xf0] }
 0x1be   : > { %3102 = vmatpush.bf16.msrb.mxu2 %v3955_v49  ;;  %v4104_v49 = vld [vmem:[%s5329_s5 + $0x4f8] sm:$0xf0]  ;;  %v4593_v56 = vld [vmem:[%s5329_s5 + $0x484] sm:$0xf] }
 0x1bf   : > { %3116 = vmatpush.bf16.msrb.mxu3 %v4019_v58  ;;  %v3984_v58 = vld [vmem:[%s5329_s5 + $0x408] sm:$0xf0] }
 0x1c0   : > { %3075 = vmatpush.bf16.msrb.mxu0 %v3819_v59  ;;  %v2830_v59 = vpop.f32.mrf.mxu2  ;;  %v3987_v4 = vor.u32 %v4577_v57, %v3984_v58  ;;  %v4631_v57 = vld [vmem:[%s5329_s5 + $0x5b4] sm:$0xf]  ;;  %v4200_v58 = vld [vmem:[%s5329_s5 + $0x5b8] sm:$0xf0] }
 0x1c1   : > { %3089 = vmatpush.bf16.msrb.mxu1 %v3883_v63  ;;  %v2831_v61 = vadd.f32 %v2830_v59, %v2817_v46  ;;  %v4107_v63 = vor.u32 %v4607_v48, %v4104_v49  ;;  %v4649_v46 = vld [vmem:[%s5329_s5 + $0x644] sm:$0xf] }
 0x1c2   : > { %3103 = vmatpush.bf16.msrb.mxu2 %v3947_v0  ;;  %v4171_v0 = vor.u32 %v4623_v52, %v4168_v53  ;;  %v4599_v52 = vld [vmem:[%s5329_s5 + $0x4b4] sm:$0xf]  ;;  %v4072_v53 = vld [vmem:[%s5329_s5 + $0x4b8] sm:$0xf0] }
 0x1c3   : > { %3117 = vmatpush.bf16.msrb.mxu3 %v4011_v8  ;;  %v4160_v8 = vld [vmem:[%s5329_s5 + $0x568] sm:$0xf0]  ;;  %v5871_v16 = vadd.f32 %v2844_v11, %v2831_v61  ;;  %v4264_v61 = vld [vmem:[%s5329_s5 + $0x638] sm:$0xf0]  ;;  %v4067_v11 = vor.u32 %v4597_v1, %v4064_v2 }
 0x1c4   : > { %3076 = vmatpush.bf16.msrb.mxu0 %v3811_v9  ;;  %v4637_v9 = vld [vmem:[%s5329_s5 + $0x5e4] sm:$0xf]  ;;  %v4163_v26 = vor.u32 %v4621_v7, %v4160_v8  ;;  %v4416_v1 = vld [vmem:[%s5329_s5 + $0x768] sm:$0xf0] }
 0x1c5   : > { %3090 = vmatpush.bf16.msrb.mxu1 %v3875_v17  ;;  %v4099_v17 = vor.u32 %v4605_v5, %v4096_v6  ;;  %v4227_v27 = vor.u32 %v4637_v9, %v4224_v10  ;;  %v4629_v5 = vld [vmem:[%s5329_s5 + $0x5a4] sm:$0xf]  ;;  %v4192_v6 = vld [vmem:[%s5329_s5 + $0x5a8] sm:$0xf0] }
 0x1c6   : > { %3104 = vmatpush.bf16.msrb.mxu2 %v3939_v18  ;;  %v4653_v18 = vld [vmem:[%s5329_s5 + $0x664] sm:$0xf] }
 0x1c7   : > { %3118 = vmatpush.bf16.msrb.mxu3 %v4003_v33  ;;  %v4152_v33 = vld [vmem:[%s5329_s5 + $0x558] sm:$0xf0] }
 0x1c8   : > { %3077 = vmatpush.bf16.msrb.mxu0 %v3803_v36  ;;  %v4291_v36 = vor.u32 %v4653_v18, %v4288_v23 }
 0x1c9   : > { %3091 = vmatpush.bf16.msrb.mxu1 %v3867_v37  ;;  %v4091_v37 = vor.u32 %v4603_v29, %v4088_v30  ;;  %v4595_v29 = vld [vmem:[%s5329_s5 + $0x494] sm:$0xf]  ;;  %v4056_v30 = vld [vmem:[%s5329_s5 + $0x498] sm:$0xf0] }
 0x1ca   : > { %3105 = vmatpush.bf16.msrb.mxu2 %v3931_v42  ;;  %v4144_v42 = vld [vmem:[%s5329_s5 + $0x548] sm:$0xf0] }
 0x1cb   : > { %3119 = vmatpush.bf16.msrb.mxu3 %v3995_v51  ;;  %v4147_v49 = vor.u32 %v4617_v41, %v4144_v42  ;;  %v4048_v42 = vld [vmem:[%s5329_s5 + $0x488] sm:$0xf0] }
 0x1cc   : > { %3078 = vmatpush.bf16.msrb.mxu0 %v3795_v20  ;;  %v2856_v43 = vpop.f32.mrf.mxu0 }
 0x1cd   : > { %3092 = vmatpush.bf16.msrb.mxu1 %v3859_v44  ;;  %v2857_v48 = vadd.f32 %v2856_v43, %v5852_v45  ;;  %v2870_v20 = vpop.f32.mrf.mxu1  ;;  %v4275_v44 = vor.u32 %v4649_v46, %v4272_v47  ;;  %v4075_v45 = vor.u32 %v4599_v52, %v4072_v53  ;;  %v4176_v43 = vld [vmem:[%s5329_s5 + $0x588] sm:$0xf0]  ;;  %v4051_v53 = vor.u32 %v4593_v56, %v4048_v42  ;;  %v4659_v56 = vld [vmem:[%s5329_s5 + $0x694] sm:$0xf]  ;;  %v4376_v42 = vld [vmem:[%s5329_s5 + $0x718] sm:$0xf0] }
 0x1ce   : > { %3106 = vmatpush.bf16.msrb.mxu2 %v3923_v60  ;;  %v4647_v60 = vld [vmem:[%s5329_s5 + $0x634] sm:$0xf] }
 0x1cf   : > { %3120 = vmatpush.bf16.msrb.mxu3 %v3987_v4  ;;  %3079 = vmatmul.bf16.vlgmr.msrb.gmra.mxu0 %v5537_v28  ;;  %v4651_v28 = vld [vmem:[%s5329_s5 + $0x654] sm:$0xf]  ;;  %v2871_v59 = vadd.f32 %v2870_v20, %v2857_v48  ;;  %v4128_v4 = vld [vmem:[%s5329_s5 + $0x528] sm:$0xf0]  ;;  %v4267_v8 = vor.u32 %v4647_v60, %v4264_v61  ;;  %v4360_v48 = vld [vmem:[%s5329_s5 + $0x6f8] sm:$0xf0] }
 0x1d0   : > { %3127 = vmatpush.bf16.msra.mxu0 %v4107_v63  ;;  %3093 = vmatmul.bf16.vlgmr.msrb.gmra.mxu1 %v5533_v24  ;;  %v4633_v24 = vld [vmem:[%s5329_s5 + $0x5c4] sm:$0xf]  ;;  %v4139_v63 = vor.u32 %v4615_v54, %v4136_v55  ;;  %v4240_v20 = vld [vmem:[%s5329_s5 + $0x608] sm:$0xf0] }
 0x1d1   : > { %3141 = vmatpush.bf16.msra.mxu1 %v4171_v0  ;;  %3107 = vmatmul.bf16.vlgmr.msrb.gmra.mxu2 %v5541_v32  ;;  %v4155_v32 = vor.u32 %v4619_v31, %v4152_v33  ;;  %v4211_v51 = vor.u32 %v4633_v24, %v4208_v62  ;;  %v4203_v0 = vor.u32 %v4631_v57, %v4200_v58  ;;  %v4611_v31 = vld [vmem:[%s5329_s5 + $0x514] sm:$0xf]  ;;  %v4609_v24 = vld [vmem:[%s5329_s5 + $0x504] sm:$0xf]  ;;  %v4112_v62 = vld [vmem:[%s5329_s5 + $0x508] sm:$0xf0] }
 0x1d2   : > { %3155 = vmatpush.bf16.msra.mxu2 %v4235_v3  ;;  %3121 = vmatmul.bf16.vlgmr.msrb.gmra.mxu3 %v5630_v14  ;;  %v4283_v14 = vor.u32 %v4651_v28, %v4280_v38  ;;  %v4613_v3 = vld [vmem:[%s5329_s5 + $0x524] sm:$0xf]  ;;  %v4059_v38 = vor.u32 %v4595_v29, %v4056_v30  ;;  %v4123_v40 = vor.u32 %v4611_v31, %v4120_v35  ;;  %v4392_v29 = vld [vmem:[%s5329_s5 + $0x738] sm:$0xf0] }
 0x1d3   : > { %3169 = vmatpush.bf16.msra.mxu3 %v4299_v12  ;;  %v4645_v12 = vld [vmem:[%s5329_s5 + $0x624] sm:$0xf]  ;;  %v4115_v57 = vor.u32 %v4609_v24, %v4112_v62 }
 0x1d4   : > { %3128 = vmatpush.bf16.msra.mxu0 %v4099_v17  ;;  %v2884_v7 = vpop.f32.mrf.mxu2  ;;  %v2858_v10 = vpop.f32.mrf.mxu0  ;;  %v4256_v17 = vld [vmem:[%s5329_s5 + $0x628] sm:$0xf0]  ;;  %v4641_v54 = vld [vmem:[%s5329_s5 + $0x604] sm:$0xf] }
 0x1d5   : > { %3142 = vmatpush.bf16.msra.mxu1 %v4163_v26  ;;  %v2885_v9 = vadd.f32 %v2884_v7, %v2871_v59  ;;  %v2859_v18 = vadd.f32 %v2858_v10, %v5871_v16  ;;  %v2898_v23 = vpop.f32.mrf.mxu3  ;;  %v4131_v26 = vor.u32 %v4613_v3, %v4128_v4  ;;  %v2872_v34 = vpop.f32.mrf.mxu1  ;;  %v4259_v28 = vor.u32 %v4645_v12, %v4256_v17  ;;  %v4669_v61 = vld [vmem:[%s5329_s5 + $0x6e4] sm:$0xf]  ;;  %v4667_v4 = vld [vmem:[%s5329_s5 + $0x6d4] sm:$0xf]  ;;  %v4408_v7 = vld [vmem:[%s5329_s5 + $0x758] sm:$0xf0] }
 0x1d6   : > { %3156 = vmatpush.bf16.msra.mxu2 %v4227_v27  ;;  %v4195_v27 = vor.u32 %v4629_v5, %v4192_v6  ;;  %v4243_v60 = vor.u32 %v4641_v54, %v4240_v20  ;;  %v4344_v5 = vld [vmem:[%s5329_s5 + $0x6d8] sm:$0xf0]  ;;  %v4683_v6 = vld [vmem:[%s5329_s5 + $0x754] sm:$0xf]  ;;  %v4336_v10 = vld [vmem:[%s5329_s5 + $0x6c8] sm:$0xf0] }
 0x1d7   : > { %3170 = vmatpush.bf16.msra.mxu3 %v4291_v36  ;;  %v5916_v33 = vadd.f32 %v2898_v23, %v2885_v9  ;;  %v4627_v36 = vld [vmem:[%s5329_s5 + $0x594] sm:$0xf]  ;;  %v2873_v16 = vadd.f32 %v2872_v34, %v2859_v18  ;;  %v4665_v9 = vld [vmem:[%s5329_s5 + $0x6c4] sm:$0xf]  ;;  %v4400_v12 = vld [vmem:[%s5329_s5 + $0x748] sm:$0xf0] }
 0x1d8   : > { %3129 = vmatpush.bf16.msra.mxu0 %v4091_v37  ;;  %v4184_v37 = vld [vmem:[%s5329_s5 + $0x598] sm:$0xf0]  ;;  %v4663_v23 = vld [vmem:[%s5329_s5 + $0x6b4] sm:$0xf]  ;;  %v4661_v35 = vld [vmem:[%s5329_s5 + $0x6a4] sm:$0xf] }
 0x1d9   : > { %3143 = vmatpush.bf16.msra.mxu1 %v4155_v32  ;;  %v4643_v32 = vld [vmem:[%s5329_s5 + $0x614] sm:$0xf]  ;;  %v4187_v41 = vor.u32 %v4627_v36, %v4184_v37  ;;  %v4320_v36 = vld [vmem:[%s5329_s5 + $0x6a8] sm:$0xf0]  ;;  %v4677_v37 = vld [vmem:[%s5329_s5 + $0x724] sm:$0xf] }
 0x1da   : > { %3157 = vmatpush.bf16.msra.mxu2 %v4219_v39  ;;  %v4248_v39 = vld [vmem:[%s5329_s5 + $0x618] sm:$0xf0] }
 0x1db   : > { %3171 = vmatpush.bf16.msra.mxu3 %v4283_v14  ;;  %v4625_v14 = vld [vmem:[%s5329_s5 + $0x584] sm:$0xf]  ;;  %v4251_v47 = vor.u32 %v4643_v32, %v4248_v39 }
 0x1dc   : > { %3130 = vmatpush.bf16.msra.mxu0 %v4083_v50  ;;  %v4671_v50 = vld [vmem:[%s5329_s5 + $0x6f4] sm:$0xf]  ;;  %v2886_v46 = vpop.f32.mrf.mxu2  ;;  %v4179_v58 = vor.u32 %v4625_v14, %v4176_v43  ;;  %v4657_v43 = vld [vmem:[%s5329_s5 + $0x684] sm:$0xf] }
 0x1dd   : > { %3144 = vmatpush.bf16.msra.mxu1 %v4147_v49  ;;  %v4687_v49 = vld [vmem:[%s5329_s5 + $0x774] sm:$0xf]  ;;  %v2887_v52 = vadd.f32 %v2886_v46, %v2873_v16  ;;  %v2900_v55 = vpop.f32.mrf.mxu3  ;;  %v4673_v46 = vld [vmem:[%s5329_s5 + $0x704] sm:$0xf] }
 0x1de   : > { %3158 = vmatpush.bf16.msra.mxu2 %v4211_v51  ;;  %v4424_v51 = vld [vmem:[%s5329_s5 + $0x778] sm:$0xf0] }
 0x1df   : > { %3172 = vmatpush.bf16.msra.mxu3 %v4275_v44  ;;  %v2901_v59 = vadd.f32 %v2900_v55, %v2887_v52  ;;  %v4363_v44 = vor.u32 %v4671_v50, %v4360_v48  ;;  %v4304_v50 = vld [vmem:[%s5329_s5 + $0x688] sm:$0xf0] }
 0x1e0   : > { %3131 = vmatpush.bf16.msra.mxu0 %v4075_v45  ;;  %v4427_v45 = vor.u32 %v4687_v49, %v4424_v51  ;;  %v4307_v48 = vor.u32 %v4657_v43, %v4304_v50 }
 0x1e1   : > { %3145 = vmatpush.bf16.msra.mxu1 %v4139_v63  ;;  %v4352_v63 = vld [vmem:[%s5329_s5 + $0x6e8] sm:$0xf0] }
 0x1e2   : > { %3159 = vmatpush.bf16.msra.mxu2 %v4203_v0  ;;  %v4685_v0 = vld [vmem:[%s5329_s5 + $0x764] sm:$0xf]  ;;  %v4355_v2 = vor.u32 %v4669_v61, %v4352_v63 }
 0x1e3   : > { %3173 = vmatpush.bf16.msra.mxu3 %v4267_v8  ;;  %v4419_v3 = vor.u32 %v4685_v0, %v4416_v1  ;;  %v4347_v8 = vor.u32 %v4667_v4, %v4344_v5 }
 0x1e4   : > { %3132 = vmatpush.bf16.msra.mxu0 %v4067_v11  ;;  %v4681_v11 = vld [vmem:[%s5329_s5 + $0x744] sm:$0xf] }
 0x1e5   : > { %3146 = vmatpush.bf16.msra.mxu1 %v4131_v26  ;;  %v4403_v17 = vor.u32 %v4681_v11, %v4400_v12  ;;  %v4328_v26 = vld [vmem:[%s5329_s5 + $0x6b8] sm:$0xf0] }
 0x1e6   : > { %3160 = vmatpush.bf16.msra.mxu2 %v4195_v27  ;;  %v4679_v27 = vld [vmem:[%s5329_s5 + $0x734] sm:$0xf]  ;;  %v4331_v31 = vor.u32 %v4663_v23, %v4328_v26 }
 0x1e7   : > { %3174 = vmatpush.bf16.msra.mxu3 %v4259_v28  ;;  %v4395_v34 = vor.u32 %v4679_v27, %v4392_v29  ;;  %v4323_v28 = vor.u32 %v4661_v35, %v4320_v36 }
 0x1e8   : > { %3133 = vmatpush.bf16.msra.mxu0 %v4059_v38 }
 0x1e9   : > { %3147 = vmatpush.bf16.msra.mxu1 %v4123_v40  ;;  %v4312_v40 = vld [vmem:[%s5329_s5 + $0x698] sm:$0xf0] }
 0x1ea   : > { %3161 = vmatpush.bf16.msra.mxu2 %v4187_v41  ;;  %v4675_v41 = vld [vmem:[%s5329_s5 + $0x714] sm:$0xf]  ;;  %v4315_v62 = vor.u32 %v4659_v56, %v4312_v40 }
 0x1eb   : > { %3175 = vmatpush.bf16.msra.mxu3 %v4251_v47  ;;  %v4379_v14 = vor.u32 %v4675_v41, %v4376_v42  ;;  %v4368_v47 = vld [vmem:[%s5329_s5 + $0x708] sm:$0xf0] }
 0x1ec   : > { %3134 = vmatpush.bf16.msra.mxu0 %v4051_v53  ;;  %v4371_v49 = vor.u32 %v4673_v46, %v4368_v47 }
 0x1ed   : > { %3148 = vmatpush.bf16.msra.mxu1 %v4115_v57  ;;  %v2926_v18 = vpop.f32.mrf.mxu1 }
 0x1ee   : > { %3162 = vmatpush.bf16.msra.mxu2 %v4179_v58 }
 0x1ef   : > { %3176 = vmatpush.bf16.msra.mxu3 %v4243_v60  ;;  %3135 = vmatmul.bf16.vlgmr.msra.gmra.mxu0 %v5637_v21  ;;  %v4411_v21 = vor.u32 %v4683_v6, %v4408_v7 }
 0x1f0   : > { %3183 = vmatpush.bf16.msrb.mxu0 %v4363_v44  ;;  %3149 = vmatmul.bf16.vlgmr.msra.gmra.mxu1 %v5635_v19  ;;  %v4339_v19 = vor.u32 %v4665_v9, %v4336_v10 }
 0x1f1   : > { %3197 = vmatpush.bf16.msrb.mxu1 %v4427_v45  ;;  %3163 = vmatmul.bf16.vlgmr.msra.gmra.mxu2 %v5641_v25  ;;  %v2912_v25 = vpop.f32.mrf.mxu0 }
 0x1f2   : > { %3177 = vmatmul.bf16.vlgmr.msra.gmra.mxu3 %v5725_v13  ;;  %v2913_v13 = vadd.f32 %v2912_v25, %v5916_v33  ;;  %v4384_v33 = vld [vmem:[%s5329_s5 + $0x728] sm:$0xf0]  ;;  %s3407_s5 = sshll.u32 %s4762_s14, 1 }
 0x1f3   : > { %v4387_v32 = vor.u32 %v4677_v37, %v4384_v33  ;;  %p1241_p11 = scmp.lt.s32.totalorder %s3407_s5, 3 }
 0x1f4   : > { %3184 = vmatpush.bf16.msrb.mxu0 %v4355_v2  ;;  %v5956_v30 = vadd.f32 %v2926_v18, %v2913_v13  ;;  %v2940_v51 = vpop.f32.mrf.mxu2 }
 0x1f5   : > { %3198 = vmatpush.bf16.msrb.mxu1 %v4419_v3  ;;  %v2928_v39 = vpop.f32.mrf.mxu1  ;;  %v2954_v52 = vpop.f32.mrf.mxu3  ;;  %s6024_s5 = smov (!%p1241_p11, %s3407_s5), 3 }
 0x1f6   : > { %v2941_v36 = vadd.f32 %v2940_v51, %v5956_v30  ;;  %s1243_s25 = scalar_lea.vmem %s6014_s2, %s6024_s5 }
 0x1f7   : > { %v3226_v43 = vld [vmem:[%s1243_s25] sm:$0x3] }
 0x1f8   : > { %3185 = vmatpush.bf16.msrb.mxu0 %v4347_v8 }
 0x1f9   : > { %3199 = vmatpush.bf16.msrb.mxu1 %v4411_v21  ;;  %v2914_v16 = vpop.f32.mrf.mxu0 }
 0x1fa   : > { %v2915_v38 = vadd.f32 %v2914_v16, %v2901_v59 }
 0x1fc   : > { %3186 = vmatpush.bf16.msrb.mxu0 %v4339_v19  ;;  %v5966_v24 = vadd.f32 %v2928_v39, %v2915_v38  ;;  %v2942_v53 = vpop.f32.mrf.mxu2  ;;  %v2955_v38 = vadd.f32 %v2954_v52, %v2941_v36 }
 0x1fd   : > { %3200 = vmatpush.bf16.msrb.mxu1 %v4403_v17  ;;  %v2956_v55 = vpop.f32.mrf.mxu3 }
 0x200   : > { %3187 = vmatpush.bf16.msrb.mxu0 %v4331_v31 }
 0x201   : > { %3201 = vmatpush.bf16.msrb.mxu1 %v4395_v34 }
 0x204   : > { %3188 = vmatpush.bf16.msrb.mxu0 %v4323_v28 }
 0x205   : > { %3202 = vmatpush.bf16.msrb.mxu1 %v4387_v32 }
 0x208   : > { %3189 = vmatpush.bf16.msrb.mxu0 %v4315_v62  ;;  %v2943_v62 = vadd.f32 %v2942_v53, %v5966_v24 }
 0x209   : > { %3203 = vmatpush.bf16.msrb.mxu1 %v4379_v14 }
 0x20a   : > { %v2957_v47 = vadd.f32 %v2956_v55, %v2943_v62 }
 0x20c   : > { %3190 = vmatpush.bf16.msrb.mxu0 %v4307_v48  ;;  %v2968_v54 = vpop.f32.mrf.mxu0 }
 0x20d   : > { %3204 = vmatpush.bf16.msrb.mxu1 %v4371_v49  ;;  %v2982_v20 = vpop.f32.mrf.mxu1  ;;  %v2969_v56 = vadd.f32 %v2968_v54, %v2955_v38  ;;  %v3228_v49 = vperm.slane %v3226_v43, 0 }
 0x20f   : > { %3191 = vmatmul.bf16.vlgmr.msrb.gmra.mxu0 %v5731_v22  ;;  %v2983_v50 = vadd.f32 %v2982_v20, %v2969_v56 }
 0x210   : > { %3205 = vmatmul.bf16.vlgmr.msrb.gmra.mxu1 %v5727_v15 }
 0x214   : > { %v2996_v57 = vpop.f32.mrf.mxu2  ;;  %v5974_v58 = vpop.f32.mrf.mxu0 }
 0x215   : > { %v3010_v59 = vpop.f32.mrf.mxu3  ;;  %v5976_v44 = vpop.f32.mrf.mxu1  ;;  %v2997_v48 = vadd.f32 %v2996_v57, %v2983_v50 }
 0x21c   : > { %v5978_v45 = vpop.f32.mrf.mxu2 }
 0x21d   : > { %v3012_v63 = vpop.f32.mrf.mxu3 }
 0x22c   : > { %v3024_v60 = vpop.f32.mrf.mxu0 }
 0x22d   : > { %v3038_v61 = vpop.f32.mrf.mxu1  ;;  %v3025_v2 = vadd.f32 %v3024_v60, %v3010_v59  ;;  %v2971_v59 = vadd.f32 %v5974_v58, %v2957_v47 }
 0x22f   : > { %v3039_v4 = vadd.f32 %v3038_v61, %v3025_v2  ;;  %v2985_v20 = vadd.f32 %v5976_v44, %v2971_v59 }
 0x234   : > { %v3052_v22 = vpop.f32.mrf.mxu2  ;;  %v3026_v0 = vpop.f32.mrf.mxu0 }
 0x235   : > { %v3040_v15 = vpop.f32.mrf.mxu1  ;;  %v3066_v1 = vpop.f32.mrf.mxu3  ;;  %v3053_v8 = vadd.f32 %v3052_v22, %v3039_v4  ;;  %v3027_v21 = vadd.f32 %v3026_v0, %v3012_v63  ;;  %v3229_v22 = vperm.slane %v3226_v43, 1  ;;  %v3232_v0 = vadd.f32 %v3228_v49, %v2997_v48 }
 0x237   : > { %v3067_v9 = vadd.f32 %v3066_v1, %v3053_v8  ;;  %v3041_v12 = vadd.f32 %v3040_v15, %v3027_v21  ;;  %v3236_v57 = vmax.f32 %v3232_v0, 0.0  ;;  %v2999_v1 = vadd.f32 %v5978_v45, %v2985_v20 }
 0x23c   : > { %v3054_v3 = vpop.f32.mrf.mxu2 }
 0x23d   : > { %v3068_v7 = vpop.f32.mrf.mxu3  ;;  %v3055_v17 = vadd.f32 %v3054_v3, %v3041_v12 }
 0x23f   : > { %v3069_v27 = vadd.f32 %v3068_v7, %v3055_v17  ;;  %v3234_v7 = vadd.f32 %v3228_v49, %v2999_v1 }
 0x24c   : > { %v3080_v5 = vpop.f32.mrf.mxu0 }
 0x24d   : > { %v3094_v6 = vpop.f32.mrf.mxu1  ;;  %v3081_v25 = vadd.f32 %v3080_v5, %v3067_v9  ;;  %v3238_v9 = vmax.f32 %v3234_v7, 0.0 }
 0x24f   : > { %v3095_v18 = vadd.f32 %v3094_v6, %v3081_v25 }
 0x254   : > { %v3108_v10 = vpop.f32.mrf.mxu2  ;;  %v3082_v11 = vpop.f32.mrf.mxu0 }
 0x255   : > { %v3096_v19 = vpop.f32.mrf.mxu1  ;;  %v3122_v13 = vpop.f32.mrf.mxu3  ;;  %v3109_v29 = vadd.f32 %v3108_v10, %v3095_v18  ;;  %v3083_v34 = vadd.f32 %v3082_v11, %v3069_v27 }
 0x257   : > { %v3123_v37 = vadd.f32 %v3122_v13, %v3109_v29  ;;  %v3097_v33 = vadd.f32 %v3096_v19, %v3083_v34 }
 0x25c   : > { %v3110_v23 = vpop.f32.mrf.mxu2 }
 0x25d   : > { %v3124_v35 = vpop.f32.mrf.mxu3  ;;  %v3111_v32 = vadd.f32 %v3110_v23, %v3097_v33 }
 0x25f   : > { %v3125_v14 = vadd.f32 %v3124_v35, %v3111_v32 }
 0x26c   : > { %v3136_v26 = vpop.f32.mrf.mxu0 }
 0x26d   : > { %v3150_v31 = vpop.f32.mrf.mxu1  ;;  %v3137_v16 = vadd.f32 %v3136_v26, %v3123_v37 }
 0x26f   : > { %v3151_v40 = vadd.f32 %v3150_v31, %v3137_v16 }
 0x274   : > { %v3164_v28 = vpop.f32.mrf.mxu2  ;;  %v3138_v39 = vpop.f32.mrf.mxu0 }
 0x275   : > { %v3152_v41 = vpop.f32.mrf.mxu1  ;;  %v3178_v42 = vpop.f32.mrf.mxu3  ;;  %v3165_v30 = vadd.f32 %v3164_v28, %v3151_v40  ;;  %v3139_v46 = vadd.f32 %v3138_v39, %v3125_v14 }
 0x277   : > { %v3179_v51 = vadd.f32 %v3178_v42, %v3165_v30  ;;  %v3153_v60 = vadd.f32 %v3152_v41, %v3139_v46 }
 0x27c   : > { %v3166_v52 = vpop.f32.mrf.mxu2 }
 0x27d   : > { %v3167_v24 = vadd.f32 %v3166_v52, %v3153_v60  ;;  %v3180_v15 = vpop.f32.mrf.mxu3 }
 0x27f   : > { %v3181_v2 = vadd.f32 %v3180_v15, %v3167_v24 }
 0x28c   : > { %v3192_v54 = vpop.f32.mrf.mxu0 }
 0x28d   : > { %v3193_v61 = vadd.f32 %v3192_v54, %v3179_v51  ;;  %v3206_v63 = vpop.f32.mrf.mxu1 }
 0x28f   : > { %v3207_v53 = vadd.f32 %v3206_v63, %v3193_v61 }
 0x291   : > { %v3233_v55 = vadd.f32 %v3229_v22, %v3207_v53 }
 0x293   : > { %v3237_v3 = vmax.f32 %v3233_v55, 0.0 }
 0x294   : > { %v3194_v4 = vpop.f32.mrf.mxu0 }
 0x295   : > { %v3240_v58 = vpack.c.bf16 %v3237_v3, %v3236_v57  ;;  %v3195_v5 = vadd.f32 %v3194_v4, %v3181_v2  ;;  %v3208_v6 = vpop.f32.mrf.mxu1 }
 0x297   : > { %3242 = vst [vmem:[%s1225_s27] sm:$0xff] %v3240_v58  ;;  %v3209_v8 = vadd.f32 %v3208_v6, %v3195_v5 }
 0x299   : > { %v3235_v21 = vadd.f32 %v3229_v22, %v3209_v8 }
 0x29b   : > { %v3239_v10 = vmax.f32 %v3235_v21, 0.0  ;;  %3250 = sbr.rel (!%p4827_p6) target bundleno = 680 (0x2a8), region = 82 }
 0x29d   : > { %v3241_v44 = vpack.c.bf16 %v3239_v10, %v3238_v9 }
 0x29e   : > { %v3287_v45 = vld [vmem:[%s1225_s27] sm:$0xff] (%p4827_p6) }
 0x29f   : > { %3243 = vst [vmem:[%s1225_s27 + $0x8] sm:$0xff] %v3241_v44 }
 0x2a0   : > { %3288 = vst [vmem:[%s3256_s29] sm:$0xff] %v3287_v45 }
 0x2a6   : > { %v3289_v11 = vld [vmem:[%s1225_s27 + $0x8] sm:$0xff] }
 0x2a7   : > { %3290 = vst [vmem:[%s3256_s29 + $0x10] sm:$0xff] %v3289_v11 }
 0x2a8 PF: > { %s13_s16 = sadd.s32 1, %s4770_s16   ;;  %s6017_s12 = smov %s4758_s13 }
 0x2a9   : > { %p10_p12 = scmp.ge.s32.totalorder %s13_s16, 4   ;;  %s6018_s13 = smov %s4832_s22 }
 0x2aa   : > { %s6019_s14 = smov %s4766_s15  ;;  %s6020_s15 = smov %s6022_s17 }
 0x2ab   :  { %12 = sbr.rel (!%p10_p12) target bundleno = 3 (0x3), region = 157 }

</bundles_post_ra>
